<compile_context>
chip_gen: v7x
topology: tpu7x:2x2x1
jax: 0.10.0
libtpu: 0.0.40
codegen_flags: <defaults>
</compile_context>

<pallas_src>
from collections import namedtuple

import jax
import jax.numpy as jnp
from jax import lax
from jax.experimental import pallas as pl
from jax.experimental.pallas import tpu as pltpu


_OFF = 7  # front offset in padded buffers so that padded column 1 sits at an 8-aligned row


def _round8(n):
    return (n + 7) // 8 * 8


# ------------------------- fused feature-extractor kernel ---------------------------------
def _fused_forward(x_nhwc, mean, inv_std, w1, b1, w2, b2, w3, b3):
    """Runs normalize + conv_1_1/relu + conv_1_2/relu + maxpool + conv_2_1/relu in one
    Pallas kernel.  Returns the three tap activations in flattened padded-row layout:
      o1, o2: (B, H*RP1, C1)    o3: (B, H2*RP2, C2)
    where block row q corresponds to image pixel (q // RP, q % RP) for q % RP < W."""
    B, H, W, Cin = x_nhwc.shape
    C1 = w1.shape[-1]
    C2 = w3.shape[-1]
    H2, W2 = H // 2, W // 2

    RP1 = _round8(W + 2)                     # row pitch of level-1 padded buffers
    RP2 = _round8(W2 + 2)                    # row pitch of the pooled padded buffer
    N1 = H * RP1                             # conv_1_x output block rows
    N2 = H2 * RP2                            # conv_2_1 output block rows
    BUF1 = _round8((H + 2) * RP1 + _OFF + 2)
    BUF2 = _round8((H2 + 2) * RP2 + _OFF + 2)
    f32 = jnp.float32

    # Interior-column masks (1.0 on real image columns, 0.0 on pad / pitch columns);
    # passed as tiny constants so the kernel needs no in-kernel mod arithmetic.
    col1 = (jnp.arange(N1) + 1) % RP1
    mask1 = ((col1 >= 1) & (col1 <= W)).astype(f32)[:, None]            # (N1, 1)
    col2 = (jnp.arange(N2) + 1) % RP2
    mask3 = ((col2 >= 1) & (col2 <= W2)).astype(f32)[:, None]           # (N2, 1)

    # Maxpool even/odd column-selection matrices, precomputed on the host (constant).
    ri = jnp.arange(W2)[:, None]
    ci = jnp.arange(W)[None, :]
    sel = jnp.stack([(ci == 2 * ri).astype(f32),                        # picks cols 0,2,...
                     (ci == 2 * ri + 1).astype(f32)])                   # picks cols 1,3,...

    def kernel(x_ref, mean_ref, istd_ref,
               w1_ref, b1_ref, w2_ref, b2_ref, w3_ref, b3_ref,
               m1_ref, m3_ref, sel_ref,
               o1_ref, o2_ref, o3_ref,
               xbuf, a1buf, a2buf, pbuf):
        # ---- zero the padded scratch buffers (the conv halo must read 0.0) ----
        xbuf[...] = jnp.zeros(xbuf.shape, f32)
        a1buf[...] = jnp.zeros(a1buf.shape, f32)
        a2buf[...] = jnp.zeros(a2buf.shape, f32)
        pbuf[...] = jnp.zeros(pbuf.shape, f32)

        mean_v = mean_ref[...]               # (1, Cin)
        istd_v = istd_ref[...]               # (1, Cin)
        m1 = m1_ref[...]                     # (N1, 1)
        m3 = m3_ref[...]                     # (N2, 1)
        sel_even = sel_ref[0]                # (W2, W)
        sel_odd = sel_ref[1]                 # (W2, W)

        # ---- Normalization fused into the padded-buffer fill: (x - mean) * (1/std) ----
        for y in range(H):
            row = (x_ref[0, y, :, :] - mean_v) * istd_v                 # (W, Cin)
            base = (y + 1) * RP1 + 1 + _OFF                             # 8-aligned store
            xbuf[base:base + W, :] = row

        def conv3x3_relu(in_buf, w_ref, b_ref, mask, rp, nrows):
            """3x3 'same' conv + bias + ReLU over a zero-padded flattened buffer.
            in_buf holds the padded image row-major with row pitch `rp` at offset _OFF;
            the returned (nrows, Cout) block starts at padded position (1, 1)."""
            cout = w_ref.shape[-1]
            acc = jnp.zeros((nrows, cout), f32)
            for ky in range(3):
                for kx in range(3):
                    start = ky * rp + kx + _OFF
                    tap = in_buf[start:start + nrows, :]                # (nrows, Cin)
                    acc = acc + jnp.dot(tap, w_ref[ky * 3 + kx],
                                        preferred_element_type=f32)
            # bias + ReLU fused; zero pad/pitch columns so the next layer's halo is exact.
            return jnp.maximum(acc + b_ref[...], 0.0) * mask

        blk_lo = RP1 + 1 + _OFF              # buffer row of padded position (1, 1)

        # ---- conv_1_1 + relu_1_1  (style tap #1) ----
        v1 = conv3x3_relu(xbuf, w1_ref, b1_ref, m1, RP1, N1)
        o1_ref[0] = v1
        a1buf[blk_lo:blk_lo + N1, :] = v1

        # ---- conv_1_2 + relu_1_2  (style tap #2) ----
        v2 = conv3x3_relu(a1buf, w2_ref, b2_ref, m1, RP1, N1)
        o2_ref[0] = v2
        a2buf[blk_lo:blk_lo + N1, :] = v2

        # ---- MaxPool2d(2, 2) fused: row-pair max + even/odd selection matmuls ----
        for y in range(H2):
            r0 = (2 * y + 1) * RP1 + 1 + _OFF
            r1 = r0 + RP1
            mrow = jnp.maximum(a2buf[r0:r0 + W, :], a2buf[r1:r1 + W, :])    # (W, C1)
            pooled = jnp.maximum(
                jnp.dot(sel_even, mrow, preferred_element_type=f32),
                jnp.dot(sel_odd, mrow, preferred_element_type=f32))        # (W2, C1)
            pbase = (y + 1) * RP2 + 1 + _OFF                                # 8-aligned store
            pbuf[pbase:pbase + W2, :] = pooled

        # ---- conv_2_1 + relu_2_1  (content tap) ----
        v3 = conv3x3_relu(pbuf, w3_ref, b3_ref, m3, RP2, N2)
        o3_ref[0] = v3

    # Advisory cost hint for XLA scheduling around the fused custom call.
    flops = 2 * B * (9 * N1 * Cin * C1 + 9 * N1 * C1 * C1 + 9 * N2 * C1 * C2
                     + 2 * H2 * W2 * W * C1)
    bytes_accessed = 4 * (x_nhwc.size + 2 * B * N1 * C1 + B * N2 * C2
                          + 9 * (Cin * C1 + C1 * C1 + C1 * C2))
    cost = pl.CostEstimate(flops=flops, transcendentals=0, bytes_accessed=bytes_accessed)

    out_shape = (
        jax.ShapeDtypeStruct((B, N1, C1), f32),
        jax.ShapeDtypeStruct((B, N1, C1), f32),
        jax.ShapeDtypeStruct((B, N2, C2), f32),
    )
    o1, o2, o3 = pl.pallas_call(
        kernel,
        out_shape=out_shape,
        grid=(B,),
        in_specs=[
            pl.BlockSpec((1, H, W, Cin), lambda b: (b, 0, 0, 0)),   # image (per batch elem)
            pl.BlockSpec((1, Cin), lambda b: (0, 0)),               # mean
            pl.BlockSpec((1, Cin), lambda b: (0, 0)),               # 1/std
            pl.BlockSpec((9, Cin, C1), lambda b: (0, 0, 0)),        # conv_1_1 weight
            pl.BlockSpec((1, C1), lambda b: (0, 0)),                # conv_1_1 bias
            pl.BlockSpec((9, C1, C1), lambda b: (0, 0, 0)),         # conv_1_2 weight
            pl.BlockSpec((1, C1), lambda b: (0, 0)),                # conv_1_2 bias
            pl.BlockSpec((9, C1, C2), lambda b: (0, 0, 0)),         # conv_2_1 weight
            pl.BlockSpec((1, C2), lambda b: (0, 0)),                # conv_2_1 bias
            pl.BlockSpec((N1, 1), lambda b: (0, 0)),                # interior mask, level 1
            pl.BlockSpec((N2, 1), lambda b: (0, 0)),                # interior mask, level 2
            pl.BlockSpec((2, W2, W), lambda b: (0, 0, 0)),          # maxpool selection mats
        ],
        out_specs=(
            pl.BlockSpec((1, N1, C1), lambda b: (b, 0, 0)),
            pl.BlockSpec((1, N1, C1), lambda b: (b, 0, 0)),
            pl.BlockSpec((1, N2, C2), lambda b: (b, 0, 0)),
        ),
        scratch_shapes=[
            pltpu.VMEM((BUF1, Cin), f32),    # padded, normalized input
            pltpu.VMEM((BUF1, C1), f32),     # padded relu_1_1
            pltpu.VMEM((BUF1, C1), f32),     # padded relu_1_2
            pltpu.VMEM((BUF2, C1), f32),     # padded pooled activation
        ],
        compiler_params=pltpu.CompilerParams(dimension_semantics=("parallel",)),
        cost_estimate=cost,
    )(x_nhwc, mean.reshape(1, Cin), inv_std.reshape(1, Cin),
      w1.reshape(9, Cin, C1), b1.reshape(1, C1),
      w2.reshape(9, C1, C1), b2.reshape(1, C1),
      w3.reshape(9, C1, C2), b3.reshape(1, C2),
      mask1, mask3, sel)
    return o1, o2, o3


# ------------------------------ StyleTransferer forward ----------------------------------
# Synthetic VGG-like feature extractor (names follow the module's renaming rule):
#   conv_1_1 -> relu_1_1 -> conv_1_2 -> relu_1_2 -> pool_1 -> conv_2_1 -> relu_2_1
# As in the PyTorch module, each recorded tap is the activation produced right AFTER the
# named layer (i.e. the following ReLU's output).
CONTENT_LAYERS = ["conv_2_1"]
STYLE_LAYERS = ["conv_1_1", "conv_1_2"]
TransferResult = namedtuple(
    "TransferResult",
    [*[f"content_{n}" for n in CONTENT_LAYERS], *[f"style_{n}" for n in STYLE_LAYERS]],
)


def init_params(key, cin):
    ks = jax.random.split(key, 6)

    def conv_param(kw, kb, ci, co):
        w = jax.random.normal(kw, (3, 3, ci, co), jnp.float32) / jnp.sqrt(9.0 * ci)
        b = jax.random.normal(kb, (co,), jnp.float32) * 0.01
        return {"w": w, "b": b}

    return {
        "conv_1_1": conv_param(ks[0], ks[1], cin, 8),
        "conv_1_2": conv_param(ks[2], ks[3], 8, 8),
        "conv_2_1": conv_param(ks[4], ks[5], 8, 16),
    }


def _tap_to_nchw(o, h, w, row_pitch):
    """(B, h*row_pitch, C) padded-row-major tap -> (B, C, h, w) NCHW."""
    B, _, C = o.shape
    return jnp.transpose(o.reshape(B, h, row_pitch, C)[:, :, :w, :], (0, 3, 1, 2))


def style_transferer_forward(x_nchw, params, mean, std):
    """Mirrors StyleTransferer.forward: normalize, run the feature extractor, and record
    the activation produced right after each named content/style layer.  NCHW in/out."""
    x_nhwc = jnp.transpose(x_nchw, (0, 2, 3, 1)).astype(jnp.float32)
    B, H, W, Cin = x_nhwc.shape
    assert H % 2 == 0 and W % 2 == 0, "MaxPool2d(2, 2) expects even spatial dims"

    inv_std = (1.0 / std).astype(jnp.float32)
    o1, o2, o3 = _fused_forward(
        x_nhwc, mean.astype(jnp.float32), inv_std,
        params["conv_1_1"]["w"], params["conv_1_1"]["b"],
        params["conv_1_2"]["w"], params["conv_1_2"]["b"],
        params["conv_2_1"]["w"], params["conv_2_1"]["b"])

    H2, W2 = H // 2, W // 2
    rp1, rp2 = _round8(W + 2), _round8(W2 + 2)
    return TransferResult(
        content_conv_2_1=_tap_to_nchw(o3, H2, W2, rp2),   # relu_2_1 output
        style_conv_1_1=_tap_to_nchw(o1, H, W, rp1),       # relu_1_1 output
        style_conv_1_2=_tap_to_nchw(o2, H, W, rp1),       # relu_1_2 output
    )


if __name__ == "__main__":
    key = jax.random.PRNGKey(0)
    k_x, k_p = jax.random.split(key)

    B, C, H, W = 2, 4, 16, 16
    x = jax.random.normal(k_x, (B, C, H, W), jnp.float32)        # NCHW, like PyTorch
    mean = jnp.array([0.485, 0.456, 0.406, 0.450], jnp.float32)  # (C,)
    std = jnp.array([0.229, 0.224, 0.225, 0.230], jnp.float32)   # (C,)
    params = init_params(k_p, cin=C)

    fwd = jax.jit(style_transferer_forward)
    out = fwd(x, params, mean, std)
    for arr in out:
        jax.block_until_ready(arr)

    assert out.style_conv_1_1.shape == (B, 8, H, W)
    assert out.style_conv_1_2.shape == (B, 8, H, W)
    assert out.content_conv_2_1.shape == (B, 16, H // 2, W // 2)
    assert bool(jnp.all(jnp.isfinite(out.style_conv_1_1)))
    assert bool(jnp.all(jnp.isfinite(out.style_conv_1_2)))
    assert bool(jnp.all(jnp.isfinite(out.content_conv_2_1)))
    print("KERNEL_OK")
</pallas_src>

<mosaic_0001>
module attributes {stable_mosaic.version = 11 : i64} {
  func.func @kernel(%arg0: i32, %arg1: memref<1x16x16x4xf32, #tpu.memory_space<vmem>>, %arg2: memref<1x4xf32, #tpu.memory_space<vmem>>, %arg3: memref<1x4xf32, #tpu.memory_space<vmem>>, %arg4: memref<9x4x8xf32, #tpu.memory_space<vmem>>, %arg5: memref<1x8xf32, #tpu.memory_space<vmem>>, %arg6: memref<9x8x8xf32, #tpu.memory_space<vmem>>, %arg7: memref<1x8xf32, #tpu.memory_space<vmem>>, %arg8: memref<9x8x16xf32, #tpu.memory_space<vmem>>, %arg9: memref<1x16xf32, #tpu.memory_space<vmem>>, %arg10: memref<384x1xf32, #tpu.memory_space<vmem>>, %arg11: memref<128x1xf32, #tpu.memory_space<vmem>>, %arg12: memref<2x8x16xf32, #tpu.memory_space<vmem>>, %arg13: memref<1x384x8xf32, #tpu.memory_space<vmem>>, %arg14: memref<1x384x8xf32, #tpu.memory_space<vmem>>, %arg15: memref<1x128x16xf32, #tpu.memory_space<vmem>>, %arg16: memref<448x4xf32, #tpu.memory_space<vmem>>, %arg17: memref<448x8xf32, #tpu.memory_space<vmem>>, %arg18: memref<448x8xf32, #tpu.memory_space<vmem>>, %arg19: memref<176x8xf32, #tpu.memory_space<vmem>>) attributes {dimension_semantics = [#tpu.dimension_semantics<parallel>], iteration_bounds = array<i64: 2>, scalar_prefetch = 0 : i64, scratch_operands = 4 : i64, tpu.core_type = #tpu.core_type<tc>, window_params = [{transform_indices = @transform_0, window_bounds = array<i64: 1, 16, 16, 4>}, {pipeline_mode = #tpu.pipeline_mode<synchronous>, transform_indices = @transform_1, window_bounds = array<i64: 1, 4>}, {pipeline_mode = #tpu.pipeline_mode<synchronous>, transform_indices = @transform_2, window_bounds = array<i64: 1, 4>}, {pipeline_mode = #tpu.pipeline_mode<synchronous>, transform_indices = @transform_3, window_bounds = array<i64: 9, 4, 8>}, {pipeline_mode = #tpu.pipeline_mode<synchronous>, transform_indices = @transform_4, window_bounds = array<i64: 1, 8>}, {pipeline_mode = #tpu.pipeline_mode<synchronous>, transform_indices = @transform_5, window_bounds = array<i64: 9, 8, 8>}, {pipeline_mode = #tpu.pipeline_mode<synchronous>, transform_indices = @transform_6, window_bounds = array<i64: 1, 8>}, {pipeline_mode = #tpu.pipeline_mode<synchronous>, transform_indices = @transform_7, window_bounds = array<i64: 9, 8, 16>}, {pipeline_mode = #tpu.pipeline_mode<synchronous>, transform_indices = @transform_8, window_bounds = array<i64: 1, 16>}, {pipeline_mode = #tpu.pipeline_mode<synchronous>, transform_indices = @transform_9, window_bounds = array<i64: 384, 1>}, {pipeline_mode = #tpu.pipeline_mode<synchronous>, transform_indices = @transform_10, window_bounds = array<i64: 128, 1>}, {pipeline_mode = #tpu.pipeline_mode<synchronous>, transform_indices = @transform_11, window_bounds = array<i64: 2, 8, 16>}, {transform_indices = @transform_12, window_bounds = array<i64: 1, 384, 8>}, {transform_indices = @transform_13, window_bounds = array<i64: 1, 384, 8>}, {transform_indices = @transform_14, window_bounds = array<i64: 1, 128, 16>}]} {
    %cst = arith.constant 0.000000e+00 : f32
    %0 = vector.broadcast %cst : f32 to vector<448x4xf32>
    %c0 = arith.constant 0 : index
    %c0_0 = arith.constant 0 : index
    %1 = vector.load %arg16[%c0, %c0_0] : memref<448x4xf32, #tpu.memory_space<vmem>>, vector<448x4xf32>
    tpu.vector_store %arg16[%c0, %c0_0], %0 {strides = array<i32>} : memref<448x4xf32, #tpu.memory_space<vmem>>, vector<448x4xf32>,
    %cst_1 = arith.constant 0.000000e+00 : f32
    %2 = vector.broadcast %cst_1 : f32 to vector<448x8xf32>
    %c0_2 = arith.constant 0 : index
    %c0_3 = arith.constant 0 : index
    %3 = vector.load %arg17[%c0_2, %c0_3] : memref<448x8xf32, #tpu.memory_space<vmem>>, vector<448x8xf32>
    tpu.vector_store %arg17[%c0_2, %c0_3], %2 {strides = array<i32>} : memref<448x8xf32, #tpu.memory_space<vmem>>, vector<448x8xf32>,
    %cst_4 = arith.constant 0.000000e+00 : f32
    %4 = vector.broadcast %cst_4 : f32 to vector<448x8xf32>
    %c0_5 = arith.constant 0 : index
    %c0_6 = arith.constant 0 : index
    %5 = vector.load %arg18[%c0_5, %c0_6] : memref<448x8xf32, #tpu.memory_space<vmem>>, vector<448x8xf32>
    tpu.vector_store %arg18[%c0_5, %c0_6], %4 {strides = array<i32>} : memref<448x8xf32, #tpu.memory_space<vmem>>, vector<448x8xf32>,
    %cst_7 = arith.constant 0.000000e+00 : f32
    %6 = vector.broadcast %cst_7 : f32 to vector<176x8xf32>
    %c0_8 = arith.constant 0 : index
    %c0_9 = arith.constant 0 : index
    %7 = vector.load %arg19[%c0_8, %c0_9] : memref<176x8xf32, #tpu.memory_space<vmem>>, vector<176x8xf32>
    tpu.vector_store %arg19[%c0_8, %c0_9], %6 {strides = array<i32>} : memref<176x8xf32, #tpu.memory_space<vmem>>, vector<176x8xf32>,
    %c0_10 = arith.constant 0 : index
    %c0_11 = arith.constant 0 : index
    %8 = vector.load %arg2[%c0_10, %c0_11] : memref<1x4xf32, #tpu.memory_space<vmem>>, vector<1x4xf32>
    %c0_12 = arith.constant 0 : index
    %c0_13 = arith.constant 0 : index
    %9 = vector.load %arg3[%c0_12, %c0_13] : memref<1x4xf32, #tpu.memory_space<vmem>>, vector<1x4xf32>
    %c0_14 = arith.constant 0 : index
    %c0_15 = arith.constant 0 : index
    %10 = vector.load %arg10[%c0_14, %c0_15] : memref<384x1xf32, #tpu.memory_space<vmem>>, vector<384x1xf32>
    %c0_16 = arith.constant 0 : index
    %c0_17 = arith.constant 0 : index
    %11 = vector.load %arg11[%c0_16, %c0_17] : memref<128x1xf32, #tpu.memory_space<vmem>>, vector<128x1xf32>
    %c0_18 = arith.constant 0 : index
    %c0_19 = arith.constant 0 : index
    %c0_20 = arith.constant 0 : index
    %12 = vector.load %arg12[%c0_18, %c0_19, %c0_20] : memref<2x8x16xf32, #tpu.memory_space<vmem>>, vector<1x8x16xf32>
    %13 = vector.shape_cast %12 : vector<1x8x16xf32> to vector<8x16xf32>
    %c1 = arith.constant 1 : index
    %c0_21 = arith.constant 0 : index
    %c0_22 = arith.constant 0 : index
    %14 = vector.load %arg12[%c1, %c0_21, %c0_22] : memref<2x8x16xf32, #tpu.memory_space<vmem>>, vector<1x8x16xf32>
    %15 = vector.shape_cast %14 : vector<1x8x16xf32> to vector<8x16xf32>
    %c0_23 = arith.constant 0 : index
    %c0_24 = arith.constant 0 : index
    %c0_25 = arith.constant 0 : index
    %c0_26 = arith.constant 0 : index
    %16 = vector.load %arg1[%c0_23, %c0_24, %c0_25, %c0_26] : memref<1x16x16x4xf32, #tpu.memory_space<vmem>>, vector<1x1x16x4xf32>
    %17 = vector.shape_cast %16 : vector<1x1x16x4xf32> to vector<16x4xf32>
    %18 = vector.broadcast %8 : vector<1x4xf32> to vector<16x4xf32>
    %19 = arith.subf %17, %18 : vector<16x4xf32>
    %20 = vector.broadcast %9 : vector<1x4xf32> to vector<16x4xf32>
    %21 = arith.mulf %19, %20 : vector<16x4xf32>
    %c32 = arith.constant 32 : index
    %c0_27 = arith.constant 0 : index
    %22 = vector.load %arg16[%c32, %c0_27] : memref<448x4xf32, #tpu.memory_space<vmem>>, vector<16x4xf32>
    tpu.vector_store %arg16[%c32, %c0_27], %21 {strides = array<i32>} : memref<448x4xf32, #tpu.memory_space<vmem>>, vector<16x4xf32>,
    %c0_28 = arith.constant 0 : index
    %c1_29 = arith.constant 1 : index
    %c0_30 = arith.constant 0 : index
    %c0_31 = arith.constant 0 : index
    %23 = vector.load %arg1[%c0_28, %c1_29, %c0_30, %c0_31] : memref<1x16x16x4xf32, #tpu.memory_space<vmem>>, vector<1x1x16x4xf32>
    %24 = vector.shape_cast %23 : vector<1x1x16x4xf32> to vector<16x4xf32>
    %25 = vector.broadcast %8 : vector<1x4xf32> to vector<16x4xf32>
    %26 = arith.subf %24, %25 : vector<16x4xf32>
    %27 = vector.broadcast %9 : vector<1x4xf32> to vector<16x4xf32>
    %28 = arith.mulf %26, %27 : vector<16x4xf32>
    %c56 = arith.constant 56 : index
    %c0_32 = arith.constant 0 : index
    %29 = vector.load %arg16[%c56, %c0_32] : memref<448x4xf32, #tpu.memory_space<vmem>>, vector<16x4xf32>
    tpu.vector_store %arg16[%c56, %c0_32], %28 {strides = array<i32>} : memref<448x4xf32, #tpu.memory_space<vmem>>, vector<16x4xf32>,
    %c0_33 = arith.constant 0 : index
    %c2 = arith.constant 2 : index
    %c0_34 = arith.constant 0 : index
    %c0_35 = arith.constant 0 : index
    %30 = vector.load %arg1[%c0_33, %c2, %c0_34, %c0_35] : memref<1x16x16x4xf32, #tpu.memory_space<vmem>>, vector<1x1x16x4xf32>
    %31 = vector.shape_cast %30 : vector<1x1x16x4xf32> to vector<16x4xf32>
    %32 = vector.broadcast %8 : vector<1x4xf32> to vector<16x4xf32>
    %33 = arith.subf %31, %32 : vector<16x4xf32>
    %34 = vector.broadcast %9 : vector<1x4xf32> to vector<16x4xf32>
    %35 = arith.mulf %33, %34 : vector<16x4xf32>
    %c80 = arith.constant 80 : index
    %c0_36 = arith.constant 0 : index
    %36 = vector.load %arg16[%c80, %c0_36] : memref<448x4xf32, #tpu.memory_space<vmem>>, vector<16x4xf32>
    tpu.vector_store %arg16[%c80, %c0_36], %35 {strides = array<i32>} : memref<448x4xf32, #tpu.memory_space<vmem>>, vector<16x4xf32>,
    %c0_37 = arith.constant 0 : index
    %c3 = arith.constant 3 : index
    %c0_38 = arith.constant 0 : index
    %c0_39 = arith.constant 0 : index
    %37 = vector.load %arg1[%c0_37, %c3, %c0_38, %c0_39] : memref<1x16x16x4xf32, #tpu.memory_space<vmem>>, vector<1x1x16x4xf32>
    %38 = vector.shape_cast %37 : vector<1x1x16x4xf32> to vector<16x4xf32>
    %39 = vector.broadcast %8 : vector<1x4xf32> to vector<16x4xf32>
    %40 = arith.subf %38, %39 : vector<16x4xf32>
    %41 = vector.broadcast %9 : vector<1x4xf32> to vector<16x4xf32>
    %42 = arith.mulf %40, %41 : vector<16x4xf32>
    %c104 = arith.constant 104 : index
    %c0_40 = arith.constant 0 : index
    %43 = vector.load %arg16[%c104, %c0_40] : memref<448x4xf32, #tpu.memory_space<vmem>>, vector<16x4xf32>
    tpu.vector_store %arg16[%c104, %c0_40], %42 {strides = array<i32>} : memref<448x4xf32, #tpu.memory_space<vmem>>, vector<16x4xf32>,
    %c0_41 = arith.constant 0 : index
    %c4 = arith.constant 4 : index
    %c0_42 = arith.constant 0 : index
    %c0_43 = arith.constant 0 : index
    %44 = vector.load %arg1[%c0_41, %c4, %c0_42, %c0_43] : memref<1x16x16x4xf32, #tpu.memory_space<vmem>>, vector<1x1x16x4xf32>
    %45 = vector.shape_cast %44 : vector<1x1x16x4xf32> to vector<16x4xf32>
    %46 = vector.broadcast %8 : vector<1x4xf32> to vector<16x4xf32>
    %47 = arith.subf %45, %46 : vector<16x4xf32>
    %48 = vector.broadcast %9 : vector<1x4xf32> to vector<16x4xf32>
    %49 = arith.mulf %47, %48 : vector<16x4xf32>
    %c128 = arith.constant 128 : index
    %c0_44 = arith.constant 0 : index
    %50 = vector.load %arg16[%c128, %c0_44] : memref<448x4xf32, #tpu.memory_space<vmem>>, vector<16x4xf32>
    tpu.vector_store %arg16[%c128, %c0_44], %49 {strides = array<i32>} : memref<448x4xf32, #tpu.memory_space<vmem>>, vector<16x4xf32>,
    %c0_45 = arith.constant 0 : index
    %c5 = arith.constant 5 : index
    %c0_46 = arith.constant 0 : index
    %c0_47 = arith.constant 0 : index
    %51 = vector.load %arg1[%c0_45, %c5, %c0_46, %c0_47] : memref<1x16x16x4xf32, #tpu.memory_space<vmem>>, vector<1x1x16x4xf32>
    %52 = vector.shape_cast %51 : vector<1x1x16x4xf32> to vector<16x4xf32>
    %53 = vector.broadcast %8 : vector<1x4xf32> to vector<16x4xf32>
    %54 = arith.subf %52, %53 : vector<16x4xf32>
    %55 = vector.broadcast %9 : vector<1x4xf32> to vector<16x4xf32>
    %56 = arith.mulf %54, %55 : vector<16x4xf32>
    %c152 = arith.constant 152 : index
    %c0_48 = arith.constant 0 : index
    %57 = vector.load %arg16[%c152, %c0_48] : memref<448x4xf32, #tpu.memory_space<vmem>>, vector<16x4xf32>
    tpu.vector_store %arg16[%c152, %c0_48], %56 {strides = array<i32>} : memref<448x4xf32, #tpu.memory_space<vmem>>, vector<16x4xf32>,
    %c0_49 = arith.constant 0 : index
    %c6 = arith.constant 6 : index
    %c0_50 = arith.constant 0 : index
    %c0_51 = arith.constant 0 : index
    %58 = vector.load %arg1[%c0_49, %c6, %c0_50, %c0_51] : memref<1x16x16x4xf32, #tpu.memory_space<vmem>>, vector<1x1x16x4xf32>
    %59 = vector.shape_cast %58 : vector<1x1x16x4xf32> to vector<16x4xf32>
    %60 = vector.broadcast %8 : vector<1x4xf32> to vector<16x4xf32>
    %61 = arith.subf %59, %60 : vector<16x4xf32>
    %62 = vector.broadcast %9 : vector<1x4xf32> to vector<16x4xf32>
    %63 = arith.mulf %61, %62 : vector<16x4xf32>
    %c176 = arith.constant 176 : index
    %c0_52 = arith.constant 0 : index
    %64 = vector.load %arg16[%c176, %c0_52] : memref<448x4xf32, #tpu.memory_space<vmem>>, vector<16x4xf32>
    tpu.vector_store %arg16[%c176, %c0_52], %63 {strides = array<i32>} : memref<448x4xf32, #tpu.memory_space<vmem>>, vector<16x4xf32>,
    %c0_53 = arith.constant 0 : index
    %c7 = arith.constant 7 : index
    %c0_54 = arith.constant 0 : index
    %c0_55 = arith.constant 0 : index
    %65 = vector.load %arg1[%c0_53, %c7, %c0_54, %c0_55] : memref<1x16x16x4xf32, #tpu.memory_space<vmem>>, vector<1x1x16x4xf32>
    %66 = vector.shape_cast %65 : vector<1x1x16x4xf32> to vector<16x4xf32>
    %67 = vector.broadcast %8 : vector<1x4xf32> to vector<16x4xf32>
    %68 = arith.subf %66, %67 : vector<16x4xf32>
    %69 = vector.broadcast %9 : vector<1x4xf32> to vector<16x4xf32>
    %70 = arith.mulf %68, %69 : vector<16x4xf32>
    %c200 = arith.constant 200 : index
    %c0_56 = arith.constant 0 : index
    %71 = vector.load %arg16[%c200, %c0_56] : memref<448x4xf32, #tpu.memory_space<vmem>>, vector<16x4xf32>
    tpu.vector_store %arg16[%c200, %c0_56], %70 {strides = array<i32>} : memref<448x4xf32, #tpu.memory_space<vmem>>, vector<16x4xf32>,
    %c0_57 = arith.constant 0 : index
    %c8 = arith.constant 8 : index
    %c0_58 = arith.constant 0 : index
    %c0_59 = arith.constant 0 : index
    %72 = vector.load %arg1[%c0_57, %c8, %c0_58, %c0_59] : memref<1x16x16x4xf32, #tpu.memory_space<vmem>>, vector<1x1x16x4xf32>
    %73 = vector.shape_cast %72 : vector<1x1x16x4xf32> to vector<16x4xf32>
    %74 = vector.broadcast %8 : vector<1x4xf32> to vector<16x4xf32>
    %75 = arith.subf %73, %74 : vector<16x4xf32>
    %76 = vector.broadcast %9 : vector<1x4xf32> to vector<16x4xf32>
    %77 = arith.mulf %75, %76 : vector<16x4xf32>
    %c224 = arith.constant 224 : index
    %c0_60 = arith.constant 0 : index
    %78 = vector.load %arg16[%c224, %c0_60] : memref<448x4xf32, #tpu.memory_space<vmem>>, vector<16x4xf32>
    tpu.vector_store %arg16[%c224, %c0_60], %77 {strides = array<i32>} : memref<448x4xf32, #tpu.memory_space<vmem>>, vector<16x4xf32>,
    %c0_61 = arith.constant 0 : index
    %c9 = arith.constant 9 : index
    %c0_62 = arith.constant 0 : index
    %c0_63 = arith.constant 0 : index
    %79 = vector.load %arg1[%c0_61, %c9, %c0_62, %c0_63] : memref<1x16x16x4xf32, #tpu.memory_space<vmem>>, vector<1x1x16x4xf32>
    %80 = vector.shape_cast %79 : vector<1x1x16x4xf32> to vector<16x4xf32>
    %81 = vector.broadcast %8 : vector<1x4xf32> to vector<16x4xf32>
    %82 = arith.subf %80, %81 : vector<16x4xf32>
    %83 = vector.broadcast %9 : vector<1x4xf32> to vector<16x4xf32>
    %84 = arith.mulf %82, %83 : vector<16x4xf32>
    %c248 = arith.constant 248 : index
    %c0_64 = arith.constant 0 : index
    %85 = vector.load %arg16[%c248, %c0_64] : memref<448x4xf32, #tpu.memory_space<vmem>>, vector<16x4xf32>
    tpu.vector_store %arg16[%c248, %c0_64], %84 {strides = array<i32>} : memref<448x4xf32, #tpu.memory_space<vmem>>, vector<16x4xf32>,
    %c0_65 = arith.constant 0 : index
    %c10 = arith.constant 10 : index
    %c0_66 = arith.constant 0 : index
    %c0_67 = arith.constant 0 : index
    %86 = vector.load %arg1[%c0_65, %c10, %c0_66, %c0_67] : memref<1x16x16x4xf32, #tpu.memory_space<vmem>>, vector<1x1x16x4xf32>
    %87 = vector.shape_cast %86 : vector<1x1x16x4xf32> to vector<16x4xf32>
    %88 = vector.broadcast %8 : vector<1x4xf32> to vector<16x4xf32>
    %89 = arith.subf %87, %88 : vector<16x4xf32>
    %90 = vector.broadcast %9 : vector<1x4xf32> to vector<16x4xf32>
    %91 = arith.mulf %89, %90 : vector<16x4xf32>
    %c272 = arith.constant 272 : index
    %c0_68 = arith.constant 0 : index
    %92 = vector.load %arg16[%c272, %c0_68] : memref<448x4xf32, #tpu.memory_space<vmem>>, vector<16x4xf32>
    tpu.vector_store %arg16[%c272, %c0_68], %91 {strides = array<i32>} : memref<448x4xf32, #tpu.memory_space<vmem>>, vector<16x4xf32>,
    %c0_69 = arith.constant 0 : index
    %c11 = arith.constant 11 : index
    %c0_70 = arith.constant 0 : index
    %c0_71 = arith.constant 0 : index
    %93 = vector.load %arg1[%c0_69, %c11, %c0_70, %c0_71] : memref<1x16x16x4xf32, #tpu.memory_space<vmem>>, vector<1x1x16x4xf32>
    %94 = vector.shape_cast %93 : vector<1x1x16x4xf32> to vector<16x4xf32>
    %95 = vector.broadcast %8 : vector<1x4xf32> to vector<16x4xf32>
    %96 = arith.subf %94, %95 : vector<16x4xf32>
    %97 = vector.broadcast %9 : vector<1x4xf32> to vector<16x4xf32>
    %98 = arith.mulf %96, %97 : vector<16x4xf32>
    %c296 = arith.constant 296 : index
    %c0_72 = arith.constant 0 : index
    %99 = vector.load %arg16[%c296, %c0_72] : memref<448x4xf32, #tpu.memory_space<vmem>>, vector<16x4xf32>
    tpu.vector_store %arg16[%c296, %c0_72], %98 {strides = array<i32>} : memref<448x4xf32, #tpu.memory_space<vmem>>, vector<16x4xf32>,
    %c0_73 = arith.constant 0 : index
    %c12 = arith.constant 12 : index
    %c0_74 = arith.constant 0 : index
    %c0_75 = arith.constant 0 : index
    %100 = vector.load %arg1[%c0_73, %c12, %c0_74, %c0_75] : memref<1x16x16x4xf32, #tpu.memory_space<vmem>>, vector<1x1x16x4xf32>
    %101 = vector.shape_cast %100 : vector<1x1x16x4xf32> to vector<16x4xf32>
    %102 = vector.broadcast %8 : vector<1x4xf32> to vector<16x4xf32>
    %103 = arith.subf %101, %102 : vector<16x4xf32>
    %104 = vector.broadcast %9 : vector<1x4xf32> to vector<16x4xf32>
    %105 = arith.mulf %103, %104 : vector<16x4xf32>
    %c320 = arith.constant 320 : index
    %c0_76 = arith.constant 0 : index
    %106 = vector.load %arg16[%c320, %c0_76] : memref<448x4xf32, #tpu.memory_space<vmem>>, vector<16x4xf32>
    tpu.vector_store %arg16[%c320, %c0_76], %105 {strides = array<i32>} : memref<448x4xf32, #tpu.memory_space<vmem>>, vector<16x4xf32>,
    %c0_77 = arith.constant 0 : index
    %c13 = arith.constant 13 : index
    %c0_78 = arith.constant 0 : index
    %c0_79 = arith.constant 0 : index
    %107 = vector.load %arg1[%c0_77, %c13, %c0_78, %c0_79] : memref<1x16x16x4xf32, #tpu.memory_space<vmem>>, vector<1x1x16x4xf32>
    %108 = vector.shape_cast %107 : vector<1x1x16x4xf32> to vector<16x4xf32>
    %109 = vector.broadcast %8 : vector<1x4xf32> to vector<16x4xf32>
    %110 = arith.subf %108, %109 : vector<16x4xf32>
    %111 = vector.broadcast %9 : vector<1x4xf32> to vector<16x4xf32>
    %112 = arith.mulf %110, %111 : vector<16x4xf32>
    %c344 = arith.constant 344 : index
    %c0_80 = arith.constant 0 : index
    %113 = vector.load %arg16[%c344, %c0_80] : memref<448x4xf32, #tpu.memory_space<vmem>>, vector<16x4xf32>
    tpu.vector_store %arg16[%c344, %c0_80], %112 {strides = array<i32>} : memref<448x4xf32, #tpu.memory_space<vmem>>, vector<16x4xf32>,
    %c0_81 = arith.constant 0 : index
    %c14 = arith.constant 14 : index
    %c0_82 = arith.constant 0 : index
    %c0_83 = arith.constant 0 : index
    %114 = vector.load %arg1[%c0_81, %c14, %c0_82, %c0_83] : memref<1x16x16x4xf32, #tpu.memory_space<vmem>>, vector<1x1x16x4xf32>
    %115 = vector.shape_cast %114 : vector<1x1x16x4xf32> to vector<16x4xf32>
    %116 = vector.broadcast %8 : vector<1x4xf32> to vector<16x4xf32>
    %117 = arith.subf %115, %116 : vector<16x4xf32>
    %118 = vector.broadcast %9 : vector<1x4xf32> to vector<16x4xf32>
    %119 = arith.mulf %117, %118 : vector<16x4xf32>
    %c368 = arith.constant 368 : index
    %c0_84 = arith.constant 0 : index
    %120 = vector.load %arg16[%c368, %c0_84] : memref<448x4xf32, #tpu.memory_space<vmem>>, vector<16x4xf32>
    tpu.vector_store %arg16[%c368, %c0_84], %119 {strides = array<i32>} : memref<448x4xf32, #tpu.memory_space<vmem>>, vector<16x4xf32>,
    %c0_85 = arith.constant 0 : index
    %c15 = arith.constant 15 : index
    %c0_86 = arith.constant 0 : index
    %c0_87 = arith.constant 0 : index
    %121 = vector.load %arg1[%c0_85, %c15, %c0_86, %c0_87] : memref<1x16x16x4xf32, #tpu.memory_space<vmem>>, vector<1x1x16x4xf32>
    %122 = vector.shape_cast %121 : vector<1x1x16x4xf32> to vector<16x4xf32>
    %123 = vector.broadcast %8 : vector<1x4xf32> to vector<16x4xf32>
    %124 = arith.subf %122, %123 : vector<16x4xf32>
    %125 = vector.broadcast %9 : vector<1x4xf32> to vector<16x4xf32>
    %126 = arith.mulf %124, %125 : vector<16x4xf32>
    %c392 = arith.constant 392 : index
    %c0_88 = arith.constant 0 : index
    %127 = vector.load %arg16[%c392, %c0_88] : memref<448x4xf32, #tpu.memory_space<vmem>>, vector<16x4xf32>
    tpu.vector_store %arg16[%c392, %c0_88], %126 {strides = array<i32>} : memref<448x4xf32, #tpu.memory_space<vmem>>, vector<16x4xf32>,
    %cst_89 = arith.constant 0.000000e+00 : f32
    %128 = vector.broadcast %cst_89 : f32 to vector<384x8xf32>
    %c7_90 = arith.constant 7 : index
    %c0_91 = arith.constant 0 : index
    %129 = vector.load %arg16[%c7_90, %c0_91] : memref<448x4xf32, #tpu.memory_space<vmem>>, vector<384x4xf32>
    %c0_92 = arith.constant 0 : index
    %c0_93 = arith.constant 0 : index
    %c0_94 = arith.constant 0 : index
    %130 = vector.load %arg4[%c0_92, %c0_93, %c0_94] : memref<9x4x8xf32, #tpu.memory_space<vmem>>, vector<1x4x8xf32>
    %131 = vector.shape_cast %130 : vector<1x4x8xf32> to vector<4x8xf32>
    %cst_95 = arith.constant dense<0.000000e+00> : vector<384x8xf32>
    %132 = tpu.matmul %129, %131, %cst_95 {dimension_numbers = #tpu.dot_dimension_numbers<[1], [0], [0], [1], [0, 0, 1, 1], [], []>} : vector<384x4xf32>, vector<4x8xf32>, vector<384x8xf32> -> vector<384x8xf32>
    %133 = arith.addf %128, %132 : vector<384x8xf32>
    %c8_96 = arith.constant 8 : index
    %c0_97 = arith.constant 0 : index
    %134 = vector.load %arg16[%c8_96, %c0_97] : memref<448x4xf32, #tpu.memory_space<vmem>>, vector<384x4xf32>
    %c1_98 = arith.constant 1 : index
    %c0_99 = arith.constant 0 : index
    %c0_100 = arith.constant 0 : index
    %135 = vector.load %arg4[%c1_98, %c0_99, %c0_100] : memref<9x4x8xf32, #tpu.memory_space<vmem>>, vector<1x4x8xf32>
    %136 = vector.shape_cast %135 : vector<1x4x8xf32> to vector<4x8xf32>
    %cst_101 = arith.constant dense<0.000000e+00> : vector<384x8xf32>
    %137 = tpu.matmul %134, %136, %cst_101 {dimension_numbers = #tpu.dot_dimension_numbers<[1], [0], [0], [1], [0, 0, 1, 1], [], []>} : vector<384x4xf32>, vector<4x8xf32>, vector<384x8xf32> -> vector<384x8xf32>
    %138 = arith.addf %133, %137 : vector<384x8xf32>
    %c9_102 = arith.constant 9 : index
    %c0_103 = arith.constant 0 : index
    %139 = vector.load %arg16[%c9_102, %c0_103] : memref<448x4xf32, #tpu.memory_space<vmem>>, vector<384x4xf32>
    %c2_104 = arith.constant 2 : index
    %c0_105 = arith.constant 0 : index
    %c0_106 = arith.constant 0 : index
    %140 = vector.load %arg4[%c2_104, %c0_105, %c0_106] : memref<9x4x8xf32, #tpu.memory_space<vmem>>, vector<1x4x8xf32>
    %141 = vector.shape_cast %140 : vector<1x4x8xf32> to vector<4x8xf32>
    %cst_107 = arith.constant dense<0.000000e+00> : vector<384x8xf32>
    %142 = tpu.matmul %139, %141, %cst_107 {dimension_numbers = #tpu.dot_dimension_numbers<[1], [0], [0], [1], [0, 0, 1, 1], [], []>} : vector<384x4xf32>, vector<4x8xf32>, vector<384x8xf32> -> vector<384x8xf32>
    %143 = arith.addf %138, %142 : vector<384x8xf32>
    %c31 = arith.constant 31 : index
    %c0_108 = arith.constant 0 : index
    %144 = vector.load %arg16[%c31, %c0_108] : memref<448x4xf32, #tpu.memory_space<vmem>>, vector<384x4xf32>
    %c3_109 = arith.constant 3 : index
    %c0_110 = arith.constant 0 : index
    %c0_111 = arith.constant 0 : index
    %145 = vector.load %arg4[%c3_109, %c0_110, %c0_111] : memref<9x4x8xf32, #tpu.memory_space<vmem>>, vector<1x4x8xf32>
    %146 = vector.shape_cast %145 : vector<1x4x8xf32> to vector<4x8xf32>
    %cst_112 = arith.constant dense<0.000000e+00> : vector<384x8xf32>
    %147 = tpu.matmul %144, %146, %cst_112 {dimension_numbers = #tpu.dot_dimension_numbers<[1], [0], [0], [1], [0, 0, 1, 1], [], []>} : vector<384x4xf32>, vector<4x8xf32>, vector<384x8xf32> -> vector<384x8xf32>
    %148 = arith.addf %143, %147 : vector<384x8xf32>
    %c32_113 = arith.constant 32 : index
    %c0_114 = arith.constant 0 : index
    %149 = vector.load %arg16[%c32_113, %c0_114] : memref<448x4xf32, #tpu.memory_space<vmem>>, vector<384x4xf32>
    %c4_115 = arith.constant 4 : index
    %c0_116 = arith.constant 0 : index
    %c0_117 = arith.constant 0 : index
    %150 = vector.load %arg4[%c4_115, %c0_116, %c0_117] : memref<9x4x8xf32, #tpu.memory_space<vmem>>, vector<1x4x8xf32>
    %151 = vector.shape_cast %150 : vector<1x4x8xf32> to vector<4x8xf32>
    %cst_118 = arith.constant dense<0.000000e+00> : vector<384x8xf32>
    %152 = tpu.matmul %149, %151, %cst_118 {dimension_numbers = #tpu.dot_dimension_numbers<[1], [0], [0], [1], [0, 0, 1, 1], [], []>} : vector<384x4xf32>, vector<4x8xf32>, vector<384x8xf32> -> vector<384x8xf32>
    %153 = arith.addf %148, %152 : vector<384x8xf32>
    %c33 = arith.constant 33 : index
    %c0_119 = arith.constant 0 : index
    %154 = vector.load %arg16[%c33, %c0_119] : memref<448x4xf32, #tpu.memory_space<vmem>>, vector<384x4xf32>
    %c5_120 = arith.constant 5 : index
    %c0_121 = arith.constant 0 : index
    %c0_122 = arith.constant 0 : index
    %155 = vector.load %arg4[%c5_120, %c0_121, %c0_122] : memref<9x4x8xf32, #tpu.memory_space<vmem>>, vector<1x4x8xf32>
    %156 = vector.shape_cast %155 : vector<1x4x8xf32> to vector<4x8xf32>
    %cst_123 = arith.constant dense<0.000000e+00> : vector<384x8xf32>
    %157 = tpu.matmul %154, %156, %cst_123 {dimension_numbers = #tpu.dot_dimension_numbers<[1], [0], [0], [1], [0, 0, 1, 1], [], []>} : vector<384x4xf32>, vector<4x8xf32>, vector<384x8xf32> -> vector<384x8xf32>
    %158 = arith.addf %153, %157 : vector<384x8xf32>
    %c55 = arith.constant 55 : index
    %c0_124 = arith.constant 0 : index
    %159 = vector.load %arg16[%c55, %c0_124] : memref<448x4xf32, #tpu.memory_space<vmem>>, vector<384x4xf32>
    %c6_125 = arith.constant 6 : index
    %c0_126 = arith.constant 0 : index
    %c0_127 = arith.constant 0 : index
    %160 = vector.load %arg4[%c6_125, %c0_126, %c0_127] : memref<9x4x8xf32, #tpu.memory_space<vmem>>, vector<1x4x8xf32>
    %161 = vector.shape_cast %160 : vector<1x4x8xf32> to vector<4x8xf32>
    %cst_128 = arith.constant dense<0.000000e+00> : vector<384x8xf32>
    %162 = tpu.matmul %159, %161, %cst_128 {dimension_numbers = #tpu.dot_dimension_numbers<[1], [0], [0], [1], [0, 0, 1, 1], [], []>} : vector<384x4xf32>, vector<4x8xf32>, vector<384x8xf32> -> vector<384x8xf32>
    %163 = arith.addf %158, %162 : vector<384x8xf32>
    %c56_129 = arith.constant 56 : index
    %c0_130 = arith.constant 0 : index
    %164 = vector.load %arg16[%c56_129, %c0_130] : memref<448x4xf32, #tpu.memory_space<vmem>>, vector<384x4xf32>
    %c7_131 = arith.constant 7 : index
    %c0_132 = arith.constant 0 : index
    %c0_133 = arith.constant 0 : index
    %165 = vector.load %arg4[%c7_131, %c0_132, %c0_133] : memref<9x4x8xf32, #tpu.memory_space<vmem>>, vector<1x4x8xf32>
    %166 = vector.shape_cast %165 : vector<1x4x8xf32> to vector<4x8xf32>
    %cst_134 = arith.constant dense<0.000000e+00> : vector<384x8xf32>
    %167 = tpu.matmul %164, %166, %cst_134 {dimension_numbers = #tpu.dot_dimension_numbers<[1], [0], [0], [1], [0, 0, 1, 1], [], []>} : vector<384x4xf32>, vector<4x8xf32>, vector<384x8xf32> -> vector<384x8xf32>
    %168 = arith.addf %163, %167 : vector<384x8xf32>
    %c57 = arith.constant 57 : index
    %c0_135 = arith.constant 0 : index
    %169 = vector.load %arg16[%c57, %c0_135] : memref<448x4xf32, #tpu.memory_space<vmem>>, vector<384x4xf32>
    %c8_136 = arith.constant 8 : index
    %c0_137 = arith.constant 0 : index
    %c0_138 = arith.constant 0 : index
    %170 = vector.load %arg4[%c8_136, %c0_137, %c0_138] : memref<9x4x8xf32, #tpu.memory_space<vmem>>, vector<1x4x8xf32>
    %171 = vector.shape_cast %170 : vector<1x4x8xf32> to vector<4x8xf32>
    %cst_139 = arith.constant dense<0.000000e+00> : vector<384x8xf32>
    %172 = tpu.matmul %169, %171, %cst_139 {dimension_numbers = #tpu.dot_dimension_numbers<[1], [0], [0], [1], [0, 0, 1, 1], [], []>} : vector<384x4xf32>, vector<4x8xf32>, vector<384x8xf32> -> vector<384x8xf32>
    %173 = arith.addf %168, %172 : vector<384x8xf32>
    %c0_140 = arith.constant 0 : index
    %c0_141 = arith.constant 0 : index
    %174 = vector.load %arg5[%c0_140, %c0_141] : memref<1x8xf32, #tpu.memory_space<vmem>>, vector<1x8xf32>
    %175 = vector.broadcast %174 : vector<1x8xf32> to vector<384x8xf32>
    %176 = arith.addf %173, %175 : vector<384x8xf32>
    %cst_142 = arith.constant 0.000000e+00 : f32
    %177 = vector.broadcast %cst_142 : f32 to vector<384x8xf32>
    %178 = arith.maximumf %176, %177 : vector<384x8xf32>
    %179 = vector.broadcast %10 : vector<384x1xf32> to vector<384x8xf32>
    %180 = arith.mulf %178, %179 : vector<384x8xf32>
    %c0_143 = arith.constant 0 : index
    %c0_144 = arith.constant 0 : index
    %c0_145 = arith.constant 0 : index
    %181 = vector.load %arg13[%c0_143, %c0_144, %c0_145] : memref<1x384x8xf32, #tpu.memory_space<vmem>>, vector<1x384x8xf32>
    %182 = vector.shape_cast %181 : vector<1x384x8xf32> to vector<384x8xf32>
    %183 = vector.shape_cast %180 : vector<384x8xf32> to vector<1x384x8xf32>
    tpu.vector_store %arg13[%c0_143, %c0_144, %c0_145], %183 {strides = array<i32>} : memref<1x384x8xf32, #tpu.memory_space<vmem>>, vector<1x384x8xf32>,
    %c32_146 = arith.constant 32 : index
    %c0_147 = arith.constant 0 : index
    %184 = vector.load %arg17[%c32_146, %c0_147] : memref<448x8xf32, #tpu.memory_space<vmem>>, vector<384x8xf32>
    tpu.vector_store %arg17[%c32_146, %c0_147], %180 {strides = array<i32>} : memref<448x8xf32, #tpu.memory_space<vmem>>, vector<384x8xf32>,
    %cst_148 = arith.constant 0.000000e+00 : f32
    %185 = vector.broadcast %cst_148 : f32 to vector<384x8xf32>
    %c7_149 = arith.constant 7 : index
    %c0_150 = arith.constant 0 : index
    %186 = vector.load %arg17[%c7_149, %c0_150] : memref<448x8xf32, #tpu.memory_space<vmem>>, vector<384x8xf32>
    %c0_151 = arith.constant 0 : index
    %c0_152 = arith.constant 0 : index
    %c0_153 = arith.constant 0 : index
    %187 = vector.load %arg6[%c0_151, %c0_152, %c0_153] : memref<9x8x8xf32, #tpu.memory_space<vmem>>, vector<1x8x8xf32>
    %188 = vector.shape_cast %187 : vector<1x8x8xf32> to vector<8x8xf32>
    %cst_154 = arith.constant dense<0.000000e+00> : vector<384x8xf32>
    %189 = tpu.matmul %186, %188, %cst_154 {dimension_numbers = #tpu.dot_dimension_numbers<[1], [0], [0], [1], [0, 0, 1, 1], [], []>} : vector<384x8xf32>, vector<8x8xf32>, vector<384x8xf32> -> vector<384x8xf32>
    %190 = arith.addf %185, %189 : vector<384x8xf32>
    %c8_155 = arith.constant 8 : index
    %c0_156 = arith.constant 0 : index
    %191 = vector.load %arg17[%c8_155, %c0_156] : memref<448x8xf32, #tpu.memory_space<vmem>>, vector<384x8xf32>
    %c1_157 = arith.constant 1 : index
    %c0_158 = arith.constant 0 : index
    %c0_159 = arith.constant 0 : index
    %192 = vector.load %arg6[%c1_157, %c0_158, %c0_159] : memref<9x8x8xf32, #tpu.memory_space<vmem>>, vector<1x8x8xf32>
    %193 = vector.shape_cast %192 : vector<1x8x8xf32> to vector<8x8xf32>
    %cst_160 = arith.constant dense<0.000000e+00> : vector<384x8xf32>
    %194 = tpu.matmul %191, %193, %cst_160 {dimension_numbers = #tpu.dot_dimension_numbers<[1], [0], [0], [1], [0, 0, 1, 1], [], []>} : vector<384x8xf32>, vector<8x8xf32>, vector<384x8xf32> -> vector<384x8xf32>
    %195 = arith.addf %190, %194 : vector<384x8xf32>
    %c9_161 = arith.constant 9 : index
    %c0_162 = arith.constant 0 : index
    %196 = vector.load %arg17[%c9_161, %c0_162] : memref<448x8xf32, #tpu.memory_space<vmem>>, vector<384x8xf32>
    %c2_163 = arith.constant 2 : index
    %c0_164 = arith.constant 0 : index
    %c0_165 = arith.constant 0 : index
    %197 = vector.load %arg6[%c2_163, %c0_164, %c0_165] : memref<9x8x8xf32, #tpu.memory_space<vmem>>, vector<1x8x8xf32>
    %198 = vector.shape_cast %197 : vector<1x8x8xf32> to vector<8x8xf32>
    %cst_166 = arith.constant dense<0.000000e+00> : vector<384x8xf32>
    %199 = tpu.matmul %196, %198, %cst_166 {dimension_numbers = #tpu.dot_dimension_numbers<[1], [0], [0], [1], [0, 0, 1, 1], [], []>} : vector<384x8xf32>, vector<8x8xf32>, vector<384x8xf32> -> vector<384x8xf32>
    %200 = arith.addf %195, %199 : vector<384x8xf32>
    %c31_167 = arith.constant 31 : index
    %c0_168 = arith.constant 0 : index
    %201 = vector.load %arg17[%c31_167, %c0_168] : memref<448x8xf32, #tpu.memory_space<vmem>>, vector<384x8xf32>
    %c3_169 = arith.constant 3 : index
    %c0_170 = arith.constant 0 : index
    %c0_171 = arith.constant 0 : index
    %202 = vector.load %arg6[%c3_169, %c0_170, %c0_171] : memref<9x8x8xf32, #tpu.memory_space<vmem>>, vector<1x8x8xf32>
    %203 = vector.shape_cast %202 : vector<1x8x8xf32> to vector<8x8xf32>
    %cst_172 = arith.constant dense<0.000000e+00> : vector<384x8xf32>
    %204 = tpu.matmul %201, %203, %cst_172 {dimension_numbers = #tpu.dot_dimension_numbers<[1], [0], [0], [1], [0, 0, 1, 1], [], []>} : vector<384x8xf32>, vector<8x8xf32>, vector<384x8xf32> -> vector<384x8xf32>
    %205 = arith.addf %200, %204 : vector<384x8xf32>
    %c32_173 = arith.constant 32 : index
    %c0_174 = arith.constant 0 : index
    %206 = vector.load %arg17[%c32_173, %c0_174] : memref<448x8xf32, #tpu.memory_space<vmem>>, vector<384x8xf32>
    %c4_175 = arith.constant 4 : index
    %c0_176 = arith.constant 0 : index
    %c0_177 = arith.constant 0 : index
    %207 = vector.load %arg6[%c4_175, %c0_176, %c0_177] : memref<9x8x8xf32, #tpu.memory_space<vmem>>, vector<1x8x8xf32>
    %208 = vector.shape_cast %207 : vector<1x8x8xf32> to vector<8x8xf32>
    %cst_178 = arith.constant dense<0.000000e+00> : vector<384x8xf32>
    %209 = tpu.matmul %206, %208, %cst_178 {dimension_numbers = #tpu.dot_dimension_numbers<[1], [0], [0], [1], [0, 0, 1, 1], [], []>} : vector<384x8xf32>, vector<8x8xf32>, vector<384x8xf32> -> vector<384x8xf32>
    %210 = arith.addf %205, %209 : vector<384x8xf32>
    %c33_179 = arith.constant 33 : index
    %c0_180 = arith.constant 0 : index
    %211 = vector.load %arg17[%c33_179, %c0_180] : memref<448x8xf32, #tpu.memory_space<vmem>>, vector<384x8xf32>
    %c5_181 = arith.constant 5 : index
    %c0_182 = arith.constant 0 : index
    %c0_183 = arith.constant 0 : index
    %212 = vector.load %arg6[%c5_181, %c0_182, %c0_183] : memref<9x8x8xf32, #tpu.memory_space<vmem>>, vector<1x8x8xf32>
    %213 = vector.shape_cast %212 : vector<1x8x8xf32> to vector<8x8xf32>
    %cst_184 = arith.constant dense<0.000000e+00> : vector<384x8xf32>
    %214 = tpu.matmul %211, %213, %cst_184 {dimension_numbers = #tpu.dot_dimension_numbers<[1], [0], [0], [1], [0, 0, 1, 1], [], []>} : vector<384x8xf32>, vector<8x8xf32>, vector<384x8xf32> -> vector<384x8xf32>
    %215 = arith.addf %210, %214 : vector<384x8xf32>
    %c55_185 = arith.constant 55 : index
    %c0_186 = arith.constant 0 : index
    %216 = vector.load %arg17[%c55_185, %c0_186] : memref<448x8xf32, #tpu.memory_space<vmem>>, vector<384x8xf32>
    %c6_187 = arith.constant 6 : index
    %c0_188 = arith.constant 0 : index
    %c0_189 = arith.constant 0 : index
    %217 = vector.load %arg6[%c6_187, %c0_188, %c0_189] : memref<9x8x8xf32, #tpu.memory_space<vmem>>, vector<1x8x8xf32>
    %218 = vector.shape_cast %217 : vector<1x8x8xf32> to vector<8x8xf32>
    %cst_190 = arith.constant dense<0.000000e+00> : vector<384x8xf32>
    %219 = tpu.matmul %216, %218, %cst_190 {dimension_numbers = #tpu.dot_dimension_numbers<[1], [0], [0], [1], [0, 0, 1, 1], [], []>} : vector<384x8xf32>, vector<8x8xf32>, vector<384x8xf32> -> vector<384x8xf32>
    %220 = arith.addf %215, %219 : vector<384x8xf32>
    %c56_191 = arith.constant 56 : index
    %c0_192 = arith.constant 0 : index
    %221 = vector.load %arg17[%c56_191, %c0_192] : memref<448x8xf32, #tpu.memory_space<vmem>>, vector<384x8xf32>
    %c7_193 = arith.constant 7 : index
    %c0_194 = arith.constant 0 : index
    %c0_195 = arith.constant 0 : index
    %222 = vector.load %arg6[%c7_193, %c0_194, %c0_195] : memref<9x8x8xf32, #tpu.memory_space<vmem>>, vector<1x8x8xf32>
    %223 = vector.shape_cast %222 : vector<1x8x8xf32> to vector<8x8xf32>
    %cst_196 = arith.constant dense<0.000000e+00> : vector<384x8xf32>
    %224 = tpu.matmul %221, %223, %cst_196 {dimension_numbers = #tpu.dot_dimension_numbers<[1], [0], [0], [1], [0, 0, 1, 1], [], []>} : vector<384x8xf32>, vector<8x8xf32>, vector<384x8xf32> -> vector<384x8xf32>
    %225 = arith.addf %220, %224 : vector<384x8xf32>
    %c57_197 = arith.constant 57 : index
    %c0_198 = arith.constant 0 : index
    %226 = vector.load %arg17[%c57_197, %c0_198] : memref<448x8xf32, #tpu.memory_space<vmem>>, vector<384x8xf32>
    %c8_199 = arith.constant 8 : index
    %c0_200 = arith.constant 0 : index
    %c0_201 = arith.constant 0 : index
    %227 = vector.load %arg6[%c8_199, %c0_200, %c0_201] : memref<9x8x8xf32, #tpu.memory_space<vmem>>, vector<1x8x8xf32>
    %228 = vector.shape_cast %227 : vector<1x8x8xf32> to vector<8x8xf32>
    %cst_202 = arith.constant dense<0.000000e+00> : vector<384x8xf32>
    %229 = tpu.matmul %226, %228, %cst_202 {dimension_numbers = #tpu.dot_dimension_numbers<[1], [0], [0], [1], [0, 0, 1, 1], [], []>} : vector<384x8xf32>, vector<8x8xf32>, vector<384x8xf32> -> vector<384x8xf32>
    %230 = arith.addf %225, %229 : vector<384x8xf32>
    %c0_203 = arith.constant 0 : index
    %c0_204 = arith.constant 0 : index
    %231 = vector.load %arg7[%c0_203, %c0_204] : memref<1x8xf32, #tpu.memory_space<vmem>>, vector<1x8xf32>
    %232 = vector.broadcast %231 : vector<1x8xf32> to vector<384x8xf32>
    %233 = arith.addf %230, %232 : vector<384x8xf32>
    %cst_205 = arith.constant 0.000000e+00 : f32
    %234 = vector.broadcast %cst_205 : f32 to vector<384x8xf32>
    %235 = arith.maximumf %233, %234 : vector<384x8xf32>
    %236 = vector.broadcast %10 : vector<384x1xf32> to vector<384x8xf32>
    %237 = arith.mulf %235, %236 : vector<384x8xf32>
    %c0_206 = arith.constant 0 : index
    %c0_207 = arith.constant 0 : index
    %c0_208 = arith.constant 0 : index
    %238 = vector.load %arg14[%c0_206, %c0_207, %c0_208] : memref<1x384x8xf32, #tpu.memory_space<vmem>>, vector<1x384x8xf32>
    %239 = vector.shape_cast %238 : vector<1x384x8xf32> to vector<384x8xf32>
    %240 = vector.shape_cast %237 : vector<384x8xf32> to vector<1x384x8xf32>
    tpu.vector_store %arg14[%c0_206, %c0_207, %c0_208], %240 {strides = array<i32>} : memref<1x384x8xf32, #tpu.memory_space<vmem>>, vector<1x384x8xf32>,
    %c32_209 = arith.constant 32 : index
    %c0_210 = arith.constant 0 : index
    %241 = vector.load %arg18[%c32_209, %c0_210] : memref<448x8xf32, #tpu.memory_space<vmem>>, vector<384x8xf32>
    tpu.vector_store %arg18[%c32_209, %c0_210], %237 {strides = array<i32>} : memref<448x8xf32, #tpu.memory_space<vmem>>, vector<384x8xf32>,
    %c32_211 = arith.constant 32 : index
    %c0_212 = arith.constant 0 : index
    %242 = vector.load %arg18[%c32_211, %c0_212] : memref<448x8xf32, #tpu.memory_space<vmem>>, vector<16x8xf32>
    %c56_213 = arith.constant 56 : index
    %c0_214 = arith.constant 0 : index
    %243 = vector.load %arg18[%c56_213, %c0_214] : memref<448x8xf32, #tpu.memory_space<vmem>>, vector<16x8xf32>
    %244 = arith.maximumf %242, %243 : vector<16x8xf32>
    %cst_215 = arith.constant dense<0.000000e+00> : vector<8x8xf32>
    %245 = tpu.matmul %13, %244, %cst_215 {dimension_numbers = #tpu.dot_dimension_numbers<[1], [0], [0], [1], [0, 0, 1, 1], [], []>} : vector<8x16xf32>, vector<16x8xf32>, vector<8x8xf32> -> vector<8x8xf32>
    %cst_216 = arith.constant dense<0.000000e+00> : vector<8x8xf32>
    %246 = tpu.matmul %15, %244, %cst_216 {dimension_numbers = #tpu.dot_dimension_numbers<[1], [0], [0], [1], [0, 0, 1, 1], [], []>} : vector<8x16xf32>, vector<16x8xf32>, vector<8x8xf32> -> vector<8x8xf32>
    %247 = arith.maximumf %245, %246 : vector<8x8xf32>
    %c24 = arith.constant 24 : index
    %c0_217 = arith.constant 0 : index
    %248 = vector.load %arg19[%c24, %c0_217] : memref<176x8xf32, #tpu.memory_space<vmem>>, vector<8x8xf32>
    tpu.vector_store %arg19[%c24, %c0_217], %247 {strides = array<i32>} : memref<176x8xf32, #tpu.memory_space<vmem>>, vector<8x8xf32>,
    %c80_218 = arith.constant 80 : index
    %c0_219 = arith.constant 0 : index
    %249 = vector.load %arg18[%c80_218, %c0_219] : memref<448x8xf32, #tpu.memory_space<vmem>>, vector<16x8xf32>
    %c104_220 = arith.constant 104 : index
    %c0_221 = arith.constant 0 : index
    %250 = vector.load %arg18[%c104_220, %c0_221] : memref<448x8xf32, #tpu.memory_space<vmem>>, vector<16x8xf32>
    %251 = arith.maximumf %249, %250 : vector<16x8xf32>
    %cst_222 = arith.constant dense<0.000000e+00> : vector<8x8xf32>
    %252 = tpu.matmul %13, %251, %cst_222 {dimension_numbers = #tpu.dot_dimension_numbers<[1], [0], [0], [1], [0, 0, 1, 1], [], []>} : vector<8x16xf32>, vector<16x8xf32>, vector<8x8xf32> -> vector<8x8xf32>
    %cst_223 = arith.constant dense<0.000000e+00> : vector<8x8xf32>
    %253 = tpu.matmul %15, %251, %cst_223 {dimension_numbers = #tpu.dot_dimension_numbers<[1], [0], [0], [1], [0, 0, 1, 1], [], []>} : vector<8x16xf32>, vector<16x8xf32>, vector<8x8xf32> -> vector<8x8xf32>
    %254 = arith.maximumf %252, %253 : vector<8x8xf32>
    %c40 = arith.constant 40 : index
    %c0_224 = arith.constant 0 : index
    %255 = vector.load %arg19[%c40, %c0_224] : memref<176x8xf32, #tpu.memory_space<vmem>>, vector<8x8xf32>
    tpu.vector_store %arg19[%c40, %c0_224], %254 {strides = array<i32>} : memref<176x8xf32, #tpu.memory_space<vmem>>, vector<8x8xf32>,
    %c128_225 = arith.constant 128 : index
    %c0_226 = arith.constant 0 : index
    %256 = vector.load %arg18[%c128_225, %c0_226] : memref<448x8xf32, #tpu.memory_space<vmem>>, vector<16x8xf32>
    %c152_227 = arith.constant 152 : index
    %c0_228 = arith.constant 0 : index
    %257 = vector.load %arg18[%c152_227, %c0_228] : memref<448x8xf32, #tpu.memory_space<vmem>>, vector<16x8xf32>
    %258 = arith.maximumf %256, %257 : vector<16x8xf32>
    %cst_229 = arith.constant dense<0.000000e+00> : vector<8x8xf32>
    %259 = tpu.matmul %13, %258, %cst_229 {dimension_numbers = #tpu.dot_dimension_numbers<[1], [0], [0], [1], [0, 0, 1, 1], [], []>} : vector<8x16xf32>, vector<16x8xf32>, vector<8x8xf32> -> vector<8x8xf32>
    %cst_230 = arith.constant dense<0.000000e+00> : vector<8x8xf32>
    %260 = tpu.matmul %15, %258, %cst_230 {dimension_numbers = #tpu.dot_dimension_numbers<[1], [0], [0], [1], [0, 0, 1, 1], [], []>} : vector<8x16xf32>, vector<16x8xf32>, vector<8x8xf32> -> vector<8x8xf32>
    %261 = arith.maximumf %259, %260 : vector<8x8xf32>
    %c56_231 = arith.constant 56 : index
    %c0_232 = arith.constant 0 : index
    %262 = vector.load %arg19[%c56_231, %c0_232] : memref<176x8xf32, #tpu.memory_space<vmem>>, vector<8x8xf32>
    tpu.vector_store %arg19[%c56_231, %c0_232], %261 {strides = array<i32>} : memref<176x8xf32, #tpu.memory_space<vmem>>, vector<8x8xf32>,
    %c176_233 = arith.constant 176 : index
    %c0_234 = arith.constant 0 : index
    %263 = vector.load %arg18[%c176_233, %c0_234] : memref<448x8xf32, #tpu.memory_space<vmem>>, vector<16x8xf32>
    %c200_235 = arith.constant 200 : index
    %c0_236 = arith.constant 0 : index
    %264 = vector.load %arg18[%c200_235, %c0_236] : memref<448x8xf32, #tpu.memory_space<vmem>>, vector<16x8xf32>
    %265 = arith.maximumf %263, %264 : vector<16x8xf32>
    %cst_237 = arith.constant dense<0.000000e+00> : vector<8x8xf32>
    %266 = tpu.matmul %13, %265, %cst_237 {dimension_numbers = #tpu.dot_dimension_numbers<[1], [0], [0], [1], [0, 0, 1, 1], [], []>} : vector<8x16xf32>, vector<16x8xf32>, vector<8x8xf32> -> vector<8x8xf32>
    %cst_238 = arith.constant dense<0.000000e+00> : vector<8x8xf32>
    %267 = tpu.matmul %15, %265, %cst_238 {dimension_numbers = #tpu.dot_dimension_numbers<[1], [0], [0], [1], [0, 0, 1, 1], [], []>} : vector<8x16xf32>, vector<16x8xf32>, vector<8x8xf32> -> vector<8x8xf32>
    %268 = arith.maximumf %266, %267 : vector<8x8xf32>
    %c72 = arith.constant 72 : index
    %c0_239 = arith.constant 0 : index
    %269 = vector.load %arg19[%c72, %c0_239] : memref<176x8xf32, #tpu.memory_space<vmem>>, vector<8x8xf32>
    tpu.vector_store %arg19[%c72, %c0_239], %268 {strides = array<i32>} : memref<176x8xf32, #tpu.memory_space<vmem>>, vector<8x8xf32>,
    %c224_240 = arith.constant 224 : index
    %c0_241 = arith.constant 0 : index
    %270 = vector.load %arg18[%c224_240, %c0_241] : memref<448x8xf32, #tpu.memory_space<vmem>>, vector<16x8xf32>
    %c248_242 = arith.constant 248 : index
    %c0_243 = arith.constant 0 : index
    %271 = vector.load %arg18[%c248_242, %c0_243] : memref<448x8xf32, #tpu.memory_space<vmem>>, vector<16x8xf32>
    %272 = arith.maximumf %270, %271 : vector<16x8xf32>
    %cst_244 = arith.constant dense<0.000000e+00> : vector<8x8xf32>
    %273 = tpu.matmul %13, %272, %cst_244 {dimension_numbers = #tpu.dot_dimension_numbers<[1], [0], [0], [1], [0, 0, 1, 1], [], []>} : vector<8x16xf32>, vector<16x8xf32>, vector<8x8xf32> -> vector<8x8xf32>
    %cst_245 = arith.constant dense<0.000000e+00> : vector<8x8xf32>
    %274 = tpu.matmul %15, %272, %cst_245 {dimension_numbers = #tpu.dot_dimension_numbers<[1], [0], [0], [1], [0, 0, 1, 1], [], []>} : vector<8x16xf32>, vector<16x8xf32>, vector<8x8xf32> -> vector<8x8xf32>
    %275 = arith.maximumf %273, %274 : vector<8x8xf32>
    %c88 = arith.constant 88 : index
    %c0_246 = arith.constant 0 : index
    %276 = vector.load %arg19[%c88, %c0_246] : memref<176x8xf32, #tpu.memory_space<vmem>>, vector<8x8xf32>
    tpu.vector_store %arg19[%c88, %c0_246], %275 {strides = array<i32>} : memref<176x8xf32, #tpu.memory_space<vmem>>, vector<8x8xf32>,
    %c272_247 = arith.constant 272 : index
    %c0_248 = arith.constant 0 : index
    %277 = vector.load %arg18[%c272_247, %c0_248] : memref<448x8xf32, #tpu.memory_space<vmem>>, vector<16x8xf32>
    %c296_249 = arith.constant 296 : index
    %c0_250 = arith.constant 0 : index
    %278 = vector.load %arg18[%c296_249, %c0_250] : memref<448x8xf32, #tpu.memory_space<vmem>>, vector<16x8xf32>
    %279 = arith.maximumf %277, %278 : vector<16x8xf32>
    %cst_251 = arith.constant dense<0.000000e+00> : vector<8x8xf32>
    %280 = tpu.matmul %13, %279, %cst_251 {dimension_numbers = #tpu.dot_dimension_numbers<[1], [0], [0], [1], [0, 0, 1, 1], [], []>} : vector<8x16xf32>, vector<16x8xf32>, vector<8x8xf32> -> vector<8x8xf32>
    %cst_252 = arith.constant dense<0.000000e+00> : vector<8x8xf32>
    %281 = tpu.matmul %15, %279, %cst_252 {dimension_numbers = #tpu.dot_dimension_numbers<[1], [0], [0], [1], [0, 0, 1, 1], [], []>} : vector<8x16xf32>, vector<16x8xf32>, vector<8x8xf32> -> vector<8x8xf32>
    %282 = arith.maximumf %280, %281 : vector<8x8xf32>
    %c104_253 = arith.constant 104 : index
    %c0_254 = arith.constant 0 : index
    %283 = vector.load %arg19[%c104_253, %c0_254] : memref<176x8xf32, #tpu.memory_space<vmem>>, vector<8x8xf32>
    tpu.vector_store %arg19[%c104_253, %c0_254], %282 {strides = array<i32>} : memref<176x8xf32, #tpu.memory_space<vmem>>, vector<8x8xf32>,
    %c320_255 = arith.constant 320 : index
    %c0_256 = arith.constant 0 : index
    %284 = vector.load %arg18[%c320_255, %c0_256] : memref<448x8xf32, #tpu.memory_space<vmem>>, vector<16x8xf32>
    %c344_257 = arith.constant 344 : index
    %c0_258 = arith.constant 0 : index
    %285 = vector.load %arg18[%c344_257, %c0_258] : memref<448x8xf32, #tpu.memory_space<vmem>>, vector<16x8xf32>
    %286 = arith.maximumf %284, %285 : vector<16x8xf32>
    %cst_259 = arith.constant dense<0.000000e+00> : vector<8x8xf32>
    %287 = tpu.matmul %13, %286, %cst_259 {dimension_numbers = #tpu.dot_dimension_numbers<[1], [0], [0], [1], [0, 0, 1, 1], [], []>} : vector<8x16xf32>, vector<16x8xf32>, vector<8x8xf32> -> vector<8x8xf32>
    %cst_260 = arith.constant dense<0.000000e+00> : vector<8x8xf32>
    %288 = tpu.matmul %15, %286, %cst_260 {dimension_numbers = #tpu.dot_dimension_numbers<[1], [0], [0], [1], [0, 0, 1, 1], [], []>} : vector<8x16xf32>, vector<16x8xf32>, vector<8x8xf32> -> vector<8x8xf32>
    %289 = arith.maximumf %287, %288 : vector<8x8xf32>
    %c120 = arith.constant 120 : index
    %c0_261 = arith.constant 0 : index
    %290 = vector.load %arg19[%c120, %c0_261] : memref<176x8xf32, #tpu.memory_space<vmem>>, vector<8x8xf32>
    tpu.vector_store %arg19[%c120, %c0_261], %289 {strides = array<i32>} : memref<176x8xf32, #tpu.memory_space<vmem>>, vector<8x8xf32>,
    %c368_262 = arith.constant 368 : index
    %c0_263 = arith.constant 0 : index
    %291 = vector.load %arg18[%c368_262, %c0_263] : memref<448x8xf32, #tpu.memory_space<vmem>>, vector<16x8xf32>
    %c392_264 = arith.constant 392 : index
    %c0_265 = arith.constant 0 : index
    %292 = vector.load %arg18[%c392_264, %c0_265] : memref<448x8xf32, #tpu.memory_space<vmem>>, vector<16x8xf32>
    %293 = arith.maximumf %291, %292 : vector<16x8xf32>
    %cst_266 = arith.constant dense<0.000000e+00> : vector<8x8xf32>
    %294 = tpu.matmul %13, %293, %cst_266 {dimension_numbers = #tpu.dot_dimension_numbers<[1], [0], [0], [1], [0, 0, 1, 1], [], []>} : vector<8x16xf32>, vector<16x8xf32>, vector<8x8xf32> -> vector<8x8xf32>
    %cst_267 = arith.constant dense<0.000000e+00> : vector<8x8xf32>
    %295 = tpu.matmul %15, %293, %cst_267 {dimension_numbers = #tpu.dot_dimension_numbers<[1], [0], [0], [1], [0, 0, 1, 1], [], []>} : vector<8x16xf32>, vector<16x8xf32>, vector<8x8xf32> -> vector<8x8xf32>
    %296 = arith.maximumf %294, %295 : vector<8x8xf32>
    %c136 = arith.constant 136 : index
    %c0_268 = arith.constant 0 : index
    %297 = vector.load %arg19[%c136, %c0_268] : memref<176x8xf32, #tpu.memory_space<vmem>>, vector<8x8xf32>
    tpu.vector_store %arg19[%c136, %c0_268], %296 {strides = array<i32>} : memref<176x8xf32, #tpu.memory_space<vmem>>, vector<8x8xf32>,
    %cst_269 = arith.constant 0.000000e+00 : f32
    %298 = vector.broadcast %cst_269 : f32 to vector<128x16xf32>
    %c7_270 = arith.constant 7 : index
    %c0_271 = arith.constant 0 : index
    %299 = vector.load %arg19[%c7_270, %c0_271] : memref<176x8xf32, #tpu.memory_space<vmem>>, vector<128x8xf32>
    %c0_272 = arith.constant 0 : index
    %c0_273 = arith.constant 0 : index
    %c0_274 = arith.constant 0 : index
    %300 = vector.load %arg8[%c0_272, %c0_273, %c0_274] : memref<9x8x16xf32, #tpu.memory_space<vmem>>, vector<1x8x16xf32>
    %301 = vector.shape_cast %300 : vector<1x8x16xf32> to vector<8x16xf32>
    %cst_275 = arith.constant dense<0.000000e+00> : vector<128x16xf32>
    %302 = tpu.matmul %299, %301, %cst_275 {dimension_numbers = #tpu.dot_dimension_numbers<[1], [0], [0], [1], [0, 0, 1, 1], [], []>} : vector<128x8xf32>, vector<8x16xf32>, vector<128x16xf32> -> vector<128x16xf32>
    %303 = arith.addf %298, %302 : vector<128x16xf32>
    %c8_276 = arith.constant 8 : index
    %c0_277 = arith.constant 0 : index
    %304 = vector.load %arg19[%c8_276, %c0_277] : memref<176x8xf32, #tpu.memory_space<vmem>>, vector<128x8xf32>
    %c1_278 = arith.constant 1 : index
    %c0_279 = arith.constant 0 : index
    %c0_280 = arith.constant 0 : index
    %305 = vector.load %arg8[%c1_278, %c0_279, %c0_280] : memref<9x8x16xf32, #tpu.memory_space<vmem>>, vector<1x8x16xf32>
    %306 = vector.shape_cast %305 : vector<1x8x16xf32> to vector<8x16xf32>
    %cst_281 = arith.constant dense<0.000000e+00> : vector<128x16xf32>
    %307 = tpu.matmul %304, %306, %cst_281 {dimension_numbers = #tpu.dot_dimension_numbers<[1], [0], [0], [1], [0, 0, 1, 1], [], []>} : vector<128x8xf32>, vector<8x16xf32>, vector<128x16xf32> -> vector<128x16xf32>
    %308 = arith.addf %303, %307 : vector<128x16xf32>
    %c9_282 = arith.constant 9 : index
    %c0_283 = arith.constant 0 : index
    %309 = vector.load %arg19[%c9_282, %c0_283] : memref<176x8xf32, #tpu.memory_space<vmem>>, vector<128x8xf32>
    %c2_284 = arith.constant 2 : index
    %c0_285 = arith.constant 0 : index
    %c0_286 = arith.constant 0 : index
    %310 = vector.load %arg8[%c2_284, %c0_285, %c0_286] : memref<9x8x16xf32, #tpu.memory_space<vmem>>, vector<1x8x16xf32>
    %311 = vector.shape_cast %310 : vector<1x8x16xf32> to vector<8x16xf32>
    %cst_287 = arith.constant dense<0.000000e+00> : vector<128x16xf32>
    %312 = tpu.matmul %309, %311, %cst_287 {dimension_numbers = #tpu.dot_dimension_numbers<[1], [0], [0], [1], [0, 0, 1, 1], [], []>} : vector<128x8xf32>, vector<8x16xf32>, vector<128x16xf32> -> vector<128x16xf32>
    %313 = arith.addf %308, %312 : vector<128x16xf32>
    %c23 = arith.constant 23 : index
    %c0_288 = arith.constant 0 : index
    %314 = vector.load %arg19[%c23, %c0_288] : memref<176x8xf32, #tpu.memory_space<vmem>>, vector<128x8xf32>
    %c3_289 = arith.constant 3 : index
    %c0_290 = arith.constant 0 : index
    %c0_291 = arith.constant 0 : index
    %315 = vector.load %arg8[%c3_289, %c0_290, %c0_291] : memref<9x8x16xf32, #tpu.memory_space<vmem>>, vector<1x8x16xf32>
    %316 = vector.shape_cast %315 : vector<1x8x16xf32> to vector<8x16xf32>
    %cst_292 = arith.constant dense<0.000000e+00> : vector<128x16xf32>
    %317 = tpu.matmul %314, %316, %cst_292 {dimension_numbers = #tpu.dot_dimension_numbers<[1], [0], [0], [1], [0, 0, 1, 1], [], []>} : vector<128x8xf32>, vector<8x16xf32>, vector<128x16xf32> -> vector<128x16xf32>
    %318 = arith.addf %313, %317 : vector<128x16xf32>
    %c24_293 = arith.constant 24 : index
    %c0_294 = arith.constant 0 : index
    %319 = vector.load %arg19[%c24_293, %c0_294] : memref<176x8xf32, #tpu.memory_space<vmem>>, vector<128x8xf32>
    %c4_295 = arith.constant 4 : index
    %c0_296 = arith.constant 0 : index
    %c0_297 = arith.constant 0 : index
    %320 = vector.load %arg8[%c4_295, %c0_296, %c0_297] : memref<9x8x16xf32, #tpu.memory_space<vmem>>, vector<1x8x16xf32>
    %321 = vector.shape_cast %320 : vector<1x8x16xf32> to vector<8x16xf32>
    %cst_298 = arith.constant dense<0.000000e+00> : vector<128x16xf32>
    %322 = tpu.matmul %319, %321, %cst_298 {dimension_numbers = #tpu.dot_dimension_numbers<[1], [0], [0], [1], [0, 0, 1, 1], [], []>} : vector<128x8xf32>, vector<8x16xf32>, vector<128x16xf32> -> vector<128x16xf32>
    %323 = arith.addf %318, %322 : vector<128x16xf32>
    %c25 = arith.constant 25 : index
    %c0_299 = arith.constant 0 : index
    %324 = vector.load %arg19[%c25, %c0_299] : memref<176x8xf32, #tpu.memory_space<vmem>>, vector<128x8xf32>
    %c5_300 = arith.constant 5 : index
    %c0_301 = arith.constant 0 : index
    %c0_302 = arith.constant 0 : index
    %325 = vector.load %arg8[%c5_300, %c0_301, %c0_302] : memref<9x8x16xf32, #tpu.memory_space<vmem>>, vector<1x8x16xf32>
    %326 = vector.shape_cast %325 : vector<1x8x16xf32> to vector<8x16xf32>
    %cst_303 = arith.constant dense<0.000000e+00> : vector<128x16xf32>
    %327 = tpu.matmul %324, %326, %cst_303 {dimension_numbers = #tpu.dot_dimension_numbers<[1], [0], [0], [1], [0, 0, 1, 1], [], []>} : vector<128x8xf32>, vector<8x16xf32>, vector<128x16xf32> -> vector<128x16xf32>
    %328 = arith.addf %323, %327 : vector<128x16xf32>
    %c39 = arith.constant 39 : index
    %c0_304 = arith.constant 0 : index
    %329 = vector.load %arg19[%c39, %c0_304] : memref<176x8xf32, #tpu.memory_space<vmem>>, vector<128x8xf32>
    %c6_305 = arith.constant 6 : index
    %c0_306 = arith.constant 0 : index
    %c0_307 = arith.constant 0 : index
    %330 = vector.load %arg8[%c6_305, %c0_306, %c0_307] : memref<9x8x16xf32, #tpu.memory_space<vmem>>, vector<1x8x16xf32>
    %331 = vector.shape_cast %330 : vector<1x8x16xf32> to vector<8x16xf32>
    %cst_308 = arith.constant dense<0.000000e+00> : vector<128x16xf32>
    %332 = tpu.matmul %329, %331, %cst_308 {dimension_numbers = #tpu.dot_dimension_numbers<[1], [0], [0], [1], [0, 0, 1, 1], [], []>} : vector<128x8xf32>, vector<8x16xf32>, vector<128x16xf32> -> vector<128x16xf32>
    %333 = arith.addf %328, %332 : vector<128x16xf32>
    %c40_309 = arith.constant 40 : index
    %c0_310 = arith.constant 0 : index
    %334 = vector.load %arg19[%c40_309, %c0_310] : memref<176x8xf32, #tpu.memory_space<vmem>>, vector<128x8xf32>
    %c7_311 = arith.constant 7 : index
    %c0_312 = arith.constant 0 : index
    %c0_313 = arith.constant 0 : index
    %335 = vector.load %arg8[%c7_311, %c0_312, %c0_313] : memref<9x8x16xf32, #tpu.memory_space<vmem>>, vector<1x8x16xf32>
    %336 = vector.shape_cast %335 : vector<1x8x16xf32> to vector<8x16xf32>
    %cst_314 = arith.constant dense<0.000000e+00> : vector<128x16xf32>
    %337 = tpu.matmul %334, %336, %cst_314 {dimension_numbers = #tpu.dot_dimension_numbers<[1], [0], [0], [1], [0, 0, 1, 1], [], []>} : vector<128x8xf32>, vector<8x16xf32>, vector<128x16xf32> -> vector<128x16xf32>
    %338 = arith.addf %333, %337 : vector<128x16xf32>
    %c41 = arith.constant 41 : index
    %c0_315 = arith.constant 0 : index
    %339 = vector.load %arg19[%c41, %c0_315] : memref<176x8xf32, #tpu.memory_space<vmem>>, vector<128x8xf32>
    %c8_316 = arith.constant 8 : index
    %c0_317 = arith.constant 0 : index
    %c0_318 = arith.constant 0 : index
    %340 = vector.load %arg8[%c8_316, %c0_317, %c0_318] : memref<9x8x16xf32, #tpu.memory_space<vmem>>, vector<1x8x16xf32>
    %341 = vector.shape_cast %340 : vector<1x8x16xf32> to vector<8x16xf32>
    %cst_319 = arith.constant dense<0.000000e+00> : vector<128x16xf32>
    %342 = tpu.matmul %339, %341, %cst_319 {dimension_numbers = #tpu.dot_dimension_numbers<[1], [0], [0], [1], [0, 0, 1, 1], [], []>} : vector<128x8xf32>, vector<8x16xf32>, vector<128x16xf32> -> vector<128x16xf32>
    %343 = arith.addf %338, %342 : vector<128x16xf32>
    %c0_320 = arith.constant 0 : index
    %c0_321 = arith.constant 0 : index
    %344 = vector.load %arg9[%c0_320, %c0_321] : memref<1x16xf32, #tpu.memory_space<vmem>>, vector<1x16xf32>
    %345 = vector.broadcast %344 : vector<1x16xf32> to vector<128x16xf32>
    %346 = arith.addf %343, %345 : vector<128x16xf32>
    %cst_322 = arith.constant 0.000000e+00 : f32
    %347 = vector.broadcast %cst_322 : f32 to vector<128x16xf32>
    %348 = arith.maximumf %346, %347 : vector<128x16xf32>
    %349 = vector.broadcast %11 : vector<128x1xf32> to vector<128x16xf32>
    %350 = arith.mulf %348, %349 : vector<128x16xf32>
    %c0_323 = arith.constant 0 : index
    %c0_324 = arith.constant 0 : index
    %c0_325 = arith.constant 0 : index
    %351 = vector.load %arg15[%c0_323, %c0_324, %c0_325] : memref<1x128x16xf32, #tpu.memory_space<vmem>>, vector<1x128x16xf32>
    %352 = vector.shape_cast %351 : vector<1x128x16xf32> to vector<128x16xf32>
    %353 = vector.shape_cast %350 : vector<128x16xf32> to vector<1x128x16xf32>
    tpu.vector_store %arg15[%c0_323, %c0_324, %c0_325], %353 {strides = array<i32>} : memref<1x128x16xf32, #tpu.memory_space<vmem>>, vector<1x128x16xf32>,
    return
  }
  func.func @transform_0(%arg0: i32) -> (i32, i32, i32, i32) {
    %c0_i32 = arith.constant 0 : i32
    %c0_i32_0 = arith.constant 0 : i32
    %c0_i32_1 = arith.constant 0 : i32
    %c0_i32_2 = arith.constant 0 : i32
    return %arg0, %c0_i32, %c0_i32_0, %c0_i32_1 : i32, i32, i32, i32
  }
  func.func @transform_1(%arg0: i32) -> (i32, i32) {
    %c0_i32 = arith.constant 0 : i32
    %c0_i32_0 = arith.constant 0 : i32
    %c0_i32_1 = arith.constant 0 : i32
    return %c0_i32, %c0_i32_0 : i32, i32
  }
  func.func @transform_2(%arg0: i32) -> (i32, i32) {
    %c0_i32 = arith.constant 0 : i32
    %c0_i32_0 = arith.constant 0 : i32
    %c0_i32_1 = arith.constant 0 : i32
    return %c0_i32, %c0_i32_0 : i32, i32
  }
  func.func @transform_3(%arg0: i32) -> (i32, i32, i32) {
    %c0_i32 = arith.constant 0 : i32
    %c0_i32_0 = arith.constant 0 : i32
    %c0_i32_1 = arith.constant 0 : i32
    %c0_i32_2 = arith.constant 0 : i32
    return %c0_i32, %c0_i32_0, %c0_i32_1 : i32, i32, i32
  }
  func.func @transform_4(%arg0: i32) -> (i32, i32) {
    %c0_i32 = arith.constant 0 : i32
    %c0_i32_0 = arith.constant 0 : i32
    %c0_i32_1 = arith.constant 0 : i32
    return %c0_i32, %c0_i32_0 : i32, i32
  }
  func.func @transform_5(%arg0: i32) -> (i32, i32, i32) {
    %c0_i32 = arith.constant 0 : i32
    %c0_i32_0 = arith.constant 0 : i32
    %c0_i32_1 = arith.constant 0 : i32
    %c0_i32_2 = arith.constant 0 : i32
    return %c0_i32, %c0_i32_0, %c0_i32_1 : i32, i32, i32
  }
  func.func @transform_6(%arg0: i32) -> (i32, i32) {
    %c0_i32 = arith.constant 0 : i32
    %c0_i32_0 = arith.constant 0 : i32
    %c0_i32_1 = arith.constant 0 : i32
    return %c0_i32, %c0_i32_0 : i32, i32
  }
  func.func @transform_7(%arg0: i32) -> (i32, i32, i32) {
    %c0_i32 = arith.constant 0 : i32
    %c0_i32_0 = arith.constant 0 : i32
    %c0_i32_1 = arith.constant 0 : i32
    %c0_i32_2 = arith.constant 0 : i32
    return %c0_i32, %c0_i32_0, %c0_i32_1 : i32, i32, i32
  }
  func.func @transform_8(%arg0: i32) -> (i32, i32) {
    %c0_i32 = arith.constant 0 : i32
    %c0_i32_0 = arith.constant 0 : i32
    %c0_i32_1 = arith.constant 0 : i32
    return %c0_i32, %c0_i32_0 : i32, i32
  }
  func.func @transform_9(%arg0: i32) -> (i32, i32) {
    %c0_i32 = arith.constant 0 : i32
    %c0_i32_0 = arith.constant 0 : i32
    %c0_i32_1 = arith.constant 0 : i32
    return %c0_i32, %c0_i32_0 : i32, i32
  }
  func.func @transform_10(%arg0: i32) -> (i32, i32) {
    %c0_i32 = arith.constant 0 : i32
    %c0_i32_0 = arith.constant 0 : i32
    %c0_i32_1 = arith.constant 0 : i32
    return %c0_i32, %c0_i32_0 : i32, i32
  }
  func.func @transform_11(%arg0: i32) -> (i32, i32, i32) {
    %c0_i32 = arith.constant 0 : i32
    %c0_i32_0 = arith.constant 0 : i32
    %c0_i32_1 = arith.constant 0 : i32
    %c0_i32_2 = arith.constant 0 : i32
    return %c0_i32, %c0_i32_0, %c0_i32_1 : i32, i32, i32
  }
  func.func @transform_12(%arg0: i32) -> (i32, i32, i32) {
    %c0_i32 = arith.constant 0 : i32
    %c0_i32_0 = arith.constant 0 : i32
    %c0_i32_1 = arith.constant 0 : i32
    return %arg0, %c0_i32, %c0_i32_0 : i32, i32, i32
  }
  func.func @transform_13(%arg0: i32) -> (i32, i32, i32) {
    %c0_i32 = arith.constant 0 : i32
    %c0_i32_0 = arith.constant 0 : i32
    %c0_i32_1 = arith.constant 0 : i32
    return %arg0, %c0_i32, %c0_i32_0 : i32, i32, i32
  }
  func.func @transform_14(%arg0: i32) -> (i32, i32, i32) {
    %c0_i32 = arith.constant 0 : i32
    %c0_i32_0 = arith.constant 0 : i32
    %c0_i32_1 = arith.constant 0 : i32
    return %arg0, %c0_i32, %c0_i32_0 : i32, i32, i32
  }
}

</mosaic_0001>

<bundles_post_ra>
// kernel: style_transferer_forward.1
= control target key start
LH: loop header
LB: loop body
LE: loop exit
PB: predicated region body
PF: predicated region fallthrough
CT: control target
= control target key end

     0   :  { %s19726_s29 = smov 0   ;;  %s23860_s0 = inlined_call_operand.vmem [shape: f32[2,16,16,4], index: 0, kind: input, shape index: {}]   ;;  %s23861_s1 = inlined_call_operand.vmem [shape: f32[1,4], index: 1, kind: input, shape index: {}]   ;;  %s23862_s2 = inlined_call_operand.vmem [shape: f32[1,4], index: 2, kind: input, shape index: {}]   ;;  %s23863_s3 = inlined_call_operand.vmem [shape: f32[9,4,8], index: 3, kind: input, shape index: {}]   ;;  %s23864_s4 = inlined_call_operand.vmem [shape: f32[1,8], index: 4, kind: input, shape index: {}]   ;;  %s23865_s5 = inlined_call_operand.vmem [shape: f32[9,8,8], index: 5, kind: input, shape index: {}]   ;;  %s23866_s6 = inlined_call_operand.vmem [shape: f32[1,8], index: 6, kind: input, shape index: {}]   ;;  %s23867_s7 = inlined_call_operand.vmem [shape: f32[9,8,16], index: 7, kind: input, shape index: {}]   ;;  %s23868_s8 = inlined_call_operand.vmem [shape: f32[1,16], index: 8, kind: input, shape index: {}]   ;;  %s23869_s9 = inlined_call_operand.vmem [shape: f32[384,1], index: 9, kind: input, shape index: {}]   ;;  %s23870_s10 = inlined_call_operand.vmem [shape: f32[128,1], index: 10, kind: input, shape index: {}]   ;;  %s23871_s11 = inlined_call_operand.vmem [shape: f32[2,8,16], index: 11, kind: input, shape index: {}]   ;;  %s23872_s12 = inlined_call_operand.vmem [shape: f32[2,384,8], index: 12, kind: output, shape index: {0}]   ;;  %s23873_s13 = inlined_call_operand.vmem [shape: f32[2,384,8], index: 13, kind: output, shape index: {1}]   ;;  %s23874_s14 = inlined_call_operand.vmem [shape: f32[2,128,16], index: 14, kind: output, shape index: {2}]  }
   0x1 LB: > { %s14796_s30 = sadd.s32 4294967295, %s19645_s29   ;;  %p14800_p0 = scmp.ge.s32.totalorder %s19645_s29, 1  ;;  %s19645_s29 = sphi %s19726_s29, %s25_s29  }
   0x2   : > { %p417_p1 = scmp.lt.s32.totalorder %s19645_s29, 3 }
   0x4   : > { %p418_p2 = pnand %p14800_p0, %p417_p1 }
   0x6   : > { %421 = sbr.rel (%p418_p2) target bundleno = 2677 (0xa75), region = 68 }
   0xd   : > { %v19737_v0 = vld [vmem:[%s23863_s3] sm:$0xf]  ;;  %vm1152_vm0 = vcmask 1043456   ;;  %vm493_vm1 = vcmask 31744   ;;  %p19741_p3 = scmp.lt.s32.totalorder %s14796_s30, 1  ;;  %v23875_v1 = vmov 0.0  }
   0xe   : > { %17061 = vmatprep.subr.msk.mxu0 %vm1152_vm0, %v19737_v0  ;;  %494 = vst.msk [vmem:[#allocation2] sm:$0xff] %vm493_vm1, %v23875_v1  ;;  %495 = vst.msk [vmem:[#allocation2 + $0x8] sm:$0xff] %vm493_vm1, %v23875_v1  ;;  %v14939_v2 = vld [vmem:[%s23863_s3 + $0x8] sm:$0xf]  ;;  %v19875_v3 = vld [vmem:[%s23861_s1] ss:$0 sm:$0xff] }
   0xf   : > { %496 = vst.msk [vmem:[#allocation2 + $0x10] sm:$0xff] %vm493_vm1, %v23875_v1  ;;  %497 = vst.msk [vmem:[#allocation2 + $0x18] sm:$0xff] %vm493_vm1, %v23875_v1  ;;  %17062 = vmatpush3.msk.msra.mxu0 %vm1152_vm0, %v19737_v0  ;;  %s24456_s30 = smov (!%p19741_p3, %s14796_s30), 1  ;;  %v19885_v4 = vld [vmem:[%s23862_s2] ss:$0 sm:$0xff]  ;;  %vm550_vm2 = vcmask 64512  }
  0x10   : > { %498 = vst.msk [vmem:[#allocation2 + $0x20] sm:$0xff] %vm493_vm1, %v23875_v1  ;;  %499 = vst.msk [vmem:[#allocation2 + $0x28] sm:$0xff] %vm493_vm1, %v23875_v1  ;;  %17135 = vmatprep.subr.msk.mxu0 %vm1152_vm0, %v14939_v2  ;;  %s15902_s20 = sshll.u32 %s24456_s30, 8  ;;  %v19902_v20 = vld [vmem:[%s23863_s3 + $0xc] sm:$0xf]  ;;  %s19611_s24 = smul.u32 384, %s24456_s30 }
  0x11   : > { %500 = vst.msk [vmem:[#allocation2 + $0x30] sm:$0xff] %vm493_vm1, %v23875_v1  ;;  %501 = vst.msk [vmem:[#allocation2 + $0x38] sm:$0xff] %vm493_vm1, %v23875_v1  ;;  %s19880_s25 = scalar_lea.vmem %s23860_s0, %s15902_s20  ;;  %vm19650_vm3 = vmmov 0   ;;  %vm11329_vm4 = vcmask 130048   ;;  %s15903_s16 = sshll.u32 %s24456_s30, 7 }
  0x12   : > { %502 = vst.msk [vmem:[#allocation2 + $0x40] sm:$0xff] %vm493_vm1, %v23875_v1  ;;  %503 = vst.msk [vmem:[#allocation2 + $0x48] sm:$0xff] %vm493_vm1, %v23875_v1  ;;  %v754_v5 = vld [vmem:[%s19880_s25] sm:$0xff]  ;;  %v755_v6 = vld [vmem:[%s19880_s25 + $0x8] sm:$0xff]  ;;  %s21668_s27 = scalar_lea.vmem %s23872_s12, %s19611_s24  ;;  %s23103_s19 = scalar_lea.vmem %s23873_s13, %s19611_s24 }
  0x13   : > { %504 = vst.msk [vmem:[#allocation2 + $0x50] sm:$0xff] %vm493_vm1, %v23875_v1  ;;  %505 = vst.msk [vmem:[#allocation2 + $0x58] sm:$0xff] %vm493_vm1, %v23875_v1  ;;  %v14810_v7 = vld [vmem:[%s19880_s25 + $0x10] sm:$0xff]  ;;  %v762_v8 = vsub.f32 %v754_v5, %v19875_v3  ;;  %v763_v9 = vsub.f32 %v755_v6, %v19875_v3  ;;  %v14811_v11 = vld [vmem:[%s19880_s25 + $0x18] sm:$0xff] }
  0x14   : > { %506 = vst.msk [vmem:[#allocation2 + $0x60] sm:$0xff] %vm493_vm1, %v23875_v1  ;;  %507 = vst.msk [vmem:[#allocation2 + $0x68] sm:$0xff] %vm493_vm1, %v23875_v1  ;;  %v777_v10 = vsub.f32 %v14810_v7, %v19875_v3  ;;  %v14812_v12 = vld [vmem:[%s19880_s25 + $0x20] sm:$0xff]  ;;  %v14813_v13 = vld [vmem:[%s19880_s25 + $0x28] sm:$0xff]  ;;  %v778_v17 = vsub.f32 %v14811_v11, %v19875_v3 }
  0x15   : > { %508 = vst.msk [vmem:[#allocation2 + $0x70] sm:$0xff] %vm493_vm1, %v23875_v1  ;;  %509 = vst.msk [vmem:[#allocation2 + $0x78] sm:$0xff] %vm493_vm1, %v23875_v1  ;;  %v909_v14 = vld [vmem:[#allocation2 + $0x7] sm:$0xff]  ;;  %v786_v18 = vsub.f32 %v14812_v12, %v19875_v3  ;;  %v787_v19 = vsub.f32 %v14813_v13, %v19875_v3  ;;  %v770_v21 = vmul.f32 %v19885_v4, %v762_v8  ;;  %v14814_v24 = vld [vmem:[%s19880_s25 + $0x30] sm:$0xff] }
  0x16   : > { %510 = vst.msk [vmem:[#allocation2 + $0x80] sm:$0xff] %vm493_vm1, %v23875_v1  ;;  %511 = vst.msk [vmem:[#allocation2 + $0x88] sm:$0xff] %vm493_vm1, %v23875_v1  ;;  %v910_v15 = vld [vmem:[#allocation2 + $0xf] sm:$0xff]  ;;  %v911_v16 = vld [vmem:[#allocation2 + $0x17] sm:$0xff]  ;;  %17063 = vmatprep.mubr.msk.f32.mxu0 %vm493_vm1, %v909_v14  ;;  %v771_v22 = vmul.f32 %v19885_v4, %v763_v9  ;;  %v779_v23 = vmul.f32 %v19885_v4, %v777_v10  ;;  %v780_v27 = vmul.f32 %v19885_v4, %v778_v17 }
  0x17   : > { %512 = vst.msk [vmem:[#allocation2 + $0x90] sm:$0xff] %vm493_vm1, %v23875_v1  ;;  %513 = vst.msk [vmem:[#allocation2 + $0x98] sm:$0xff] %vm493_vm1, %v23875_v1  ;;  %v14815_v25 = vld [vmem:[%s19880_s25 + $0x38] sm:$0xff]  ;;  %v14816_v26 = vld [vmem:[%s19880_s25 + $0x40] sm:$0xff]  ;;  %17064 = vmatmul.mubr.msk.f32.vlgmr.msra.gmra.mrb[0].mxu0 %vm493_vm1, %v910_v15  ;;  %v788_v28 = vmul.f32 %v19885_v4, %v786_v18  ;;  %v789_v29 = vmul.f32 %v19885_v4, %v787_v19  ;;  %v795_v30 = vsub.f32 %v14814_v24, %v19875_v3 }
  0x18   : > { %514 = vst.msk [vmem:[#allocation2 + $0xa0] sm:$0xff] %vm493_vm1, %v23875_v1  ;;  %515 = vst.msk [vmem:[#allocation2 + $0xa8] sm:$0xff] %vm493_vm1, %v23875_v1  ;;  %v14817_v31 = vld [vmem:[%s19880_s25 + $0x48] sm:$0xff]  ;;  %v14818_v32 = vld [vmem:[%s19880_s25 + $0x50] sm:$0xff]  ;;  %17066 = vmatprep.mubr.msk.f32.mxu0 %vm493_vm1, %v911_v16  ;;  %v796_v34 = vsub.f32 %v14815_v25, %v19875_v3  ;;  %v804_v35 = vsub.f32 %v14816_v26, %v19875_v3  ;;  %17136 = vmatpush3.msk.msra.mxu0 %vm1152_vm0, %v14939_v2 }
  0x19   : > { %516 = vst.msk [vmem:[#allocation2 + $0xb0] sm:$0xff] %vm493_vm1, %v23875_v1  ;;  %517 = vst.msk [vmem:[#allocation2 + $0xb8] sm:$0xff] %vm493_vm1, %v23875_v1  ;;  %v14819_v33 = vld [vmem:[%s19880_s25 + $0x58] sm:$0xff]  ;;  %v805_v36 = vsub.f32 %v14817_v31, %v19875_v3  ;;  %v813_v37 = vsub.f32 %v14818_v32, %v19875_v3  ;;  %v14820_v38 = vld [vmem:[%s19880_s25 + $0x60] sm:$0xff]  ;;  %v797_v40 = vmul.f32 %v19885_v4, %v795_v30  ;;  %17209 = vmatprep.subr.msk.mxu0 %vm1152_vm0, %v19902_v20 }
  0x1a   : > { %518 = vst.msk [vmem:[#allocation2 + $0xc0] sm:$0xff] %vm493_vm1, %v23875_v1  ;;  %519 = vst.msk [vmem:[#allocation2 + $0xc8] sm:$0xff] %vm493_vm1, %v23875_v1  ;;  %v14821_v39 = vld [vmem:[%s19880_s25 + $0x68] sm:$0xff]  ;;  %v814_v41 = vsub.f32 %v14819_v33, %v19875_v3  ;;  %v822_v42 = vsub.f32 %v14820_v38, %v19875_v3  ;;  %v14822_v44 = vld [vmem:[%s19880_s25 + $0x70] sm:$0xff]  ;;  %v798_v46 = vmul.f32 %v19885_v4, %v796_v34 }
  0x1b   : > { %520 = vst.msk [vmem:[#allocation2 + $0xd0] sm:$0xff] %vm493_vm1, %v23875_v1  ;;  %521 = vst.msk [vmem:[#allocation2 + $0xd8] sm:$0xff] %vm493_vm1, %v23875_v1  ;;  %v823_v43 = vsub.f32 %v14821_v39, %v19875_v3  ;;  %v14823_v45 = vld [vmem:[%s19880_s25 + $0x78] sm:$0xff]  ;;  %v806_v47 = vmul.f32 %v19885_v4, %v804_v35  ;;  %v807_v48 = vmul.f32 %v19885_v4, %v805_v36  ;;  %v14824_v50 = vld [vmem:[%s19880_s25 + $0x80] sm:$0xff] }
  0x1c   : > { %522 = vst.msk [vmem:[#allocation2 + $0xe0] sm:$0xff] %vm493_vm1, %v23875_v1  ;;  %523 = vst.msk [vmem:[#allocation2 + $0xe8] sm:$0xff] %vm493_vm1, %v23875_v1  ;;  %v815_v49 = vmul.f32 %v19885_v4, %v813_v37  ;;  %v14825_v51 = vld [vmem:[%s19880_s25 + $0x88] sm:$0xff]  ;;  %v14826_v52 = vld [vmem:[%s19880_s25 + $0x90] sm:$0xff]  ;;  %v816_v53 = vmul.f32 %v19885_v4, %v814_v41  ;;  %v824_v54 = vmul.f32 %v19885_v4, %v822_v42 }
  0x1d   : > { %524 = vst.msk [vmem:[#allocation2 + $0xf0] sm:$0xff] %vm493_vm1, %v23875_v1  ;;  %525 = vst.msk [vmem:[#allocation2 + $0xf8] sm:$0xff] %vm493_vm1, %v23875_v1  ;;  %v825_v55 = vmul.f32 %v19885_v4, %v823_v43  ;;  %v831_v56 = vsub.f32 %v14822_v44, %v19875_v3  ;;  %v14827_v57 = vld [vmem:[%s19880_s25 + $0x98] sm:$0xff]  ;;  %v14828_v58 = vld [vmem:[%s19880_s25 + $0xa0] sm:$0xff]  ;;  %v832_v60 = vsub.f32 %v14823_v45, %v19875_v3 }
  0x1e   : > { %526 = vst.msk [vmem:[#allocation2 + $0x100] sm:$0xff] %vm493_vm1, %v23875_v1  ;;  %527 = vst.msk [vmem:[#allocation2 + $0x108] sm:$0xff] %vm493_vm1, %v23875_v1  ;;  %v14829_v59 = vld [vmem:[%s19880_s25 + $0xa8] sm:$0xff]  ;;  %v840_v61 = vsub.f32 %v14824_v50, %v19875_v3  ;;  %v841_v62 = vsub.f32 %v14825_v51, %v19875_v3  ;;  %v849_v63 = vsub.f32 %v14826_v52, %v19875_v3  ;;  %v14830_v0 = vld [vmem:[%s19880_s25 + $0xb0] sm:$0xff] }
  0x1f   : > { %528 = vst.msk [vmem:[#allocation2 + $0x110] sm:$0xff] %vm493_vm1, %v23875_v1  ;;  %529 = vst.msk [vmem:[#allocation2 + $0x118] sm:$0xff] %vm493_vm1, %v23875_v1  ;;  %v14831_v2 = vld [vmem:[%s19880_s25 + $0xb8] sm:$0xff]  ;;  %v833_v5 = vmul.f32 %v19885_v4, %v831_v56  ;;  %v850_v6 = vsub.f32 %v14827_v57, %v19875_v3  ;;  %v858_v7 = vsub.f32 %v14828_v58, %v19875_v3  ;;  %v14832_v9 = vld [vmem:[%s19880_s25 + $0xc0] sm:$0xff] }
  0x20   : > { %530 = vst.msk [vmem:[#allocation2 + $0x120] sm:$0xff] %vm493_vm1, %v23875_v1  ;;  %531 = vst.msk [vmem:[#allocation2 + $0x128] sm:$0xff] %vm493_vm1, %v23875_v1  ;;  %v859_v8 = vsub.f32 %v14829_v59, %v19875_v3  ;;  %v14833_v10 = vld [vmem:[%s19880_s25 + $0xc8] sm:$0xff]  ;;  %v14834_v11 = vld [vmem:[%s19880_s25 + $0xd0] sm:$0xff]  ;;  %v834_v12 = vmul.f32 %v19885_v4, %v832_v60  ;;  %v842_v13 = vmul.f32 %v19885_v4, %v840_v61 }
  0x21   : > { %532 = vst.msk [vmem:[#allocation2 + $0x130] sm:$0xff] %vm493_vm1, %v23875_v1  ;;  %533 = vst.msk [vmem:[#allocation2 + $0x138] sm:$0xff] %vm493_vm1, %v23875_v1  ;;  %v843_v14 = vmul.f32 %v19885_v4, %v841_v62  ;;  %v851_v15 = vmul.f32 %v19885_v4, %v849_v63  ;;  %v14835_v16 = vld [vmem:[%s19880_s25 + $0xd8] sm:$0xff]  ;;  %v14836_v17 = vld [vmem:[%s19880_s25 + $0xe0] sm:$0xff]  ;;  %v867_v25 = vsub.f32 %v14830_v0, %v19875_v3 }
  0x22   : > { %534 = vst.msk [vmem:[#allocation2 + $0x140] sm:$0xff] %vm493_vm1, %v23875_v1  ;;  %535 = vst.msk [vmem:[#allocation2 + $0x148] sm:$0xff] %vm493_vm1, %v23875_v1  ;;  %v14837_v18 = vld [vmem:[%s19880_s25 + $0xe8] sm:$0xff]  ;;  %v861_v24 = vmul.f32 %v19885_v4, %v859_v8  ;;  %v868_v26 = vsub.f32 %v14831_v2, %v19875_v3  ;;  %v14838_v30 = vld [vmem:[%s19880_s25 + $0xf0] sm:$0xff]  ;;  %v886_v33 = vsub.f32 %v14835_v16, %v19875_v3 }
  0x23   : > { %536 = vst.msk [vmem:[#allocation2 + $0x150] sm:$0xff] %vm493_vm1, %v23875_v1  ;;  %537 = vst.msk [vmem:[#allocation2 + $0x158] sm:$0xff] %vm493_vm1, %v23875_v1  ;;  %v869_v32 = vmul.f32 %v19885_v4, %v867_v25  ;;  %v894_v34 = vsub.f32 %v14836_v17, %v19875_v3  ;;  %v895_v35 = vsub.f32 %v14837_v18, %v19875_v3  ;;  %v1913_v63 = vld [vmem:[#allocation2 + $0x9] sm:$0xff]  ;;  %v1914_v0 = vld [vmem:[#allocation2 + $0x11] sm:$0xff] }
  0x24   : > { %538 = vst.msk [vmem:[#allocation2 + $0x160] sm:$0xff] %vm493_vm1, %v23875_v1  ;;  %539 = vst.msk [vmem:[#allocation2 + $0x168] sm:$0xff] %vm493_vm1, %v23875_v1  ;;  %v870_v37 = vmul.f32 %v19885_v4, %v868_v26  ;;  %v888_v41 = vmul.f32 %v19885_v4, %v886_v33  ;;  %v903_v44 = vsub.f32 %v14838_v30, %v19875_v3  ;;  %v14839_v33 = vld [vmem:[%s19880_s25 + $0xf8] sm:$0xff] }
  0x25   : > { %540 = vst.msk [vmem:[#allocation2 + $0x170] sm:$0xff] %vm493_vm1, %v23875_v1  ;;  %541 = vst.msk [vmem:[#allocation2 + $0x178] sm:$0xff] %vm493_vm1, %v23875_v1  ;;  %v896_v42 = vmul.f32 %v19885_v4, %v894_v34  ;;  %v897_v43 = vmul.f32 %v19885_v4, %v895_v35  ;;  %v904_v34 = vsub.f32 %v14839_v33, %v19875_v3 }
  0x26   : > { %542 = vst.msk [vmem:[#allocation2 + $0x180] sm:$0xff] %vm493_vm1, %v23875_v1  ;;  %543 = vst.msk [vmem:[#allocation2 + $0x188] sm:$0xff] %vm493_vm1, %v23875_v1 }
  0x27   : > { %544 = vst.msk [vmem:[#allocation2 + $0x190] sm:$0xff] %vm493_vm1, %v23875_v1  ;;  %545 = vst.msk [vmem:[#allocation2 + $0x198] sm:$0xff] %vm493_vm1, %v23875_v1 }
  0x28   : > { %546 = vst.msk [vmem:[#allocation2 + $0x1a0] sm:$0xff] %vm493_vm1, %v23875_v1  ;;  %547 = vst.msk [vmem:[#allocation2 + $0x1a8] sm:$0xff] %vm493_vm1, %v23875_v1 }
  0x29   : > { %548 = vst.msk [vmem:[#allocation2 + $0x1b0] sm:$0xff] %vm493_vm1, %v23875_v1  ;;  %549 = vst.msk [vmem:[#allocation2 + $0x1b8] sm:$0xff] %vm493_vm1, %v23875_v1 }
  0x2a   : > { %772 = vst.msk [vmem:[#allocation2 + $0x20] sm:$0xff] %vm493_vm1, %v770_v21  ;;  %773 = vst.msk [vmem:[#allocation2 + $0x28] sm:$0xff] %vm493_vm1, %v771_v22  ;;  %v852_v22 = vmul.f32 %v19885_v4, %v850_v6 }
  0x2b   : > { %781 = vst.msk [vmem:[#allocation2 + $0x38] sm:$0xff] %vm493_vm1, %v779_v23  ;;  %782 = vst.msk [vmem:[#allocation2 + $0x40] sm:$0xff] %vm493_vm1, %v780_v27  ;;  %v860_v23 = vmul.f32 %v19885_v4, %v858_v7  ;;  %v876_v27 = vsub.f32 %v14832_v9, %v19875_v3 }
  0x2c   : > { %790 = vst.msk [vmem:[#allocation2 + $0x50] sm:$0xff] %vm493_vm1, %v788_v28  ;;  %791 = vst.msk [vmem:[#allocation2 + $0x58] sm:$0xff] %vm493_vm1, %v789_v29  ;;  %v877_v28 = vsub.f32 %v14833_v10, %v19875_v3  ;;  %v885_v29 = vsub.f32 %v14834_v11, %v19875_v3  ;;  %v20136_v10 = vld [vmem:[%s23863_s3 + $0x10] sm:$0xf] }
  0x2d   : > { %799 = vst.msk [vmem:[#allocation2 + $0x68] sm:$0xff] %vm493_vm1, %v797_v40  ;;  %800 = vst.msk [vmem:[#allocation2 + $0x70] sm:$0xff] %vm493_vm1, %v798_v46  ;;  %v878_v38 = vmul.f32 %v19885_v4, %v876_v27  ;;  %v905_v46 = vmul.f32 %v19885_v4, %v903_v44 }
  0x2e   : > { %808 = vst.msk [vmem:[#allocation2 + $0x80] sm:$0xff] %vm493_vm1, %v806_v47  ;;  %809 = vst.msk [vmem:[#allocation2 + $0x88] sm:$0xff] %vm493_vm1, %v807_v48  ;;  %v879_v39 = vmul.f32 %v19885_v4, %v877_v28  ;;  %v887_v40 = vmul.f32 %v19885_v4, %v885_v29 }
  0x2f   : > { %817 = vst.msk [vmem:[#allocation2 + $0x98] sm:$0xff] %vm493_vm1, %v815_v49  ;;  %818 = vst.msk [vmem:[#allocation2 + $0xa0] sm:$0xff] %vm493_vm1, %v816_v53 }
  0x30   : > { %826 = vst.msk [vmem:[#allocation2 + $0xb0] sm:$0xff] %vm493_vm1, %v824_v54  ;;  %827 = vst.msk [vmem:[#allocation2 + $0xb8] sm:$0xff] %vm493_vm1, %v825_v55 }
  0x31   : > { %v19983_v19 = vld [vmem:[#allocation2 + $0x1f] sm:$0xff]  ;;  %v19985_v21 = vld [vmem:[#allocation2 + $0x27] sm:$0xff]  ;;  %835 = vst.msk [vmem:[#allocation2 + $0xc8] sm:$0xff] %vm493_vm1, %v833_v5  ;;  %836 = vst.msk [vmem:[#allocation2 + $0xd0] sm:$0xff] %vm493_vm1, %v834_v12 }
  0x32   : > { %17067 = vmatmul.mubr.msk.f32.gmra.mrb[2].mxu0 %vm493_vm1, %v19983_v19  ;;  %844 = vst.msk [vmem:[#allocation2 + $0xe0] sm:$0xff] %vm493_vm1, %v842_v13  ;;  %845 = vst.msk [vmem:[#allocation2 + $0xe8] sm:$0xff] %vm493_vm1, %v843_v14  ;;  %v20005_v31 = vld [vmem:[#allocation2 + $0x2f] sm:$0xff]  ;;  %v20014_v36 = vld [vmem:[#allocation2 + $0x37] sm:$0xff] }
  0x33   : > { %853 = vst.msk [vmem:[#allocation2 + $0xf8] sm:$0xff] %vm493_vm1, %v851_v15  ;;  %17069 = vmatprep.mubr.msk.f32.mxu0 %vm493_vm1, %v19985_v21  ;;  %854 = vst.msk [vmem:[#allocation2 + $0x100] sm:$0xff] %vm493_vm1, %v852_v22  ;;  %v20033_v45 = vld [vmem:[#allocation2 + $0x3f] sm:$0xff]  ;;  %v20039_v47 = vld [vmem:[#allocation2 + $0x47] sm:$0xff] }
  0x34   : > { %862 = vst.msk [vmem:[#allocation2 + $0x110] sm:$0xff] %vm493_vm1, %v860_v23  ;;  %863 = vst.msk [vmem:[#allocation2 + $0x118] sm:$0xff] %vm493_vm1, %v861_v24  ;;  %v20046_v48 = vld [vmem:[#allocation2 + $0x4f] sm:$0xff]  ;;  %v20048_v49 = vld [vmem:[#allocation2 + $0x57] sm:$0xff] }
  0x35   : > { %871 = vst.msk [vmem:[#allocation2 + $0x128] sm:$0xff] %vm493_vm1, %v869_v32  ;;  %872 = vst.msk [vmem:[#allocation2 + $0x130] sm:$0xff] %vm493_vm1, %v870_v37  ;;  %v20054_v50 = vld [vmem:[#allocation2 + $0x5f] sm:$0xff]  ;;  %v20056_v51 = vld [vmem:[#allocation2 + $0x67] sm:$0xff]  ;;  %v906_v37 = vmul.f32 %v19885_v4, %v904_v34 }
  0x36   : > { %17070 = vmatmul.mubr.msk.f32.gmra.mrb[4].mxu0 %vm493_vm1, %v20005_v31  ;;  %880 = vst.msk [vmem:[#allocation2 + $0x140] sm:$0xff] %vm493_vm1, %v878_v38  ;;  %881 = vst.msk [vmem:[#allocation2 + $0x148] sm:$0xff] %vm493_vm1, %v879_v39  ;;  %v20062_v52 = vld [vmem:[#allocation2 + $0x6f] sm:$0xff]  ;;  %v20064_v53 = vld [vmem:[#allocation2 + $0x77] sm:$0xff] }
  0x37   : > { %889 = vst.msk [vmem:[#allocation2 + $0x158] sm:$0xff] %vm493_vm1, %v887_v40  ;;  %17072 = vmatprep.mubr.msk.f32.mxu0 %vm493_vm1, %v20014_v36  ;;  %890 = vst.msk [vmem:[#allocation2 + $0x160] sm:$0xff] %vm493_vm1, %v888_v41  ;;  %v20070_v54 = vld [vmem:[#allocation2 + $0x7f] sm:$0xff]  ;;  %v20072_v55 = vld [vmem:[#allocation2 + $0x87] sm:$0xff] }
  0x38   : > { %898 = vst.msk [vmem:[#allocation2 + $0x170] sm:$0xff] %vm493_vm1, %v896_v42  ;;  %899 = vst.msk [vmem:[#allocation2 + $0x178] sm:$0xff] %vm493_vm1, %v897_v43  ;;  %v20078_v56 = vld [vmem:[#allocation2 + $0x8f] sm:$0xff]  ;;  %v20080_v57 = vld [vmem:[#allocation2 + $0x97] sm:$0xff] }
  0x39   : > { %907 = vst.msk [vmem:[#allocation2 + $0x188] sm:$0xff] %vm493_vm1, %v905_v46  ;;  %v20086_v58 = vld [vmem:[#allocation2 + $0x9f] sm:$0xff]  ;;  %v20088_v59 = vld [vmem:[#allocation2 + $0xa7] sm:$0xff]  ;;  %v20094_v60 = vld [vmem:[#allocation2 + $0xaf] sm:$0xff] }
  0x3a   : > { %17073 = vmatmul.mubr.msk.f32.gmra.mrb[6].mxu0 %vm493_vm1, %v20033_v45  ;;  %24077 = vst [vmem:[#allocation6_spill] sm:$0xff] %v20094_v60  ;;  %v20096_v61 = vld [vmem:[#allocation2 + $0xb7] sm:$0xff]  ;;  %v20102_v62 = vld [vmem:[#allocation2 + $0xbf] sm:$0xff]  ;;  %v20113_v6 = vld [vmem:[#allocation2 + $0x29] sm:$0xff] }
  0x3b   : > { %17075 = vmatprep.mubr.msk.f32.mxu0 %vm493_vm1, %v20039_v47  ;;  %24078 = vst [vmem:[#allocation7_spill] sm:$0xff] %v20096_v61  ;;  %24079 = vst [vmem:[#allocation8_spill] sm:$0xff] %v20102_v62  ;;  %v1915_v2 = vld [vmem:[#allocation2 + $0x19] sm:$0xff]  ;;  %v20109_v5 = vld [vmem:[#allocation2 + $0x21] sm:$0xff] }
  0x3c   : > { %v20119_v7 = vld [vmem:[#allocation2 + $0x31] sm:$0xff]  ;;  %v20121_v8 = vld [vmem:[#allocation2 + $0x39] sm:$0xff]  ;;  %v20127_v9 = vld [vmem:[#allocation2 + $0x41] sm:$0xff]  ;;  %908 = vst.msk [vmem:[#allocation2 + $0x190] sm:$0xff] %vm493_vm1, %v906_v37 }
  0x3d   : > { %v20140_v11 = vld [vmem:[#allocation2 + $0x51] sm:$0xff]  ;;  %v20144_v12 = vld [vmem:[#allocation2 + $0x59] sm:$0xff]  ;;  %v20150_v13 = vld [vmem:[#allocation2 + $0x61] sm:$0xff] }
  0x3e   : > { %17076 = vmatmul.mubr.msk.f32.gmra.mrb[8].mxu0 %vm493_vm1, %v20046_v48  ;;  %v20152_v14 = vld [vmem:[#allocation2 + $0x69] sm:$0xff]  ;;  %v20158_v15 = vld [vmem:[#allocation2 + $0x71] sm:$0xff]  ;;  %v20160_v16 = vld [vmem:[#allocation2 + $0x79] sm:$0xff] }
  0x3f   : > { %17078 = vmatprep.mubr.msk.f32.mxu0 %vm493_vm1, %v20048_v49  ;;  %v20166_v17 = vld [vmem:[#allocation2 + $0x81] sm:$0xff]  ;;  %v20168_v18 = vld [vmem:[#allocation2 + $0x89] sm:$0xff]  ;;  %v20174_v22 = vld [vmem:[#allocation2 + $0x91] sm:$0xff] }
  0x40   : > { %v20176_v23 = vld [vmem:[#allocation2 + $0x99] sm:$0xff]  ;;  %v20182_v24 = vld [vmem:[#allocation2 + $0xa1] sm:$0xff]  ;;  %v20184_v25 = vld [vmem:[#allocation2 + $0xa9] sm:$0xff] }
  0x41   : > { %v20190_v26 = vld [vmem:[#allocation2 + $0xb1] sm:$0xff]  ;;  %v20192_v27 = vld [vmem:[#allocation2 + $0xb9] sm:$0xff]  ;;  %v20198_v28 = vld [vmem:[#allocation2 + $0xc1] sm:$0xff] }
  0x42   : > { %17079 = vmatmul.mubr.msk.f32.gmra.mrb[10].mxu0 %vm493_vm1, %v20054_v50  ;;  %v20200_v29 = vld [vmem:[#allocation2 + $0xc9] sm:$0xff]  ;;  %v20206_v30 = vld [vmem:[#allocation2 + $0xd1] sm:$0xff]  ;;  %v20208_v32 = vld [vmem:[#allocation2 + $0xd9] sm:$0xff] }
  0x43   : > { %17081 = vmatprep.mubr.msk.f32.mxu0 %vm493_vm1, %v20056_v51  ;;  %v20216_v35 = vld [vmem:[#allocation2 + $0xe1] sm:$0xff]  ;;  %v20219_v38 = vld [vmem:[#allocation2 + $0xe9] sm:$0xff]  ;;  %v20226_v3 = vld [vmem:[#allocation2 + $0xf1] sm:$0xff] }
  0x44   : > { %v20228_v39 = vld [vmem:[#allocation2 + $0xf9] sm:$0xff]  ;;  %v20234_v4 = vld [vmem:[#allocation2 + $0x101] sm:$0xff]  ;;  %v20236_v40 = vld [vmem:[#allocation2 + $0x109] sm:$0xff] }
  0x45   : > { %v20242_v41 = vld [vmem:[#allocation2 + $0x111] sm:$0xff]  ;;  %v20244_v42 = vld [vmem:[#allocation2 + $0x119] sm:$0xff]  ;;  %v20250_v43 = vld [vmem:[#allocation2 + $0x121] sm:$0xff] }
  0x46   : > { %17082 = vmatmul.mubr.msk.f32.gmra.mrb[12].mxu0 %vm493_vm1, %v20062_v52  ;;  %v20252_v44 = vld [vmem:[#allocation2 + $0x129] sm:$0xff]  ;;  %v20258_v46 = vld [vmem:[#allocation2 + $0x131] sm:$0xff]  ;;  %v20276_v34 = vld [vmem:[#allocation2 + $0x159] sm:$0xff] }
  0x47   : > { %17084 = vmatprep.mubr.msk.f32.mxu0 %vm493_vm1, %v20064_v53  ;;  %v20274_v33 = vld [vmem:[#allocation2 + $0x151] sm:$0xff]  ;;  %24082 = vst [vmem:[#allocation11_spill] sm:$0xff] %v20276_v34  ;;  %v20282_v37 = vld [vmem:[#allocation2 + $0x161] sm:$0xff]  ;;  %v20284_v1 = vld [vmem:[#allocation2 + $0x169] sm:$0xff] }
  0x4a   : > { %17085 = vmatmul.mubr.msk.f32.gmra.mrb[14].mxu0 %vm493_vm1, %v20070_v54 }
  0x4b   : > { %17087 = vmatprep.mubr.msk.f32.mxu0 %vm493_vm1, %v20072_v55 }
  0x4e   : > { %17088 = vmatmul.mubr.msk.f32.gmra.mrb[16].mxu0 %vm493_vm1, %v20078_v56 }
  0x4f   : > { %17090 = vmatprep.mubr.msk.f32.mxu0 %vm493_vm1, %v20080_v57 }
  0x52   : > { %17091 = vmatmul.mubr.msk.f32.gmra.mrb[18].mxu0 %vm493_vm1, %v20086_v58 }
  0x53   : > { %17093 = vmatprep.mubr.msk.f32.mxu0 %vm493_vm1, %v20088_v59 }
  0x56   : > { %17094 = vmatmul.mubr.msk.f32.gmra.mrb[20].mxu0 %vm493_vm1, %v20094_v60 }
  0x57   : > { %17096 = vmatprep.mubr.msk.f32.mxu0 %vm493_vm1, %v20096_v61 }
  0x5a   : > { %17097 = vmatmul.mubr.msk.f32.gmra.mrb[22].mxu0 %vm493_vm1, %v20102_v62 }
  0x5b   : > { %17137 = vmatprep.mubr.msk.f32.mxu0 %vm493_vm1, %v1913_v63  ;;  %v20260_v63 = vld [vmem:[#allocation2 + $0x139] sm:$0xff] }
  0x5e   : > { %17138 = vmatmul.mubr.msk.f32.vlgmr.msra.gmra.mrb[0].mxu0 %vm493_vm1, %v1914_v0  ;;  %v20266_v0 = vld [vmem:[#allocation2 + $0x141] sm:$0xff] }
  0x5f   : > { %17140 = vmatprep.mubr.msk.f32.mxu0 %vm493_vm1, %v1915_v2  ;;  %17210 = vmatpush3.msk.msra.mxu0 %vm1152_vm0, %v19902_v20  ;;  %v20129_v20 = vld [vmem:[#allocation2 + $0x49] sm:$0xff]  ;;  %24080 = vst [vmem:[#allocation9_spill] sm:$0xff] %v20266_v0 }
  0x60   : > { %17283 = vmatprep.subr.msk.mxu0 %vm1152_vm0, %v20136_v10  ;;  %v20268_v2 = vld [vmem:[#allocation2 + $0x149] sm:$0xff] }
  0x61   : > { %24081 = vst [vmem:[#allocation10_spill] sm:$0xff] %v20268_v2 }
  0x62   : > { %17141 = vmatmul.mubr.msk.f32.gmra.mrb[2].mxu0 %vm493_vm1, %v20109_v5 }
  0x63   : > { %17143 = vmatprep.mubr.msk.f32.mxu0 %vm493_vm1, %v20113_v6 }
  0x66   : > { %17144 = vmatmul.mubr.msk.f32.gmra.mrb[4].mxu0 %vm493_vm1, %v20119_v7 }
  0x67   : > { %17146 = vmatprep.mubr.msk.f32.mxu0 %vm493_vm1, %v20121_v8 }
  0x6a   : > { %17147 = vmatmul.mubr.msk.f32.gmra.mrb[6].mxu0 %vm493_vm1, %v20127_v9 }
  0x6b   : > { %17149 = vmatprep.mubr.msk.f32.mxu0 %vm493_vm1, %v20129_v20 }
  0x6e   : > { %17150 = vmatmul.mubr.msk.f32.gmra.mrb[8].mxu0 %vm493_vm1, %v20140_v11 }
  0x6f   : > { %17152 = vmatprep.mubr.msk.f32.mxu0 %vm493_vm1, %v20144_v12 }
  0x72   : > { %17153 = vmatmul.mubr.msk.f32.gmra.mrb[10].mxu0 %vm493_vm1, %v20150_v13 }
  0x73   : > { %17155 = vmatprep.mubr.msk.f32.mxu0 %vm493_vm1, %v20152_v14 }
  0x76   : > { %17156 = vmatmul.mubr.msk.f32.gmra.mrb[12].mxu0 %vm493_vm1, %v20158_v15 }
  0x77   : > { %17158 = vmatprep.mubr.msk.f32.mxu0 %vm493_vm1, %v20160_v16 }
  0x7a   : > { %17159 = vmatmul.mubr.msk.f32.gmra.mrb[14].mxu0 %vm493_vm1, %v20166_v17 }
  0x7b   : > { %17161 = vmatprep.mubr.msk.f32.mxu0 %vm493_vm1, %v20168_v18 }
  0x7e   : > { %17162 = vmatmul.mubr.msk.f32.gmra.mrb[16].mxu0 %vm493_vm1, %v20174_v22 }
  0x7f   : > { %17164 = vmatprep.mubr.msk.f32.mxu0 %vm493_vm1, %v20176_v23 }
  0x82   : > { %17165 = vmatmul.mubr.msk.f32.gmra.mrb[18].mxu0 %vm493_vm1, %v20182_v24 }
  0x83   : > { %17167 = vmatprep.mubr.msk.f32.mxu0 %vm493_vm1, %v20184_v25 }
  0x86   : > { %17168 = vmatmul.mubr.msk.f32.gmra.mrb[20].mxu0 %vm493_vm1, %v20190_v26 }
  0x87   : > { %17170 = vmatprep.mubr.msk.f32.mxu0 %vm493_vm1, %v20192_v27 }
  0x8a   : > { %17171 = vmatmul.mubr.msk.f32.gmra.mrb[22].mxu0 %vm493_vm1, %v20198_v28 }
  0x8b   : > { %17173 = vmatprep.mubr.msk.f32.mxu0 %vm493_vm1, %v20200_v29 }
  0x8e   : > { %17174 = vmatmul.mubr.msk.f32.gmra.mrb[24].mxu0 %vm493_vm1, %v20206_v30 }
  0x8f   : > { %17176 = vmatprep.mubr.msk.f32.mxu0 %vm493_vm1, %v20208_v32 }
  0x92   : > { %17177 = vmatmul.mubr.msk.f32.gmra.mrb[26].mxu0 %vm493_vm1, %v20216_v35 }
  0x93   : > { %17179 = vmatprep.mubr.msk.f32.mxu0 %vm493_vm1, %v20219_v38 }
  0x96   : > { %17180 = vmatmul.mubr.msk.f32.gmra.mrb[28].mxu0 %vm493_vm1, %v20226_v3 }
  0x97   : > { %17182 = vmatprep.mubr.msk.f32.mxu0 %vm493_vm1, %v20228_v39 }
  0x9a   : > { %17183 = vmatmul.mubr.msk.f32.gmra.mrb[30].mxu0 %vm493_vm1, %v20234_v4 }
  0x9b   : > { %17185 = vmatprep.mubr.msk.f32.mxu0 %vm493_vm1, %v20236_v40 }
  0x9e   : > { %17186 = vmatmul.mubr.msk.f32.gmra.mrb[32].mxu0 %vm493_vm1, %v20242_v41 }
  0x9f   : > { %17188 = vmatprep.mubr.msk.f32.mxu0 %vm493_vm1, %v20244_v42 }
  0xa2   : > { %17189 = vmatmul.mubr.msk.f32.gmra.mrb[34].mxu0 %vm493_vm1, %v20250_v43 }
  0xa3   : > { %17191 = vmatprep.mubr.msk.f32.mxu0 %vm493_vm1, %v20252_v44 }
  0xa6   : > { %17192 = vmatmul.mubr.msk.f32.gmra.mrb[36].mxu0 %vm493_vm1, %v20258_v46 }
  0xa7   : > { %17194 = vmatprep.mubr.msk.f32.mxu0 %vm493_vm1, %v20260_v63 }
  0xaa   : > { %17195 = vmatmul.mubr.msk.f32.gmra.mrb[38].mxu0 %vm493_vm1, %v20266_v0  ;;  %v20292_v0 = vld [vmem:[#allocation2 + $0x179] sm:$0xff] }
  0xab   : > { %17197 = vmatprep.mubr.msk.f32.mxu0 %vm493_vm1, %v20268_v2  ;;  %v20290_v2 = vld [vmem:[#allocation2 + $0x171] sm:$0xff] }
  0xae   : > { %17198 = vmatmul.mubr.msk.f32.gmra.mrb[40].mxu0 %vm493_vm1, %v20274_v33 }
  0xaf   : > { %17200 = vmatprep.mubr.msk.f32.mxu0 %vm493_vm1, %v20276_v34  ;;  %v20298_v34 = vld [vmem:[#allocation2 + $0x181] sm:$0xff] }
  0xb2   : > { %17201 = vmatmul.mubr.msk.f32.gmra.mrb[42].mxu0 %vm493_vm1, %v20282_v37 }
  0xb3   : > { %17203 = vmatprep.mubr.msk.f32.mxu0 %vm493_vm1, %v20284_v1 }
  0xb6   : > { %17204 = vmatmul.mubr.msk.f32.gmra.mrb[44].mxu0 %vm493_vm1, %v20290_v2 }
  0xb7   : > { %17206 = vmatprep.mubr.msk.f32.mxu0 %vm493_vm1, %v20292_v0 }
  0xba   : > { %17207 = vmatmul.mubr.msk.f32.gmra.mrb[46].mxu0 %vm493_vm1, %v20298_v34 }
  0xbb   : > { %17211 = vmatprep.mubr.msk.f32.mxu0 %vm493_vm1, %v19983_v19  ;;  %v20323_v19 = vld [vmem:[%s23863_s3 + $0x14] sm:$0xf] }
  0xbe   : > { %17212 = vmatmul.mubr.msk.f32.vlgmr.msra.gmra.mrb[0].mxu0 %vm493_vm1, %v19985_v21  ;;  %v20353_v21 = vld [vmem:[#allocation2 + $0xc7] sm:$0xff] }
  0xbf   : > { %17214 = vmatprep.mubr.msk.f32.mxu0 %vm493_vm1, %v20005_v31  ;;  %17284 = vmatpush3.msk.msra.mxu0 %vm1152_vm0, %v20136_v10  ;;  %24083 = vst [vmem:[#allocation12_spill] sm:$0xff] %v20353_v21  ;;  %v20355_v31 = vld [vmem:[#allocation2 + $0xcf] sm:$0xff] }
  0xc0   : > { %17357 = vmatprep.subr.msk.mxu0 %vm1152_vm0, %v20323_v19  ;;  %24084 = vst [vmem:[#allocation13_spill] sm:$0xff] %v20355_v31  ;;  %v20419_v10 = vld [vmem:[#allocation2 + $0x14f] sm:$0xff] }
  0xc1   : > { %24100 = vst [vmem:[#allocation29_spill] sm:$0xff] %v20419_v10 }
  0xc2   : > { %17215 = vmatmul.mubr.msk.f32.gmra.mrb[2].mxu0 %vm493_vm1, %v20014_v36  ;;  %v20361_v36 = vld [vmem:[#allocation2 + $0xd7] sm:$0xff] }
  0xc3   : > { %17217 = vmatprep.mubr.msk.f32.mxu0 %vm493_vm1, %v20033_v45  ;;  %24085 = vst [vmem:[#allocation14_spill] sm:$0xff] %v20361_v36  ;;  %v20363_v45 = vld [vmem:[#allocation2 + $0xdf] sm:$0xff] }
  0xc4   : > { %24086 = vst [vmem:[#allocation15_spill] sm:$0xff] %v20363_v45 }
  0xc6   : > { %17218 = vmatmul.mubr.msk.f32.gmra.mrb[4].mxu0 %vm493_vm1, %v20039_v47  ;;  %v20369_v47 = vld [vmem:[#allocation2 + $0xe7] sm:$0xff] }
  0xc7   : > { %17220 = vmatprep.mubr.msk.f32.mxu0 %vm493_vm1, %v20046_v48  ;;  %24087 = vst [vmem:[#allocation16_spill] sm:$0xff] %v20369_v47  ;;  %v20371_v48 = vld [vmem:[#allocation2 + $0xef] sm:$0xff] }
  0xc8   : > { %24088 = vst [vmem:[#allocation17_spill] sm:$0xff] %v20371_v48 }
  0xca   : > { %17221 = vmatmul.mubr.msk.f32.gmra.mrb[6].mxu0 %vm493_vm1, %v20048_v49  ;;  %v20377_v49 = vld [vmem:[#allocation2 + $0xf7] sm:$0xff] }
  0xcb   : > { %17223 = vmatprep.mubr.msk.f32.mxu0 %vm493_vm1, %v20054_v50  ;;  %24089 = vst [vmem:[#allocation18_spill] sm:$0xff] %v20377_v49  ;;  %v20379_v50 = vld [vmem:[#allocation2 + $0xff] sm:$0xff] }
  0xcc   : > { %24090 = vst [vmem:[#allocation19_spill] sm:$0xff] %v20379_v50 }
  0xce   : > { %17224 = vmatmul.mubr.msk.f32.gmra.mrb[8].mxu0 %vm493_vm1, %v20056_v51  ;;  %v20385_v51 = vld [vmem:[#allocation2 + $0x107] sm:$0xff] }
  0xcf   : > { %17226 = vmatprep.mubr.msk.f32.mxu0 %vm493_vm1, %v20062_v52  ;;  %24091 = vst [vmem:[#allocation20_spill] sm:$0xff] %v20385_v51  ;;  %v20387_v52 = vld [vmem:[#allocation2 + $0x10f] sm:$0xff] }
  0xd0   : > { %24092 = vst [vmem:[#allocation21_spill] sm:$0xff] %v20387_v52 }
  0xd2   : > { %17227 = vmatmul.mubr.msk.f32.gmra.mrb[10].mxu0 %vm493_vm1, %v20064_v53  ;;  %v20393_v53 = vld [vmem:[#allocation2 + $0x117] sm:$0xff] }
  0xd3   : > { %17229 = vmatprep.mubr.msk.f32.mxu0 %vm493_vm1, %v20070_v54  ;;  %24093 = vst [vmem:[#allocation22_spill] sm:$0xff] %v20393_v53  ;;  %v20395_v54 = vld [vmem:[#allocation2 + $0x11f] sm:$0xff] }
  0xd4   : > { %24094 = vst [vmem:[#allocation23_spill] sm:$0xff] %v20395_v54 }
  0xd6   : > { %17230 = vmatmul.mubr.msk.f32.gmra.mrb[12].mxu0 %vm493_vm1, %v20072_v55  ;;  %v20401_v55 = vld [vmem:[#allocation2 + $0x127] sm:$0xff] }
  0xd7   : > { %17232 = vmatprep.mubr.msk.f32.mxu0 %vm493_vm1, %v20078_v56  ;;  %24095 = vst [vmem:[#allocation24_spill] sm:$0xff] %v20401_v55  ;;  %v20403_v56 = vld [vmem:[#allocation2 + $0x12f] sm:$0xff] }
  0xd8   : > { %24096 = vst [vmem:[#allocation25_spill] sm:$0xff] %v20403_v56 }
  0xda   : > { %17233 = vmatmul.mubr.msk.f32.gmra.mrb[14].mxu0 %vm493_vm1, %v20080_v57  ;;  %v20409_v57 = vld [vmem:[#allocation2 + $0x137] sm:$0xff] }
  0xdb   : > { %17235 = vmatprep.mubr.msk.f32.mxu0 %vm493_vm1, %v20086_v58  ;;  %24097 = vst [vmem:[#allocation26_spill] sm:$0xff] %v20409_v57  ;;  %v20411_v58 = vld [vmem:[#allocation2 + $0x13f] sm:$0xff] }
  0xdc   : > { %24098 = vst [vmem:[#allocation27_spill] sm:$0xff] %v20411_v58 }
  0xde   : > { %17236 = vmatmul.mubr.msk.f32.gmra.mrb[16].mxu0 %vm493_vm1, %v20088_v59  ;;  %v20417_v59 = vld [vmem:[#allocation2 + $0x147] sm:$0xff] }
  0xdf   : > { %17238 = vmatprep.mubr.msk.f32.mxu0 %vm493_vm1, %v20094_v60  ;;  %24099 = vst [vmem:[#allocation28_spill] sm:$0xff] %v20417_v59  ;;  %v20548_v60 = vld [vmem:[#allocation2 + $0xc0] sm:$0xff] }
  0xe0   : > { %24115 = vst [vmem:[#allocation44_spill] sm:$0xff] %v20548_v60 }
  0xe2   : > { %17239 = vmatmul.mubr.msk.f32.gmra.mrb[18].mxu0 %vm493_vm1, %v20096_v61  ;;  %v20546_v61 = vld [vmem:[#allocation2 + $0xb8] sm:$0xff] }
  0xe3   : > { %17241 = vmatprep.mubr.msk.f32.mxu0 %vm493_vm1, %v20102_v62  ;;  %v20540_v62 = vld [vmem:[#allocation2 + $0xb0] sm:$0xff]  ;;  %24114 = vst [vmem:[#allocation43_spill] sm:$0xff] %v20546_v61 }
  0xe4   : > { %24113 = vst [vmem:[#allocation42_spill] sm:$0xff] %v20540_v62 }
  0xe6   : > { %17242 = vmatmul.mubr.msk.f32.gmra.mrb[20].mxu0 %vm493_vm1, %v20353_v21  ;;  %v20538_v21 = vld [vmem:[#allocation2 + $0xa8] sm:$0xff] }
  0xe7   : > { %17244 = vmatprep.mubr.msk.f32.mxu0 %vm493_vm1, %v20355_v31  ;;  %v20532_v31 = vld [vmem:[#allocation2 + $0xa0] sm:$0xff]  ;;  %24112 = vst [vmem:[#allocation41_spill] sm:$0xff] %v20538_v21 }
  0xe8   : > { %24111 = vst [vmem:[#allocation40_spill] sm:$0xff] %v20532_v31 }
  0xea   : > { %17245 = vmatmul.mubr.msk.f32.gmra.mrb[22].mxu0 %vm493_vm1, %v20361_v36  ;;  %v20530_v36 = vld [vmem:[#allocation2 + $0x98] sm:$0xff] }
  0xeb   : > { %17247 = vmatprep.mubr.msk.f32.mxu0 %vm493_vm1, %v20363_v45  ;;  %v20524_v45 = vld [vmem:[#allocation2 + $0x90] sm:$0xff]  ;;  %24110 = vst [vmem:[#allocation39_spill] sm:$0xff] %v20530_v36 }
  0xee   : > { %17248 = vmatmul.mubr.msk.f32.gmra.mrb[24].mxu0 %vm493_vm1, %v20369_v47  ;;  %v20522_v47 = vld [vmem:[#allocation2 + $0x88] sm:$0xff] }
  0xef   : > { %17250 = vmatprep.mubr.msk.f32.mxu0 %vm493_vm1, %v20371_v48  ;;  %v20516_v48 = vld [vmem:[#allocation2 + $0x80] sm:$0xff] }
  0xf2   : > { %17251 = vmatmul.mubr.msk.f32.gmra.mrb[26].mxu0 %vm493_vm1, %v20377_v49  ;;  %v20514_v49 = vld [vmem:[#allocation2 + $0x78] sm:$0xff] }
  0xf3   : > { %17253 = vmatprep.mubr.msk.f32.mxu0 %vm493_vm1, %v20379_v50  ;;  %v20508_v50 = vld [vmem:[#allocation2 + $0x70] sm:$0xff] }
  0xf6   : > { %17254 = vmatmul.mubr.msk.f32.gmra.mrb[28].mxu0 %vm493_vm1, %v20385_v51  ;;  %v20504_v51 = vld [vmem:[#allocation2 + $0x68] sm:$0xff] }
  0xf7   : > { %17256 = vmatprep.mubr.msk.f32.mxu0 %vm493_vm1, %v20387_v52  ;;  %v20500_v52 = vld [vmem:[%s23863_s3 + $0x18] sm:$0xf] }
  0xfa   : > { %17257 = vmatmul.mubr.msk.f32.gmra.mrb[30].mxu0 %vm493_vm1, %v20393_v53  ;;  %v20491_v53 = vld [vmem:[#allocation2 + $0x58] sm:$0xff] }
  0xfb   : > { %17259 = vmatprep.mubr.msk.f32.mxu0 %vm493_vm1, %v20395_v54  ;;  %v20485_v54 = vld [vmem:[#allocation2 + $0x50] sm:$0xff] }
  0xfe   : > { %17260 = vmatmul.mubr.msk.f32.gmra.mrb[32].mxu0 %vm493_vm1, %v20401_v55  ;;  %v20427_v55 = vld [vmem:[#allocation2 + $0x15f] sm:$0xff] }
  0xff   : > { %17262 = vmatprep.mubr.msk.f32.mxu0 %vm493_vm1, %v20403_v56  ;;  %v20425_v56 = vld [vmem:[#allocation2 + $0x157] sm:$0xff]  ;;  %24102 = vst [vmem:[#allocation31_spill] sm:$0xff] %v20427_v55 }
 0x100   : > { %24101 = vst [vmem:[#allocation30_spill] sm:$0xff] %v20425_v56 }
 0x102   : > { %17263 = vmatmul.mubr.msk.f32.gmra.mrb[34].mxu0 %vm493_vm1, %v20409_v57  ;;  %v20435_v57 = vld [vmem:[#allocation2 + $0x16f] sm:$0xff] }
 0x103   : > { %17265 = vmatprep.mubr.msk.f32.mxu0 %vm493_vm1, %v20411_v58  ;;  %v20433_v58 = vld [vmem:[#allocation2 + $0x167] sm:$0xff]  ;;  %24104 = vst [vmem:[#allocation33_spill] sm:$0xff] %v20435_v57 }
 0x104   : > { %24103 = vst [vmem:[#allocation32_spill] sm:$0xff] %v20433_v58 }
 0x106   : > { %17266 = vmatmul.mubr.msk.f32.gmra.mrb[36].mxu0 %vm493_vm1, %v20417_v59  ;;  %v20443_v59 = vld [vmem:[#allocation2 + $0x17f] sm:$0xff] }
 0x107   : > { %17268 = vmatprep.mubr.msk.f32.mxu0 %vm493_vm1, %v20419_v10  ;;  %v20441_v10 = vld [vmem:[#allocation2 + $0x177] sm:$0xff]  ;;  %24106 = vst [vmem:[#allocation35_spill] sm:$0xff] %v20443_v59 }
 0x108   : > { %24105 = vst [vmem:[#allocation34_spill] sm:$0xff] %v20441_v10 }
 0x10a   : > { %17269 = vmatmul.mubr.msk.f32.gmra.mrb[38].mxu0 %vm493_vm1, %v20425_v56  ;;  %v20451_v56 = vld [vmem:[#allocation2 + $0x18f] sm:$0xff] }
 0x10b   : > { %17271 = vmatprep.mubr.msk.f32.mxu0 %vm493_vm1, %v20427_v55  ;;  %v20449_v55 = vld [vmem:[#allocation2 + $0x187] sm:$0xff]  ;;  %24108 = vst [vmem:[#allocation37_spill] sm:$0xff] %v20451_v56 }
 0x10c   : > { %24107 = vst [vmem:[#allocation36_spill] sm:$0xff] %v20449_v55 }
 0x10e   : > { %17272 = vmatmul.mubr.msk.f32.gmra.mrb[40].mxu0 %vm493_vm1, %v20433_v58  ;;  %v20459_v58 = vld [vmem:[#allocation2 + $0x20] sm:$0xff] }
 0x10f   : > { %17274 = vmatprep.mubr.msk.f32.mxu0 %vm493_vm1, %v20435_v57  ;;  %v20457_v57 = vld [vmem:[#allocation2 + $0x197] sm:$0xff] }
 0x110   : > { %24109 = vst [vmem:[#allocation38_spill] sm:$0xff] %v20457_v57 }
 0x112   : > { %17275 = vmatmul.mubr.msk.f32.gmra.mrb[42].mxu0 %vm493_vm1, %v20441_v10  ;;  %v20467_v10 = vld [vmem:[#allocation2 + $0x30] sm:$0xff] }
 0x113   : > { %17277 = vmatprep.mubr.msk.f32.mxu0 %vm493_vm1, %v20443_v59  ;;  %v20465_v59 = vld [vmem:[#allocation2 + $0x28] sm:$0xff] }
 0x116   : > { %17278 = vmatmul.mubr.msk.f32.gmra.mrb[44].mxu0 %vm493_vm1, %v20449_v55  ;;  %v20477_v55 = vld [vmem:[#allocation2 + $0x40] sm:$0xff] }
 0x117   : > { %17280 = vmatprep.mubr.msk.f32.mxu0 %vm493_vm1, %v20451_v56  ;;  %v20473_v56 = vld [vmem:[#allocation2 + $0x38] sm:$0xff] }
 0x11a   : > { %17281 = vmatmul.mubr.msk.f32.gmra.mrb[46].mxu0 %vm493_vm1, %v20457_v57  ;;  %v20483_v57 = vld [vmem:[#allocation2 + $0x48] sm:$0xff] }
 0x11b   : > { %17285 = vmatprep.mubr.msk.f32.mxu0 %vm493_vm1, %v20459_v58 }
 0x11e   : > { %17286 = vmatmul.mubr.msk.f32.vlgmr.msra.gmra.mrb[0].mxu0 %vm493_vm1, %v20465_v59 }
 0x11f   : > { %17288 = vmatprep.mubr.msk.f32.mxu0 %vm493_vm1, %v20467_v10  ;;  %17358 = vmatpush3.msk.msra.mxu0 %vm1152_vm0, %v20323_v19  ;;  %v20493_v19 = vld [vmem:[#allocation2 + $0x60] sm:$0xff] }
 0x120   : > { %17431 = vmatprep.subr.msk.mxu0 %vm1152_vm0, %v20500_v52 }
 0x122   : > { %17289 = vmatmul.mubr.msk.f32.gmra.mrb[2].mxu0 %vm493_vm1, %v20473_v56 }
 0x123   : > { %17291 = vmatprep.mubr.msk.f32.mxu0 %vm493_vm1, %v20477_v55 }
 0x126   : > { %17292 = vmatmul.mubr.msk.f32.gmra.mrb[4].mxu0 %vm493_vm1, %v20483_v57 }
 0x127   : > { %17294 = vmatprep.mubr.msk.f32.mxu0 %vm493_vm1, %v20485_v54 }
 0x12a   : > { %17295 = vmatmul.mubr.msk.f32.gmra.mrb[6].mxu0 %vm493_vm1, %v20491_v53 }
 0x12b   : > { %17297 = vmatprep.mubr.msk.f32.mxu0 %vm493_vm1, %v20493_v19 }
 0x12e   : > { %17298 = vmatmul.mubr.msk.f32.gmra.mrb[8].mxu0 %vm493_vm1, %v20504_v51 }
 0x12f   : > { %17300 = vmatprep.mubr.msk.f32.mxu0 %vm493_vm1, %v20508_v50 }
 0x132   : > { %17301 = vmatmul.mubr.msk.f32.gmra.mrb[10].mxu0 %vm493_vm1, %v20514_v49 }
 0x133   : > { %17303 = vmatprep.mubr.msk.f32.mxu0 %vm493_vm1, %v20516_v48 }
 0x136   : > { %17304 = vmatmul.mubr.msk.f32.gmra.mrb[12].mxu0 %vm493_vm1, %v20522_v47 }
 0x137   : > { %17306 = vmatprep.mubr.msk.f32.mxu0 %vm493_vm1, %v20524_v45 }
 0x13a   : > { %17307 = vmatmul.mubr.msk.f32.gmra.mrb[14].mxu0 %vm493_vm1, %v20530_v36  ;;  %v20556_v36 = vld [vmem:[#allocation2 + $0xd0] sm:$0xff] }
 0x13b   : > { %17309 = vmatprep.mubr.msk.f32.mxu0 %vm493_vm1, %v20532_v31  ;;  %v20554_v31 = vld [vmem:[#allocation2 + $0xc8] sm:$0xff]  ;;  %24117 = vst [vmem:[#allocation46_spill] sm:$0xff] %v20556_v36 }
 0x13c   : > { %24116 = vst [vmem:[#allocation45_spill] sm:$0xff] %v20554_v31 }
 0x13e   : > { %17310 = vmatmul.mubr.msk.f32.gmra.mrb[16].mxu0 %vm493_vm1, %v20538_v21  ;;  %v20564_v21 = vld [vmem:[#allocation2 + $0xe0] sm:$0xff] }
 0x13f   : > { %17312 = vmatprep.mubr.msk.f32.mxu0 %vm493_vm1, %v20540_v62  ;;  %v20562_v62 = vld [vmem:[#allocation2 + $0xd8] sm:$0xff]  ;;  %24119 = vst [vmem:[#allocation48_spill] sm:$0xff] %v20564_v21 }
 0x140   : > { %24118 = vst [vmem:[#allocation47_spill] sm:$0xff] %v20562_v62 }
 0x142   : > { %17313 = vmatmul.mubr.msk.f32.gmra.mrb[18].mxu0 %vm493_vm1, %v20546_v61  ;;  %v20572_v61 = vld [vmem:[#allocation2 + $0xf0] sm:$0xff] }
 0x143   : > { %17315 = vmatprep.mubr.msk.f32.mxu0 %vm493_vm1, %v20548_v60  ;;  %v20570_v60 = vld [vmem:[#allocation2 + $0xe8] sm:$0xff]  ;;  %24121 = vst [vmem:[#allocation50_spill] sm:$0xff] %v20572_v61 }
 0x144   : > { %24120 = vst [vmem:[#allocation49_spill] sm:$0xff] %v20570_v60 }
 0x146   : > { %17316 = vmatmul.mubr.msk.f32.gmra.mrb[20].mxu0 %vm493_vm1, %v20554_v31  ;;  %v20580_v31 = vld [vmem:[#allocation2 + $0x100] sm:$0xff] }
 0x147   : > { %17318 = vmatprep.mubr.msk.f32.mxu0 %vm493_vm1, %v20556_v36  ;;  %v20578_v36 = vld [vmem:[#allocation2 + $0xf8] sm:$0xff]  ;;  %24123 = vst [vmem:[#allocation52_spill] sm:$0xff] %v20580_v31 }
 0x148   : > { %24122 = vst [vmem:[#allocation51_spill] sm:$0xff] %v20578_v36 }
 0x14a   : > { %17319 = vmatmul.mubr.msk.f32.gmra.mrb[22].mxu0 %vm493_vm1, %v20562_v62  ;;  %v20588_v62 = vld [vmem:[#allocation2 + $0x110] sm:$0xff] }
 0x14b   : > { %17321 = vmatprep.mubr.msk.f32.mxu0 %vm493_vm1, %v20564_v21  ;;  %v20586_v21 = vld [vmem:[#allocation2 + $0x108] sm:$0xff]  ;;  %24125 = vst [vmem:[#allocation54_spill] sm:$0xff] %v20588_v62 }
 0x14c   : > { %24124 = vst [vmem:[#allocation53_spill] sm:$0xff] %v20586_v21 }
 0x14e   : > { %17322 = vmatmul.mubr.msk.f32.gmra.mrb[24].mxu0 %vm493_vm1, %v20570_v60  ;;  %v20596_v60 = vld [vmem:[#allocation2 + $0x120] sm:$0xff] }
 0x14f   : > { %17324 = vmatprep.mubr.msk.f32.mxu0 %vm493_vm1, %v20572_v61  ;;  %v20594_v61 = vld [vmem:[#allocation2 + $0x118] sm:$0xff]  ;;  %24127 = vst [vmem:[#allocation56_spill] sm:$0xff] %v20596_v60 }
 0x150   : > { %24126 = vst [vmem:[#allocation55_spill] sm:$0xff] %v20594_v61 }
 0x152   : > { %17325 = vmatmul.mubr.msk.f32.gmra.mrb[26].mxu0 %vm493_vm1, %v20578_v36  ;;  %v20604_v36 = vld [vmem:[#allocation2 + $0x130] sm:$0xff] }
 0x153   : > { %17327 = vmatprep.mubr.msk.f32.mxu0 %vm493_vm1, %v20580_v31  ;;  %v20602_v31 = vld [vmem:[#allocation2 + $0x128] sm:$0xff]  ;;  %24129 = vst [vmem:[#allocation58_spill] sm:$0xff] %v20604_v36 }
 0x154   : > { %24128 = vst [vmem:[#allocation57_spill] sm:$0xff] %v20602_v31 }
 0x156   : > { %17328 = vmatmul.mubr.msk.f32.gmra.mrb[28].mxu0 %vm493_vm1, %v20586_v21  ;;  %v20612_v21 = vld [vmem:[#allocation2 + $0x140] sm:$0xff] }
 0x157   : > { %17330 = vmatprep.mubr.msk.f32.mxu0 %vm493_vm1, %v20588_v62  ;;  %v20610_v62 = vld [vmem:[#allocation2 + $0x138] sm:$0xff]  ;;  %24131 = vst [vmem:[#allocation60_spill] sm:$0xff] %v20612_v21 }
 0x158   : > { %24130 = vst [vmem:[#allocation59_spill] sm:$0xff] %v20610_v62 }
 0x15a   : > { %17331 = vmatmul.mubr.msk.f32.gmra.mrb[30].mxu0 %vm493_vm1, %v20594_v61  ;;  %v20620_v61 = vld [vmem:[#allocation2 + $0x150] sm:$0xff] }
 0x15b   : > { %17333 = vmatprep.mubr.msk.f32.mxu0 %vm493_vm1, %v20596_v60  ;;  %v20618_v60 = vld [vmem:[#allocation2 + $0x148] sm:$0xff]  ;;  %24133 = vst [vmem:[#allocation62_spill] sm:$0xff] %v20620_v61 }
 0x15c   : > { %24132 = vst [vmem:[#allocation61_spill] sm:$0xff] %v20618_v60 }
 0x15e   : > { %17334 = vmatmul.mubr.msk.f32.gmra.mrb[32].mxu0 %vm493_vm1, %v20602_v31  ;;  %v20628_v31 = vld [vmem:[#allocation2 + $0x160] sm:$0xff] }
 0x15f   : > { %17336 = vmatprep.mubr.msk.f32.mxu0 %vm493_vm1, %v20604_v36  ;;  %v20626_v36 = vld [vmem:[#allocation2 + $0x158] sm:$0xff]  ;;  %24135 = vst [vmem:[#allocation64_spill] sm:$0xff] %v20628_v31 }
 0x160   : > { %24134 = vst [vmem:[#allocation63_spill] sm:$0xff] %v20626_v36 }
 0x162   : > { %17337 = vmatmul.mubr.msk.f32.gmra.mrb[34].mxu0 %vm493_vm1, %v20610_v62  ;;  %v20636_v62 = vld [vmem:[#allocation2 + $0x170] sm:$0xff] }
 0x163   : > { %17339 = vmatprep.mubr.msk.f32.mxu0 %vm493_vm1, %v20612_v21  ;;  %v20634_v21 = vld [vmem:[#allocation2 + $0x168] sm:$0xff] }
 0x164   : > { %24136 = vst [vmem:[#allocation65_spill] sm:$0xff] %v20634_v21 }
 0x166   : > { %17340 = vmatmul.mubr.msk.f32.gmra.mrb[36].mxu0 %vm493_vm1, %v20618_v60  ;;  %v20644_v60 = vld [vmem:[#allocation2 + $0x180] sm:$0xff] }
 0x167   : > { %17342 = vmatprep.mubr.msk.f32.mxu0 %vm493_vm1, %v20620_v61  ;;  %v20642_v61 = vld [vmem:[#allocation2 + $0x178] sm:$0xff] }
 0x16a   : > { %17343 = vmatmul.mubr.msk.f32.gmra.mrb[38].mxu0 %vm493_vm1, %v20626_v36  ;;  %v3059_v36 = vld [vmem:[#allocation2 + $0x190] sm:$0xff] }
 0x16b   : > { %17345 = vmatprep.mubr.msk.f32.mxu0 %vm493_vm1, %v20628_v31  ;;  %v3058_v31 = vld [vmem:[#allocation2 + $0x188] sm:$0xff] }
 0x16e   : > { %17346 = vmatmul.mubr.msk.f32.gmra.mrb[40].mxu0 %vm493_vm1, %v20634_v21  ;;  %v3060_v21 = vld [vmem:[#allocation2 + $0x198] sm:$0xff] }
 0x16f   : > { %17348 = vmatprep.mubr.msk.f32.mxu0 %vm493_vm1, %v20636_v62 }
 0x172   : > { %17349 = vmatmul.mubr.msk.f32.gmra.mrb[42].mxu0 %vm493_vm1, %v20642_v61 }
 0x173   : > { %17351 = vmatprep.mubr.msk.f32.mxu0 %vm493_vm1, %v20644_v60 }
 0x176   : > { %17352 = vmatmul.mubr.msk.f32.gmra.mrb[44].mxu0 %vm493_vm1, %v3058_v31  ;;  %v687_v31 = vld [vmem:[%s23869_s9] sm:$0xff] }
 0x177   : > { %17354 = vmatprep.mubr.msk.f32.mxu0 %vm493_vm1, %v3059_v36  ;;  %v24155_v36 = vld [vmem:[#allocation53_spill] sm:$0xff] }
 0x17a   : > { %17355 = vmatmul.mubr.msk.f32.gmra.mrb[46].mxu0 %vm493_vm1, %v3060_v21  ;;  %v24154_v21 = vld [vmem:[#allocation6_spill] sm:$0xff] }
 0x17b   : > { %17359 = vmatprep.mubr.msk.f32.mxu0 %vm493_vm1, %v20109_v5  ;;  %v20674_v5 = vld [vmem:[%s23863_s3 + $0x1c] sm:$0xf] }
 0x17e   : > { %17360 = vmatmul.mubr.msk.f32.vlgmr.msra.gmra.mrb[0].mxu0 %vm493_vm1, %v20113_v6  ;;  %v14840_v6 = vld [vmem:[%s23863_s3 + $0x4] sm:$0xf] }
 0x17f   : > { %17362 = vmatprep.mubr.msk.f32.mxu0 %vm493_vm1, %v20119_v7  ;;  %17432 = vmatpush3.msk.msra.mxu0 %vm1152_vm0, %v20500_v52  ;;  %v958_v7 = vld [vmem:[#allocation2 + $0x8] sm:$0xff]  ;;  %v24156_v52 = vld [vmem:[#allocation7_spill] sm:$0xff] }
 0x180   : > { %17505 = vmatprep.subr.msk.mxu0 %vm1152_vm0, %v20674_v5  ;;  %16987 = vmatprep.subr.msk.mxu1 %vm1152_vm0, %v14840_v6 }
 0x181   : > { %16988 = vmatpush3.msk.msra.mxu1 %vm1152_vm0, %v14840_v6  ;;  %16989 = vmatprep.mubr.msk.f32.mxu1 %vm493_vm1, %v958_v7  ;;  %v688_v6 = vld [vmem:[%s23869_s9 + $0x8] sm:$0xff]  ;;  %v24159_v7 = vld [vmem:[#allocation55_spill] sm:$0xff] }
 0x182   : > { %17363 = vmatmul.mubr.msk.f32.gmra.mrb[2].mxu0 %vm493_vm1, %v20121_v8  ;;  %v959_v8 = vld [vmem:[#allocation2 + $0x10] sm:$0xff] }
 0x183   : > { %17365 = vmatprep.mubr.msk.f32.mxu0 %vm493_vm1, %v20127_v9  ;;  %16990 = vmatmul.mubr.msk.f32.vlgmr.msra.gmra.mrb[0].mxu1 %vm493_vm1, %v959_v8  ;;  %v19626_v9 = vld [vmem:[%s23863_s3] sm:$0xf] }
 0x184   : > { %18713 = vmatprep.subr.msk.mxu1 %vm1152_vm0, %v19626_v9  ;;  %v24160_v8 = vld [vmem:[#allocation12_spill] sm:$0xff] }
 0x185   : > { %18714 = vmatpush3.msk.msra.mxu1 %vm1152_vm0, %v19626_v9  ;;  %v24161_v9 = vld [vmem:[#allocation56_spill] sm:$0xff] }
 0x186   : > { %17366 = vmatmul.mubr.msk.f32.gmra.mrb[4].mxu0 %vm493_vm1, %v20129_v20  ;;  %v960_v20 = vld [vmem:[#allocation2 + $0x18] sm:$0xff] }
 0x187   : > { %17368 = vmatprep.mubr.msk.f32.mxu0 %vm493_vm1, %v20140_v11  ;;  %16992 = vmatprep.mubr.msk.f32.mxu1 %vm493_vm1, %v960_v20  ;;  %v24137_v11 = vld [vmem:[#allocation9_spill] sm:$0xff] }
 0x188   : > { %16993 = vmatmul.mubr.msk.f32.gmra.mrb[2].mxu1 %vm493_vm1, %v20459_v58  ;;  %v19648_v58 = vmov 0   ;;  %v24162_v20 = vld [vmem:[#allocation13_spill] sm:$0xff] }
 0x189   : > { %16995 = vmatprep.mubr.msk.f32.mxu1 %vm493_vm1, %v20465_v59  ;;  %19624 = vset.pattern.permute.xlu0 %v19648_v58  ;;  %v24157_v59 = vld [vmem:[#allocation54_spill] sm:$0xff] }
 0x18a   : > { %17369 = vmatmul.mubr.msk.f32.gmra.mrb[6].mxu0 %vm493_vm1, %v20144_v12  ;;  %v24138_v12 = vld [vmem:[#allocation10_spill] sm:$0xff]  ;;  %5868 = vperm.xlu0 %19624, %v687_v31   ;;  %v24177_v31 = vld [vmem:[#allocation64_spill] sm:$0xff] }
 0x18b   : > { %17371 = vmatprep.mubr.msk.f32.mxu0 %vm493_vm1, %v20150_v13  ;;  %v24139_v13 = vld [vmem:[#allocation11_spill] sm:$0xff]  ;;  %19625 = vset.pattern.permute.xlu1 %v19648_v58 }
 0x18c   : > { %16996 = vmatmul.mubr.msk.f32.gmra.mrb[4].mxu1 %vm493_vm1, %v20467_v10  ;;  %v24158_v10 = vld [vmem:[#allocation8_spill] sm:$0xff]  ;;  %v698_v58 = vld [vmem:[%s23869_s9 + $0x58] sm:$0xff] }
 0x18d   : > { %16998 = vmatprep.mubr.msk.f32.mxu1 %vm493_vm1, %v20473_v56 }
 0x18e   : > { %17372 = vmatmul.mubr.msk.f32.gmra.mrb[8].mxu0 %vm493_vm1, %v20152_v14  ;;  %v3608_v14 = vld [vmem:[#allocation2 + $0x189] sm:$0xff]  ;;  %5873 = vperm.xlu0 %19624, %v688_v6  }
 0x18f   : > { %17374 = vmatprep.mubr.msk.f32.mxu0 %vm493_vm1, %v20158_v15  ;;  %v3610_v15 = vld [vmem:[#allocation2 + $0x199] sm:$0xff]  ;;  %v24180_v6 = vld [vmem:[#allocation22_spill] sm:$0xff] }
 0x190   : > { %16999 = vmatmul.mubr.msk.f32.gmra.mrb[6].mxu1 %vm493_vm1, %v20477_v55 }
 0x191   : > { %17001 = vmatprep.mubr.msk.f32.mxu1 %vm493_vm1, %v20483_v57 }
 0x192   : > { %17375 = vmatmul.mubr.msk.f32.gmra.mrb[10].mxu0 %vm493_vm1, %v20160_v16  ;;  %v4113_v16 = vld [vmem:[#allocation2 + $0x37] sm:$0xff] }
 0x193   : > { %17377 = vmatprep.mubr.msk.f32.mxu0 %vm493_vm1, %v20166_v17  ;;  %v4114_v17 = vld [vmem:[#allocation2 + $0x3f] sm:$0xff] }
 0x194   : > { %17002 = vmatmul.mubr.msk.f32.gmra.mrb[8].mxu1 %vm493_vm1, %v20485_v54 }
 0x195   : > { %17004 = vmatprep.mubr.msk.f32.mxu1 %vm493_vm1, %v20491_v53 }
 0x196   : > { %17378 = vmatmul.mubr.msk.f32.gmra.mrb[12].mxu0 %vm493_vm1, %v20168_v18  ;;  %v4115_v18 = vld [vmem:[#allocation2 + $0x47] sm:$0xff] }
 0x197   : > { %17380 = vmatprep.mubr.msk.f32.mxu0 %vm493_vm1, %v20174_v22  ;;  %v24140_v22 = vld [vmem:[#allocation39_spill] sm:$0xff] }
 0x198   : > { %17005 = vmatmul.mubr.msk.f32.gmra.mrb[10].mxu1 %vm493_vm1, %v20493_v19 }
 0x199   : > { %17007 = vmatprep.mubr.msk.f32.mxu1 %vm493_vm1, %v20504_v51 }
 0x19a   : > { %17381 = vmatmul.mubr.msk.f32.gmra.mrb[14].mxu0 %vm493_vm1, %v20176_v23  ;;  %v4116_v23 = vld [vmem:[#allocation2 + $0x4f] sm:$0xff] }
 0x19b   : > { %17383 = vmatprep.mubr.msk.f32.mxu0 %vm493_vm1, %v20182_v24  ;;  %v4117_v24 = vld [vmem:[#allocation2 + $0x57] sm:$0xff] }
 0x19c   : > { %17008 = vmatmul.mubr.msk.f32.gmra.mrb[12].mxu1 %vm493_vm1, %v20508_v50 }
 0x19d   : > { %17010 = vmatprep.mubr.msk.f32.mxu1 %vm493_vm1, %v20514_v49 }
 0x19e   : > { %17384 = vmatmul.mubr.msk.f32.gmra.mrb[16].mxu0 %vm493_vm1, %v20184_v25  ;;  %v24141_v25 = vld [vmem:[#allocation40_spill] sm:$0xff] }
 0x19f   : > { %17386 = vmatprep.mubr.msk.f32.mxu0 %vm493_vm1, %v20190_v26  ;;  %v24142_v26 = vld [vmem:[#allocation41_spill] sm:$0xff] }
 0x1a0   : > { %17011 = vmatmul.mubr.msk.f32.gmra.mrb[14].mxu1 %vm493_vm1, %v20516_v48 }
 0x1a1   : > { %17013 = vmatprep.mubr.msk.f32.mxu1 %vm493_vm1, %v20522_v47 }
 0x1a2   : > { %17387 = vmatmul.mubr.msk.f32.gmra.mrb[18].mxu0 %vm493_vm1, %v20192_v27  ;;  %v4118_v27 = vld [vmem:[#allocation2 + $0x5f] sm:$0xff] }
 0x1a3   : > { %17389 = vmatprep.mubr.msk.f32.mxu0 %vm493_vm1, %v20198_v28  ;;  %v4119_v28 = vld [vmem:[#allocation2 + $0x67] sm:$0xff] }
 0x1a4   : > { %17014 = vmatmul.mubr.msk.f32.gmra.mrb[16].mxu1 %vm493_vm1, %v20524_v45 }
 0x1a5   : > { %17016 = vmatprep.mubr.msk.f32.mxu1 %vm493_vm1, %v24140_v22 }
 0x1a6   : > { %17390 = vmatmul.mubr.msk.f32.gmra.mrb[20].mxu0 %vm493_vm1, %v20200_v29  ;;  %v24143_v29 = vld [vmem:[#allocation42_spill] sm:$0xff] }
 0x1a7   : > { %17392 = vmatprep.mubr.msk.f32.mxu0 %vm493_vm1, %v20206_v30  ;;  %v24144_v30 = vld [vmem:[#allocation43_spill] sm:$0xff] }
 0x1a8   : > { %17017 = vmatmul.mubr.msk.f32.gmra.mrb[18].mxu1 %vm493_vm1, %v24141_v25 }
 0x1a9   : > { %17019 = vmatprep.mubr.msk.f32.mxu1 %vm493_vm1, %v24142_v26 }
 0x1aa   : > { %17393 = vmatmul.mubr.msk.f32.gmra.mrb[22].mxu0 %vm493_vm1, %v20208_v32  ;;  %v4120_v32 = vld [vmem:[#allocation2 + $0x6f] sm:$0xff] }
 0x1ab   : > { %17395 = vmatprep.mubr.msk.f32.mxu0 %vm493_vm1, %v20216_v35  ;;  %v4121_v35 = vld [vmem:[#allocation2 + $0x77] sm:$0xff] }
 0x1ac   : > { %17020 = vmatmul.mubr.msk.f32.gmra.mrb[20].mxu1 %vm493_vm1, %v24143_v29 }
 0x1ad   : > { %17022 = vmatprep.mubr.msk.f32.mxu1 %vm493_vm1, %v24144_v30 }
 0x1ae   : > { %17396 = vmatmul.mubr.msk.f32.gmra.mrb[24].mxu0 %vm493_vm1, %v20219_v38  ;;  %v24145_v38 = vld [vmem:[#allocation44_spill] sm:$0xff] }
 0x1af   : > { %17398 = vmatprep.mubr.msk.f32.mxu0 %vm493_vm1, %v20226_v3  ;;  %v20823_v3 = vld [vmem:[%s23863_s3 + $0x20] sm:$0xf] }
 0x1b0   : > { %17023 = vmatmul.mubr.msk.f32.gmra.mrb[22].mxu1 %vm493_vm1, %v24145_v38 }
 0x1b2   : > { %17399 = vmatmul.mubr.msk.f32.gmra.mrb[26].mxu0 %vm493_vm1, %v20228_v39  ;;  %v24146_v39 = vld [vmem:[#allocation45_spill] sm:$0xff] }
 0x1b3   : > { %17401 = vmatprep.mubr.msk.f32.mxu0 %vm493_vm1, %v20234_v4  ;;  %17025 = vmatprep.mubr.msk.f32.mxu1 %vm493_vm1, %v24146_v39  ;;  %v4122_v4 = vld [vmem:[#allocation2 + $0x7f] sm:$0xff] }
 0x1b6   : > { %17402 = vmatmul.mubr.msk.f32.gmra.mrb[28].mxu0 %vm493_vm1, %v20236_v40  ;;  %v4123_v40 = vld [vmem:[#allocation2 + $0x87] sm:$0xff] }
 0x1b7   : > { %17404 = vmatprep.mubr.msk.f32.mxu0 %vm493_vm1, %v20242_v41  ;;  %v24147_v41 = vld [vmem:[#allocation46_spill] sm:$0xff] }
 0x1b8   : > { %17026 = vmatmul.mubr.msk.f32.gmra.mrb[24].mxu1 %vm493_vm1, %v24147_v41 }
 0x1ba   : > { %17405 = vmatmul.mubr.msk.f32.gmra.mrb[30].mxu0 %vm493_vm1, %v20244_v42  ;;  %v24148_v42 = vld [vmem:[#allocation47_spill] sm:$0xff] }
 0x1bb   : > { %17407 = vmatprep.mubr.msk.f32.mxu0 %vm493_vm1, %v20250_v43  ;;  %17028 = vmatprep.mubr.msk.f32.mxu1 %vm493_vm1, %v24148_v42  ;;  %v4124_v43 = vld [vmem:[#allocation2 + $0x8f] sm:$0xff] }
 0x1be   : > { %17408 = vmatmul.mubr.msk.f32.gmra.mrb[32].mxu0 %vm493_vm1, %v20252_v44  ;;  %v4125_v44 = vld [vmem:[#allocation2 + $0x97] sm:$0xff] }
 0x1bf   : > { %17410 = vmatprep.mubr.msk.f32.mxu0 %vm493_vm1, %v20258_v46  ;;  %v24149_v46 = vld [vmem:[#allocation48_spill] sm:$0xff] }
 0x1c0   : > { %17029 = vmatmul.mubr.msk.f32.gmra.mrb[26].mxu1 %vm493_vm1, %v24149_v46 }
 0x1c2   : > { %17411 = vmatmul.mubr.msk.f32.gmra.mrb[34].mxu0 %vm493_vm1, %v20260_v63  ;;  %v24150_v63 = vld [vmem:[#allocation49_spill] sm:$0xff] }
 0x1c3   : > { %17413 = vmatprep.mubr.msk.f32.mxu0 %vm493_vm1, %v24137_v11  ;;  %17031 = vmatprep.mubr.msk.f32.mxu1 %vm493_vm1, %v24150_v63  ;;  %v690_v11 = vld [vmem:[%s23869_s9 + $0x18] sm:$0xff] }
 0x1c6   : > { %17414 = vmatmul.mubr.msk.f32.gmra.mrb[36].mxu0 %vm493_vm1, %v24138_v12  ;;  %v691_v12 = vld [vmem:[%s23869_s9 + $0x20] sm:$0xff] }
 0x1c7   : > { %17416 = vmatprep.mubr.msk.f32.mxu0 %vm493_vm1, %v20274_v33  ;;  %v24151_v33 = vld [vmem:[#allocation50_spill] sm:$0xff]  ;;  %5888 = vperm.xlu0 %19624, %v691_v12   ;;  %v24182_v12 = vld [vmem:[#allocation24_spill] sm:$0xff] }
 0x1c8   : > { %17032 = vmatmul.mubr.msk.f32.gmra.mrb[28].mxu1 %vm493_vm1, %v24151_v33 }
 0x1ca   : > { %17417 = vmatmul.mubr.msk.f32.gmra.mrb[38].mxu0 %vm493_vm1, %v24139_v13  ;;  %v24163_v13 = vld [vmem:[#allocation57_spill] sm:$0xff] }
 0x1cb   : > { %17419 = vmatprep.mubr.msk.f32.mxu0 %vm493_vm1, %v20282_v37  ;;  %v24153_v37 = vld [vmem:[#allocation52_spill] sm:$0xff] }
 0x1ce   : > { %17420 = vmatmul.mubr.msk.f32.gmra.mrb[40].mxu0 %vm493_vm1, %v20284_v1  ;;  %v3609_v1 = vld [vmem:[#allocation2 + $0x191] sm:$0xff] }
 0x1cf   : > { %17422 = vmatprep.mubr.msk.f32.mxu0 %vm493_vm1, %v20290_v2  ;;  %v4127_v2 = vld [vmem:[#allocation2 + $0xa7] sm:$0xff] }
 0x1d2   : > { %17423 = vmatmul.mubr.msk.f32.gmra.mrb[42].mxu0 %vm493_vm1, %v20292_v0  ;;  %v4126_v0 = vld [vmem:[#allocation2 + $0x9f] sm:$0xff] }
 0x1d3   : > { %17425 = vmatprep.mubr.msk.f32.mxu0 %vm493_vm1, %v20298_v34  ;;  %v24152_v34 = vld [vmem:[#allocation51_spill] sm:$0xff] }
 0x1d4   : > { %17034 = vmatprep.mubr.msk.f32.mxu1 %vm493_vm1, %v24152_v34 }
 0x1d5   : > { %17035 = vmatmul.mubr.msk.f32.gmra.mrb[30].mxu1 %vm493_vm1, %v24153_v37 }
 0x1d6   : > { %17426 = vmatmul.mubr.msk.f32.gmra.mrb[44].mxu0 %vm493_vm1, %v3608_v14  ;;  %17037 = vmatprep.mubr.msk.f32.mxu1 %vm493_vm1, %v24155_v36  ;;  %v24164_v14 = vld [vmem:[#allocation14_spill] sm:$0xff] }
 0x1d7   : > { %17428 = vmatprep.mubr.msk.f32.mxu0 %vm493_vm1, %v3609_v1  ;;  %v24165_v1 = vld [vmem:[#allocation58_spill] sm:$0xff] }
 0x1d9   : > { %17038 = vmatmul.mubr.msk.f32.gmra.mrb[32].mxu1 %vm493_vm1, %v24157_v59 }
 0x1da   : > { %17429 = vmatmul.mubr.msk.f32.gmra.mrb[46].mxu0 %vm493_vm1, %v3610_v15  ;;  %17040 = vmatprep.mubr.msk.f32.mxu1 %vm493_vm1, %v24159_v7  ;;  %v24166_v15 = vld [vmem:[#allocation15_spill] sm:$0xff] }
 0x1db   : > { %17433 = vmatprep.mubr.msk.f32.mxu0 %vm493_vm1, %v4113_v16  ;;  %v692_v16 = vld [vmem:[%s23869_s9 + $0x28] sm:$0xff] }
 0x1dd   : > { %17041 = vmatmul.mubr.msk.f32.gmra.mrb[34].mxu1 %vm493_vm1, %v24161_v9 }
 0x1de   : > { %17434 = vmatmul.mubr.msk.f32.vlgmr.msra.gmra.mrb[0].mxu0 %vm493_vm1, %v4114_v17  ;;  %17043 = vmatprep.mubr.msk.f32.mxu1 %vm493_vm1, %v24163_v13  ;;  %v693_v17 = vld [vmem:[%s23869_s9 + $0x30] sm:$0xff] }
 0x1df   : > { %17436 = vmatprep.mubr.msk.f32.mxu0 %vm493_vm1, %v4115_v18  ;;  %17506 = vmatpush3.msk.msra.mxu0 %vm1152_vm0, %v20674_v5  ;;  %v689_v5 = vld [vmem:[%s23869_s9 + $0x10] sm:$0xff]  ;;  %v24167_v18 = vld [vmem:[#allocation59_spill] sm:$0xff] }
 0x1e0   : > { %17579 = vmatprep.subr.msk.mxu0 %vm1152_vm0, %v20823_v3  ;;  %5878 = vperm.xlu1 %19625, %v689_v5   ;;  %v24179_v5 = vld [vmem:[#allocation65_spill] sm:$0xff] }
 0x1e1   : > { %17044 = vmatmul.mubr.msk.f32.gmra.mrb[36].mxu1 %vm493_vm1, %v24165_v1  ;;  %5898 = vperm.xlu0 %19624, %v693_v17   ;;  %v934_v17 = vld [vmem:[#allocation2 + $0xcf] sm:$0xff] }
 0x1e2   : > { %17437 = vmatmul.mubr.msk.f32.gmra.mrb[2].mxu0 %vm493_vm1, %v4116_v23  ;;  %17046 = vmatprep.mubr.msk.f32.mxu1 %vm493_vm1, %v24167_v18  ;;  %v24168_v23 = vld [vmem:[#allocation16_spill] sm:$0xff] }
 0x1e3   : > { %17439 = vmatprep.mubr.msk.f32.mxu0 %vm493_vm1, %v4117_v24  ;;  %v24169_v24 = vld [vmem:[#allocation60_spill] sm:$0xff] }
 0x1e4   : > { %5883 = vperm.xlu1 %19625, %v690_v11   ;;  %v701_v11 = vld [vmem:[%s23869_s9 + $0x70] sm:$0xff] }
 0x1e5   : > { %17047 = vmatmul.mubr.msk.f32.gmra.mrb[38].mxu1 %vm493_vm1, %v24169_v24  ;;  %v705_v24 = vld [vmem:[%s23869_s9 + $0x90] sm:$0xff] }
 0x1e6   : > { %17440 = vmatmul.mubr.msk.f32.gmra.mrb[4].mxu0 %vm493_vm1, %v4118_v27  ;;  %v24170_v27 = vld [vmem:[#allocation17_spill] sm:$0xff] }
 0x1e7   : > { %17442 = vmatprep.mubr.msk.f32.mxu0 %vm493_vm1, %v4119_v28  ;;  %v694_v28 = vld [vmem:[%s23869_s9 + $0x38] sm:$0xff] }
 0x1e8   : > { %5893 = vperm.xlu1 %19625, %v692_v16   ;;  %v24184_v16 = vld [vmem:[#allocation26_spill] sm:$0xff] }
 0x1ea   : > { %17443 = vmatmul.mubr.msk.f32.gmra.mrb[6].mxu0 %vm493_vm1, %v4120_v32  ;;  %v695_v32 = vld [vmem:[%s23869_s9 + $0x40] sm:$0xff] }
 0x1eb   : > { %17445 = vmatprep.mubr.msk.f32.mxu0 %vm493_vm1, %v4121_v35  ;;  %v24171_v35 = vld [vmem:[#allocation61_spill] sm:$0xff]  ;;  %5908 = vperm.xlu0 %19624, %v695_v32   ;;  %v936_v32 = vld [vmem:[#allocation2 + $0xdf] sm:$0xff] }
 0x1ec   : > { %17049 = vmatprep.mubr.msk.f32.mxu1 %vm493_vm1, %v24171_v35  ;;  %5903 = vperm.xlu1 %19625, %v694_v28   ;;  %v24186_v28 = vld [vmem:[#allocation28_spill] sm:$0xff]  ;;  %v24187_v35 = vld [vmem:[#allocation29_spill] sm:$0xff] }
 0x1ee   : > { %17446 = vmatmul.mubr.msk.f32.gmra.mrb[8].mxu0 %vm493_vm1, %v4122_v4  ;;  %v24172_v4 = vld [vmem:[#allocation18_spill] sm:$0xff] }
 0x1ef   : > { %17448 = vmatprep.mubr.msk.f32.mxu0 %vm493_vm1, %v4123_v40  ;;  %v24173_v40 = vld [vmem:[#allocation62_spill] sm:$0xff] }
 0x1f0   : > { %17050 = vmatmul.mubr.msk.f32.gmra.mrb[40].mxu1 %vm493_vm1, %v24173_v40  ;;  %v707_v40 = vld [vmem:[%s23869_s9 + $0xa0] sm:$0xff] }
 0x1f2   : > { %17449 = vmatmul.mubr.msk.f32.gmra.mrb[10].mxu0 %vm493_vm1, %v4124_v43  ;;  %v24174_v43 = vld [vmem:[#allocation19_spill] sm:$0xff] }
 0x1f3   : > { %17451 = vmatprep.mubr.msk.f32.mxu0 %vm493_vm1, %v4125_v44  ;;  %v696_v44 = vld [vmem:[%s23869_s9 + $0x48] sm:$0xff] }
 0x1f4   : > { %5913 = vperm.xlu1 %19625, %v696_v44   ;;  %v24188_v44 = vld [vmem:[#allocation30_spill] sm:$0xff] }
 0x1f6   : > { %17452 = vmatmul.mubr.msk.f32.gmra.mrb[12].mxu0 %vm493_vm1, %v4126_v0  ;;  %v697_v0 = vld [vmem:[%s23869_s9 + $0x50] sm:$0xff] }
 0x1f7   : > { %17454 = vmatprep.mubr.msk.f32.mxu0 %vm493_vm1, %v4127_v2  ;;  %v24175_v2 = vld [vmem:[#allocation63_spill] sm:$0xff]  ;;  %5918 = vperm.xlu0 %19624, %v697_v0   ;;  %v938_v0 = vld [vmem:[#allocation2 + $0xef] sm:$0xff] }
 0x1f8   : > { %17052 = vmatprep.mubr.msk.f32.mxu1 %vm493_vm1, %v24175_v2  ;;  %5923 = vperm.xlu1 %19625, %v698_v58   ;;  %v24189_v2 = vld [vmem:[#allocation31_spill] sm:$0xff]  ;;  %v24190_v58 = vld [vmem:[#allocation32_spill] sm:$0xff] }
 0x1f9   : > { %17053 = vmatmul.mubr.msk.f32.gmra.mrb[42].mxu1 %vm493_vm1, %v24177_v31  ;;  %v709_v31 = vld [vmem:[%s23869_s9 + $0xb0] sm:$0xff] }
 0x1fa   : > { %17455 = vmatmul.mubr.msk.f32.gmra.mrb[14].mxu0 %vm493_vm1, %v24154_v21  ;;  %v24176_v21 = vld [vmem:[#allocation20_spill] sm:$0xff]  ;;  %17055 = vmatprep.mubr.msk.f32.mxu1 %vm493_vm1, %v24179_v5  ;;  %v24191_v5 = vld [vmem:[#allocation33_spill] sm:$0xff] }
 0x1fb   : > { %17457 = vmatprep.mubr.msk.f32.mxu0 %vm493_vm1, %v24156_v52  ;;  %v24178_v52 = vld [vmem:[#allocation21_spill] sm:$0xff] }
 0x1fd   : > { %17056 = vmatmul.mubr.msk.f32.gmra.mrb[44].mxu1 %vm493_vm1, %v20636_v62  ;;  %v24183_v62 = vld [vmem:[#allocation25_spill] sm:$0xff] }
 0x1fe   : > { %17458 = vmatmul.mubr.msk.f32.gmra.mrb[16].mxu0 %vm493_vm1, %v24158_v10  ;;  %v699_v10 = vld [vmem:[%s23869_s9 + $0x60] sm:$0xff]  ;;  %17058 = vmatprep.mubr.msk.f32.mxu1 %vm493_vm1, %v20642_v61 }
 0x1ff   : > { %17460 = vmatprep.mubr.msk.f32.mxu0 %vm493_vm1, %v24160_v8  ;;  %5928 = vperm.xlu0 %19624, %v699_v10   ;;  %v24181_v8 = vld [vmem:[#allocation23_spill] sm:$0xff]  ;;  %v933_v61 = vld [vmem:[#allocation2 + $0xc7] sm:$0xff] }
 0x200   : > { %v940_v10 = vld [vmem:[#allocation2 + $0xff] sm:$0xff] }
 0x201   : > { %17059 = vmatmul.mubr.msk.f32.gmra.mrb[46].mxu1 %vm493_vm1, %v20644_v60  ;;  %v24185_v60 = vld [vmem:[#allocation27_spill] sm:$0xff] }
 0x202   : > { %17461 = vmatmul.mubr.msk.f32.gmra.mrb[18].mxu0 %vm493_vm1, %v24162_v20  ;;  %v700_v20 = vld [vmem:[%s23869_s9 + $0x68] sm:$0xff]  ;;  %17099 = vmatprep.mubr.msk.f32.mxu1 %vm493_vm1, %v933_v61  ;;  %v943_v61 = vld [vmem:[#allocation2 + $0x117] sm:$0xff] }
 0x203   : > { %17463 = vmatprep.mubr.msk.f32.mxu0 %vm493_vm1, %v24164_v14  ;;  %5933 = vperm.xlu1 %19625, %v700_v20   ;;  %v702_v14 = vld [vmem:[%s23869_s9 + $0x78] sm:$0xff]  ;;  %v941_v20 = vld [vmem:[#allocation2 + $0x107] sm:$0xff] }
 0x204   : > { %5938 = vperm.xlu0 %19624, %v701_v11   ;;  %v24192_v11 = vld [vmem:[#allocation34_spill] sm:$0xff] }
 0x205   : > { %17100 = vmatmul.mubr.msk.f32.vlgmr.msra.gmra.mrb[24].mxu1 %vm493_vm1, %v934_v17  ;;  %v944_v17 = vld [vmem:[#allocation2 + $0x11f] sm:$0xff] }
 0x206   : > { %17464 = vmatmul.mubr.msk.f32.gmra.mrb[20].mxu0 %vm493_vm1, %v24166_v15  ;;  %v703_v15 = vld [vmem:[%s23869_s9 + $0x80] sm:$0xff] }
 0x207   : > { %17466 = vmatprep.mubr.msk.f32.mxu0 %vm493_vm1, %v24168_v23  ;;  %5943 = vperm.xlu1 %19625, %v702_v14   ;;  %v704_v23 = vld [vmem:[%s23869_s9 + $0x88] sm:$0xff] }
 0x208   : > { %5948 = vperm.xlu0 %19624, %v703_v15   ;;  %v712_v14 = vld [vmem:[%s23869_s9 + $0xc8] sm:$0xff]  ;;  %v713_v15 = vld [vmem:[%s23869_s9 + $0xd0] sm:$0xff] }
 0x20a   : > { %17467 = vmatmul.mubr.msk.f32.gmra.mrb[22].mxu0 %vm493_vm1, %v24170_v27  ;;  %v935_v27 = vld [vmem:[#allocation2 + $0xd7] sm:$0xff] }
 0x20b   : > { %17469 = vmatprep.mubr.msk.f32.mxu0 %vm493_vm1, %v24172_v4  ;;  %5953 = vperm.xlu1 %19625, %v704_v23   ;;  %v706_v4 = vld [vmem:[%s23869_s9 + $0x98] sm:$0xff] }
 0x20c   : > { %5958 = vperm.xlu0 %19624, %v705_v24   ;;  %17102 = vmatprep.mubr.msk.f32.mxu1 %vm493_vm1, %v935_v27  ;;  %v714_v23 = vld [vmem:[%s23869_s9 + $0xd8] sm:$0xff]  ;;  %v715_v24 = vld [vmem:[%s23869_s9 + $0xe0] sm:$0xff] }
 0x20d   : > { %17103 = vmatmul.mubr.msk.f32.gmra.mrb[26].mxu1 %vm493_vm1, %v936_v32  ;;  %v945_v27 = vld [vmem:[#allocation2 + $0x127] sm:$0xff]  ;;  %v4158_v32 = vld [vmem:[#allocation2 + $0x19f] sm:$0xff] }
 0x20e   : > { %17470 = vmatmul.mubr.msk.f32.gmra.mrb[24].mxu0 %vm493_vm1, %v24174_v43  ;;  %v937_v43 = vld [vmem:[#allocation2 + $0xe7] sm:$0xff] }
 0x20f   : > { %17472 = vmatprep.mubr.msk.f32.mxu0 %vm493_vm1, %v24176_v21  ;;  %5963 = vperm.xlu1 %19625, %v706_v4   ;;  %v708_v21 = vld [vmem:[%s23869_s9 + $0xa8] sm:$0xff] }
 0x210   : > { %5968 = vperm.xlu0 %19624, %v707_v40   ;;  %17105 = vmatprep.mubr.msk.f32.mxu1 %vm493_vm1, %v937_v43  ;;  %v4159_v4 = vld [vmem:[#allocation2 + $0x1a7] sm:$0xff]  ;;  %v717_v43 = vld [vmem:[%s23869_s9 + $0xf0] sm:$0xff] }
 0x211   : > { %17106 = vmatmul.mubr.msk.f32.gmra.mrb[28].mxu1 %vm493_vm1, %v938_v0  ;;  %v716_v40 = vld [vmem:[%s23869_s9 + $0xe8] sm:$0xff] }
 0x212   : > { %17473 = vmatmul.mubr.msk.f32.gmra.mrb[26].mxu0 %vm493_vm1, %v24178_v52  ;;  %v939_v52 = vld [vmem:[#allocation2 + $0xf7] sm:$0xff]  ;;  %v4160_v0 = vld [vmem:[#allocation2 + $0x1af] sm:$0xff] }
 0x213   : > { %17475 = vmatprep.mubr.msk.f32.mxu0 %vm493_vm1, %v24180_v6  ;;  %5973 = vperm.xlu1 %19625, %v708_v21   ;;  %v710_v6 = vld [vmem:[%s23869_s9 + $0xb8] sm:$0xff] }
 0x214   : > { %5978 = vperm.xlu0 %19624, %v709_v31   ;;  %17108 = vmatprep.mubr.msk.f32.mxu1 %vm493_vm1, %v939_v52  ;;  %v718_v21 = vld [vmem:[%s23869_s9 + $0xf8] sm:$0xff]  ;;  %v719_v31 = vld [vmem:[%s23869_s9 + $0x100] sm:$0xff] }
 0x215   : > { %17109 = vmatmul.mubr.msk.f32.gmra.mrb[30].mxu1 %vm493_vm1, %v940_v10  ;;  %v949_v52 = vld [vmem:[#allocation2 + $0x147] sm:$0xff] }
 0x216   : > { %17476 = vmatmul.mubr.msk.f32.gmra.mrb[28].mxu0 %vm493_vm1, %v24181_v8  ;;  %v711_v8 = vld [vmem:[%s23869_s9 + $0xc0] sm:$0xff]  ;;  %17111 = vmatprep.mubr.msk.f32.mxu1 %vm493_vm1, %v941_v20  ;;  %v720_v10 = vld [vmem:[%s23869_s9 + $0x108] sm:$0xff]  ;;  %v725_v20 = vld [vmem:[%s23869_s9 + $0x130] sm:$0xff] }
 0x217   : > { %17478 = vmatprep.mubr.msk.f32.mxu0 %vm493_vm1, %v24182_v12  ;;  %5983 = vperm.xlu1 %19625, %v710_v6   ;;  %v942_v12 = vld [vmem:[#allocation2 + $0x10f] sm:$0xff]  ;;  %v951_v6 = vld [vmem:[#allocation2 + $0x157] sm:$0xff] }
 0x218   : > { %5988 = vperm.xlu0 %19624, %v711_v8   ;;  %v953_v8 = vld [vmem:[#allocation2 + $0x167] sm:$0xff] }
 0x219   : > { %17112 = vmatmul.mubr.msk.f32.gmra.mrb[32].mxu1 %vm493_vm1, %v942_v12  ;;  %v727_v12 = vld [vmem:[%s23869_s9 + $0x140] sm:$0xff] }
 0x21a   : > { %17479 = vmatmul.mubr.msk.f32.gmra.mrb[30].mxu0 %vm493_vm1, %v24183_v62  ;;  %v24193_v62 = vld [vmem:[#allocation35_spill] sm:$0xff]  ;;  %17114 = vmatprep.mubr.msk.f32.mxu1 %vm493_vm1, %v943_v61  ;;  %v19633_v61 = vld [vmem:[#allocation2 + $0x170] sm:$0xff] }
 0x21b   : > { %17481 = vmatprep.mubr.msk.f32.mxu0 %vm493_vm1, %v24184_v16  ;;  %v24194_v16 = vld [vmem:[#allocation36_spill] sm:$0xff]  ;;  %5993 = vperm.xlu1 %19625, %v712_v14  }
 0x21c   : > { %5998 = vperm.xlu0 %19624, %v713_v15   ;;  %v19631_v14 = vld [vmem:[#allocation2 + $0x160] sm:$0xff]  ;;  %v19632_v15 = vld [vmem:[#allocation2 + $0x168] sm:$0xff] }
 0x21d   : > { %17115 = vmatmul.mubr.msk.f32.gmra.mrb[34].mxu1 %vm493_vm1, %v944_v17  ;;  %v19635_v17 = vld [vmem:[#allocation2 + $0x180] sm:$0xff] }
 0x21e   : > { %17482 = vmatmul.mubr.msk.f32.gmra.mrb[32].mxu0 %vm493_vm1, %v24185_v60  ;;  %v24195_v60 = vld [vmem:[#allocation37_spill] sm:$0xff]  ;;  %17117 = vmatprep.mubr.msk.f32.mxu1 %vm493_vm1, %v945_v27  ;;  %v19637_v27 = vld [vmem:[#allocation2 + $0x190] sm:$0xff] }
 0x21f   : > { %17484 = vmatprep.mubr.msk.f32.mxu0 %vm493_vm1, %v24186_v28  ;;  %v24196_v28 = vld [vmem:[#allocation38_spill] sm:$0xff]  ;;  %6003 = vperm.xlu1 %19625, %v714_v23  }
 0x220   : > { %6008 = vperm.xlu0 %19624, %v715_v24  }
 0x222   : > { %17485 = vmatmul.mubr.msk.f32.gmra.mrb[34].mxu0 %vm493_vm1, %v24187_v35  ;;  %v946_v35 = vld [vmem:[#allocation2 + $0x12f] sm:$0xff] }
 0x223   : > { %17487 = vmatprep.mubr.msk.f32.mxu0 %vm493_vm1, %v24188_v44  ;;  %17118 = vmatmul.mubr.msk.f32.gmra.mrb[36].mxu1 %vm493_vm1, %v946_v35  ;;  %v947_v44 = vld [vmem:[#allocation2 + $0x137] sm:$0xff]  ;;  %v4709_v35 = vld [vmem:[#allocation2 + $0x1a8] sm:$0xff] }
 0x224   : > { %6013 = vperm.xlu1 %19625, %v716_v40   ;;  %6018 = vperm.xlu0 %19624, %v717_v43   ;;  %v4710_v43 = vld [vmem:[#allocation2 + $0x1b0] sm:$0xff] }
 0x225   : > { %17120 = vmatprep.mubr.msk.f32.mxu1 %vm493_vm1, %v947_v44  ;;  %v5213_v44 = vld [vmem:[#allocation2 + $0x39] sm:$0xff] }
 0x226   : > { %17488 = vmatmul.mubr.msk.f32.gmra.mrb[36].mxu0 %vm493_vm1, %v24189_v2  ;;  %v948_v2 = vld [vmem:[#allocation2 + $0x13f] sm:$0xff] }
 0x227   : > { %17490 = vmatprep.mubr.msk.f32.mxu0 %vm493_vm1, %v24190_v58  ;;  %17121 = vmatmul.mubr.msk.f32.gmra.mrb[38].mxu1 %vm493_vm1, %v948_v2  ;;  %v950_v58 = vld [vmem:[#allocation2 + $0x14f] sm:$0xff] }
 0x228   : > { %6023 = vperm.xlu1 %19625, %v718_v21   ;;  %6028 = vperm.xlu0 %19624, %v719_v31   ;;  %v5214_v21 = vld [vmem:[#allocation2 + $0x41] sm:$0xff]  ;;  %v5215_v31 = vld [vmem:[#allocation2 + $0x49] sm:$0xff] }
 0x229   : > { %17123 = vmatprep.mubr.msk.f32.mxu1 %vm493_vm1, %v949_v52 }
 0x22a   : > { %17491 = vmatmul.mubr.msk.f32.gmra.mrb[38].mxu0 %vm493_vm1, %v24191_v5  ;;  %v721_v5 = vld [vmem:[%s23869_s9 + $0x110] sm:$0xff] }
 0x22b   : > { %17493 = vmatprep.mubr.msk.f32.mxu0 %vm493_vm1, %v24192_v11  ;;  %17124 = vmatmul.mubr.msk.f32.gmra.mrb[40].mxu1 %vm493_vm1, %v950_v58  ;;  %v955_v11 = vld [vmem:[#allocation2 + $0x177] sm:$0xff] }
 0x22c   : > { %6033 = vperm.xlu1 %19625, %v720_v10   ;;  %6038 = vperm.xlu0 %19624, %v721_v5   ;;  %v5216_v10 = vld [vmem:[#allocation2 + $0x51] sm:$0xff]  ;;  %v5217_v5 = vld [vmem:[#allocation2 + $0x59] sm:$0xff] }
 0x22d   : > { %17126 = vmatprep.mubr.msk.f32.mxu1 %vm493_vm1, %v951_v6 }
 0x22e   : > { %17494 = vmatmul.mubr.msk.f32.gmra.mrb[40].mxu0 %vm493_vm1, %v24193_v62  ;;  %v19630_v62 = vld [vmem:[#allocation2 + $0x158] sm:$0xff] }
 0x22f   : > { %17496 = vmatprep.mubr.msk.f32.mxu0 %vm493_vm1, %v24194_v16  ;;  %v19634_v16 = vld [vmem:[#allocation2 + $0x178] sm:$0xff] }
 0x232   : > { %17497 = vmatmul.mubr.msk.f32.gmra.mrb[42].mxu0 %vm493_vm1, %v24195_v60  ;;  %v19636_v60 = vld [vmem:[#allocation2 + $0x188] sm:$0xff] }
 0x233   : > { %17499 = vmatprep.mubr.msk.f32.mxu0 %vm493_vm1, %v24196_v28  ;;  %v19638_v28 = vld [vmem:[#allocation2 + $0x198] sm:$0xff] }
 0x236   : > { %17500 = vmatmul.mubr.msk.f32.gmra.mrb[44].mxu0 %vm493_vm1, %v4158_v32  ;;  %v4708_v32 = vld [vmem:[#allocation2 + $0x1a0] sm:$0xff] }
 0x237   : > { %17502 = vmatprep.mubr.msk.f32.mxu0 %vm493_vm1, %v4159_v4 }
 0x23a   : > { %17503 = vmatmul.mubr.msk.f32.gmra.mrb[46].mxu0 %vm493_vm1, %v4160_v0 }
 0x23b   : > { %17507 = vmatprep.mubr.msk.f32.mxu0 %vm493_vm1, %v20473_v56  ;;  %v952_v56 = vld [vmem:[#allocation2 + $0x15f] sm:$0xff] }
 0x23c   : > { %17127 = vmatmul.mubr.msk.f32.gmra.mrb[42].mxu1 %vm493_vm1, %v952_v56 }
 0x23d   : > { %17129 = vmatprep.mubr.msk.f32.mxu1 %vm493_vm1, %v953_v8 }
 0x23e   : > { %17508 = vmatmul.mubr.msk.f32.vlgmr.msra.gmra.mrb[0].mxu0 %vm493_vm1, %v20477_v55  ;;  %v722_v55 = vld [vmem:[%s23869_s9 + $0x118] sm:$0xff] }
 0x23f   : > { %17510 = vmatprep.mubr.msk.f32.mxu0 %vm493_vm1, %v20483_v57  ;;  %17580 = vmatpush3.msk.msra.mxu0 %vm1152_vm0, %v20823_v3  ;;  %v723_v57 = vld [vmem:[%s23869_s9 + $0x120] sm:$0xff]  ;;  %v954_v3 = vld [vmem:[#allocation2 + $0x16f] sm:$0xff] }
 0x240   : > { %6043 = vperm.xlu1 %19625, %v722_v55   ;;  %6048 = vperm.xlu0 %19624, %v723_v57   ;;  %v5218_v55 = vld [vmem:[#allocation2 + $0x61] sm:$0xff]  ;;  %v5219_v57 = vld [vmem:[#allocation2 + $0x69] sm:$0xff] }
 0x241   : > { %17130 = vmatmul.mubr.msk.f32.gmra.mrb[44].mxu1 %vm493_vm1, %v954_v3 }
 0x242   : > { %17511 = vmatmul.mubr.msk.f32.gmra.mrb[2].mxu0 %vm493_vm1, %v20485_v54  ;;  %v724_v54 = vld [vmem:[%s23869_s9 + $0x128] sm:$0xff]  ;;  %17132 = vmatprep.mubr.msk.f32.mxu1 %vm493_vm1, %v955_v11 }
 0x243   : > { %17513 = vmatprep.mubr.msk.f32.mxu0 %vm493_vm1, %v20491_v53  ;;  %v956_v53 = vld [vmem:[#allocation2 + $0x17f] sm:$0xff] }
 0x244   : > { %6053 = vperm.xlu1 %19625, %v724_v54   ;;  %6058 = vperm.xlu0 %19624, %v725_v20   ;;  %v5220_v54 = vld [vmem:[#allocation2 + $0x71] sm:$0xff]  ;;  %v5221_v20 = vld [vmem:[#allocation2 + $0x79] sm:$0xff] }
 0x245   : > { %17133 = vmatmul.mubr.msk.f32.gmra.mrb[46].mxu1 %vm493_vm1, %v956_v53 }
 0x246   : > { %17514 = vmatmul.mubr.msk.f32.gmra.mrb[4].mxu0 %vm493_vm1, %v20493_v19  ;;  %v726_v19 = vld [vmem:[%s23869_s9 + $0x138] sm:$0xff] }
 0x247   : > { %17516 = vmatprep.mubr.msk.f32.mxu0 %vm493_vm1, %v20504_v51  ;;  %v729_v51 = vld [vmem:[%s23869_s9 + $0x150] sm:$0xff] }
 0x248   : > { %6063 = vperm.xlu1 %19625, %v726_v19   ;;  %6068 = vperm.xlu0 %19624, %v727_v12   ;;  %v5222_v19 = vld [vmem:[#allocation2 + $0x81] sm:$0xff]  ;;  %v5223_v12 = vld [vmem:[#allocation2 + $0x89] sm:$0xff] }
 0x24a   : > { %17517 = vmatmul.mubr.msk.f32.gmra.mrb[6].mxu0 %vm493_vm1, %v20508_v50  ;;  %v728_v50 = vld [vmem:[%s23869_s9 + $0x148] sm:$0xff] }
 0x24b   : > { %17519 = vmatprep.mubr.msk.f32.mxu0 %vm493_vm1, %v20514_v49  ;;  %v731_v49 = vld [vmem:[%s23869_s9 + $0x160] sm:$0xff] }
 0x24c   : > { %6073 = vperm.xlu1 %19625, %v728_v50   ;;  %6078 = vperm.xlu0 %19624, %v729_v51  }
 0x24e   : > { %17520 = vmatmul.mubr.msk.f32.gmra.mrb[8].mxu0 %vm493_vm1, %v20516_v48  ;;  %v730_v48 = vld [vmem:[%s23869_s9 + $0x158] sm:$0xff] }
 0x24f   : > { %17522 = vmatprep.mubr.msk.f32.mxu0 %vm493_vm1, %v20522_v47  ;;  %v733_v47 = vld [vmem:[%s23869_s9 + $0x170] sm:$0xff] }
 0x250   : > { %6083 = vperm.xlu1 %19625, %v730_v48   ;;  %6088 = vperm.xlu0 %19624, %v731_v49   ;;  %v5224_v48 = vld [vmem:[#allocation2 + $0x91] sm:$0xff]  ;;  %v5225_v49 = vld [vmem:[#allocation2 + $0x99] sm:$0xff] }
 0x252   : > { %17523 = vmatmul.mubr.msk.f32.gmra.mrb[10].mxu0 %vm493_vm1, %v20524_v45  ;;  %v732_v45 = vld [vmem:[%s23869_s9 + $0x168] sm:$0xff] }
 0x253   : > { %17525 = vmatprep.mubr.msk.f32.mxu0 %vm493_vm1, %v24140_v22  ;;  %v734_v22 = vld [vmem:[%s23869_s9 + $0x178] sm:$0xff] }
 0x254   : > { %6093 = vperm.xlu1 %19625, %v732_v45   ;;  %6098 = vperm.xlu0 %19624, %v733_v47  }
 0x256   : > { %17526 = vmatmul.mubr.msk.f32.gmra.mrb[12].mxu0 %vm493_vm1, %v24141_v25  ;;  %v735_v25 = vld [vmem:[%s23870_s10] sm:$0xff]  ;;  %v21462_v23 = vpop.f32.mrb[0].mxu1 }
 0x257   : > { %17528 = vmatprep.mubr.msk.f32.mxu0 %vm493_vm1, %v24142_v26  ;;  %v736_v26 = vld [vmem:[%s23870_s10 + $0x8] sm:$0xff]  ;;  %v21464_v24 = vpop.f32.mrb[1].mxu1 }
 0x258   : > { %6103 = vperm.xlu1 %19625, %v734_v22   ;;  %14565 = vperm.xlu0 %19624, %v735_v25   ;;  %v5226_v22 = vld [vmem:[#allocation2 + $0xa1] sm:$0xff]  ;;  %v5227_v25 = vld [vmem:[#allocation2 + $0xa9] sm:$0xff] }
 0x25a   : > { %17529 = vmatmul.mubr.msk.f32.gmra.mrb[14].mxu0 %vm493_vm1, %v24143_v29  ;;  %v737_v29 = vld [vmem:[%s23870_s10 + $0x10] sm:$0xff] }
 0x25b   : > { %17531 = vmatprep.mubr.msk.f32.mxu0 %vm493_vm1, %v24144_v30  ;;  %v738_v30 = vld [vmem:[%s23870_s10 + $0x18] sm:$0xff]  ;;  %v21468_v4 = vpop.f32.mrb[2].mxu1 }
 0x25c   : > { %14570 = vperm.xlu1 %19625, %v736_v26   ;;  %14575 = vperm.xlu0 %19624, %v737_v29   ;;  %v21470_v40 = vpop.f32.mrb[3].mxu1 }
 0x25e   : > { %17532 = vmatmul.mubr.msk.f32.gmra.mrb[16].mxu0 %vm493_vm1, %v24145_v38  ;;  %v739_v38 = vld [vmem:[%s23870_s10 + $0x20] sm:$0xff] }
 0x25f   : > { %17534 = vmatprep.mubr.msk.f32.mxu0 %vm493_vm1, %v24146_v39  ;;  %v740_v39 = vld [vmem:[%s23870_s10 + $0x28] sm:$0xff]  ;;  %v21474_v0 = vpop.f32.mrb[4].mxu1 }
 0x260   : > { %14580 = vperm.xlu1 %19625, %v738_v30   ;;  %14585 = vperm.xlu0 %19624, %v739_v38   ;;  %v21476_v2 = vpop.f32.mrb[5].mxu1  ;;  %v5228_v30 = vld [vmem:[#allocation2 + $0xb1] sm:$0xff]  ;;  %v5229_v38 = vld [vmem:[#allocation2 + $0xb9] sm:$0xff] }
 0x262   : > { %17535 = vmatmul.mubr.msk.f32.gmra.mrb[18].mxu0 %vm493_vm1, %v24147_v41  ;;  %v741_v41 = vld [vmem:[%s23870_s10 + $0x30] sm:$0xff] }
 0x263   : > { %17537 = vmatprep.mubr.msk.f32.mxu0 %vm493_vm1, %v24148_v42  ;;  %v742_v42 = vld [vmem:[%s23870_s10 + $0x38] sm:$0xff]  ;;  %v21480_v52 = vpop.f32.mrb[6].mxu1 }
 0x264   : > { %14590 = vperm.xlu1 %19625, %v740_v39   ;;  %14595 = vperm.xlu0 %19624, %v741_v41   ;;  %v21482_v58 = vpop.f32.mrb[7].mxu1 }
 0x266   : > { %17538 = vmatmul.mubr.msk.f32.gmra.mrb[20].mxu0 %vm493_vm1, %v24149_v46  ;;  %v743_v46 = vld [vmem:[%s23870_s10 + $0x40] sm:$0xff] }
 0x267   : > { %17540 = vmatprep.mubr.msk.f32.mxu0 %vm493_vm1, %v24150_v63  ;;  %v744_v63 = vld [vmem:[%s23870_s10 + $0x48] sm:$0xff]  ;;  %v21486_v6 = vpop.f32.mrb[8].mxu1 }
 0x268   : > { %14600 = vperm.xlu1 %19625, %v742_v42   ;;  %14605 = vperm.xlu0 %19624, %v743_v46   ;;  %v21488_v56 = vpop.f32.mrb[9].mxu1  ;;  %v5230_v42 = vld [vmem:[#allocation2 + $0xc1] sm:$0xff]  ;;  %v5231_v46 = vld [vmem:[#allocation2 + $0xc9] sm:$0xff] }
 0x26a   : > { %17541 = vmatmul.mubr.msk.f32.gmra.mrb[22].mxu0 %vm493_vm1, %v24151_v33  ;;  %v745_v33 = vld [vmem:[%s23870_s10 + $0x50] sm:$0xff] }
 0x26b   : > { %17543 = vmatprep.mubr.msk.f32.mxu0 %vm493_vm1, %v24152_v34  ;;  %v746_v34 = vld [vmem:[%s23870_s10 + $0x58] sm:$0xff]  ;;  %v21492_v8 = vpop.f32.mrb[10].mxu1 }
 0x26c   : > { %14610 = vperm.xlu1 %19625, %v744_v63   ;;  %14615 = vperm.xlu0 %19624, %v745_v33   ;;  %v21494_v3 = vpop.f32.mrb[11].mxu1 }
 0x26e   : > { %17544 = vmatmul.mubr.msk.f32.gmra.mrb[24].mxu0 %vm493_vm1, %v24153_v37  ;;  %v747_v37 = vld [vmem:[%s23870_s10 + $0x60] sm:$0xff] }
 0x26f   : > { %17546 = vmatprep.mubr.msk.f32.mxu0 %vm493_vm1, %v24155_v36  ;;  %v748_v36 = vld [vmem:[%s23870_s10 + $0x68] sm:$0xff]  ;;  %v21498_v11 = vpop.f32.mrb[12].mxu1 }
 0x270   : > { %14620 = vperm.xlu1 %19625, %v746_v34   ;;  %14625 = vperm.xlu0 %19624, %v747_v37   ;;  %v21500_v53 = vpop.f32.mrb[13].mxu1  ;;  %v5232_v34 = vld [vmem:[#allocation2 + $0xd1] sm:$0xff]  ;;  %v5233_v37 = vld [vmem:[#allocation2 + $0xd9] sm:$0xff] }
 0x272   : > { %17547 = vmatmul.mubr.msk.f32.gmra.mrb[26].mxu0 %vm493_vm1, %v24157_v59  ;;  %v749_v59 = vld [vmem:[%s23870_s10 + $0x70] sm:$0xff] }
 0x273   : > { %17549 = vmatprep.mubr.msk.f32.mxu0 %vm493_vm1, %v24159_v7  ;;  %v21227_v7 = vld [vmem:[%s23870_s10 + $0x78] sm:$0xff]  ;;  %v21504_v50 = vpop.f32.mrb[14].mxu1 }
 0x274   : > { %14630 = vperm.xlu1 %19625, %v748_v36   ;;  %14635 = vperm.xlu0 %19624, %v749_v59   ;;  %v21506_v51 = vpop.f32.mrb[15].mxu1  ;;  %v5234_v36 = vld [vmem:[#allocation2 + $0xe1] sm:$0xff]  ;;  %v5235_v59 = vld [vmem:[#allocation2 + $0xe9] sm:$0xff] }
 0x276   : > { %17550 = vmatmul.mubr.msk.f32.gmra.mrb[28].mxu0 %vm493_vm1, %v24161_v9  ;;  %v24197_v9 = vmov 0.0  }
 0x277   : > { %17552 = vmatprep.mubr.msk.f32.mxu0 %vm493_vm1, %v24163_v13  ;;  %556 = vst.msk [vmem:[#allocation3 + $0x28] sm:$0xff] %vm550_vm2, %v24197_v9  ;;  %551 = vst.msk [vmem:[#allocation3] sm:$0xff] %vm550_vm2, %v24197_v9  ;;  %v19627_v13 = vld [vmem:[#allocation2 + $0x140] sm:$0xff]  ;;  %v21510_v45 = vpop.f32.mrb[16].mxu1 }
 0x278   : > { %552 = vst.msk [vmem:[#allocation3 + $0x8] sm:$0xff] %vm550_vm2, %v24197_v9  ;;  %553 = vst.msk [vmem:[#allocation3 + $0x10] sm:$0xff] %vm550_vm2, %v24197_v9  ;;  %14640 = vperm.xlu1 %19625, %v21227_v7   ;;  %v21512_v47 = vpop.f32.mrb[17].mxu1  ;;  %v5236_v7 = vld [vmem:[#allocation2 + $0xf1] sm:$0xff] }
 0x279   : > { %554 = vst.msk [vmem:[#allocation3 + $0x18] sm:$0xff] %vm550_vm2, %v24197_v9  ;;  %555 = vst.msk [vmem:[#allocation3 + $0x20] sm:$0xff] %vm550_vm2, %v24197_v9 }
 0x27a   : > { %17553 = vmatmul.mubr.msk.f32.gmra.mrb[30].mxu0 %vm493_vm1, %v24165_v1  ;;  %557 = vst.msk [vmem:[#allocation3 + $0x30] sm:$0xff] %vm550_vm2, %v24197_v9  ;;  %558 = vst.msk [vmem:[#allocation3 + $0x38] sm:$0xff] %vm550_vm2, %v24197_v9  ;;  %v19628_v1 = vld [vmem:[#allocation2 + $0x148] sm:$0xff] }
 0x27b   : > { %17555 = vmatprep.mubr.msk.f32.mxu0 %vm493_vm1, %v24167_v18  ;;  %559 = vst.msk [vmem:[#allocation3 + $0x40] sm:$0xff] %vm550_vm2, %v24197_v9  ;;  %560 = vst.msk [vmem:[#allocation3 + $0x48] sm:$0xff] %vm550_vm2, %v24197_v9  ;;  %v19629_v18 = vld [vmem:[#allocation2 + $0x150] sm:$0xff]  ;;  %v21516_v26 = vpop.f32.mrb[18].mxu1 }
 0x27c   : > { %561 = vst.msk [vmem:[#allocation3 + $0x50] sm:$0xff] %vm550_vm2, %v24197_v9  ;;  %562 = vst.msk [vmem:[#allocation3 + $0x58] sm:$0xff] %vm550_vm2, %v24197_v9  ;;  %v21518_v29 = vpop.f32.mrb[19].mxu1 }
 0x27d   : > { %563 = vst.msk [vmem:[#allocation3 + $0x60] sm:$0xff] %vm550_vm2, %v24197_v9  ;;  %564 = vst.msk [vmem:[#allocation3 + $0x68] sm:$0xff] %vm550_vm2, %v24197_v9 }
 0x27e   : > { %565 = vst.msk [vmem:[#allocation3 + $0x70] sm:$0xff] %vm550_vm2, %v24197_v9  ;;  %566 = vst.msk [vmem:[#allocation3 + $0x78] sm:$0xff] %vm550_vm2, %v24197_v9  ;;  %17556 = vmatmul.mubr.msk.f32.gmra.mrb[32].mxu0 %vm493_vm1, %v19627_v13  ;;  %v5237_v13 = vld [vmem:[#allocation2 + $0xf9] sm:$0xff] }
 0x27f   : > { %567 = vst.msk [vmem:[#allocation3 + $0x80] sm:$0xff] %vm550_vm2, %v24197_v9  ;;  %568 = vst.msk [vmem:[#allocation3 + $0x88] sm:$0xff] %vm550_vm2, %v24197_v9  ;;  %17558 = vmatprep.mubr.msk.f32.mxu0 %vm493_vm1, %v19628_v1  ;;  %v21522_v39 = vpop.f32.mrb[20].mxu1  ;;  %v5238_v1 = vld [vmem:[#allocation2 + $0x101] sm:$0xff] }
 0x280   : > { %569 = vst.msk [vmem:[#allocation3 + $0x90] sm:$0xff] %vm550_vm2, %v24197_v9  ;;  %570 = vst.msk [vmem:[#allocation3 + $0x98] sm:$0xff] %vm550_vm2, %v24197_v9  ;;  %v21524_v41 = vpop.f32.mrb[21].mxu1 }
 0x281   : > { %571 = vst.msk [vmem:[#allocation3 + $0xa0] sm:$0xff] %vm550_vm2, %v24197_v9  ;;  %572 = vst.msk [vmem:[#allocation3 + $0xa8] sm:$0xff] %vm550_vm2, %v24197_v9 }
 0x282   : > { %573 = vst.msk [vmem:[#allocation3 + $0xb0] sm:$0xff] %vm550_vm2, %v24197_v9  ;;  %574 = vst.msk [vmem:[#allocation3 + $0xb8] sm:$0xff] %vm550_vm2, %v24197_v9  ;;  %17559 = vmatmul.mubr.msk.f32.gmra.mrb[34].mxu0 %vm493_vm1, %v19629_v18  ;;  %v5239_v18 = vld [vmem:[#allocation2 + $0x109] sm:$0xff] }
 0x283   : > { %575 = vst.msk [vmem:[#allocation3 + $0xc0] sm:$0xff] %vm550_vm2, %v24197_v9  ;;  %576 = vst.msk [vmem:[#allocation3 + $0xc8] sm:$0xff] %vm550_vm2, %v24197_v9  ;;  %17561 = vmatprep.mubr.msk.f32.mxu0 %vm493_vm1, %v19630_v62  ;;  %v21528_v63 = vpop.f32.mrb[22].mxu1  ;;  %v5240_v62 = vld [vmem:[#allocation2 + $0x111] sm:$0xff] }
 0x284   : > { %577 = vst.msk [vmem:[#allocation3 + $0xd0] sm:$0xff] %vm550_vm2, %v24197_v9  ;;  %578 = vst.msk [vmem:[#allocation3 + $0xd8] sm:$0xff] %vm550_vm2, %v24197_v9  ;;  %v21530_v33 = vpop.f32.mrb[23].mxu1 }
 0x285   : > { %579 = vst.msk [vmem:[#allocation3 + $0xe0] sm:$0xff] %vm550_vm2, %v24197_v9  ;;  %580 = vst.msk [vmem:[#allocation3 + $0xe8] sm:$0xff] %vm550_vm2, %v24197_v9 }
 0x286   : > { %581 = vst.msk [vmem:[#allocation3 + $0xf0] sm:$0xff] %vm550_vm2, %v24197_v9  ;;  %582 = vst.msk [vmem:[#allocation3 + $0xf8] sm:$0xff] %vm550_vm2, %v24197_v9  ;;  %17562 = vmatmul.mubr.msk.f32.gmra.mrb[36].mxu0 %vm493_vm1, %v19631_v14  ;;  %v5241_v14 = vld [vmem:[#allocation2 + $0x119] sm:$0xff] }
 0x287   : > { %583 = vst.msk [vmem:[#allocation3 + $0x100] sm:$0xff] %vm550_vm2, %v24197_v9  ;;  %584 = vst.msk [vmem:[#allocation3 + $0x108] sm:$0xff] %vm550_vm2, %v24197_v9  ;;  %17564 = vmatprep.mubr.msk.f32.mxu0 %vm493_vm1, %v19632_v15  ;;  %v5242_v15 = vld [vmem:[#allocation2 + $0x121] sm:$0xff] }
 0x288   : > { %585 = vst.msk [vmem:[#allocation3 + $0x110] sm:$0xff] %vm550_vm2, %v24197_v9  ;;  %586 = vst.msk [vmem:[#allocation3 + $0x118] sm:$0xff] %vm550_vm2, %v24197_v9 }
 0x289   : > { %587 = vst.msk [vmem:[#allocation3 + $0x120] sm:$0xff] %vm550_vm2, %v24197_v9  ;;  %588 = vst.msk [vmem:[#allocation3 + $0x128] sm:$0xff] %vm550_vm2, %v24197_v9 }
 0x28a   : > { %589 = vst.msk [vmem:[#allocation3 + $0x130] sm:$0xff] %vm550_vm2, %v24197_v9  ;;  %590 = vst.msk [vmem:[#allocation3 + $0x138] sm:$0xff] %vm550_vm2, %v24197_v9  ;;  %17565 = vmatmul.mubr.msk.f32.gmra.mrb[38].mxu0 %vm493_vm1, %v19633_v61  ;;  %v5243_v61 = vld [vmem:[#allocation2 + $0x129] sm:$0xff] }
 0x28b   : > { %591 = vst.msk [vmem:[#allocation3 + $0x140] sm:$0xff] %vm550_vm2, %v24197_v9  ;;  %592 = vst.msk [vmem:[#allocation3 + $0x148] sm:$0xff] %vm550_vm2, %v24197_v9  ;;  %17567 = vmatprep.mubr.msk.f32.mxu0 %vm493_vm1, %v19634_v16  ;;  %v5244_v16 = vld [vmem:[#allocation2 + $0x131] sm:$0xff] }
 0x28c   : > { %593 = vst.msk [vmem:[#allocation3 + $0x150] sm:$0xff] %vm550_vm2, %v24197_v9  ;;  %594 = vst.msk [vmem:[#allocation3 + $0x158] sm:$0xff] %vm550_vm2, %v24197_v9 }
 0x28d   : > { %595 = vst.msk [vmem:[#allocation3 + $0x160] sm:$0xff] %vm550_vm2, %v24197_v9  ;;  %596 = vst.msk [vmem:[#allocation3 + $0x168] sm:$0xff] %vm550_vm2, %v24197_v9 }
 0x28e   : > { %597 = vst.msk [vmem:[#allocation3 + $0x170] sm:$0xff] %vm550_vm2, %v24197_v9  ;;  %598 = vst.msk [vmem:[#allocation3 + $0x178] sm:$0xff] %vm550_vm2, %v24197_v9  ;;  %17568 = vmatmul.mubr.msk.f32.gmra.mrb[40].mxu0 %vm493_vm1, %v19635_v17  ;;  %v5245_v17 = vld [vmem:[#allocation2 + $0x139] sm:$0xff] }
 0x28f   : > { %599 = vst.msk [vmem:[#allocation3 + $0x180] sm:$0xff] %vm550_vm2, %v24197_v9  ;;  %600 = vst.msk [vmem:[#allocation3 + $0x188] sm:$0xff] %vm550_vm2, %v24197_v9  ;;  %17570 = vmatprep.mubr.msk.f32.mxu0 %vm493_vm1, %v19636_v60  ;;  %v5246_v60 = vld [vmem:[#allocation2 + $0x141] sm:$0xff] }
 0x290   : > { %601 = vst.msk [vmem:[#allocation3 + $0x190] sm:$0xff] %vm550_vm2, %v24197_v9  ;;  %602 = vst.msk [vmem:[#allocation3 + $0x198] sm:$0xff] %vm550_vm2, %v24197_v9 }
 0x291   : > { %603 = vst.msk [vmem:[#allocation3 + $0x1a0] sm:$0xff] %vm550_vm2, %v24197_v9  ;;  %604 = vst.msk [vmem:[#allocation3 + $0x1a8] sm:$0xff] %vm550_vm2, %v24197_v9 }
 0x292   : > { %605 = vst.msk [vmem:[#allocation3 + $0x1b0] sm:$0xff] %vm550_vm2, %v24197_v9  ;;  %606 = vst.msk [vmem:[#allocation3 + $0x1b8] sm:$0xff] %vm550_vm2, %v24197_v9  ;;  %17571 = vmatmul.mubr.msk.f32.gmra.mrb[42].mxu0 %vm493_vm1, %v19637_v27  ;;  %v5247_v27 = vld [vmem:[#allocation2 + $0x149] sm:$0xff] }
 0x293   : > { %611 = vst.msk [vmem:[#allocation4 + $0x20] sm:$0xff] %vm550_vm2, %v24197_v9  ;;  %612 = vst.msk [vmem:[#allocation4 + $0x28] sm:$0xff] %vm550_vm2, %v24197_v9  ;;  %17573 = vmatprep.mubr.msk.f32.mxu0 %vm493_vm1, %v19638_v28  ;;  %v5248_v28 = vld [vmem:[#allocation2 + $0x151] sm:$0xff] }
 0x294   : > { %614 = vst.msk [vmem:[#allocation4 + $0x38] sm:$0xff] %vm550_vm2, %v24197_v9  ;;  %615 = vst.msk [vmem:[#allocation4 + $0x40] sm:$0xff] %vm550_vm2, %v24197_v9 }
 0x295   : > { %617 = vst.msk [vmem:[#allocation4 + $0x50] sm:$0xff] %vm550_vm2, %v24197_v9  ;;  %618 = vst.msk [vmem:[#allocation4 + $0x58] sm:$0xff] %vm550_vm2, %v24197_v9 }
 0x296   : > { %620 = vst.msk [vmem:[#allocation4 + $0x68] sm:$0xff] %vm550_vm2, %v24197_v9  ;;  %621 = vst.msk [vmem:[#allocation4 + $0x70] sm:$0xff] %vm550_vm2, %v24197_v9  ;;  %17574 = vmatmul.mubr.msk.f32.gmra.mrb[44].mxu0 %vm493_vm1, %v4708_v32  ;;  %v5249_v32 = vld [vmem:[#allocation2 + $0x159] sm:$0xff] }
 0x297   : > { %623 = vst.msk [vmem:[#allocation4 + $0x80] sm:$0xff] %vm550_vm2, %v24197_v9  ;;  %624 = vst.msk [vmem:[#allocation4 + $0x88] sm:$0xff] %vm550_vm2, %v24197_v9  ;;  %17576 = vmatprep.mubr.msk.f32.mxu0 %vm493_vm1, %v4709_v35  ;;  %v5250_v35 = vld [vmem:[#allocation2 + $0x161] sm:$0xff] }
 0x298   : > { %626 = vst.msk [vmem:[#allocation4 + $0x98] sm:$0xff] %vm550_vm2, %v24197_v9  ;;  %627 = vst.msk [vmem:[#allocation4 + $0xa0] sm:$0xff] %vm550_vm2, %v24197_v9 }
 0x299   : > { %629 = vst.msk [vmem:[#allocation4 + $0xb0] sm:$0xff] %vm550_vm2, %v24197_v9  ;;  %630 = vst.msk [vmem:[#allocation4 + $0xb8] sm:$0xff] %vm550_vm2, %v24197_v9 }
 0x29a   : > { %632 = vst.msk [vmem:[#allocation4 + $0xc8] sm:$0xff] %vm550_vm2, %v24197_v9  ;;  %633 = vst.msk [vmem:[#allocation4 + $0xd0] sm:$0xff] %vm550_vm2, %v24197_v9  ;;  %17577 = vmatmul.mubr.msk.f32.gmra.mrb[46].mxu0 %vm493_vm1, %v4710_v43  ;;  %v5251_v43 = vld [vmem:[#allocation2 + $0x169] sm:$0xff] }
 0x29b   : > { %635 = vst.msk [vmem:[#allocation4 + $0xe0] sm:$0xff] %vm550_vm2, %v24197_v9  ;;  %636 = vst.msk [vmem:[#allocation4 + $0xe8] sm:$0xff] %vm550_vm2, %v24197_v9  ;;  %17581 = vmatprep.mubr.msk.f32.mxu0 %vm493_vm1, %v5213_v44  ;;  %v5252_v44 = vld [vmem:[#allocation2 + $0x171] sm:$0xff] }
 0x29c   : > { %638 = vst.msk [vmem:[#allocation4 + $0xf8] sm:$0xff] %vm550_vm2, %v24197_v9  ;;  %639 = vst.msk [vmem:[#allocation4 + $0x100] sm:$0xff] %vm550_vm2, %v24197_v9 }
 0x29d   : > { %641 = vst.msk [vmem:[#allocation4 + $0x110] sm:$0xff] %vm550_vm2, %v24197_v9  ;;  %642 = vst.msk [vmem:[#allocation4 + $0x118] sm:$0xff] %vm550_vm2, %v24197_v9 }
 0x29e   : > { %644 = vst.msk [vmem:[#allocation4 + $0x128] sm:$0xff] %vm550_vm2, %v24197_v9  ;;  %645 = vst.msk [vmem:[#allocation4 + $0x130] sm:$0xff] %vm550_vm2, %v24197_v9  ;;  %17582 = vmatmul.mubr.msk.f32.vlgmr.msra.gmra.mrb[0].mxu0 %vm493_vm1, %v5214_v21  ;;  %v5253_v21 = vld [vmem:[#allocation2 + $0x179] sm:$0xff] }
 0x29f   : > { %647 = vst.msk [vmem:[#allocation4 + $0x140] sm:$0xff] %vm550_vm2, %v24197_v9  ;;  %648 = vst.msk [vmem:[#allocation4 + $0x148] sm:$0xff] %vm550_vm2, %v24197_v9  ;;  %17584 = vmatprep.mubr.msk.f32.mxu0 %vm493_vm1, %v5215_v31  ;;  %v5254_v31 = vld [vmem:[#allocation2 + $0x181] sm:$0xff] }
 0x2a0   : > { %650 = vst.msk [vmem:[#allocation4 + $0x158] sm:$0xff] %vm550_vm2, %v24197_v9  ;;  %651 = vst.msk [vmem:[#allocation4 + $0x160] sm:$0xff] %vm550_vm2, %v24197_v9 }
 0x2a1   : > { %653 = vst.msk [vmem:[#allocation4 + $0x170] sm:$0xff] %vm550_vm2, %v24197_v9  ;;  %654 = vst.msk [vmem:[#allocation4 + $0x178] sm:$0xff] %vm550_vm2, %v24197_v9 }
 0x2a2   : > { %656 = vst.msk [vmem:[#allocation4 + $0x188] sm:$0xff] %vm550_vm2, %v24197_v9  ;;  %657 = vst.msk [vmem:[#allocation4 + $0x190] sm:$0xff] %vm550_vm2, %v24197_v9  ;;  %17585 = vmatmul.mubr.msk.f32.gmra.mrb[2].mxu0 %vm493_vm1, %v5216_v10  ;;  %v5255_v10 = vld [vmem:[#allocation2 + $0x189] sm:$0xff] }
 0x2a3   : > { %663 = vst.msk [vmem:[#allocation5] sm:$0xff] %vm550_vm2, %v24197_v9  ;;  %664 = vst.msk [vmem:[#allocation5 + $0x8] sm:$0xff] %vm550_vm2, %v24197_v9  ;;  %17587 = vmatprep.mubr.msk.f32.mxu0 %vm493_vm1, %v5217_v5  ;;  %v5256_v5 = vld [vmem:[#allocation2 + $0x191] sm:$0xff] }
 0x2a4   : > { %665 = vst.msk [vmem:[#allocation5 + $0x10] sm:$0xff] %vm550_vm2, %v24197_v9  ;;  %666 = vst.msk [vmem:[#allocation5 + $0x18] sm:$0xff] %vm550_vm2, %v24197_v9 }
 0x2a5   : > { %667 = vst.msk [vmem:[#allocation5 + $0x20] sm:$0xff] %vm550_vm2, %v24197_v9  ;;  %668 = vst.msk [vmem:[#allocation5 + $0x28] sm:$0xff] %vm550_vm2, %v24197_v9 }
 0x2a6   : > { %669 = vst.msk [vmem:[#allocation5 + $0x30] sm:$0xff] %vm550_vm2, %v24197_v9  ;;  %670 = vst.msk [vmem:[#allocation5 + $0x38] sm:$0xff] %vm550_vm2, %v24197_v9  ;;  %17588 = vmatmul.mubr.msk.f32.gmra.mrb[4].mxu0 %vm493_vm1, %v5218_v55  ;;  %v5257_v55 = vld [vmem:[#allocation2 + $0x199] sm:$0xff] }
 0x2a7   : > { %671 = vst.msk [vmem:[#allocation5 + $0x40] sm:$0xff] %vm550_vm2, %v24197_v9  ;;  %672 = vst.msk [vmem:[#allocation5 + $0x48] sm:$0xff] %vm550_vm2, %v24197_v9  ;;  %17590 = vmatprep.mubr.msk.f32.mxu0 %vm493_vm1, %v5219_v57 }
 0x2a8   : > { %673 = vst.msk [vmem:[#allocation5 + $0x50] sm:$0xff] %vm550_vm2, %v24197_v9  ;;  %674 = vst.msk [vmem:[#allocation5 + $0x58] sm:$0xff] %vm550_vm2, %v24197_v9 }
 0x2a9   : > { %675 = vst.msk [vmem:[#allocation5 + $0x60] sm:$0xff] %vm550_vm2, %v24197_v9  ;;  %676 = vst.msk [vmem:[#allocation5 + $0x68] sm:$0xff] %vm550_vm2, %v24197_v9 }
 0x2aa   : > { %677 = vst.msk [vmem:[#allocation5 + $0x70] sm:$0xff] %vm550_vm2, %v24197_v9  ;;  %678 = vst.msk [vmem:[#allocation5 + $0x78] sm:$0xff] %vm550_vm2, %v24197_v9  ;;  %17591 = vmatmul.mubr.msk.f32.gmra.mrb[6].mxu0 %vm493_vm1, %v5220_v54 }
 0x2ab   : > { %679 = vst.msk [vmem:[#allocation5 + $0x80] sm:$0xff] %vm550_vm2, %v24197_v9  ;;  %680 = vst.msk [vmem:[#allocation5 + $0x88] sm:$0xff] %vm550_vm2, %v24197_v9  ;;  %17593 = vmatprep.mubr.msk.f32.mxu0 %vm493_vm1, %v5221_v20  ;;  %v5258_v20 = vld [vmem:[#allocation2 + $0x1a1] sm:$0xff] }
 0x2ac   : > { %681 = vst.msk [vmem:[#allocation5 + $0x90] sm:$0xff] %vm550_vm2, %v24197_v9  ;;  %682 = vst.msk [vmem:[#allocation5 + $0x98] sm:$0xff] %vm550_vm2, %v24197_v9 }
 0x2ad   : > { %683 = vst.msk [vmem:[#allocation5 + $0xa0] sm:$0xff] %vm550_vm2, %v24197_v9  ;;  %684 = vst.msk [vmem:[#allocation5 + $0xa8] sm:$0xff] %vm550_vm2, %v24197_v9  ;;  %v21651_v9 = vld [vmem:[%s23864_s4] ss:$0 sm:$0xff] }
 0x2ae   : > { %17594 = vmatmul.mubr.msk.f32.gmra.mrb[8].mxu0 %vm493_vm1, %v5222_v19  ;;  %v5259_v19 = vld [vmem:[#allocation2 + $0x1a9] sm:$0xff] }
 0x2af   : > { %17596 = vmatprep.mubr.msk.f32.mxu0 %vm493_vm1, %v5223_v12 }
 0x2b2   : > { %17597 = vmatmul.mubr.msk.f32.gmra.mrb[10].mxu0 %vm493_vm1, %v5224_v48 }
 0x2b3   : > { %17599 = vmatprep.mubr.msk.f32.mxu0 %vm493_vm1, %v5225_v49  ;;  %v5260_v49 = vld [vmem:[#allocation2 + $0x1b1] sm:$0xff] }
 0x2b6   : > { %17600 = vmatmul.mubr.msk.f32.gmra.mrb[12].mxu0 %vm493_vm1, %v5226_v22 }
 0x2b7   : > { %17602 = vmatprep.mubr.msk.f32.mxu0 %vm493_vm1, %v5227_v25 }
 0x2ba   : > { %17603 = vmatmul.mubr.msk.f32.gmra.mrb[14].mxu0 %vm493_vm1, %v5228_v30  ;;  %v15290_v30 = vld [vmem:[%s23865_s5 + $0x8] sm:$0xff] }
 0x2bb   : > { %17605 = vmatprep.mubr.msk.f32.mxu0 %vm493_vm1, %v5229_v38  ;;  %17653 = vmatprep.subr.mxu1 %v15290_v30 }
 0x2bc   : > { %17654 = vmatpush3.msra.mxu1 %v15290_v30 }
 0x2be   : > { %17606 = vmatmul.mubr.msk.f32.gmra.mrb[16].mxu0 %vm493_vm1, %v5230_v42 }
 0x2bf   : > { %17608 = vmatprep.mubr.msk.f32.mxu0 %vm493_vm1, %v5231_v46  ;;  %v6299_v46 = vld [vmem:[#allocation3 + $0x8] sm:$0xff] }
 0x2c0   : > { %17655 = vmatprep.mubr.msk.f32.mxu1 %vm550_vm2, %v6299_v46 }
 0x2c2   : > { %17609 = vmatmul.mubr.msk.f32.gmra.mrb[18].mxu0 %vm493_vm1, %v5232_v34  ;;  %v6300_v34 = vld [vmem:[#allocation3 + $0x10] sm:$0xff] }
 0x2c3   : > { %17611 = vmatprep.mubr.msk.f32.mxu0 %vm493_vm1, %v5233_v37  ;;  %17656 = vmatmul.mubr.msk.f32.vlgmr.msra.gmra.mrb[48].mxu1 %vm550_vm2, %v6300_v34 }
 0x2c6   : > { %17612 = vmatmul.mubr.msk.f32.gmra.mrb[20].mxu0 %vm493_vm1, %v5234_v36 }
 0x2c7   : > { %17614 = vmatprep.mubr.msk.f32.mxu0 %vm493_vm1, %v5235_v59  ;;  %v6301_v59 = vld [vmem:[#allocation3 + $0x18] sm:$0xff] }
 0x2c8   : > { %17658 = vmatprep.mubr.msk.f32.mxu1 %vm550_vm2, %v6301_v59 }
 0x2ca   : > { %17615 = vmatmul.mubr.msk.f32.gmra.mrb[22].mxu0 %vm493_vm1, %v5236_v7 }
 0x2cb   : > { %17617 = vmatprep.mubr.msk.f32.mxu0 %vm493_vm1, %v5237_v13 }
 0x2ce   : > { %17618 = vmatmul.mubr.msk.f32.gmra.mrb[24].mxu0 %vm493_vm1, %v5238_v1 }
 0x2cf   : > { %17620 = vmatprep.mubr.msk.f32.mxu0 %vm493_vm1, %v5239_v18 }
 0x2d2   : > { %17621 = vmatmul.mubr.msk.f32.gmra.mrb[26].mxu0 %vm493_vm1, %v5240_v62 }
 0x2d3   : > { %17623 = vmatprep.mubr.msk.f32.mxu0 %vm493_vm1, %v5241_v14 }
 0x2d6   : > { %17624 = vmatmul.mubr.msk.f32.gmra.mrb[28].mxu0 %vm493_vm1, %v5242_v15 }
 0x2d7   : > { %17626 = vmatprep.mubr.msk.f32.mxu0 %vm493_vm1, %v5243_v61 }
 0x2d8   : > { %v21558_v57 = vpop.f32.mrb[24].mxu1 }
 0x2d9   : > { %v21560_v54 = vpop.f32.mrb[25].mxu1 }
 0x2da   : > { %17627 = vmatmul.mubr.msk.f32.gmra.mrb[30].mxu0 %vm493_vm1, %v5244_v16 }
 0x2db   : > { %17629 = vmatprep.mubr.msk.f32.mxu0 %vm493_vm1, %v5245_v17 }
 0x2de   : > { %17630 = vmatmul.mubr.msk.f32.gmra.mrb[32].mxu0 %vm493_vm1, %v5246_v60 }
 0x2df   : > { %17632 = vmatprep.mubr.msk.f32.mxu0 %vm493_vm1, %v5247_v27 }
 0x2e0   : > { %v21564_v12 = vpop.f32.mrb[26].mxu1 }
 0x2e1   : > { %v21566_v48 = vpop.f32.mrb[27].mxu1 }
 0x2e2   : > { %17633 = vmatmul.mubr.msk.f32.gmra.mrb[34].mxu0 %vm493_vm1, %v5248_v28 }
 0x2e3   : > { %17635 = vmatprep.mubr.msk.f32.mxu0 %vm493_vm1, %v5249_v32 }
 0x2e4   : > { %v21570_v22 = vpop.f32.mrb[28].mxu1 }
 0x2e5   : > { %v21572_v25 = vpop.f32.mrb[29].mxu1 }
 0x2e6   : > { %17636 = vmatmul.mubr.msk.f32.gmra.mrb[36].mxu0 %vm493_vm1, %v5250_v35  ;;  %v6298_v35 = vld [vmem:[%s23865_s5] sm:$0xff] }
 0x2e7   : > { %17638 = vmatprep.mubr.msk.f32.mxu0 %vm493_vm1, %v5251_v43  ;;  %17727 = vmatprep.subr.mxu1 %v6298_v35  ;;  %v21620_v43 = vpop.permute.xlu1 %5878 }
 0x2e8   : > { %v21578_v38 = vpop.f32.mrb[30].mxu1  ;;  %17728 = vmatpush3.msra.mxu1 %v6298_v35  ;;  %24209 = vst [vmem:[#allocation47_spill] sm:$0xff] %v21620_v43 }
 0x2e9   : > { %v21580_v42 = vpop.f32.mrb[31].mxu1 }
 0x2ea   : > { %17639 = vmatmul.mubr.msk.f32.gmra.mrb[38].mxu0 %vm493_vm1, %v5252_v44  ;;  %v21622_v44 = vpop.permute.xlu0 %5868 }
 0x2eb   : > { %17641 = vmatprep.mubr.msk.f32.mxu0 %vm493_vm1, %v5253_v21  ;;  %24210 = vst [vmem:[#allocation48_spill] sm:$0xff] %v21622_v44  ;;  %v21624_v21 = vpop.permute.xlu1 %5883 }
 0x2ec   : > { %v21584_v37 = vpop.f32.mrb[32].mxu1  ;;  %24211 = vst [vmem:[#allocation49_spill] sm:$0xff] %v21624_v21 }
 0x2ed   : > { %v21586_v36 = vpop.f32.mrb[33].mxu1 }
 0x2ee   : > { %17642 = vmatmul.mubr.msk.f32.gmra.mrb[40].mxu0 %vm493_vm1, %v5254_v31  ;;  %v21626_v31 = vpop.permute.xlu0 %5873 }
 0x2ef   : > { %17644 = vmatprep.mubr.msk.f32.mxu0 %vm493_vm1, %v5255_v10  ;;  %24212 = vst [vmem:[#allocation50_spill] sm:$0xff] %v21626_v31  ;;  %v21628_v10 = vpop.permute.xlu1 %5893 }
 0x2f0   : > { %v21589_v7 = vpop.f32.mrb[34].mxu1  ;;  %24213 = vst [vmem:[#allocation51_spill] sm:$0xff] %v21628_v10 }
 0x2f1   : > { %v21591_v13 = vpop.f32.mrb[35].mxu1 }
 0x2f2   : > { %17645 = vmatmul.mubr.msk.f32.gmra.mrb[42].mxu0 %vm493_vm1, %v5256_v5  ;;  %v21630_v5 = vpop.permute.xlu0 %5888 }
 0x2f3   : > { %17647 = vmatprep.mubr.msk.f32.mxu0 %vm493_vm1, %v5257_v55  ;;  %24214 = vst [vmem:[#allocation52_spill] sm:$0xff] %v21630_v5  ;;  %v21632_v55 = vpop.permute.xlu1 %5903 }
 0x2f4   : > { %24215 = vst [vmem:[#allocation6_spill] sm:$0xff] %v21632_v55 }
 0x2f6   : > { %17648 = vmatmul.mubr.msk.f32.gmra.mrb[44].mxu0 %vm493_vm1, %v5258_v20  ;;  %v21593_v1 = vpop.f32.mrb[36].mxu1  ;;  %v21634_v20 = vpop.permute.xlu0 %5898 }
 0x2f7   : > { %17650 = vmatprep.mubr.msk.f32.mxu0 %vm493_vm1, %v5259_v19  ;;  %v21595_v18 = vpop.f32.mrb[37].mxu1  ;;  %24216 = vst [vmem:[#allocation53_spill] sm:$0xff] %v21634_v20  ;;  %v21636_v19 = vpop.permute.xlu1 %5913 }
 0x2f8   : > { %24198 = vst [vmem:[#allocation9_spill] sm:$0xff] %v21595_v18  ;;  %24217 = vst [vmem:[#allocation7_spill] sm:$0xff] %v21636_v19 }
 0x2fa   : > { %17651 = vmatmul.mubr.msk.f32.gmra.mrb[46].mxu0 %vm493_vm1, %v5260_v49  ;;  %v21597_v62 = vpop.f32.mrb[38].mxu1  ;;  %v21638_v49 = vpop.permute.xlu0 %5908 }
 0x2fb   : > { %24199 = vst [vmem:[#allocation10_spill] sm:$0xff] %v21597_v62  ;;  %v21599_v14 = vpop.f32.mrb[39].mxu1  ;;  %24218 = vst [vmem:[#allocation54_spill] sm:$0xff] %v21638_v49  ;;  %v21640_v30 = vpop.permute.xlu1 %5923 }
 0x2fc   : > { %24200 = vst [vmem:[#allocation11_spill] sm:$0xff] %v21599_v14  ;;  %24219 = vst [vmem:[#allocation8_spill] sm:$0xff] %v21640_v30 }
 0x2fe   : > { %v21601_v15 = vpop.f32.mrb[40].mxu1  ;;  %v21642_v46 = vpop.permute.xlu0 %5918 }
 0x2ff   : > { %24201 = vst [vmem:[#allocation39_spill] sm:$0xff] %v21601_v15  ;;  %v21603_v61 = vpop.f32.mrb[41].mxu1  ;;  %24220 = vst [vmem:[#allocation55_spill] sm:$0xff] %v21642_v46  ;;  %v21644_v34 = vpop.permute.xlu1 %5933 }
 0x300   : > { %24202 = vst [vmem:[#allocation40_spill] sm:$0xff] %v21603_v61  ;;  %24221 = vst [vmem:[#allocation12_spill] sm:$0xff] %v21644_v34 }
 0x302   : > { %v21646_v59 = vpop.permute.xlu0 %5928 }
 0x303   : > { %24222 = vst [vmem:[#allocation56_spill] sm:$0xff] %v21646_v59 }
 0x30f   : > { %v21605_v16 = vpop.f32.mrb[42].mxu1 }
 0x310   : > { %24203 = vst [vmem:[#allocation41_spill] sm:$0xff] %v21605_v16  ;;  %v21607_v17 = vpop.f32.mrb[43].mxu1 }
 0x311   : > { %24204 = vst [vmem:[#allocation42_spill] sm:$0xff] %v21607_v17  ;;  %v21658_v17 = vpop.permute.xlu0 %5938 }
 0x312   : > { %24224 = vst [vmem:[#allocation57_spill] sm:$0xff] %v21658_v17 }
 0x314   : > { %v21609_v60 = vpop.f32.mrb[44].mxu1 }
 0x315   : > { %24205 = vst [vmem:[#allocation43_spill] sm:$0xff] %v21609_v60  ;;  %v21611_v27 = vpop.f32.mrb[45].mxu1 }
 0x316   : > { %24206 = vst [vmem:[#allocation44_spill] sm:$0xff] %v21611_v27  ;;  %v21654_v27 = vpop.permute.xlu1 %5943 }
 0x317   : > { %24223 = vst [vmem:[#allocation13_spill] sm:$0xff] %v21654_v27 }
 0x318   : > { %v21613_v28 = vpop.f32.mrb[46].mxu1 }
 0x319   : > { %24207 = vst [vmem:[#allocation45_spill] sm:$0xff] %v21613_v28  ;;  %v21615_v32 = vpop.f32.mrb[47].mxu1 }
 0x31a   : > { %24208 = vst [vmem:[#allocation46_spill] sm:$0xff] %v21615_v32 }
 0x371   : > { %v17583_v35 = vpop.f32.mrb[0].mxu0 }
 0x372   : > { %v18715_v32 = vadd.f32 %v17583_v35, %v21462_v23  ;;  %v5476_v28 = vpop.f32.mrb[1].mxu0  ;;  %v21677_v35 = vpop.permute.xlu0 %5948 }
 0x373   : > { %v18716_v60 = vadd.f32 %v5476_v28, %v21464_v24  ;;  %24226 = vst [vmem:[#allocation58_spill] sm:$0xff] %v21677_v35 }
 0x374   : > { %v5771_v16 = vadd.f32 %v18715_v32, %v21651_v9  ;;  %v21673_v32 = vpop.permute.xlu1 %5953 }
 0x375   : > { %v5770_v61 = vadd.f32 %v18716_v60, %v21651_v9  ;;  %v17586_v15 = vpop.f32.mrb[2].mxu0  ;;  %24225 = vst [vmem:[#allocation14_spill] sm:$0xff] %v21673_v32 }
 0x376   : > { %v5819_v14 = vmax.f32 %v5771_v16, 0.0  ;;  %v18717_v62 = vadd.f32 %v17586_v15, %v21468_v4  ;;  %v5486_v18 = vpop.f32.mrb[3].mxu0 }
 0x377   : > { %v5818_v23 = vmax.f32 %v5770_v61, 0.0  ;;  %v18718_v24 = vadd.f32 %v5486_v18, %v21470_v40 }
 0x378   : > { %v6107_v28 = vmul.f32 %v21626_v31, %v5819_v14  ;;  %v5773_v60 = vadd.f32 %v18717_v62, %v21651_v9 }
 0x379   : > { %v6106_v4 = vmul.f32 %v21622_v44, %v5818_v23  ;;  %v5772_v15 = vadd.f32 %v18718_v24, %v21651_v9  ;;  %v17589_v16 = vpop.f32.mrb[4].mxu0 }
 0x37a   : > { %6155 = vst.msk [vmem:[%s21668_s27 + $0x8] sm:$0xff] %vm550_vm2, %v6107_v28  ;;  %6203 = vst.msk [vmem:[#allocation3 + $0x28] sm:$0xff] %vm550_vm2, %v6107_v28  ;;  %v5821_v61 = vmax.f32 %v5773_v60, 0.0  ;;  %v18719_v40 = vadd.f32 %v17589_v16, %v21474_v0  ;;  %v5496_v18 = vpop.f32.mrb[5].mxu0  ;;  %v21695_v16 = vpop.permute.xlu1 %5963 }
 0x37b   : > { %6154 = vst.msk [vmem:[%s21668_s27] sm:$0xff] %vm550_vm2, %v6106_v4  ;;  %6202 = vst.msk [vmem:[#allocation3 + $0x20] sm:$0xff] %vm550_vm2, %v6106_v4  ;;  %v5820_v62 = vmax.f32 %v5772_v15, 0.0  ;;  %v18720_v14 = vadd.f32 %v5496_v18, %v21476_v2 }
 0x37c   : > { %v6109_v23 = vmul.f32 %v21624_v21, %v5821_v61  ;;  %v5775_v24 = vadd.f32 %v18719_v40, %v21651_v9  ;;  %24227 = vst [vmem:[#allocation15_spill] sm:$0xff] %v21695_v16  ;;  %v21701_v40 = vpop.permute.xlu0 %5958 }
 0x37d   : > { %v6108_v44 = vmul.f32 %v21620_v43, %v5820_v62  ;;  %v5774_v28 = vadd.f32 %v18720_v14, %v21651_v9  ;;  %v17592_v60 = vpop.f32.mrb[6].mxu0  ;;  %24228 = vst [vmem:[#allocation59_spill] sm:$0xff] %v21701_v40 }
 0x37e   : > { %6157 = vst.msk [vmem:[%s21668_s27 + $0x18] sm:$0xff] %vm550_vm2, %v6109_v23  ;;  %6205 = vst.msk [vmem:[#allocation3 + $0x38] sm:$0xff] %vm550_vm2, %v6109_v23  ;;  %v5823_v0 = vmax.f32 %v5775_v24, 0.0  ;;  %v18721_v4 = vadd.f32 %v17592_v60, %v21480_v52  ;;  %v5506_v15 = vpop.f32.mrb[7].mxu0 }
 0x37f   : > { %6156 = vst.msk [vmem:[%s21668_s27 + $0x10] sm:$0xff] %vm550_vm2, %v6108_v44  ;;  %6204 = vst.msk [vmem:[#allocation3 + $0x30] sm:$0xff] %vm550_vm2, %v6108_v44  ;;  %v5822_v2 = vmax.f32 %v5774_v28, 0.0  ;;  %v18722_v61 = vadd.f32 %v5506_v15, %v21482_v58 }
 0x380   : > { %v6111_v18 = vmul.f32 %v21628_v10, %v5823_v0  ;;  %v5777_v62 = vadd.f32 %v18721_v4, %v21651_v9 }
 0x381   : > { %v6110_v14 = vmul.f32 %v21630_v5, %v5822_v2  ;;  %v5776_v52 = vadd.f32 %v18722_v61, %v21651_v9  ;;  %v17595_v23 = vpop.f32.mrb[8].mxu0  ;;  %v6303_v4 = vld [vmem:[#allocation3 + $0x28] sm:$0xff] }
 0x382   : > { %6159 = vst.msk [vmem:[%s21668_s27 + $0x28] sm:$0xff] %vm550_vm2, %v6111_v18  ;;  %6207 = vst.msk [vmem:[#allocation3 + $0x48] sm:$0xff] %vm550_vm2, %v6111_v18  ;;  %v5825_v24 = vmax.f32 %v5777_v62, 0.0  ;;  %v18723_v44 = vadd.f32 %v17595_v23, %v21486_v6  ;;  %v5516_v28 = vpop.f32.mrb[9].mxu0  ;;  %v6302_v58 = vld [vmem:[#allocation3 + $0x20] sm:$0xff]  ;;  %v21719_v6 = vpop.permute.xlu1 %5973 }
 0x383   : > { %6158 = vst.msk [vmem:[%s21668_s27 + $0x20] sm:$0xff] %vm550_vm2, %v6110_v14  ;;  %6206 = vst.msk [vmem:[#allocation3 + $0x40] sm:$0xff] %vm550_vm2, %v6110_v14  ;;  %v5824_v60 = vmax.f32 %v5776_v52, 0.0  ;;  %v18724_v0 = vadd.f32 %v5516_v28, %v21488_v56  ;;  %17659 = vmatmul.mubr.msk.f32.gmra.mrb[50].mxu1 %vm550_vm2, %v6302_v58  ;;  %v21723_v14 = vpop.permute.xlu0 %5968 }
 0x384   : > { %v6113_v15 = vmul.f32 %v21632_v55, %v5825_v24  ;;  %v5779_v2 = vadd.f32 %v18723_v44, %v21651_v9  ;;  %17661 = vmatprep.mubr.msk.f32.mxu1 %vm550_vm2, %v6303_v4  ;;  %24229 = vst [vmem:[#allocation16_spill] sm:$0xff] %v21719_v6  ;;  %24230 = vst [vmem:[#allocation60_spill] sm:$0xff] %v21723_v14 }
 0x385   : > { %v6112_v61 = vmul.f32 %v21634_v20, %v5824_v60  ;;  %v5778_v18 = vadd.f32 %v18724_v0, %v21651_v9  ;;  %v17598_v62 = vpop.f32.mrb[10].mxu0  ;;  %v6305_v58 = vld [vmem:[#allocation3 + $0x38] sm:$0xff] }
 0x386   : > { %6161 = vst.msk [vmem:[%s21668_s27 + $0x38] sm:$0xff] %vm550_vm2, %v6113_v15  ;;  %6209 = vst.msk [vmem:[#allocation3 + $0x58] sm:$0xff] %vm550_vm2, %v6113_v15  ;;  %v5827_v56 = vmax.f32 %v5779_v2, 0.0  ;;  %v18725_v52 = vadd.f32 %v17598_v62, %v21492_v8  ;;  %v5526_v23 = vpop.f32.mrb[11].mxu0  ;;  %v6304_v24 = vld [vmem:[#allocation3 + $0x30] sm:$0xff]  ;;  %v21743_v62 = vpop.permute.xlu1 %5983 }
 0x387   : > { %6160 = vst.msk [vmem:[%s21668_s27 + $0x30] sm:$0xff] %vm550_vm2, %v6112_v61  ;;  %6208 = vst.msk [vmem:[#allocation3 + $0x50] sm:$0xff] %vm550_vm2, %v6112_v61  ;;  %v5826_v44 = vmax.f32 %v5778_v18, 0.0  ;;  %v18726_v28 = vadd.f32 %v5526_v23, %v21494_v3  ;;  %17662 = vmatmul.mubr.msk.f32.gmra.mrb[52].mxu1 %vm550_vm2, %v6304_v24  ;;  %v21755_v24 = vpop.permute.xlu0 %5978 }
 0x388   : > { %v6115_v60 = vmul.f32 %v21636_v19, %v5827_v56  ;;  %v5781_v0 = vadd.f32 %v18725_v52, %v21651_v9  ;;  %17664 = vmatprep.mubr.msk.f32.mxu1 %vm550_vm2, %v6305_v58  ;;  %24231 = vst [vmem:[#allocation17_spill] sm:$0xff] %v21743_v62  ;;  %24232 = vst [vmem:[#allocation61_spill] sm:$0xff] %v21755_v24 }
 0x389   : > { %v6114_v8 = vmul.f32 %v21638_v49, %v5826_v44  ;;  %v5780_v4 = vadd.f32 %v18726_v28, %v21651_v9  ;;  %v17601_v15 = vpop.f32.mrb[12].mxu0  ;;  %v6307_v23 = vld [vmem:[#allocation3 + $0x48] sm:$0xff] }
 0x38a   : > { %6163 = vst.msk [vmem:[%s21668_s27 + $0x48] sm:$0xff] %vm550_vm2, %v6115_v60  ;;  %6211 = vst.msk [vmem:[#allocation3 + $0x68] sm:$0xff] %vm550_vm2, %v6115_v60  ;;  %v5829_v3 = vmax.f32 %v5781_v0, 0.0  ;;  %v18727_v2 = vadd.f32 %v17601_v15, %v21498_v11  ;;  %v5536_v61 = vpop.f32.mrb[13].mxu0  ;;  %v6306_v18 = vld [vmem:[#allocation3 + $0x40] sm:$0xff]  ;;  %v21753_v11 = vld [vmem:[%s23865_s5 + $0x10] sm:$0xff] }
 0x38b   : > { %6162 = vst.msk [vmem:[%s21668_s27 + $0x40] sm:$0xff] %vm550_vm2, %v6114_v8  ;;  %6210 = vst.msk [vmem:[#allocation3 + $0x60] sm:$0xff] %vm550_vm2, %v6114_v8  ;;  %v5828_v56 = vmax.f32 %v5780_v4, 0.0  ;;  %v18728_v52 = vadd.f32 %v5536_v61, %v21500_v53  ;;  %17665 = vmatmul.mubr.msk.f32.gmra.mrb[54].mxu1 %vm550_vm2, %v6306_v18  ;;  %17801 = vmatprep.subr.mxu1 %v21753_v11 }
 0x38c   : > { %v6117_v44 = vmul.f32 %v21640_v30, %v5829_v3  ;;  %v5783_v28 = vadd.f32 %v18727_v2, %v21651_v9  ;;  %17667 = vmatprep.mubr.msk.f32.mxu1 %vm550_vm2, %v6307_v23 }
 0x38d   : > { %v6116_v53 = vmul.f32 %v21642_v46, %v5828_v56  ;;  %v5782_v58 = vadd.f32 %v18728_v52, %v21651_v9  ;;  %v17604_v60 = vpop.f32.mrb[14].mxu0  ;;  %v6309_v61 = vld [vmem:[#allocation3 + $0x58] sm:$0xff] }
 0x38e   : > { %6165 = vst.msk [vmem:[%s21668_s27 + $0x58] sm:$0xff] %vm550_vm2, %v6117_v44  ;;  %6213 = vst.msk [vmem:[#allocation3 + $0x78] sm:$0xff] %vm550_vm2, %v6117_v44  ;;  %v5831_v0 = vmax.f32 %v5783_v28, 0.0  ;;  %v18729_v8 = vadd.f32 %v17604_v60, %v21504_v50  ;;  %v5546_v4 = vpop.f32.mrb[15].mxu0  ;;  %v6308_v15 = vld [vmem:[#allocation3 + $0x50] sm:$0xff]  ;;  %v21775_v50 = vpop.permute.xlu1 %5993 }
 0x38f   : > { %6164 = vst.msk [vmem:[%s21668_s27 + $0x50] sm:$0xff] %vm550_vm2, %v6116_v53  ;;  %6212 = vst.msk [vmem:[#allocation3 + $0x70] sm:$0xff] %vm550_vm2, %v6116_v53  ;;  %v5830_v3 = vmax.f32 %v5782_v58, 0.0  ;;  %v18730_v2 = vadd.f32 %v5546_v4, %v21506_v51  ;;  %17668 = vmatmul.mubr.msk.f32.gmra.mrb[56].mxu1 %vm550_vm2, %v6308_v15  ;;  %v21779_v28 = vpop.permute.xlu0 %5988 }
 0x390   : > { %v6119_v18 = vmul.f32 %v21644_v34, %v5831_v0  ;;  %v5785_v56 = vadd.f32 %v18729_v8, %v21651_v9  ;;  %17670 = vmatprep.mubr.msk.f32.mxu1 %vm550_vm2, %v6309_v61  ;;  %24233 = vst [vmem:[#allocation18_spill] sm:$0xff] %v21775_v50  ;;  %24234 = vst [vmem:[#allocation62_spill] sm:$0xff] %v21779_v28 }
 0x391   : > { %v6118_v52 = vmul.f32 %v21646_v59, %v5830_v3  ;;  %v5784_v23 = vadd.f32 %v18730_v2, %v21651_v9  ;;  %v17607_v44 = vpop.f32.mrb[16].mxu0  ;;  %v6311_v4 = vld [vmem:[#allocation3 + $0x68] sm:$0xff] }
 0x392   : > { %6167 = vst.msk [vmem:[%s21668_s27 + $0x68] sm:$0xff] %vm550_vm2, %v6119_v18  ;;  %6215 = vst.msk [vmem:[#allocation3 + $0x88] sm:$0xff] %vm550_vm2, %v6119_v18  ;;  %v5833_v51 = vmax.f32 %v5785_v56, 0.0  ;;  %v18731_v53 = vadd.f32 %v17607_v44, %v21510_v45  ;;  %v5556_v58 = vpop.f32.mrb[17].mxu0  ;;  %v6310_v60 = vld [vmem:[#allocation3 + $0x60] sm:$0xff] }
 0x393   : > { %6166 = vst.msk [vmem:[%s21668_s27 + $0x60] sm:$0xff] %vm550_vm2, %v6118_v52  ;;  %6214 = vst.msk [vmem:[#allocation3 + $0x80] sm:$0xff] %vm550_vm2, %v6118_v52  ;;  %v5832_v0 = vmax.f32 %v5784_v23, 0.0  ;;  %v18732_v8 = vadd.f32 %v5556_v58, %v21512_v47  ;;  %17671 = vmatmul.mubr.msk.f32.gmra.mrb[58].mxu1 %vm550_vm2, %v6310_v60  ;;  %v21799_v23 = vpop.permute.xlu1 %6003  ;;  %v21806_v58 = vpop.permute.xlu0 %5998 }
 0x394   : > { %v6121_v15 = vmul.f32 %v21654_v27, %v5833_v51  ;;  %v5787_v3 = vadd.f32 %v18731_v53, %v21651_v9  ;;  %17673 = vmatprep.mubr.msk.f32.mxu1 %vm550_vm2, %v6311_v4  ;;  %24235 = vst [vmem:[#allocation19_spill] sm:$0xff] %v21799_v23  ;;  %24236 = vst [vmem:[#allocation63_spill] sm:$0xff] %v21806_v58 }
 0x395   : > { %v6120_v45 = vmul.f32 %v21658_v17, %v5832_v0  ;;  %v5786_v2 = vadd.f32 %v18732_v8, %v21651_v9  ;;  %v17610_v61 = vpop.f32.mrb[18].mxu0  ;;  %v6313_v53 = vld [vmem:[#allocation3 + $0x78] sm:$0xff] }
 0x396   : > { %6169 = vst.msk [vmem:[%s21668_s27 + $0x78] sm:$0xff] %vm550_vm2, %v6121_v15  ;;  %6217 = vst.msk [vmem:[#allocation3 + $0x98] sm:$0xff] %vm550_vm2, %v6121_v15  ;;  %v5835_v47 = vmax.f32 %v5787_v3, 0.0  ;;  %v18733_v18 = vadd.f32 %v17610_v61, %v21516_v26  ;;  %v5566_v56 = vpop.f32.mrb[19].mxu0  ;;  %v6312_v52 = vld [vmem:[#allocation3 + $0x70] sm:$0xff] }
 0x397   : > { %6168 = vst.msk [vmem:[%s21668_s27 + $0x70] sm:$0xff] %vm550_vm2, %v6120_v45  ;;  %6216 = vst.msk [vmem:[#allocation3 + $0x90] sm:$0xff] %vm550_vm2, %v6120_v45  ;;  %v5834_v44 = vmax.f32 %v5786_v2, 0.0  ;;  %v18734_v51 = vadd.f32 %v5566_v56, %v21518_v29  ;;  %17674 = vmatmul.mubr.msk.f32.gmra.mrb[60].mxu1 %vm550_vm2, %v6312_v52 }
 0x398   : > { %v6123_v26 = vmul.f32 %v21673_v32, %v5835_v47  ;;  %v5789_v60 = vadd.f32 %v18733_v18, %v21651_v9  ;;  %17676 = vmatprep.mubr.msk.f32.mxu1 %vm550_vm2, %v6313_v53  ;;  %v21829_v53 = vpop.permute.xlu0 %6008 }
 0x399   : > { %v6122_v0 = vmul.f32 %v21677_v35, %v5834_v44  ;;  %v5788_v8 = vadd.f32 %v18734_v51, %v21651_v9  ;;  %v17613_v4 = vpop.f32.mrb[20].mxu0  ;;  %v6315_v47 = vld [vmem:[#allocation3 + $0x88] sm:$0xff]  ;;  %24238 = vst [vmem:[#allocation64_spill] sm:$0xff] %v21829_v53 }
 0x39a   : > { %6171 = vst.msk [vmem:[%s21668_s27 + $0x88] sm:$0xff] %vm550_vm2, %v6123_v26  ;;  %6219 = vst.msk [vmem:[#allocation3 + $0xa8] sm:$0xff] %vm550_vm2, %v6123_v26  ;;  %v5837_v29 = vmax.f32 %v5789_v60, 0.0  ;;  %v18735_v15 = vadd.f32 %v17613_v4, %v21522_v39  ;;  %v5576_v3 = vpop.f32.mrb[21].mxu0  ;;  %v6314_v45 = vld [vmem:[#allocation3 + $0x80] sm:$0xff]  ;;  %v21825_v39 = vpop.permute.xlu1 %6013 }
 0x39b   : > { %6170 = vst.msk [vmem:[%s21668_s27 + $0x80] sm:$0xff] %vm550_vm2, %v6122_v0  ;;  %6218 = vst.msk [vmem:[#allocation3 + $0xa0] sm:$0xff] %vm550_vm2, %v6122_v0  ;;  %v5836_v2 = vmax.f32 %v5788_v8, 0.0  ;;  %v18736_v61 = vadd.f32 %v5576_v3, %v21524_v41  ;;  %17677 = vmatmul.mubr.msk.f32.gmra.mrb[62].mxu1 %vm550_vm2, %v6314_v45 }
 0x39c   : > { %v6125_v18 = vmul.f32 %v21695_v16, %v5837_v29  ;;  %v5791_v56 = vadd.f32 %v18735_v15, %v21651_v9  ;;  %17679 = vmatprep.mubr.msk.f32.mxu1 %vm550_vm2, %v6315_v47  ;;  %24237 = vst [vmem:[#allocation20_spill] sm:$0xff] %v21825_v39 }
 0x39d   : > { %v6124_v52 = vmul.f32 %v21701_v40, %v5836_v2  ;;  %v5790_v44 = vadd.f32 %v18736_v61, %v21651_v9  ;;  %v17616_v51 = vpop.f32.mrb[22].mxu0  ;;  %v6317_v29 = vld [vmem:[#allocation3 + $0x98] sm:$0xff] }
 0x39e   : > { %6173 = vst.msk [vmem:[%s21668_s27 + $0x98] sm:$0xff] %vm550_vm2, %v6125_v18  ;;  %6221 = vst.msk [vmem:[#allocation3 + $0xb8] sm:$0xff] %vm550_vm2, %v6125_v18  ;;  %v5839_v41 = vmax.f32 %v5791_v56, 0.0  ;;  %v18737_v26 = vadd.f32 %v17616_v51, %v21528_v63  ;;  %v5586_v60 = vpop.f32.mrb[23].mxu0  ;;  %v6316_v0 = vld [vmem:[#allocation3 + $0x90] sm:$0xff]  ;;  %v21849_v56 = vpop.permute.xlu1 %6023 }
 0x39f   : > { %6172 = vst.msk [vmem:[%s21668_s27 + $0x90] sm:$0xff] %vm550_vm2, %v6124_v52  ;;  %6220 = vst.msk [vmem:[#allocation3 + $0xb0] sm:$0xff] %vm550_vm2, %v6124_v52  ;;  %v5838_v8 = vmax.f32 %v5790_v44, 0.0  ;;  %v18738_v4 = vadd.f32 %v5586_v60, %v21530_v33  ;;  %17680 = vmatmul.mubr.msk.f32.gmra.mrb[64].mxu1 %vm550_vm2, %v6316_v0 }
 0x3a0   : > { %v6127_v15 = vmul.f32 %v21719_v6, %v5839_v41  ;;  %v5793_v3 = vadd.f32 %v18737_v26, %v21651_v9  ;;  %17682 = vmatprep.mubr.msk.f32.mxu1 %vm550_vm2, %v6317_v29  ;;  %24239 = vst [vmem:[#allocation21_spill] sm:$0xff] %v21849_v56  ;;  %v21856_v41 = vpop.permute.xlu0 %6018 }
 0x3a1   : > { %v6126_v63 = vmul.f32 %v21723_v14, %v5838_v8  ;;  %v5792_v45 = vadd.f32 %v18738_v4, %v21651_v9  ;;  %v17619_v2 = vpop.f32.mrb[24].mxu0  ;;  %v6319_v51 = vld [vmem:[#allocation3 + $0xa8] sm:$0xff]  ;;  %24240 = vst [vmem:[#allocation65_spill] sm:$0xff] %v21856_v41 }
 0x3a2   : > { %6175 = vst.msk [vmem:[%s21668_s27 + $0xa8] sm:$0xff] %vm550_vm2, %v6127_v15  ;;  %6223 = vst.msk [vmem:[#allocation3 + $0xc8] sm:$0xff] %vm550_vm2, %v6127_v15  ;;  %v5841_v33 = vmax.f32 %v5793_v3, 0.0  ;;  %v18739_v61 = vadd.f32 %v17619_v2, %v21558_v57  ;;  %v5596_v47 = vpop.f32.mrb[25].mxu0  ;;  %v6318_v18 = vld [vmem:[#allocation3 + $0xa0] sm:$0xff] }
 0x3a3   : > { %6174 = vst.msk [vmem:[%s21668_s27 + $0xa0] sm:$0xff] %vm550_vm2, %v6126_v63  ;;  %6222 = vst.msk [vmem:[#allocation3 + $0xc0] sm:$0xff] %vm550_vm2, %v6126_v63  ;;  %v5840_v52 = vmax.f32 %v5792_v45, 0.0  ;;  %v18740_v44 = vadd.f32 %v5596_v47, %v21560_v54  ;;  %17683 = vmatmul.mubr.msk.f32.gmra.mrb[66].mxu1 %vm550_vm2, %v6318_v18 }
 0x3a4   : > { %v6129_v57 = vmul.f32 %v21743_v62, %v5841_v33  ;;  %v5795_v26 = vadd.f32 %v18739_v61, %v21651_v9  ;;  %17685 = vmatprep.mubr.msk.f32.mxu1 %vm550_vm2, %v6319_v51 }
 0x3a5   : > { %v6128_v60 = vmul.f32 %v21755_v24, %v5840_v52  ;;  %v5794_v0 = vadd.f32 %v18740_v44, %v21651_v9  ;;  %v17622_v8 = vpop.f32.mrb[26].mxu0  ;;  %v6321_v45 = vld [vmem:[#allocation3 + $0xb8] sm:$0xff]  ;;  %v21879_v52 = vpop.permute.xlu0 %6028  ;;  %v22215_v24 = vld [vmem:[#allocation3 + $0xa7] sm:$0xff] }
 0x3a6   : > { %6177 = vst.msk [vmem:[%s21668_s27 + $0xb8] sm:$0xff] %vm550_vm2, %v6129_v57  ;;  %6225 = vst.msk [vmem:[#allocation3 + $0xd8] sm:$0xff] %vm550_vm2, %v6129_v57  ;;  %v5843_v54 = vmax.f32 %v5795_v26, 0.0  ;;  %v18741_v4 = vadd.f32 %v17622_v8, %v21564_v12  ;;  %v5606_v29 = vpop.f32.mrb[27].mxu0  ;;  %v6320_v15 = vld [vmem:[#allocation3 + $0xb0] sm:$0xff]  ;;  %v21875_v12 = vpop.permute.xlu1 %6033 }
 0x3a7   : > { %6176 = vst.msk [vmem:[%s21668_s27 + $0xb0] sm:$0xff] %vm550_vm2, %v6128_v60  ;;  %6224 = vst.msk [vmem:[#allocation3 + $0xd0] sm:$0xff] %vm550_vm2, %v6128_v60  ;;  %v5842_v3 = vmax.f32 %v5794_v0, 0.0  ;;  %v18742_v63 = vadd.f32 %v5606_v29, %v21566_v48  ;;  %17686 = vmatmul.mubr.msk.f32.gmra.mrb[68].mxu1 %vm550_vm2, %v6320_v15  ;;  %v22219_v62 = vld [vmem:[#allocation3 + $0xaf] sm:$0xff]  ;;  %v22223_v14 = vld [vmem:[#allocation3 + $0xb7] sm:$0xff] }
 0x3a8   : > { %v6131_v2 = vmul.f32 %v21775_v50, %v5843_v54  ;;  %v5797_v33 = vadd.f32 %v18741_v4, %v21651_v9  ;;  %17688 = vmatprep.mubr.msk.f32.mxu1 %vm550_vm2, %v6321_v45  ;;  %24241 = vst [vmem:[#allocation22_spill] sm:$0xff] %v21875_v12  ;;  %24242 = vst [vmem:[#allocation23_spill] sm:$0xff] %v21879_v52  ;;  %v22211_v50 = vld [vmem:[#allocation3 + $0x9f] sm:$0xff] }
 0x3a9   : > { %v6130_v61 = vmul.f32 %v21779_v28, %v5842_v3  ;;  %v5796_v47 = vadd.f32 %v18742_v63, %v21651_v9  ;;  %v17625_v18 = vpop.f32.mrb[28].mxu0  ;;  %v6323_v0 = vld [vmem:[#allocation3 + $0xc8] sm:$0xff]  ;;  %v22207_v28 = vld [vmem:[#allocation3 + $0x97] sm:$0xff] }
 0x3aa   : > { %6179 = vst.msk [vmem:[%s21668_s27 + $0xc8] sm:$0xff] %vm550_vm2, %v6131_v2  ;;  %6227 = vst.msk [vmem:[#allocation3 + $0xe8] sm:$0xff] %vm550_vm2, %v6131_v2  ;;  %v5845_v48 = vmax.f32 %v5797_v33, 0.0  ;;  %v18743_v44 = vadd.f32 %v17625_v18, %v21570_v22  ;;  %v5616_v51 = vpop.f32.mrb[29].mxu0  ;;  %v6322_v57 = vld [vmem:[#allocation3 + $0xc0] sm:$0xff]  ;;  %v21901_v45 = vpop.permute.xlu1 %6043 }
 0x3ab   : > { %6178 = vst.msk [vmem:[%s21668_s27 + $0xc0] sm:$0xff] %vm550_vm2, %v6130_v61  ;;  %6226 = vst.msk [vmem:[#allocation3 + $0xe0] sm:$0xff] %vm550_vm2, %v6130_v61  ;;  %v5844_v26 = vmax.f32 %v5796_v47, 0.0  ;;  %v18744_v60 = vadd.f32 %v5616_v51, %v21572_v25  ;;  %17689 = vmatmul.mubr.msk.f32.gmra.mrb[70].mxu1 %vm550_vm2, %v6322_v57  ;;  %v22227_v6 = vld [vmem:[#allocation3 + $0xbf] sm:$0xff]  ;;  %v22231_v40 = vld [vmem:[#allocation3 + $0xc7] sm:$0xff] }
 0x3ac   : > { %v6133_v8 = vmul.f32 %v21799_v23, %v5845_v48  ;;  %v5799_v54 = vadd.f32 %v18743_v44, %v21651_v9  ;;  %17691 = vmatprep.mubr.msk.f32.mxu1 %vm550_vm2, %v6323_v0  ;;  %24243 = vst [vmem:[#allocation24_spill] sm:$0xff] %v21901_v45  ;;  %v22203_v23 = vld [vmem:[#allocation3 + $0x8f] sm:$0xff] }
 0x3ad   : > { %v6132_v22 = vmul.f32 %v21806_v58, %v5844_v26  ;;  %v5798_v4 = vadd.f32 %v18744_v60, %v21651_v9  ;;  %v17628_v29 = vpop.f32.mrb[30].mxu0  ;;  %v21909_v61 = vld [vmem:[#allocation3 + $0xd8] sm:$0xff]  ;;  %v22199_v58 = vld [vmem:[#allocation3 + $0x87] sm:$0xff] }
 0x3ae   : > { %6181 = vst.msk [vmem:[%s21668_s27 + $0xd8] sm:$0xff] %vm550_vm2, %v6133_v8  ;;  %6229 = vst.msk [vmem:[#allocation3 + $0xf8] sm:$0xff] %vm550_vm2, %v6133_v8  ;;  %v5847_v25 = vmax.f32 %v5799_v54, 0.0  ;;  %v18745_v15 = vadd.f32 %v17628_v29, %v21578_v38  ;;  %v5626_v3 = vpop.f32.mrb[31].mxu0  ;;  %v21899_v63 = vld [vmem:[#allocation3 + $0xd0] sm:$0xff]  ;;  %v21911_v38 = vpop.permute.xlu0 %6038 }
 0x3af   : > { %6180 = vst.msk [vmem:[%s21668_s27 + $0xd0] sm:$0xff] %vm550_vm2, %v6132_v22  ;;  %6228 = vst.msk [vmem:[#allocation3 + $0xf0] sm:$0xff] %vm550_vm2, %v6132_v22  ;;  %v5846_v2 = vmax.f32 %v5798_v4, 0.0  ;;  %v18746_v33 = vadd.f32 %v5626_v3, %v21580_v42  ;;  %17692 = vmatmul.mubr.msk.f32.gmra.mrb[72].mxu1 %vm550_vm2, %v21899_v63  ;;  %v21937_v4 = vpop.permute.xlu1 %6053  ;;  %v22235_v16 = vld [vmem:[#allocation3 + $0xcf] sm:$0xff]  ;;  %v22239_v35 = vld [vmem:[#allocation3 + $0xd7] sm:$0xff] }
 0x3b0   : > { %24244 = vst [vmem:[#allocation25_spill] sm:$0xff] %v21911_v38  ;;  %v6135_v47 = vmul.f32 %v21825_v39, %v5847_v25  ;;  %v5801_v18 = vadd.f32 %v18745_v15, %v21651_v9  ;;  %17694 = vmatprep.mubr.msk.f32.mxu1 %vm550_vm2, %v21909_v61  ;;  %24245 = vst [vmem:[#allocation26_spill] sm:$0xff] %v21937_v4  ;;  %v22195_v39 = vld [vmem:[#allocation3 + $0x7f] sm:$0xff] }
 0x3b1   : > { %v6134_v48 = vmul.f32 %v21829_v53, %v5846_v2  ;;  %v5800_v44 = vadd.f32 %v18746_v33, %v21651_v9  ;;  %v17631_v42 = vpop.f32.mrb[32].mxu0  ;;  %v21931_v54 = vld [vmem:[#allocation3 + $0xe8] sm:$0xff]  ;;  %v22191_v53 = vld [vmem:[#allocation3 + $0x77] sm:$0xff] }
 0x3b2   : > { %6183 = vst.msk [vmem:[%s21668_s27 + $0xe8] sm:$0xff] %vm550_vm2, %v6135_v47  ;;  %6231 = vst.msk [vmem:[#allocation3 + $0x108] sm:$0xff] %vm550_vm2, %v6135_v47  ;;  %v5849_v51 = vmax.f32 %v5801_v18, 0.0  ;;  %v18747_v57 = vadd.f32 %v17631_v42, %v21584_v37  ;;  %v5636_v26 = vpop.f32.mrb[33].mxu0  ;;  %v21923_v60 = vld [vmem:[#allocation3 + $0xe0] sm:$0xff]  ;;  %v21941_v15 = vpop.permute.xlu0 %6048 }
 0x3b3   : > { %6182 = vst.msk [vmem:[%s21668_s27 + $0xe0] sm:$0xff] %vm550_vm2, %v6134_v48  ;;  %6230 = vst.msk [vmem:[#allocation3 + $0x100] sm:$0xff] %vm550_vm2, %v6134_v48  ;;  %v5848_v0 = vmax.f32 %v5800_v44, 0.0  ;;  %v18748_v8 = vadd.f32 %v5636_v26, %v21586_v36  ;;  %17695 = vmatmul.mubr.msk.f32.gmra.mrb[74].mxu1 %vm550_vm2, %v21923_v60  ;;  %v22243_v32 = vld [vmem:[#allocation3 + $0xdf] sm:$0xff]  ;;  %v22247_v17 = vld [vmem:[#allocation3 + $0xe7] sm:$0xff] }
 0x3b4   : > { %v6137_v22 = vmul.f32 %v21849_v56, %v5849_v51  ;;  %v5803_v37 = vadd.f32 %v18747_v57, %v21651_v9  ;;  %17697 = vmatprep.mubr.msk.f32.mxu1 %vm550_vm2, %v21931_v54  ;;  %24246 = vst [vmem:[#allocation27_spill] sm:$0xff] %v21941_v15  ;;  %v22187_v56 = vld [vmem:[#allocation3 + $0x6f] sm:$0xff] }
 0x3b5   : > { %v6136_v29 = vmul.f32 %v21856_v41, %v5848_v0  ;;  %v5802_v25 = vadd.f32 %v18748_v8, %v21651_v9  ;;  %v17634_v36 = vpop.f32.mrb[34].mxu0  ;;  %v21955_v44 = vld [vmem:[#allocation3 + $0xf8] sm:$0xff] }
 0x3b6   : > { %6185 = vst.msk [vmem:[%s21668_s27 + $0xf8] sm:$0xff] %vm550_vm2, %v6137_v22  ;;  %6233 = vst.msk [vmem:[#allocation3 + $0x118] sm:$0xff] %vm550_vm2, %v6137_v22  ;;  %v5851_v3 = vmax.f32 %v5803_v37, 0.0  ;;  %v18749_v2 = vadd.f32 %v17634_v36, %v21589_v7  ;;  %v5646_v33 = vpop.f32.mrb[35].mxu0  ;;  %v21947_v47 = vld [vmem:[#allocation3 + $0xf0] sm:$0xff]  ;;  %v21969_v37 = vpop.permute.xlu1 %6063 }
 0x3b7   : > { %6184 = vst.msk [vmem:[%s21668_s27 + $0xf0] sm:$0xff] %vm550_vm2, %v6136_v29  ;;  %6232 = vst.msk [vmem:[#allocation3 + $0x110] sm:$0xff] %vm550_vm2, %v6136_v29  ;;  %v5850_v18 = vmax.f32 %v5802_v25, 0.0  ;;  %v18750_v48 = vadd.f32 %v5646_v33, %v21591_v13  ;;  %17698 = vmatmul.mubr.msk.f32.gmra.mrb[76].mxu1 %vm550_vm2, %v21947_v47  ;;  %v24248_v25 = vld [vmem:[#allocation9_spill] sm:$0xff]  ;;  %v22255_v59 = vld [vmem:[#allocation3 + $0xf7] sm:$0xff] }
 0x3b8   : > { %v6139_v42 = vmul.f32 %v21875_v12, %v5851_v3  ;;  %v5805_v7 = vadd.f32 %v18749_v2, %v21651_v9  ;;  %17700 = vmatprep.mubr.msk.f32.mxu1 %vm550_vm2, %v21955_v44  ;;  %24247 = vst [vmem:[#allocation28_spill] sm:$0xff] %v21969_v37  ;;  %v22251_v27 = vld [vmem:[#allocation3 + $0xef] sm:$0xff] }
 0x3b9   : > { %v6138_v51 = vmul.f32 %v21879_v52, %v5850_v18  ;;  %v5804_v57 = vadd.f32 %v18750_v48, %v21651_v9  ;;  %v17637_v26 = vpop.f32.mrb[36].mxu0  ;;  %v21977_v3 = vld [vmem:[#allocation3 + $0x108] sm:$0xff] }
 0x3ba   : > { %6187 = vst.msk [vmem:[%s21668_s27 + $0x108] sm:$0xff] %vm550_vm2, %v6139_v42  ;;  %6235 = vst.msk [vmem:[#allocation3 + $0x128] sm:$0xff] %vm550_vm2, %v6139_v42  ;;  %v5853_v13 = vmax.f32 %v5805_v7, 0.0  ;;  %v18751_v0 = vadd.f32 %v17637_v26, %v21593_v1  ;;  %v5656_v8 = vpop.f32.mrb[37].mxu0  ;;  %v21967_v22 = vld [vmem:[#allocation3 + $0x100] sm:$0xff]  ;;  %v21979_v1 = vpop.permute.xlu0 %6058 }
 0x3bb   : > { %6186 = vst.msk [vmem:[%s21668_s27 + $0x100] sm:$0xff] %vm550_vm2, %v6138_v51  ;;  %6234 = vst.msk [vmem:[#allocation3 + $0x120] sm:$0xff] %vm550_vm2, %v6138_v51  ;;  %v5852_v29 = vmax.f32 %v5804_v57, 0.0  ;;  %v18752_v36 = vadd.f32 %v5656_v8, %v24248_v25  ;;  %17701 = vmatmul.mubr.msk.f32.gmra.mrb[78].mxu1 %vm550_vm2, %v21967_v22  ;;  %v24250_v51 = vld [vmem:[#allocation10_spill] sm:$0xff]  ;;  %v24251_v8 = vld [vmem:[#allocation11_spill] sm:$0xff] }
 0x3bc   : > { %24249 = vst [vmem:[#allocation29_spill] sm:$0xff] %v21979_v1  ;;  %v6141_v2 = vmul.f32 %v21901_v45, %v5853_v13  ;;  %v5807_v33 = vadd.f32 %v18751_v0, %v21651_v9  ;;  %17703 = vmatprep.mubr.msk.f32.mxu1 %vm550_vm2, %v21977_v3  ;;  %v22259_v34 = vld [vmem:[#allocation3 + $0xff] sm:$0xff]  ;;  %v22263_v46 = vld [vmem:[#allocation3 + $0x107] sm:$0xff] }
 0x3bd   : > { %v6140_v18 = vmul.f32 %v21911_v38, %v5852_v29  ;;  %v5806_v48 = vadd.f32 %v18752_v36, %v21651_v9  ;;  %v17640_v42 = vpop.f32.mrb[38].mxu0  ;;  %v21999_v25 = vld [vmem:[#allocation3 + $0x118] sm:$0xff] }
 0x3be   : > { %6189 = vst.msk [vmem:[%s21668_s27 + $0x118] sm:$0xff] %vm550_vm2, %v6141_v2  ;;  %6237 = vst.msk [vmem:[#allocation3 + $0x138] sm:$0xff] %vm550_vm2, %v6141_v2  ;;  %v5855_v7 = vmax.f32 %v5807_v33, 0.0  ;;  %v18753_v57 = vadd.f32 %v17640_v42, %v24250_v51  ;;  %v5666_v26 = vpop.f32.mrb[39].mxu0  ;;  %v21991_v13 = vld [vmem:[#allocation3 + $0x110] sm:$0xff]  ;;  %v22005_v33 = vpop.permute.xlu1 %6073 }
 0x3bf   : > { %6188 = vst.msk [vmem:[%s21668_s27 + $0x110] sm:$0xff] %vm550_vm2, %v6140_v18  ;;  %6236 = vst.msk [vmem:[#allocation3 + $0x130] sm:$0xff] %vm550_vm2, %v6140_v18  ;;  %v5854_v0 = vmax.f32 %v5806_v48, 0.0  ;;  %v18754_v29 = vadd.f32 %v5666_v26, %v24251_v8  ;;  %17704 = vmatmul.mubr.msk.f32.gmra.mrb[80].mxu1 %vm550_vm2, %v21991_v13  ;;  %v22009_v51 = vpop.permute.xlu0 %6068  ;;  %v22267_v30 = vld [vmem:[#allocation3 + $0x10f] sm:$0xff]  ;;  %v22271_v49 = vld [vmem:[#allocation3 + $0x117] sm:$0xff] }
 0x3c0   : > { %v6143_v36 = vmul.f32 %v21937_v4, %v5855_v7  ;;  %v5809_v2 = vadd.f32 %v18753_v57, %v21651_v9  ;;  %17706 = vmatprep.mubr.msk.f32.mxu1 %vm550_vm2, %v21999_v25  ;;  %24252 = vst [vmem:[#allocation30_spill] sm:$0xff] %v22005_v33  ;;  %24253 = vst [vmem:[#allocation31_spill] sm:$0xff] %v22009_v51  ;;  %v24254_v7 = vld [vmem:[#allocation39_spill] sm:$0xff] }
 0x3c1   : > { %v6142_v18 = vmul.f32 %v21941_v15, %v5854_v0  ;;  %v5808_v48 = vadd.f32 %v18754_v29, %v21651_v9  ;;  %v17643_v42 = vpop.f32.mrb[40].mxu0  ;;  %v24255_v29 = vld [vmem:[#allocation40_spill] sm:$0xff]  ;;  %v22023_v38 = vld [vmem:[#allocation3 + $0x128] sm:$0xff] }
 0x3c2   : > { %6191 = vst.msk [vmem:[%s21668_s27 + $0x128] sm:$0xff] %vm550_vm2, %v6143_v36  ;;  %6239 = vst.msk [vmem:[#allocation3 + $0x148] sm:$0xff] %vm550_vm2, %v6143_v36  ;;  %v5857_v26 = vmax.f32 %v5809_v2, 0.0  ;;  %v18755_v57 = vadd.f32 %v17643_v42, %v24254_v7  ;;  %v5676_v8 = vpop.f32.mrb[41].mxu0  ;;  %v22015_v4 = vld [vmem:[#allocation3 + $0x120] sm:$0xff] }
 0x3c3   : > { %6190 = vst.msk [vmem:[%s21668_s27 + $0x120] sm:$0xff] %vm550_vm2, %v6142_v18  ;;  %6238 = vst.msk [vmem:[#allocation3 + $0x140] sm:$0xff] %vm550_vm2, %v6142_v18  ;;  %v5856_v0 = vmax.f32 %v5808_v48, 0.0  ;;  %v18756_v15 = vadd.f32 %v5676_v8, %v24255_v29  ;;  %17707 = vmatmul.mubr.msk.f32.gmra.mrb[82].mxu1 %vm550_vm2, %v22015_v4  ;;  %v24256_v8 = vld [vmem:[#allocation41_spill] sm:$0xff]  ;;  %v22275_v19 = vld [vmem:[#allocation3 + $0x11f] sm:$0xff] }
 0x3c4   : > { %v6145_v36 = vmul.f32 %v21969_v37, %v5857_v26  ;;  %v5811_v2 = vadd.f32 %v18755_v57, %v21651_v9  ;;  %17709 = vmatprep.mubr.msk.f32.mxu1 %vm550_vm2, %v22023_v38  ;;  %v22037_v57 = vpop.permute.xlu1 %6083  ;;  %v24262_v37 = vld [vmem:[#allocation43_spill] sm:$0xff]  ;;  %v22279_v20 = vld [vmem:[#allocation3 + $0x127] sm:$0xff] }
 0x3c5   : > { %v6144_v42 = vmul.f32 %v21979_v1, %v5856_v0  ;;  %v5810_v18 = vadd.f32 %v18756_v15, %v21651_v9  ;;  %v17646_v48 = vpop.f32.mrb[42].mxu0  ;;  %24258 = vst [vmem:[#allocation33_spill] sm:$0xff] %v22037_v57  ;;  %v24259_v15 = vld [vmem:[#allocation42_spill] sm:$0xff] }
 0x3c6   : > { %6193 = vst.msk [vmem:[%s21668_s27 + $0x138] sm:$0xff] %vm550_vm2, %v6145_v36  ;;  %6241 = vst.msk [vmem:[#allocation3 + $0x158] sm:$0xff] %vm550_vm2, %v6145_v36  ;;  %v5859_v7 = vmax.f32 %v5811_v2, 0.0  ;;  %v18757_v29 = vadd.f32 %v17646_v48, %v24256_v8  ;;  %v5686_v45 = vpop.f32.mrb[43].mxu0  ;;  %v22035_v26 = vld [vmem:[#allocation3 + $0x130] sm:$0xff]  ;;  %v22045_v36 = vld [vmem:[#allocation3 + $0x138] sm:$0xff]  ;;  %v22047_v2 = vpop.permute.xlu0 %6078 }
 0x3c7   : > { %24257 = vst [vmem:[#allocation32_spill] sm:$0xff] %v22035_v26  ;;  %6192 = vst.msk [vmem:[%s21668_s27 + $0x130] sm:$0xff] %vm550_vm2, %v6144_v42  ;;  %v5858_v0 = vmax.f32 %v5810_v18, 0.0  ;;  %v18758_v1 = vadd.f32 %v5686_v45, %v24259_v15  ;;  %17710 = vmatmul.mubr.msk.f32.gmra.mrb[84].mxu1 %vm550_vm2, %v22035_v26  ;;  %v22283_v55 = vld [vmem:[#allocation3 + $0x12f] sm:$0xff]  ;;  %v22287_v5 = vld [vmem:[#allocation3 + $0x137] sm:$0xff] }
 0x3c8   : > { %6240 = vst.msk [vmem:[#allocation3 + $0x150] sm:$0xff] %vm550_vm2, %v6144_v42  ;;  %24260 = vst [vmem:[#allocation34_spill] sm:$0xff] %v22045_v36  ;;  %v6147_v48 = vmul.f32 %v22005_v33, %v5859_v7  ;;  %v5813_v8 = vadd.f32 %v18757_v29, %v21651_v9  ;;  %17712 = vmatprep.mubr.msk.f32.mxu1 %vm550_vm2, %v22045_v36  ;;  %v22335_v36 = vld [vmem:[#allocation3 + $0x29] sm:$0xff]  ;;  %v22339_v26 = vld [vmem:[#allocation3 + $0x31] sm:$0xff] }
 0x3c9   : > { %24261 = vst [vmem:[#allocation35_spill] sm:$0xff] %v22047_v2  ;;  %v6146_v42 = vmul.f32 %v22009_v51, %v5858_v0  ;;  %v5812_v18 = vadd.f32 %v18758_v1, %v21651_v9  ;;  %v17649_v45 = vpop.f32.mrb[44].mxu0  ;;  %v24264_v0 = vld [vmem:[#allocation44_spill] sm:$0xff]  ;;  %v22067_v1 = vld [vmem:[#allocation3 + $0x148] sm:$0xff]  ;;  %24282 = vst [vmem:[#allocation68_spill] sm:$0xff] %v22335_v36 }
 0x3ca   : > { %6195 = vst.msk [vmem:[%s21668_s27 + $0x148] sm:$0xff] %vm550_vm2, %v6147_v48  ;;  %6243 = vst.msk [vmem:[#allocation3 + $0x168] sm:$0xff] %vm550_vm2, %v6147_v48  ;;  %v5861_v15 = vmax.f32 %v5813_v8, 0.0  ;;  %v18759_v52 = vadd.f32 %v17649_v45, %v24262_v37  ;;  %v5696_v12 = vpop.f32.mrb[45].mxu0  ;;  %v22059_v7 = vld [vmem:[#allocation3 + $0x140] sm:$0xff]  ;;  %v22073_v8 = vpop.permute.xlu1 %6093 }
 0x3cb   : > { %24263 = vst [vmem:[#allocation36_spill] sm:$0xff] %v22059_v7  ;;  %6194 = vst.msk [vmem:[%s21668_s27 + $0x140] sm:$0xff] %vm550_vm2, %v6146_v42  ;;  %v5860_v29 = vmax.f32 %v5812_v18, 0.0  ;;  %v18760_v51 = vadd.f32 %v5696_v12, %v24264_v0  ;;  %17713 = vmatmul.mubr.msk.f32.gmra.mrb[86].mxu1 %vm550_vm2, %v22059_v7  ;;  %v22077_v45 = vpop.permute.xlu0 %6088  ;;  %v24268_v0 = vld [vmem:[#allocation45_spill] sm:$0xff]  ;;  %v22291_v10 = vld [vmem:[#allocation3 + $0x13f] sm:$0xff] }
 0x3cc   : > { %6242 = vst.msk [vmem:[#allocation3 + $0x160] sm:$0xff] %vm550_vm2, %v6146_v42  ;;  %24265 = vst [vmem:[#allocation37_spill] sm:$0xff] %v22067_v1  ;;  %v6149_v48 = vmul.f32 %v22037_v57, %v5861_v15  ;;  %v5815_v37 = vadd.f32 %v18759_v52, %v21651_v9  ;;  %17715 = vmatprep.mubr.msk.f32.mxu1 %vm550_vm2, %v22067_v1  ;;  %v22295_v43 = vld [vmem:[#allocation3 + $0x147] sm:$0xff]  ;;  %v7249_v1 = vld [vmem:[#allocation3 + $0x19] sm:$0xff] }
 0x3cd   : > { %24266 = vst [vmem:[#allocation38_spill] sm:$0xff] %v22073_v8  ;;  %v6148_v42 = vmul.f32 %v22047_v2, %v5860_v29  ;;  %v5814_v18 = vadd.f32 %v18760_v51, %v21651_v9  ;;  %v17652_v12 = vpop.f32.mrb[46].mxu0  ;;  %24267 = vst [vmem:[#allocation9_spill] sm:$0xff] %v22077_v45  ;;  %v24270_v29 = vld [vmem:[#allocation46_spill] sm:$0xff]  ;;  %v22091_v41 = vld [vmem:[#allocation3 + $0x158] sm:$0xff] }
 0x3ce   : > { %6197 = vst.msk [vmem:[%s21668_s27 + $0x158] sm:$0xff] %vm550_vm2, %v6149_v48  ;;  %6245 = vst.msk [vmem:[#allocation3 + $0x178] sm:$0xff] %vm550_vm2, %v6149_v48  ;;  %v5863_v15 = vmax.f32 %v5815_v37, 0.0  ;;  %v18761_v52 = vadd.f32 %v17652_v12, %v24268_v0  ;;  %v5706_v57 = vpop.f32.mrb[47].mxu0  ;;  %v22104_v0 = vpop.permute.xlu1 %6103  ;;  %v22331_v7 = vld [vmem:[#allocation3 + $0x21] sm:$0xff] }
 0x3cf   : > { %v22083_v33 = vld [vmem:[#allocation3 + $0x150] sm:$0xff]  ;;  %6196 = vst.msk [vmem:[%s21668_s27 + $0x150] sm:$0xff] %vm550_vm2, %v6148_v42  ;;  %6244 = vst.msk [vmem:[#allocation3 + $0x170] sm:$0xff] %vm550_vm2, %v6148_v42  ;;  %v5862_v51 = vmax.f32 %v5814_v18, 0.0  ;;  %v18762_v2 = vadd.f32 %v5706_v57, %v24270_v29 }
 0x3d0   : > { %24269 = vst [vmem:[#allocation10_spill] sm:$0xff] %v22083_v33  ;;  %17716 = vmatmul.mubr.msk.f32.gmra.mrb[88].mxu1 %vm550_vm2, %v22083_v33  ;;  %24271 = vst [vmem:[#allocation11_spill] sm:$0xff] %v22091_v41  ;;  %v6151_v48 = vmul.f32 %v22073_v8, %v5863_v15  ;;  %v5817_v37 = vadd.f32 %v18761_v52, %v21651_v9  ;;  %v22183_v8 = vld [vmem:[#allocation3 + $0x67] sm:$0xff]  ;;  %v22299_v21 = vld [vmem:[#allocation3 + $0x14f] sm:$0xff] }
 0x3d1   : > { %17718 = vmatprep.mubr.msk.f32.mxu1 %vm550_vm2, %v22091_v41  ;;  %v6150_v12 = vmul.f32 %v22077_v45, %v5862_v51  ;;  %v5816_v42 = vadd.f32 %v18762_v2, %v21651_v9  ;;  %24273 = vst [vmem:[#allocation40_spill] sm:$0xff] %v22104_v0  ;;  %v22111_v52 = vld [vmem:[#allocation3 + $0x168] sm:$0xff]  ;;  %v22113_v9 = vpop.permute.xlu0 %6098  ;;  %v22179_v45 = vld [vmem:[#allocation3 + $0x5f] sm:$0xff]  ;;  %v22303_v31 = vld [vmem:[#allocation3 + $0x157] sm:$0xff] }
 0x3d2   : > { %6199 = vst.msk [vmem:[%s21668_s27 + $0x168] sm:$0xff] %vm550_vm2, %v6151_v48  ;;  %6247 = vst.msk [vmem:[#allocation3 + $0x188] sm:$0xff] %vm550_vm2, %v6151_v48  ;;  %v5865_v57 = vmax.f32 %v5817_v37, 0.0  ;;  %v6250_v37 = vld [vmem:[#allocation3 + $0x7] sm:$0xff]  ;;  %v7248_v33 = vld [vmem:[#allocation3 + $0x11] sm:$0xff] }
 0x3d3   : > { %v22102_v18 = vld [vmem:[#allocation3 + $0x160] sm:$0xff]  ;;  %6198 = vst.msk [vmem:[%s21668_s27 + $0x160] sm:$0xff] %vm550_vm2, %v6150_v12  ;;  %6246 = vst.msk [vmem:[#allocation3 + $0x180] sm:$0xff] %vm550_vm2, %v6150_v12  ;;  %v5864_v15 = vmax.f32 %v5816_v42, 0.0  ;;  %v6251_v42 = vld [vmem:[#allocation3 + $0xf] sm:$0xff] }
 0x3d4   : > { %24272 = vst [vmem:[#allocation39_spill] sm:$0xff] %v22102_v18  ;;  %17719 = vmatmul.mubr.msk.f32.gmra.mrb[90].mxu1 %vm550_vm2, %v22102_v18  ;;  %24274 = vst [vmem:[#allocation41_spill] sm:$0xff] %v22111_v52  ;;  %v6153_v2 = vmul.f32 %v22104_v0, %v5865_v57  ;;  %v6252_v57 = vld [vmem:[#allocation3 + $0x17] sm:$0xff]  ;;  %v7247_v18 = vld [vmem:[#allocation3 + $0x9] sm:$0xff] }
 0x3d5   : > { %24275 = vst [vmem:[#allocation42_spill] sm:$0xff] %v22113_v9  ;;  %17721 = vmatprep.mubr.msk.f32.mxu1 %vm550_vm2, %v22111_v52  ;;  %v6152_v51 = vmul.f32 %v22113_v9, %v5864_v15  ;;  %v22129_v48 = vld [vmem:[#allocation3 + $0x178] sm:$0xff]  ;;  %v22171_v9 = vld [vmem:[#allocation3 + $0x4f] sm:$0xff]  ;;  %24283 = vst [vmem:[#allocation69_spill] sm:$0xff] %v22339_v26 }
 0x3d6   : > { %6201 = vst.msk [vmem:[%s21668_s27 + $0x178] sm:$0xff] %vm550_vm2, %v6153_v2  ;;  %6249 = vst.msk [vmem:[#allocation3 + $0x198] sm:$0xff] %vm550_vm2, %v6153_v2  ;;  %v22122_v29 = vld [vmem:[#allocation3 + $0x170] sm:$0xff]  ;;  %v22141_v15 = vld [vmem:[#allocation3 + $0x1f] sm:$0xff] }
 0x3d7   : > { %24276 = vst [vmem:[#allocation43_spill] sm:$0xff] %v22122_v29  ;;  %6200 = vst.msk [vmem:[%s21668_s27 + $0x170] sm:$0xff] %vm550_vm2, %v6152_v51  ;;  %v22145_v2 = vld [vmem:[#allocation3 + $0x27] sm:$0xff]  ;;  %v22175_v0 = vld [vmem:[#allocation3 + $0x57] sm:$0xff] }
 0x3d8   : > { %6248 = vst.msk [vmem:[#allocation3 + $0x190] sm:$0xff] %vm550_vm2, %v6152_v51  ;;  %17722 = vmatmul.mubr.msk.f32.gmra.mrb[92].mxu1 %vm550_vm2, %v22122_v29  ;;  %24277 = vst [vmem:[#allocation44_spill] sm:$0xff] %v22129_v48  ;;  %v22149_v51 = vld [vmem:[#allocation3 + $0x2f] sm:$0xff]  ;;  %v22319_v52 = vld [vmem:[#allocation3 + $0x177] sm:$0xff] }
 0x3d9   : > { %17724 = vmatprep.mubr.msk.f32.mxu1 %vm550_vm2, %v22129_v48  ;;  %v22311_v48 = vld [vmem:[#allocation3 + $0x167] sm:$0xff]  ;;  %v22315_v29 = vld [vmem:[#allocation3 + $0x16f] sm:$0xff]  ;;  %24280 = vst [vmem:[#allocation66_spill] sm:$0xff] %v22319_v52 }
 0x3da   : > { %v22133_v12 = vld [vmem:[#allocation3 + $0x180] sm:$0xff]  ;;  %24279 = vst [vmem:[#allocation46_spill] sm:$0xff] %v22315_v29 }
 0x3db   : > { %24278 = vst [vmem:[#allocation45_spill] sm:$0xff] %v22133_v12  ;;  %v22323_v41 = vld [vmem:[#allocation3 + $0x17f] sm:$0xff] }
 0x3dc   : > { %17725 = vmatmul.mubr.msk.f32.gmra.mrb[94].mxu1 %vm550_vm2, %v22133_v12  ;;  %v22307_v12 = vld [vmem:[#allocation3 + $0x15f] sm:$0xff]  ;;  %24281 = vst [vmem:[#allocation67_spill] sm:$0xff] %v22323_v41 }
 0x3dd   : > { %17729 = vmatprep.mubr.msk.f32.mxu1 %vm550_vm2, %v6250_v37  ;;  %v22153_v37 = vld [vmem:[#allocation3 + $0x37] sm:$0xff] }
 0x3e0   : > { %17730 = vmatmul.mubr.msk.f32.vlgmr.msra.gmra.mrb[48].mxu1 %vm550_vm2, %v6251_v42  ;;  %v22161_v42 = vld [vmem:[#allocation3 + $0x47] sm:$0xff] }
 0x3e1   : > { %17732 = vmatprep.mubr.msk.f32.mxu1 %vm550_vm2, %v6252_v57  ;;  %17802 = vmatpush3.msra.mxu1 %v21753_v11  ;;  %v22157_v11 = vld [vmem:[#allocation3 + $0x3f] sm:$0xff] }
 0x3e2   : > { %v22166_v57 = vld [vmem:[%s23865_s5 + $0x18] sm:$0xff] }
 0x3e3   : > { %17875 = vmatprep.subr.mxu1 %v22166_v57 }
 0x3e4   : > { %17733 = vmatmul.mubr.msk.f32.gmra.mrb[50].mxu1 %vm550_vm2, %v22141_v15 }
 0x3e5   : > { %17735 = vmatprep.mubr.msk.f32.mxu1 %vm550_vm2, %v22145_v2 }
 0x3e8   : > { %17736 = vmatmul.mubr.msk.f32.gmra.mrb[52].mxu1 %vm550_vm2, %v22149_v51 }
 0x3e9   : > { %17738 = vmatprep.mubr.msk.f32.mxu1 %vm550_vm2, %v22153_v37 }
 0x3ec   : > { %17739 = vmatmul.mubr.msk.f32.gmra.mrb[54].mxu1 %vm550_vm2, %v22157_v11 }
 0x3ed   : > { %17741 = vmatprep.mubr.msk.f32.mxu1 %vm550_vm2, %v22161_v42 }
 0x3f0   : > { %17742 = vmatmul.mubr.msk.f32.gmra.mrb[56].mxu1 %vm550_vm2, %v22171_v9 }
 0x3f1   : > { %17744 = vmatprep.mubr.msk.f32.mxu1 %vm550_vm2, %v22175_v0 }
 0x3f4   : > { %17745 = vmatmul.mubr.msk.f32.gmra.mrb[58].mxu1 %vm550_vm2, %v22179_v45 }
 0x3f5   : > { %17747 = vmatprep.mubr.msk.f32.mxu1 %vm550_vm2, %v22183_v8 }
 0x3f8   : > { %17748 = vmatmul.mubr.msk.f32.gmra.mrb[60].mxu1 %vm550_vm2, %v22187_v56 }
 0x3f9   : > { %17750 = vmatprep.mubr.msk.f32.mxu1 %vm550_vm2, %v22191_v53 }
 0x3fc   : > { %17751 = vmatmul.mubr.msk.f32.gmra.mrb[62].mxu1 %vm550_vm2, %v22195_v39 }
 0x3fd   : > { %17753 = vmatprep.mubr.msk.f32.mxu1 %vm550_vm2, %v22199_v58 }
 0x400   : > { %17754 = vmatmul.mubr.msk.f32.gmra.mrb[64].mxu1 %vm550_vm2, %v22203_v23 }
 0x401   : > { %17756 = vmatprep.mubr.msk.f32.mxu1 %vm550_vm2, %v22207_v28 }
 0x404   : > { %17757 = vmatmul.mubr.msk.f32.gmra.mrb[66].mxu1 %vm550_vm2, %v22211_v50 }
 0x405   : > { %17759 = vmatprep.mubr.msk.f32.mxu1 %vm550_vm2, %v22215_v24 }
 0x408   : > { %17760 = vmatmul.mubr.msk.f32.gmra.mrb[68].mxu1 %vm550_vm2, %v22219_v62 }
 0x409   : > { %17762 = vmatprep.mubr.msk.f32.mxu1 %vm550_vm2, %v22223_v14 }
 0x40c   : > { %17763 = vmatmul.mubr.msk.f32.gmra.mrb[70].mxu1 %vm550_vm2, %v22227_v6 }
 0x40d   : > { %17765 = vmatprep.mubr.msk.f32.mxu1 %vm550_vm2, %v22231_v40 }
 0x410   : > { %17766 = vmatmul.mubr.msk.f32.gmra.mrb[72].mxu1 %vm550_vm2, %v22235_v16 }
 0x411   : > { %17768 = vmatprep.mubr.msk.f32.mxu1 %vm550_vm2, %v22239_v35 }
 0x414   : > { %17769 = vmatmul.mubr.msk.f32.gmra.mrb[74].mxu1 %vm550_vm2, %v22243_v32 }
 0x415   : > { %17771 = vmatprep.mubr.msk.f32.mxu1 %vm550_vm2, %v22247_v17 }
 0x418   : > { %17772 = vmatmul.mubr.msk.f32.gmra.mrb[76].mxu1 %vm550_vm2, %v22251_v27 }
 0x419   : > { %17774 = vmatprep.mubr.msk.f32.mxu1 %vm550_vm2, %v22255_v59 }
 0x41c   : > { %17775 = vmatmul.mubr.msk.f32.gmra.mrb[78].mxu1 %vm550_vm2, %v22259_v34 }
 0x41d   : > { %17777 = vmatprep.mubr.msk.f32.mxu1 %vm550_vm2, %v22263_v46 }
 0x420   : > { %17778 = vmatmul.mubr.msk.f32.gmra.mrb[80].mxu1 %vm550_vm2, %v22267_v30 }
 0x421   : > { %17780 = vmatprep.mubr.msk.f32.mxu1 %vm550_vm2, %v22271_v49 }
 0x424   : > { %17781 = vmatmul.mubr.msk.f32.gmra.mrb[82].mxu1 %vm550_vm2, %v22275_v19 }
 0x425   : > { %17783 = vmatprep.mubr.msk.f32.mxu1 %vm550_vm2, %v22279_v20 }
 0x428   : > { %17784 = vmatmul.mubr.msk.f32.gmra.mrb[84].mxu1 %vm550_vm2, %v22283_v55 }
 0x429   : > { %17786 = vmatprep.mubr.msk.f32.mxu1 %vm550_vm2, %v22287_v5 }
 0x42c   : > { %17787 = vmatmul.mubr.msk.f32.gmra.mrb[86].mxu1 %vm550_vm2, %v22291_v10 }
 0x42d   : > { %17789 = vmatprep.mubr.msk.f32.mxu1 %vm550_vm2, %v22295_v43 }
 0x430   : > { %17790 = vmatmul.mubr.msk.f32.gmra.mrb[88].mxu1 %vm550_vm2, %v22299_v21 }
 0x431   : > { %17792 = vmatprep.mubr.msk.f32.mxu1 %vm550_vm2, %v22303_v31 }
 0x434   : > { %17793 = vmatmul.mubr.msk.f32.gmra.mrb[90].mxu1 %vm550_vm2, %v22307_v12 }
 0x435   : > { %17795 = vmatprep.mubr.msk.f32.mxu1 %vm550_vm2, %v22311_v48 }
 0x438   : > { %17796 = vmatmul.mubr.msk.f32.gmra.mrb[92].mxu1 %vm550_vm2, %v22315_v29 }
 0x439   : > { %17798 = vmatprep.mubr.msk.f32.mxu1 %vm550_vm2, %v22319_v52 }
 0x43c   : > { %17799 = vmatmul.mubr.msk.f32.gmra.mrb[94].mxu1 %vm550_vm2, %v22323_v41 }
 0x43d   : > { %17803 = vmatprep.mubr.msk.f32.mxu1 %vm550_vm2, %v7247_v18  ;;  %v22351_v18 = vld [vmem:[#allocation3 + $0x49] sm:$0xff] }
 0x43e   : > { %24286 = vst [vmem:[#allocation72_spill] sm:$0xff] %v22351_v18 }
 0x440   : > { %17804 = vmatmul.mubr.msk.f32.vlgmr.msra.gmra.mrb[48].mxu1 %vm550_vm2, %v7248_v33  ;;  %v22343_v33 = vld [vmem:[#allocation3 + $0x39] sm:$0xff] }
 0x441   : > { %17806 = vmatprep.mubr.msk.f32.mxu1 %vm550_vm2, %v7249_v1  ;;  %17876 = vmatpush3.msra.mxu1 %v22166_v57  ;;  %24284 = vst [vmem:[#allocation70_spill] sm:$0xff] %v22343_v33  ;;  %v22347_v1 = vld [vmem:[#allocation3 + $0x41] sm:$0xff] }
 0x442   : > { %24285 = vst [vmem:[#allocation71_spill] sm:$0xff] %v22347_v1  ;;  %v22356_v57 = vld [vmem:[%s23865_s5 + $0x20] sm:$0xff] }
 0x443   : > { %17949 = vmatprep.subr.mxu1 %v22356_v57 }
 0x444   : > { %17807 = vmatmul.mubr.msk.f32.gmra.mrb[50].mxu1 %vm550_vm2, %v22331_v7 }
 0x445   : > { %17809 = vmatprep.mubr.msk.f32.mxu1 %vm550_vm2, %v22335_v36  ;;  %v22373_v36 = vld [vmem:[#allocation3 + $0x69] sm:$0xff] }
 0x446   : > { %24290 = vst [vmem:[#allocation76_spill] sm:$0xff] %v22373_v36 }
 0x448   : > { %17810 = vmatmul.mubr.msk.f32.gmra.mrb[52].mxu1 %vm550_vm2, %v22339_v26  ;;  %v22361_v26 = vld [vmem:[#allocation3 + $0x51] sm:$0xff] }
 0x449   : > { %17812 = vmatprep.mubr.msk.f32.mxu1 %vm550_vm2, %v22343_v33  ;;  %24287 = vst [vmem:[#allocation73_spill] sm:$0xff] %v22361_v26  ;;  %v22365_v33 = vld [vmem:[#allocation3 + $0x59] sm:$0xff] }
 0x44a   : > { %24288 = vst [vmem:[#allocation74_spill] sm:$0xff] %v22365_v33 }
 0x44c   : > { %17813 = vmatmul.mubr.msk.f32.gmra.mrb[54].mxu1 %vm550_vm2, %v22347_v1  ;;  %v22369_v1 = vld [vmem:[#allocation3 + $0x61] sm:$0xff] }
 0x44d   : > { %17815 = vmatprep.mubr.msk.f32.mxu1 %vm550_vm2, %v22351_v18  ;;  %24289 = vst [vmem:[#allocation75_spill] sm:$0xff] %v22369_v1  ;;  %v22377_v18 = vld [vmem:[#allocation3 + $0x71] sm:$0xff] }
 0x44e   : > { %24291 = vst [vmem:[#allocation77_spill] sm:$0xff] %v22377_v18 }
 0x450   : > { %17816 = vmatmul.mubr.msk.f32.gmra.mrb[56].mxu1 %vm550_vm2, %v22361_v26  ;;  %v22381_v26 = vld [vmem:[#allocation3 + $0x79] sm:$0xff] }
 0x451   : > { %17818 = vmatprep.mubr.msk.f32.mxu1 %vm550_vm2, %v22365_v33  ;;  %24292 = vst [vmem:[#allocation78_spill] sm:$0xff] %v22381_v26  ;;  %v22385_v33 = vld [vmem:[#allocation3 + $0x81] sm:$0xff] }
 0x452   : > { %24293 = vst [vmem:[#allocation79_spill] sm:$0xff] %v22385_v33 }
 0x454   : > { %17819 = vmatmul.mubr.msk.f32.gmra.mrb[58].mxu1 %vm550_vm2, %v22369_v1  ;;  %v22389_v1 = vld [vmem:[#allocation3 + $0x89] sm:$0xff] }
 0x455   : > { %17821 = vmatprep.mubr.msk.f32.mxu1 %vm550_vm2, %v22373_v36  ;;  %24294 = vst [vmem:[#allocation80_spill] sm:$0xff] %v22389_v1  ;;  %v22393_v36 = vld [vmem:[#allocation3 + $0x91] sm:$0xff] }
 0x456   : > { %24295 = vst [vmem:[#allocation81_spill] sm:$0xff] %v22393_v36 }
 0x458   : > { %17822 = vmatmul.mubr.msk.f32.gmra.mrb[60].mxu1 %vm550_vm2, %v22377_v18  ;;  %v22397_v18 = vld [vmem:[#allocation3 + $0x99] sm:$0xff] }
 0x459   : > { %17824 = vmatprep.mubr.msk.f32.mxu1 %vm550_vm2, %v22381_v26  ;;  %24296 = vst [vmem:[#allocation82_spill] sm:$0xff] %v22397_v18  ;;  %v22401_v26 = vld [vmem:[#allocation3 + $0xa1] sm:$0xff] }
 0x45a   : > { %24297 = vst [vmem:[#allocation83_spill] sm:$0xff] %v22401_v26 }
 0x45c   : > { %17825 = vmatmul.mubr.msk.f32.gmra.mrb[62].mxu1 %vm550_vm2, %v22385_v33  ;;  %v22405_v33 = vld [vmem:[#allocation3 + $0xa9] sm:$0xff] }
 0x45d   : > { %17827 = vmatprep.mubr.msk.f32.mxu1 %vm550_vm2, %v22389_v1  ;;  %24298 = vst [vmem:[#allocation84_spill] sm:$0xff] %v22405_v33  ;;  %v22409_v1 = vld [vmem:[#allocation3 + $0xb1] sm:$0xff] }
 0x45e   : > { %24299 = vst [vmem:[#allocation85_spill] sm:$0xff] %v22409_v1 }
 0x460   : > { %17828 = vmatmul.mubr.msk.f32.gmra.mrb[64].mxu1 %vm550_vm2, %v22393_v36  ;;  %v22413_v36 = vld [vmem:[#allocation3 + $0xb9] sm:$0xff] }
 0x461   : > { %17830 = vmatprep.mubr.msk.f32.mxu1 %vm550_vm2, %v22397_v18  ;;  %24300 = vst [vmem:[#allocation86_spill] sm:$0xff] %v22413_v36  ;;  %v22417_v18 = vld [vmem:[#allocation3 + $0xc1] sm:$0xff] }
 0x462   : > { %24301 = vst [vmem:[#allocation87_spill] sm:$0xff] %v22417_v18 }
 0x464   : > { %17831 = vmatmul.mubr.msk.f32.gmra.mrb[66].mxu1 %vm550_vm2, %v22401_v26  ;;  %v22421_v26 = vld [vmem:[#allocation3 + $0xc9] sm:$0xff] }
 0x465   : > { %17833 = vmatprep.mubr.msk.f32.mxu1 %vm550_vm2, %v22405_v33  ;;  %24302 = vst [vmem:[#allocation88_spill] sm:$0xff] %v22421_v26  ;;  %v22425_v33 = vld [vmem:[#allocation3 + $0xd1] sm:$0xff] }
 0x466   : > { %24303 = vst [vmem:[#allocation89_spill] sm:$0xff] %v22425_v33 }
 0x468   : > { %17834 = vmatmul.mubr.msk.f32.gmra.mrb[68].mxu1 %vm550_vm2, %v22409_v1  ;;  %v22429_v1 = vld [vmem:[#allocation3 + $0xd9] sm:$0xff] }
 0x469   : > { %17836 = vmatprep.mubr.msk.f32.mxu1 %vm550_vm2, %v22413_v36  ;;  %24304 = vst [vmem:[#allocation90_spill] sm:$0xff] %v22429_v1  ;;  %v22433_v36 = vld [vmem:[#allocation3 + $0xe1] sm:$0xff] }
 0x46a   : > { %24305 = vst [vmem:[#allocation91_spill] sm:$0xff] %v22433_v36 }
 0x46c   : > { %17837 = vmatmul.mubr.msk.f32.gmra.mrb[70].mxu1 %vm550_vm2, %v22417_v18  ;;  %v22437_v18 = vld [vmem:[#allocation3 + $0xe9] sm:$0xff] }
 0x46d   : > { %17839 = vmatprep.mubr.msk.f32.mxu1 %vm550_vm2, %v22421_v26  ;;  %24306 = vst [vmem:[#allocation92_spill] sm:$0xff] %v22437_v18  ;;  %v22441_v26 = vld [vmem:[#allocation3 + $0xf1] sm:$0xff] }
 0x46e   : > { %24307 = vst [vmem:[#allocation93_spill] sm:$0xff] %v22441_v26 }
 0x470   : > { %17840 = vmatmul.mubr.msk.f32.gmra.mrb[72].mxu1 %vm550_vm2, %v22425_v33  ;;  %v22445_v33 = vld [vmem:[#allocation3 + $0xf9] sm:$0xff] }
 0x471   : > { %17842 = vmatprep.mubr.msk.f32.mxu1 %vm550_vm2, %v22429_v1  ;;  %24308 = vst [vmem:[#allocation94_spill] sm:$0xff] %v22445_v33  ;;  %v22449_v1 = vld [vmem:[#allocation3 + $0x101] sm:$0xff] }
 0x472   : > { %24309 = vst [vmem:[#allocation95_spill] sm:$0xff] %v22449_v1 }
 0x474   : > { %17843 = vmatmul.mubr.msk.f32.gmra.mrb[74].mxu1 %vm550_vm2, %v22433_v36  ;;  %v22453_v36 = vld [vmem:[#allocation3 + $0x109] sm:$0xff] }
 0x475   : > { %17845 = vmatprep.mubr.msk.f32.mxu1 %vm550_vm2, %v22437_v18  ;;  %24310 = vst [vmem:[#allocation96_spill] sm:$0xff] %v22453_v36  ;;  %v22457_v18 = vld [vmem:[#allocation3 + $0x111] sm:$0xff] }
 0x476   : > { %24311 = vst [vmem:[#allocation97_spill] sm:$0xff] %v22457_v18 }
 0x478   : > { %17846 = vmatmul.mubr.msk.f32.gmra.mrb[76].mxu1 %vm550_vm2, %v22441_v26  ;;  %v22461_v26 = vld [vmem:[#allocation3 + $0x119] sm:$0xff] }
 0x479   : > { %17848 = vmatprep.mubr.msk.f32.mxu1 %vm550_vm2, %v22445_v33  ;;  %24312 = vst [vmem:[#allocation98_spill] sm:$0xff] %v22461_v26  ;;  %v22465_v33 = vld [vmem:[#allocation3 + $0x121] sm:$0xff] }
 0x47a   : > { %24313 = vst [vmem:[#allocation99_spill] sm:$0xff] %v22465_v33 }
 0x47c   : > { %17849 = vmatmul.mubr.msk.f32.gmra.mrb[78].mxu1 %vm550_vm2, %v22449_v1  ;;  %v22469_v1 = vld [vmem:[#allocation3 + $0x129] sm:$0xff] }
 0x47d   : > { %17851 = vmatprep.mubr.msk.f32.mxu1 %vm550_vm2, %v22453_v36  ;;  %24314 = vst [vmem:[#allocation100_spill] sm:$0xff] %v22469_v1  ;;  %v22473_v36 = vld [vmem:[#allocation3 + $0x131] sm:$0xff] }
 0x47e   : > { %24315 = vst [vmem:[#allocation101_spill] sm:$0xff] %v22473_v36 }
 0x480   : > { %17852 = vmatmul.mubr.msk.f32.gmra.mrb[80].mxu1 %vm550_vm2, %v22457_v18  ;;  %v22477_v18 = vld [vmem:[#allocation3 + $0x139] sm:$0xff] }
 0x481   : > { %17854 = vmatprep.mubr.msk.f32.mxu1 %vm550_vm2, %v22461_v26  ;;  %24316 = vst [vmem:[#allocation102_spill] sm:$0xff] %v22477_v18  ;;  %v22481_v26 = vld [vmem:[#allocation3 + $0x141] sm:$0xff] }
 0x482   : > { %24317 = vst [vmem:[#allocation103_spill] sm:$0xff] %v22481_v26 }
 0x484   : > { %17855 = vmatmul.mubr.msk.f32.gmra.mrb[82].mxu1 %vm550_vm2, %v22465_v33  ;;  %v22485_v33 = vld [vmem:[#allocation3 + $0x149] sm:$0xff] }
 0x485   : > { %17857 = vmatprep.mubr.msk.f32.mxu1 %vm550_vm2, %v22469_v1  ;;  %24318 = vst [vmem:[#allocation104_spill] sm:$0xff] %v22485_v33  ;;  %v22489_v1 = vld [vmem:[#allocation3 + $0x151] sm:$0xff] }
 0x486   : > { %24319 = vst [vmem:[#allocation105_spill] sm:$0xff] %v22489_v1 }
 0x488   : > { %17858 = vmatmul.mubr.msk.f32.gmra.mrb[84].mxu1 %vm550_vm2, %v22473_v36  ;;  %v22493_v36 = vld [vmem:[#allocation3 + $0x159] sm:$0xff] }
 0x489   : > { %17860 = vmatprep.mubr.msk.f32.mxu1 %vm550_vm2, %v22477_v18  ;;  %24320 = vst [vmem:[#allocation106_spill] sm:$0xff] %v22493_v36  ;;  %v22497_v18 = vld [vmem:[#allocation3 + $0x161] sm:$0xff] }
 0x48c   : > { %17861 = vmatmul.mubr.msk.f32.gmra.mrb[86].mxu1 %vm550_vm2, %v22481_v26  ;;  %v22501_v26 = vld [vmem:[#allocation3 + $0x169] sm:$0xff] }
 0x48d   : > { %17863 = vmatprep.mubr.msk.f32.mxu1 %vm550_vm2, %v22485_v33  ;;  %v22505_v33 = vld [vmem:[#allocation3 + $0x171] sm:$0xff] }
 0x490   : > { %17864 = vmatmul.mubr.msk.f32.gmra.mrb[88].mxu1 %vm550_vm2, %v22489_v1  ;;  %v22509_v1 = vld [vmem:[#allocation3 + $0x179] sm:$0xff] }
 0x491   : > { %17866 = vmatprep.mubr.msk.f32.mxu1 %vm550_vm2, %v22493_v36  ;;  %v22513_v36 = vld [vmem:[#allocation3 + $0x181] sm:$0xff] }
 0x494   : > { %17867 = vmatmul.mubr.msk.f32.gmra.mrb[90].mxu1 %vm550_vm2, %v22497_v18 }
 0x495   : > { %17869 = vmatprep.mubr.msk.f32.mxu1 %vm550_vm2, %v22501_v26 }
 0x498   : > { %17870 = vmatmul.mubr.msk.f32.gmra.mrb[92].mxu1 %vm550_vm2, %v22505_v33 }
 0x499   : > { %17872 = vmatprep.mubr.msk.f32.mxu1 %vm550_vm2, %v22509_v1 }
 0x49c   : > { %17873 = vmatmul.mubr.msk.f32.gmra.mrb[94].mxu1 %vm550_vm2, %v22513_v36 }
 0x49d   : > { %17877 = vmatprep.mubr.msk.f32.mxu1 %vm550_vm2, %v22141_v15  ;;  %v15534_v15 = vld [vmem:[%s23865_s5 + $0x28] sm:$0xff] }
 0x4a0   : > { %17878 = vmatmul.mubr.msk.f32.vlgmr.msra.gmra.mrb[48].mxu1 %vm550_vm2, %v22145_v2  ;;  %v22611_v2 = vld [vmem:[#allocation3 + $0x187] sm:$0xff] }
 0x4a1   : > { %17880 = vmatprep.mubr.msk.f32.mxu1 %vm550_vm2, %v22149_v51  ;;  %17950 = vmatpush3.msra.mxu1 %v22356_v57  ;;  %24321 = vst [vmem:[#allocation107_spill] sm:$0xff] %v22611_v2  ;;  %v22615_v51 = vld [vmem:[#allocation3 + $0x18f] sm:$0xff]  ;;  %v22619_v57 = vld [vmem:[#allocation3 + $0x197] sm:$0xff] }
 0x4a2   : > { %18023 = vmatprep.subr.mxu1 %v15534_v15  ;;  %24322 = vst [vmem:[#allocation108_spill] sm:$0xff] %v22615_v51  ;;  %24323 = vst [vmem:[#allocation109_spill] sm:$0xff] %v22619_v57 }
 0x4a4   : > { %17881 = vmatmul.mubr.msk.f32.gmra.mrb[50].mxu1 %vm550_vm2, %v22153_v37 }
 0x4a5   : > { %17883 = vmatprep.mubr.msk.f32.mxu1 %vm550_vm2, %v22157_v11 }
 0x4a8   : > { %17884 = vmatmul.mubr.msk.f32.gmra.mrb[52].mxu1 %vm550_vm2, %v22161_v42 }
 0x4a9   : > { %17886 = vmatprep.mubr.msk.f32.mxu1 %vm550_vm2, %v22171_v9 }
 0x4ac   : > { %17887 = vmatmul.mubr.msk.f32.gmra.mrb[54].mxu1 %vm550_vm2, %v22175_v0 }
 0x4ad   : > { %17889 = vmatprep.mubr.msk.f32.mxu1 %vm550_vm2, %v22179_v45 }
 0x4b0   : > { %17890 = vmatmul.mubr.msk.f32.gmra.mrb[56].mxu1 %vm550_vm2, %v22183_v8 }
 0x4b1   : > { %17892 = vmatprep.mubr.msk.f32.mxu1 %vm550_vm2, %v22187_v56 }
 0x4b4   : > { %17893 = vmatmul.mubr.msk.f32.gmra.mrb[58].mxu1 %vm550_vm2, %v22191_v53 }
 0x4b5   : > { %17895 = vmatprep.mubr.msk.f32.mxu1 %vm550_vm2, %v22195_v39 }
 0x4b8   : > { %17896 = vmatmul.mubr.msk.f32.gmra.mrb[60].mxu1 %vm550_vm2, %v22199_v58 }
 0x4b9   : > { %17898 = vmatprep.mubr.msk.f32.mxu1 %vm550_vm2, %v22203_v23 }
 0x4bc   : > { %17899 = vmatmul.mubr.msk.f32.gmra.mrb[62].mxu1 %vm550_vm2, %v22207_v28 }
 0x4bd   : > { %17901 = vmatprep.mubr.msk.f32.mxu1 %vm550_vm2, %v22211_v50 }
 0x4c0   : > { %17902 = vmatmul.mubr.msk.f32.gmra.mrb[64].mxu1 %vm550_vm2, %v22215_v24 }
 0x4c1   : > { %17904 = vmatprep.mubr.msk.f32.mxu1 %vm550_vm2, %v22219_v62 }
 0x4c4   : > { %17905 = vmatmul.mubr.msk.f32.gmra.mrb[66].mxu1 %vm550_vm2, %v22223_v14 }
 0x4c5   : > { %17907 = vmatprep.mubr.msk.f32.mxu1 %vm550_vm2, %v22227_v6 }
 0x4c8   : > { %17908 = vmatmul.mubr.msk.f32.gmra.mrb[68].mxu1 %vm550_vm2, %v22231_v40 }
 0x4c9   : > { %17910 = vmatprep.mubr.msk.f32.mxu1 %vm550_vm2, %v22235_v16 }
 0x4cc   : > { %17911 = vmatmul.mubr.msk.f32.gmra.mrb[70].mxu1 %vm550_vm2, %v22239_v35 }
 0x4cd   : > { %17913 = vmatprep.mubr.msk.f32.mxu1 %vm550_vm2, %v22243_v32 }
 0x4d0   : > { %17914 = vmatmul.mubr.msk.f32.gmra.mrb[72].mxu1 %vm550_vm2, %v22247_v17 }
 0x4d1   : > { %17916 = vmatprep.mubr.msk.f32.mxu1 %vm550_vm2, %v22251_v27 }
 0x4d4   : > { %17917 = vmatmul.mubr.msk.f32.gmra.mrb[74].mxu1 %vm550_vm2, %v22255_v59 }
 0x4d5   : > { %17919 = vmatprep.mubr.msk.f32.mxu1 %vm550_vm2, %v22259_v34 }
 0x4d8   : > { %17920 = vmatmul.mubr.msk.f32.gmra.mrb[76].mxu1 %vm550_vm2, %v22263_v46 }
 0x4d9   : > { %17922 = vmatprep.mubr.msk.f32.mxu1 %vm550_vm2, %v22267_v30 }
 0x4dc   : > { %17923 = vmatmul.mubr.msk.f32.gmra.mrb[78].mxu1 %vm550_vm2, %v22271_v49 }
 0x4dd   : > { %17925 = vmatprep.mubr.msk.f32.mxu1 %vm550_vm2, %v22275_v19 }
 0x4e0   : > { %17926 = vmatmul.mubr.msk.f32.gmra.mrb[80].mxu1 %vm550_vm2, %v22279_v20 }
 0x4e1   : > { %17928 = vmatprep.mubr.msk.f32.mxu1 %vm550_vm2, %v22283_v55 }
 0x4e4   : > { %17929 = vmatmul.mubr.msk.f32.gmra.mrb[82].mxu1 %vm550_vm2, %v22287_v5 }
 0x4e5   : > { %17931 = vmatprep.mubr.msk.f32.mxu1 %vm550_vm2, %v22291_v10 }
 0x4e8   : > { %17932 = vmatmul.mubr.msk.f32.gmra.mrb[84].mxu1 %vm550_vm2, %v22295_v43 }
 0x4e9   : > { %17934 = vmatprep.mubr.msk.f32.mxu1 %vm550_vm2, %v22299_v21 }
 0x4ec   : > { %17935 = vmatmul.mubr.msk.f32.gmra.mrb[86].mxu1 %vm550_vm2, %v22303_v31 }
 0x4ed   : > { %17937 = vmatprep.mubr.msk.f32.mxu1 %vm550_vm2, %v22307_v12 }
 0x4f0   : > { %17938 = vmatmul.mubr.msk.f32.gmra.mrb[88].mxu1 %vm550_vm2, %v22311_v48 }
 0x4f1   : > { %17940 = vmatprep.mubr.msk.f32.mxu1 %vm550_vm2, %v22315_v29  ;;  %v8341_v29 = vld [vmem:[#allocation3 + $0x20] sm:$0xff] }
 0x4f4   : > { %17941 = vmatmul.mubr.msk.f32.gmra.mrb[90].mxu1 %vm550_vm2, %v22319_v52  ;;  %v8342_v52 = vld [vmem:[#allocation3 + $0x28] sm:$0xff] }
 0x4f5   : > { %17943 = vmatprep.mubr.msk.f32.mxu1 %vm550_vm2, %v22323_v41  ;;  %v8343_v41 = vld [vmem:[#allocation3 + $0x30] sm:$0xff] }
 0x4f8   : > { %17944 = vmatmul.mubr.msk.f32.gmra.mrb[92].mxu1 %vm550_vm2, %v22611_v2  ;;  %v22626_v2 = vld [vmem:[#allocation3 + $0x38] sm:$0xff] }
 0x4f9   : > { %17946 = vmatprep.mubr.msk.f32.mxu1 %vm550_vm2, %v22615_v51  ;;  %v22630_v51 = vld [vmem:[#allocation3 + $0x40] sm:$0xff] }
 0x4fa   : > { %24324 = vst [vmem:[#allocation110_spill] sm:$0xff] %v22630_v51 }
 0x4fc   : > { %17947 = vmatmul.mubr.msk.f32.gmra.mrb[94].mxu1 %vm550_vm2, %v22619_v57  ;;  %v22634_v57 = vld [vmem:[#allocation3 + $0x48] sm:$0xff] }
 0x4fd   : > { %17951 = vmatprep.mubr.msk.f32.mxu1 %vm550_vm2, %v8341_v29  ;;  %24325 = vst [vmem:[#allocation111_spill] sm:$0xff] %v22634_v57  ;;  %v22646_v29 = vld [vmem:[#allocation3 + $0x60] sm:$0xff] }
 0x4fe   : > { %24328 = vst [vmem:[#allocation114_spill] sm:$0xff] %v22646_v29 }
 0x500   : > { %17952 = vmatmul.mubr.msk.f32.vlgmr.msra.gmra.mrb[48].mxu1 %vm550_vm2, %v8342_v52  ;;  %v22638_v52 = vld [vmem:[#allocation3 + $0x50] sm:$0xff] }
 0x501   : > { %17954 = vmatprep.mubr.msk.f32.mxu1 %vm550_vm2, %v8343_v41  ;;  %18024 = vmatpush3.msra.mxu1 %v15534_v15  ;;  %24326 = vst [vmem:[#allocation112_spill] sm:$0xff] %v22638_v52  ;;  %v22642_v41 = vld [vmem:[#allocation3 + $0x58] sm:$0xff]  ;;  %v15583_v15 = vld [vmem:[%s23865_s5 + $0x30] sm:$0xff] }
 0x502   : > { %24327 = vst [vmem:[#allocation113_spill] sm:$0xff] %v22642_v41  ;;  %18097 = vmatprep.subr.mxu1 %v15583_v15 }
 0x504   : > { %17955 = vmatmul.mubr.msk.f32.gmra.mrb[50].mxu1 %vm550_vm2, %v22626_v2 }
 0x505   : > { %17957 = vmatprep.mubr.msk.f32.mxu1 %vm550_vm2, %v22630_v51  ;;  %v22665_v51 = vld [vmem:[#allocation3 + $0x80] sm:$0xff] }
 0x506   : > { %24332 = vst [vmem:[#allocation118_spill] sm:$0xff] %v22665_v51 }
 0x508   : > { %17958 = vmatmul.mubr.msk.f32.gmra.mrb[52].mxu1 %vm550_vm2, %v22634_v57  ;;  %v22653_v57 = vld [vmem:[#allocation3 + $0x68] sm:$0xff] }
 0x509   : > { %17960 = vmatprep.mubr.msk.f32.mxu1 %vm550_vm2, %v22638_v52  ;;  %24329 = vst [vmem:[#allocation115_spill] sm:$0xff] %v22653_v57  ;;  %v22657_v52 = vld [vmem:[#allocation3 + $0x70] sm:$0xff] }
 0x50a   : > { %24330 = vst [vmem:[#allocation116_spill] sm:$0xff] %v22657_v52 }
 0x50c   : > { %17961 = vmatmul.mubr.msk.f32.gmra.mrb[54].mxu1 %vm550_vm2, %v22642_v41  ;;  %v22661_v41 = vld [vmem:[#allocation3 + $0x78] sm:$0xff] }
 0x50d   : > { %17963 = vmatprep.mubr.msk.f32.mxu1 %vm550_vm2, %v22646_v29  ;;  %24331 = vst [vmem:[#allocation117_spill] sm:$0xff] %v22661_v41  ;;  %v22669_v29 = vld [vmem:[#allocation3 + $0x88] sm:$0xff] }
 0x50e   : > { %24333 = vst [vmem:[#allocation119_spill] sm:$0xff] %v22669_v29 }
 0x510   : > { %17964 = vmatmul.mubr.msk.f32.gmra.mrb[56].mxu1 %vm550_vm2, %v22653_v57  ;;  %v22673_v57 = vld [vmem:[#allocation3 + $0x90] sm:$0xff] }
 0x511   : > { %17966 = vmatprep.mubr.msk.f32.mxu1 %vm550_vm2, %v22657_v52  ;;  %24334 = vst [vmem:[#allocation120_spill] sm:$0xff] %v22673_v57  ;;  %v22677_v52 = vld [vmem:[#allocation3 + $0x98] sm:$0xff] }
 0x512   : > { %24335 = vst [vmem:[#allocation121_spill] sm:$0xff] %v22677_v52 }
 0x514   : > { %17967 = vmatmul.mubr.msk.f32.gmra.mrb[58].mxu1 %vm550_vm2, %v22661_v41  ;;  %v22681_v41 = vld [vmem:[#allocation3 + $0xa0] sm:$0xff] }
 0x515   : > { %17969 = vmatprep.mubr.msk.f32.mxu1 %vm550_vm2, %v22665_v51  ;;  %24336 = vst [vmem:[#allocation122_spill] sm:$0xff] %v22681_v41  ;;  %v22685_v51 = vld [vmem:[#allocation3 + $0xa8] sm:$0xff] }
 0x518   : > { %17970 = vmatmul.mubr.msk.f32.gmra.mrb[60].mxu1 %vm550_vm2, %v22669_v29  ;;  %v22689_v29 = vld [vmem:[#allocation3 + $0xb0] sm:$0xff] }
 0x519   : > { %17972 = vmatprep.mubr.msk.f32.mxu1 %vm550_vm2, %v22673_v57  ;;  %v22693_v57 = vld [vmem:[#allocation3 + $0xb8] sm:$0xff] }
 0x51c   : > { %17973 = vmatmul.mubr.msk.f32.gmra.mrb[62].mxu1 %vm550_vm2, %v22677_v52  ;;  %v22697_v52 = vld [vmem:[#allocation3 + $0xc0] sm:$0xff] }
 0x51d   : > { %17975 = vmatprep.mubr.msk.f32.mxu1 %vm550_vm2, %v22681_v41  ;;  %v22701_v41 = vld [vmem:[#allocation3 + $0xc8] sm:$0xff] }
 0x520   : > { %17976 = vmatmul.mubr.msk.f32.gmra.mrb[64].mxu1 %vm550_vm2, %v22685_v51 }
 0x521   : > { %17978 = vmatprep.mubr.msk.f32.mxu1 %vm550_vm2, %v22689_v29 }
 0x524   : > { %17979 = vmatmul.mubr.msk.f32.gmra.mrb[66].mxu1 %vm550_vm2, %v22693_v57 }
 0x525   : > { %17981 = vmatprep.mubr.msk.f32.mxu1 %vm550_vm2, %v22697_v52 }
 0x528   : > { %17982 = vmatmul.mubr.msk.f32.gmra.mrb[68].mxu1 %vm550_vm2, %v22701_v41 }
 0x529   : > { %17984 = vmatprep.mubr.msk.f32.mxu1 %vm550_vm2, %v21899_v63  ;;  %v24337_v63 = vld [vmem:[#allocation32_spill] sm:$0xff] }
 0x52c   : > { %17985 = vmatmul.mubr.msk.f32.gmra.mrb[70].mxu1 %vm550_vm2, %v21909_v61  ;;  %v24338_v61 = vld [vmem:[#allocation34_spill] sm:$0xff] }
 0x52d   : > { %17987 = vmatprep.mubr.msk.f32.mxu1 %vm550_vm2, %v21923_v60  ;;  %v24339_v60 = vld [vmem:[#allocation36_spill] sm:$0xff] }
 0x530   : > { %17988 = vmatmul.mubr.msk.f32.gmra.mrb[72].mxu1 %vm550_vm2, %v21931_v54  ;;  %v24340_v54 = vld [vmem:[#allocation37_spill] sm:$0xff] }
 0x531   : > { %17990 = vmatprep.mubr.msk.f32.mxu1 %vm550_vm2, %v21947_v47  ;;  %v24341_v47 = vld [vmem:[#allocation10_spill] sm:$0xff] }
 0x534   : > { %17991 = vmatmul.mubr.msk.f32.gmra.mrb[74].mxu1 %vm550_vm2, %v21955_v44  ;;  %v24342_v44 = vld [vmem:[#allocation11_spill] sm:$0xff] }
 0x535   : > { %17993 = vmatprep.mubr.msk.f32.mxu1 %vm550_vm2, %v21967_v22  ;;  %v24345_v22 = vld [vmem:[#allocation43_spill] sm:$0xff] }
 0x538   : > { %17994 = vmatmul.mubr.msk.f32.gmra.mrb[76].mxu1 %vm550_vm2, %v21977_v3  ;;  %v24346_v3 = vld [vmem:[#allocation44_spill] sm:$0xff] }
 0x539   : > { %17996 = vmatprep.mubr.msk.f32.mxu1 %vm550_vm2, %v21991_v13  ;;  %v24347_v13 = vld [vmem:[#allocation45_spill] sm:$0xff] }
 0x53c   : > { %17997 = vmatmul.mubr.msk.f32.gmra.mrb[78].mxu1 %vm550_vm2, %v21999_v25  ;;  %v22751_v25 = vld [vmem:[#allocation3 + $0x188] sm:$0xff] }
 0x53d   : > { %17999 = vmatprep.mubr.msk.f32.mxu1 %vm550_vm2, %v22015_v4  ;;  %v24343_v4 = vld [vmem:[#allocation39_spill] sm:$0xff] }
 0x540   : > { %18000 = vmatmul.mubr.msk.f32.gmra.mrb[80].mxu1 %vm550_vm2, %v22023_v38  ;;  %v24344_v38 = vld [vmem:[#allocation41_spill] sm:$0xff] }
 0x541   : > { %18002 = vmatprep.mubr.msk.f32.mxu1 %vm550_vm2, %v24337_v63  ;;  %v22755_v63 = vld [vmem:[#allocation3 + $0x190] sm:$0xff] }
 0x544   : > { %18003 = vmatmul.mubr.msk.f32.gmra.mrb[82].mxu1 %vm550_vm2, %v24338_v61  ;;  %v22759_v61 = vld [vmem:[#allocation3 + $0x198] sm:$0xff] }
 0x545   : > { %18005 = vmatprep.mubr.msk.f32.mxu1 %vm550_vm2, %v24339_v60  ;;  %v24348_v60 = vld [vmem:[#allocation68_spill] sm:$0xff] }
 0x548   : > { %18006 = vmatmul.mubr.msk.f32.gmra.mrb[84].mxu1 %vm550_vm2, %v24340_v54  ;;  %v24349_v54 = vld [vmem:[#allocation69_spill] sm:$0xff] }
 0x549   : > { %18008 = vmatprep.mubr.msk.f32.mxu1 %vm550_vm2, %v24341_v47  ;;  %v24350_v47 = vld [vmem:[#allocation70_spill] sm:$0xff] }
 0x54c   : > { %18009 = vmatmul.mubr.msk.f32.gmra.mrb[86].mxu1 %vm550_vm2, %v24342_v44  ;;  %v24351_v44 = vld [vmem:[#allocation71_spill] sm:$0xff] }
 0x54d   : > { %18011 = vmatprep.mubr.msk.f32.mxu1 %vm550_vm2, %v24343_v4  ;;  %v24352_v4 = vld [vmem:[#allocation72_spill] sm:$0xff] }
 0x550   : > { %18012 = vmatmul.mubr.msk.f32.gmra.mrb[88].mxu1 %vm550_vm2, %v24344_v38  ;;  %v24353_v38 = vld [vmem:[#allocation73_spill] sm:$0xff] }
 0x551   : > { %18014 = vmatprep.mubr.msk.f32.mxu1 %vm550_vm2, %v24345_v22  ;;  %v15632_v22 = vld [vmem:[%s23865_s5 + $0x38] sm:$0xff] }
 0x554   : > { %18015 = vmatmul.mubr.msk.f32.gmra.mrb[90].mxu1 %vm550_vm2, %v24346_v3  ;;  %v24356_v3 = vld [vmem:[#allocation76_spill] sm:$0xff] }
 0x555   : > { %18017 = vmatprep.mubr.msk.f32.mxu1 %vm550_vm2, %v24347_v13  ;;  %v24357_v13 = vld [vmem:[#allocation77_spill] sm:$0xff] }
 0x558   : > { %18018 = vmatmul.mubr.msk.f32.gmra.mrb[92].mxu1 %vm550_vm2, %v22751_v25 }
 0x559   : > { %18020 = vmatprep.mubr.msk.f32.mxu1 %vm550_vm2, %v22755_v63 }
 0x55c   : > { %18021 = vmatmul.mubr.msk.f32.gmra.mrb[94].mxu1 %vm550_vm2, %v22759_v61 }
 0x55d   : > { %18025 = vmatprep.mubr.msk.f32.mxu1 %vm550_vm2, %v22331_v7  ;;  %v24354_v7 = vld [vmem:[#allocation74_spill] sm:$0xff] }
 0x560   : > { %18026 = vmatmul.mubr.msk.f32.vlgmr.msra.gmra.mrb[48].mxu1 %vm550_vm2, %v24348_v60  ;;  %v24358_v60 = vld [vmem:[#allocation78_spill] sm:$0xff] }
 0x561   : > { %18028 = vmatprep.mubr.msk.f32.mxu1 %vm550_vm2, %v24349_v54  ;;  %18098 = vmatpush3.msra.mxu1 %v15583_v15  ;;  %v24355_v15 = vld [vmem:[#allocation75_spill] sm:$0xff] }
 0x562   : > { %18171 = vmatprep.subr.mxu1 %v15632_v22  ;;  %v24359_v54 = vld [vmem:[#allocation79_spill] sm:$0xff] }
 0x564   : > { %18029 = vmatmul.mubr.msk.f32.gmra.mrb[50].mxu1 %vm550_vm2, %v24350_v47  ;;  %v24360_v47 = vld [vmem:[#allocation80_spill] sm:$0xff] }
 0x565   : > { %18031 = vmatprep.mubr.msk.f32.mxu1 %vm550_vm2, %v24351_v44  ;;  %v24361_v44 = vld [vmem:[#allocation81_spill] sm:$0xff] }
 0x568   : > { %18032 = vmatmul.mubr.msk.f32.gmra.mrb[52].mxu1 %vm550_vm2, %v24352_v4  ;;  %v24362_v4 = vld [vmem:[#allocation82_spill] sm:$0xff] }
 0x569   : > { %18034 = vmatprep.mubr.msk.f32.mxu1 %vm550_vm2, %v24353_v38  ;;  %v24363_v38 = vld [vmem:[#allocation83_spill] sm:$0xff] }
 0x56c   : > { %18035 = vmatmul.mubr.msk.f32.gmra.mrb[54].mxu1 %vm550_vm2, %v24354_v7  ;;  %v24364_v7 = vld [vmem:[#allocation84_spill] sm:$0xff] }
 0x56d   : > { %18037 = vmatprep.mubr.msk.f32.mxu1 %vm550_vm2, %v24355_v15  ;;  %v24365_v15 = vld [vmem:[#allocation85_spill] sm:$0xff] }
 0x570   : > { %18038 = vmatmul.mubr.msk.f32.gmra.mrb[56].mxu1 %vm550_vm2, %v24356_v3  ;;  %v24366_v3 = vld [vmem:[#allocation86_spill] sm:$0xff] }
 0x571   : > { %18040 = vmatprep.mubr.msk.f32.mxu1 %vm550_vm2, %v24357_v13  ;;  %v24367_v13 = vld [vmem:[#allocation87_spill] sm:$0xff] }
 0x574   : > { %18041 = vmatmul.mubr.msk.f32.gmra.mrb[58].mxu1 %vm550_vm2, %v24358_v60  ;;  %v24368_v60 = vld [vmem:[#allocation88_spill] sm:$0xff] }
 0x575   : > { %18043 = vmatprep.mubr.msk.f32.mxu1 %vm550_vm2, %v24359_v54  ;;  %v24369_v54 = vld [vmem:[#allocation89_spill] sm:$0xff] }
 0x578   : > { %18044 = vmatmul.mubr.msk.f32.gmra.mrb[60].mxu1 %vm550_vm2, %v24360_v47  ;;  %v24370_v47 = vld [vmem:[#allocation90_spill] sm:$0xff] }
 0x579   : > { %18046 = vmatprep.mubr.msk.f32.mxu1 %vm550_vm2, %v24361_v44  ;;  %v24371_v44 = vld [vmem:[#allocation91_spill] sm:$0xff] }
 0x57c   : > { %18047 = vmatmul.mubr.msk.f32.gmra.mrb[62].mxu1 %vm550_vm2, %v24362_v4  ;;  %v24372_v4 = vld [vmem:[#allocation92_spill] sm:$0xff] }
 0x57d   : > { %18049 = vmatprep.mubr.msk.f32.mxu1 %vm550_vm2, %v24363_v38  ;;  %v24373_v38 = vld [vmem:[#allocation93_spill] sm:$0xff] }
 0x580   : > { %18050 = vmatmul.mubr.msk.f32.gmra.mrb[64].mxu1 %vm550_vm2, %v24364_v7  ;;  %v24374_v7 = vld [vmem:[#allocation94_spill] sm:$0xff] }
 0x581   : > { %18052 = vmatprep.mubr.msk.f32.mxu1 %vm550_vm2, %v24365_v15  ;;  %v24375_v15 = vld [vmem:[#allocation95_spill] sm:$0xff] }
 0x584   : > { %18053 = vmatmul.mubr.msk.f32.gmra.mrb[66].mxu1 %vm550_vm2, %v24366_v3  ;;  %v24376_v3 = vld [vmem:[#allocation96_spill] sm:$0xff] }
 0x585   : > { %18055 = vmatprep.mubr.msk.f32.mxu1 %vm550_vm2, %v24367_v13  ;;  %v24377_v13 = vld [vmem:[#allocation97_spill] sm:$0xff] }
 0x588   : > { %18056 = vmatmul.mubr.msk.f32.gmra.mrb[68].mxu1 %vm550_vm2, %v24368_v60  ;;  %v24378_v60 = vld [vmem:[#allocation98_spill] sm:$0xff] }
 0x589   : > { %18058 = vmatprep.mubr.msk.f32.mxu1 %vm550_vm2, %v24369_v54  ;;  %v24379_v54 = vld [vmem:[#allocation99_spill] sm:$0xff] }
 0x58c   : > { %18059 = vmatmul.mubr.msk.f32.gmra.mrb[70].mxu1 %vm550_vm2, %v24370_v47  ;;  %v24380_v47 = vld [vmem:[#allocation100_spill] sm:$0xff] }
 0x58d   : > { %18061 = vmatprep.mubr.msk.f32.mxu1 %vm550_vm2, %v24371_v44  ;;  %v24381_v44 = vld [vmem:[#allocation101_spill] sm:$0xff] }
 0x590   : > { %18062 = vmatmul.mubr.msk.f32.gmra.mrb[72].mxu1 %vm550_vm2, %v24372_v4  ;;  %v24382_v4 = vld [vmem:[#allocation102_spill] sm:$0xff] }
 0x591   : > { %18064 = vmatprep.mubr.msk.f32.mxu1 %vm550_vm2, %v24373_v38  ;;  %v24383_v38 = vld [vmem:[#allocation103_spill] sm:$0xff] }
 0x594   : > { %18065 = vmatmul.mubr.msk.f32.gmra.mrb[74].mxu1 %vm550_vm2, %v24374_v7  ;;  %v24384_v7 = vld [vmem:[#allocation104_spill] sm:$0xff] }
 0x595   : > { %18067 = vmatprep.mubr.msk.f32.mxu1 %vm550_vm2, %v24375_v15  ;;  %v24385_v15 = vld [vmem:[#allocation105_spill] sm:$0xff] }
 0x598   : > { %18068 = vmatmul.mubr.msk.f32.gmra.mrb[76].mxu1 %vm550_vm2, %v24376_v3  ;;  %v24386_v3 = vld [vmem:[#allocation106_spill] sm:$0xff] }
 0x599   : > { %18070 = vmatprep.mubr.msk.f32.mxu1 %vm550_vm2, %v24377_v13  ;;  %v22856_v13 = vld [vmem:[#allocation3 + $0x189] sm:$0xff] }
 0x59c   : > { %18071 = vmatmul.mubr.msk.f32.gmra.mrb[78].mxu1 %vm550_vm2, %v24378_v60  ;;  %v22860_v60 = vld [vmem:[#allocation3 + $0x191] sm:$0xff] }
 0x59d   : > { %18073 = vmatprep.mubr.msk.f32.mxu1 %vm550_vm2, %v24379_v54  ;;  %v10530_v54 = vld [vmem:[#allocation3 + $0x41] sm:$0xff] }
 0x5a0   : > { %18074 = vmatmul.mubr.msk.f32.gmra.mrb[80].mxu1 %vm550_vm2, %v24380_v47  ;;  %v10534_v47 = vld [vmem:[#allocation3 + $0x61] sm:$0xff] }
 0x5a1   : > { %18076 = vmatprep.mubr.msk.f32.mxu1 %vm550_vm2, %v24381_v44  ;;  %v10535_v44 = vld [vmem:[#allocation3 + $0x69] sm:$0xff] }
 0x5a4   : > { %18077 = vmatmul.mubr.msk.f32.gmra.mrb[82].mxu1 %vm550_vm2, %v24382_v4  ;;  %v10536_v4 = vld [vmem:[#allocation3 + $0x71] sm:$0xff] }
 0x5a5   : > { %18079 = vmatprep.mubr.msk.f32.mxu1 %vm550_vm2, %v24383_v38  ;;  %v10537_v38 = vld [vmem:[#allocation3 + $0x79] sm:$0xff] }
 0x5a8   : > { %18080 = vmatmul.mubr.msk.f32.gmra.mrb[84].mxu1 %vm550_vm2, %v24384_v7  ;;  %v10538_v7 = vld [vmem:[#allocation3 + $0x81] sm:$0xff] }
 0x5a9   : > { %18082 = vmatprep.mubr.msk.f32.mxu1 %vm550_vm2, %v24385_v15  ;;  %v10539_v15 = vld [vmem:[#allocation3 + $0x89] sm:$0xff] }
 0x5ac   : > { %18083 = vmatmul.mubr.msk.f32.gmra.mrb[86].mxu1 %vm550_vm2, %v24386_v3  ;;  %v10540_v3 = vld [vmem:[#allocation3 + $0x91] sm:$0xff] }
 0x5ad   : > { %18085 = vmatprep.mubr.msk.f32.mxu1 %vm550_vm2, %v22497_v18  ;;  %v10020_v18 = vld [vmem:[#allocation3 + $0x168] sm:$0xff] }
 0x5b0   : > { %18086 = vmatmul.mubr.msk.f32.gmra.mrb[88].mxu1 %vm550_vm2, %v22501_v26  ;;  %v22864_v26 = vld [vmem:[#allocation3 + $0x199] sm:$0xff] }
 0x5b1   : > { %18088 = vmatprep.mubr.msk.f32.mxu1 %vm550_vm2, %v22505_v33  ;;  %v10018_v33 = vld [vmem:[#allocation3 + $0x158] sm:$0xff] }
 0x5b4   : > { %18089 = vmatmul.mubr.msk.f32.gmra.mrb[90].mxu1 %vm550_vm2, %v22509_v1  ;;  %v10019_v1 = vld [vmem:[#allocation3 + $0x160] sm:$0xff] }
 0x5b5   : > { %18091 = vmatprep.mubr.msk.f32.mxu1 %vm550_vm2, %v22513_v36  ;;  %v15681_v36 = vld [vmem:[%s23865_s5 + $0x40] sm:$0xff] }
 0x5b8   : > { %18092 = vmatmul.mubr.msk.f32.gmra.mrb[92].mxu1 %vm550_vm2, %v22856_v13 }
 0x5b9   : > { %18094 = vmatprep.mubr.msk.f32.mxu1 %vm550_vm2, %v22860_v60 }
 0x5bc   : > { %18095 = vmatmul.mubr.msk.f32.gmra.mrb[94].mxu1 %vm550_vm2, %v22864_v26 }
 0x5bd   : > { %18099 = vmatprep.mubr.msk.f32.mxu1 %vm550_vm2, %v22153_v37  ;;  %v10015_v37 = vld [vmem:[#allocation3 + $0x140] sm:$0xff] }
 0x5c0   : > { %18100 = vmatmul.mubr.msk.f32.vlgmr.msra.gmra.mrb[48].mxu1 %vm550_vm2, %v22157_v11  ;;  %v10016_v11 = vld [vmem:[#allocation3 + $0x148] sm:$0xff] }
 0x5c1   : > { %18102 = vmatprep.mubr.msk.f32.mxu1 %vm550_vm2, %v22161_v42  ;;  %18172 = vmatpush3.msra.mxu1 %v15632_v22  ;;  %v10017_v42 = vld [vmem:[#allocation3 + $0x150] sm:$0xff]  ;;  %v10529_v22 = vld [vmem:[#allocation3 + $0x39] sm:$0xff] }
 0x5c2   : > { %18245 = vmatprep.subr.mxu1 %v15681_v36 }
 0x5c4   : > { %18103 = vmatmul.mubr.msk.f32.gmra.mrb[50].mxu1 %vm550_vm2, %v22171_v9  ;;  %v10012_v9 = vld [vmem:[#allocation3 + $0x128] sm:$0xff] }
 0x5c5   : > { %18105 = vmatprep.mubr.msk.f32.mxu1 %vm550_vm2, %v22175_v0  ;;  %v10011_v0 = vld [vmem:[#allocation3 + $0x120] sm:$0xff] }
 0x5c8   : > { %18106 = vmatmul.mubr.msk.f32.gmra.mrb[52].mxu1 %vm550_vm2, %v22179_v45  ;;  %v10010_v45 = vld [vmem:[#allocation3 + $0x118] sm:$0xff] }
 0x5c9   : > { %18108 = vmatprep.mubr.msk.f32.mxu1 %vm550_vm2, %v22183_v8  ;;  %v10009_v8 = vld [vmem:[#allocation3 + $0x110] sm:$0xff] }
 0x5cc   : > { %18109 = vmatmul.mubr.msk.f32.gmra.mrb[54].mxu1 %vm550_vm2, %v22187_v56  ;;  %v10008_v56 = vld [vmem:[#allocation3 + $0x108] sm:$0xff] }
 0x5cd   : > { %18111 = vmatprep.mubr.msk.f32.mxu1 %vm550_vm2, %v22191_v53  ;;  %v10007_v53 = vld [vmem:[#allocation3 + $0x100] sm:$0xff] }
 0x5d0   : > { %18112 = vmatmul.mubr.msk.f32.gmra.mrb[56].mxu1 %vm550_vm2, %v22195_v39  ;;  %v10006_v39 = vld [vmem:[#allocation3 + $0xf8] sm:$0xff] }
 0x5d1   : > { %18114 = vmatprep.mubr.msk.f32.mxu1 %vm550_vm2, %v22199_v58  ;;  %v10005_v58 = vld [vmem:[#allocation3 + $0xf0] sm:$0xff] }
 0x5d4   : > { %18115 = vmatmul.mubr.msk.f32.gmra.mrb[58].mxu1 %vm550_vm2, %v22203_v23  ;;  %v10004_v23 = vld [vmem:[#allocation3 + $0xe8] sm:$0xff] }
 0x5d5   : > { %18117 = vmatprep.mubr.msk.f32.mxu1 %vm550_vm2, %v22207_v28  ;;  %v10003_v28 = vld [vmem:[#allocation3 + $0xe0] sm:$0xff] }
 0x5d8   : > { %18118 = vmatmul.mubr.msk.f32.gmra.mrb[60].mxu1 %vm550_vm2, %v22211_v50  ;;  %v10002_v50 = vld [vmem:[#allocation3 + $0xd8] sm:$0xff] }
 0x5d9   : > { %18120 = vmatprep.mubr.msk.f32.mxu1 %vm550_vm2, %v22215_v24  ;;  %v10001_v24 = vld [vmem:[#allocation3 + $0xd0] sm:$0xff] }
 0x5dc   : > { %18121 = vmatmul.mubr.msk.f32.gmra.mrb[62].mxu1 %vm550_vm2, %v22219_v62  ;;  %v24405_v62 = vld [vmem:[#allocation122_spill] sm:$0xff] }
 0x5dd   : > { %18123 = vmatprep.mubr.msk.f32.mxu1 %vm550_vm2, %v22223_v14  ;;  %v24404_v14 = vld [vmem:[#allocation121_spill] sm:$0xff] }
 0x5e0   : > { %18124 = vmatmul.mubr.msk.f32.gmra.mrb[64].mxu1 %vm550_vm2, %v22227_v6  ;;  %v24403_v6 = vld [vmem:[#allocation120_spill] sm:$0xff] }
 0x5e1   : > { %18126 = vmatprep.mubr.msk.f32.mxu1 %vm550_vm2, %v22231_v40  ;;  %v24402_v40 = vld [vmem:[#allocation119_spill] sm:$0xff] }
 0x5e4   : > { %18127 = vmatmul.mubr.msk.f32.gmra.mrb[66].mxu1 %vm550_vm2, %v22235_v16  ;;  %v24401_v16 = vld [vmem:[#allocation118_spill] sm:$0xff] }
 0x5e5   : > { %18129 = vmatprep.mubr.msk.f32.mxu1 %vm550_vm2, %v22239_v35  ;;  %v24400_v35 = vld [vmem:[#allocation117_spill] sm:$0xff] }
 0x5e8   : > { %18130 = vmatmul.mubr.msk.f32.gmra.mrb[68].mxu1 %vm550_vm2, %v22243_v32  ;;  %v24399_v32 = vld [vmem:[#allocation116_spill] sm:$0xff] }
 0x5e9   : > { %18132 = vmatprep.mubr.msk.f32.mxu1 %vm550_vm2, %v22247_v17  ;;  %v24387_v17 = vld [vmem:[#allocation46_spill] sm:$0xff] }
 0x5ec   : > { %18133 = vmatmul.mubr.msk.f32.gmra.mrb[70].mxu1 %vm550_vm2, %v22251_v27  ;;  %v24388_v27 = vld [vmem:[#allocation66_spill] sm:$0xff] }
 0x5ed   : > { %18135 = vmatprep.mubr.msk.f32.mxu1 %vm550_vm2, %v22255_v59  ;;  %v24398_v59 = vld [vmem:[#allocation115_spill] sm:$0xff] }
 0x5f0   : > { %18136 = vmatmul.mubr.msk.f32.gmra.mrb[72].mxu1 %vm550_vm2, %v22259_v34  ;;  %v24397_v34 = vld [vmem:[#allocation114_spill] sm:$0xff] }
 0x5f1   : > { %18138 = vmatprep.mubr.msk.f32.mxu1 %vm550_vm2, %v22263_v46  ;;  %v24396_v46 = vld [vmem:[#allocation113_spill] sm:$0xff] }
 0x5f4   : > { %18139 = vmatmul.mubr.msk.f32.gmra.mrb[74].mxu1 %vm550_vm2, %v22267_v30  ;;  %v24395_v30 = vld [vmem:[#allocation112_spill] sm:$0xff] }
 0x5f5   : > { %18141 = vmatprep.mubr.msk.f32.mxu1 %vm550_vm2, %v22271_v49  ;;  %v24394_v49 = vld [vmem:[#allocation111_spill] sm:$0xff] }
 0x5f8   : > { %18142 = vmatmul.mubr.msk.f32.gmra.mrb[76].mxu1 %vm550_vm2, %v22275_v19  ;;  %v24393_v19 = vld [vmem:[#allocation110_spill] sm:$0xff] }
 0x5f9   : > { %18144 = vmatprep.mubr.msk.f32.mxu1 %vm550_vm2, %v22279_v20  ;;  %v9482_v20 = vld [vmem:[#allocation3 + $0x1af] sm:$0xff] }
 0x5fc   : > { %18145 = vmatmul.mubr.msk.f32.gmra.mrb[78].mxu1 %vm550_vm2, %v22283_v55  ;;  %v9480_v55 = vld [vmem:[#allocation3 + $0x19f] sm:$0xff] }
 0x5fd   : > { %18147 = vmatprep.mubr.msk.f32.mxu1 %vm550_vm2, %v22287_v5  ;;  %v9481_v5 = vld [vmem:[#allocation3 + $0x1a7] sm:$0xff] }
 0x600   : > { %18148 = vmatmul.mubr.msk.f32.gmra.mrb[80].mxu1 %vm550_vm2, %v22291_v10  ;;  %v24389_v10 = vld [vmem:[#allocation67_spill] sm:$0xff] }
 0x601   : > { %18150 = vmatprep.mubr.msk.f32.mxu1 %vm550_vm2, %v22295_v43  ;;  %v24390_v43 = vld [vmem:[#allocation107_spill] sm:$0xff] }
 0x604   : > { %18151 = vmatmul.mubr.msk.f32.gmra.mrb[82].mxu1 %vm550_vm2, %v22299_v21  ;;  %v24391_v21 = vld [vmem:[#allocation108_spill] sm:$0xff] }
 0x605   : > { %18153 = vmatprep.mubr.msk.f32.mxu1 %vm550_vm2, %v22303_v31  ;;  %v24392_v31 = vld [vmem:[#allocation109_spill] sm:$0xff] }
 0x608   : > { %18154 = vmatmul.mubr.msk.f32.gmra.mrb[84].mxu1 %vm550_vm2, %v22307_v12  ;;  %v10014_v12 = vld [vmem:[#allocation3 + $0x138] sm:$0xff] }
 0x609   : > { %18156 = vmatprep.mubr.msk.f32.mxu1 %vm550_vm2, %v22311_v48  ;;  %v10013_v48 = vld [vmem:[#allocation3 + $0x130] sm:$0xff] }
 0x60c   : > { %18157 = vmatmul.mubr.msk.f32.gmra.mrb[86].mxu1 %vm550_vm2, %v24387_v17  ;;  %v10542_v17 = vld [vmem:[#allocation3 + $0xa1] sm:$0xff] }
 0x60d   : > { %18159 = vmatprep.mubr.msk.f32.mxu1 %vm550_vm2, %v24388_v27  ;;  %v10543_v27 = vld [vmem:[#allocation3 + $0xa9] sm:$0xff] }
 0x610   : > { %18160 = vmatmul.mubr.msk.f32.gmra.mrb[88].mxu1 %vm550_vm2, %v24389_v10  ;;  %v10544_v10 = vld [vmem:[#allocation3 + $0xb1] sm:$0xff] }
 0x611   : > { %18162 = vmatprep.mubr.msk.f32.mxu1 %vm550_vm2, %v24390_v43  ;;  %v10545_v43 = vld [vmem:[#allocation3 + $0xb9] sm:$0xff] }
 0x614   : > { %18163 = vmatmul.mubr.msk.f32.gmra.mrb[90].mxu1 %vm550_vm2, %v24391_v21  ;;  %v10546_v21 = vld [vmem:[#allocation3 + $0xc1] sm:$0xff] }
 0x615   : > { %18165 = vmatprep.mubr.msk.f32.mxu1 %vm550_vm2, %v24392_v31  ;;  %v10547_v31 = vld [vmem:[#allocation3 + $0xc9] sm:$0xff] }
 0x618   : > { %18166 = vmatmul.mubr.msk.f32.gmra.mrb[92].mxu1 %vm550_vm2, %v9480_v55  ;;  %v10549_v55 = vld [vmem:[#allocation3 + $0xd9] sm:$0xff] }
 0x619   : > { %18168 = vmatprep.mubr.msk.f32.mxu1 %vm550_vm2, %v9481_v5  ;;  %v10548_v5 = vld [vmem:[#allocation3 + $0xd1] sm:$0xff] }
 0x61c   : > { %18169 = vmatmul.mubr.msk.f32.gmra.mrb[94].mxu1 %vm550_vm2, %v9482_v20  ;;  %v10550_v20 = vld [vmem:[#allocation3 + $0xe1] sm:$0xff] }
 0x61d   : > { %18173 = vmatprep.mubr.msk.f32.mxu1 %vm550_vm2, %v22626_v2  ;;  %v10021_v2 = vld [vmem:[#allocation3 + $0x170] sm:$0xff] }
 0x620   : > { %18174 = vmatmul.mubr.msk.f32.vlgmr.msra.gmra.mrb[48].mxu1 %vm550_vm2, %v24393_v19  ;;  %v10551_v19 = vld [vmem:[#allocation3 + $0xe9] sm:$0xff] }
 0x621   : > { %18176 = vmatprep.mubr.msk.f32.mxu1 %vm550_vm2, %v24394_v49  ;;  %18246 = vmatpush3.msra.mxu1 %v15681_v36  ;;  %v10541_v36 = vld [vmem:[#allocation3 + $0x99] sm:$0xff]  ;;  %v10552_v49 = vld [vmem:[#allocation3 + $0xf1] sm:$0xff] }
 0x624   : > { %18177 = vmatmul.mubr.msk.f32.gmra.mrb[50].mxu1 %vm550_vm2, %v24395_v30  ;;  %v10553_v30 = vld [vmem:[#allocation3 + $0xf9] sm:$0xff] }
 0x625   : > { %18179 = vmatprep.mubr.msk.f32.mxu1 %vm550_vm2, %v24396_v46  ;;  %v10554_v46 = vld [vmem:[#allocation3 + $0x101] sm:$0xff] }
 0x628   : > { %18180 = vmatmul.mubr.msk.f32.gmra.mrb[52].mxu1 %vm550_vm2, %v24397_v34  ;;  %v10555_v34 = vld [vmem:[#allocation3 + $0x109] sm:$0xff] }
 0x629   : > { %18182 = vmatprep.mubr.msk.f32.mxu1 %vm550_vm2, %v24398_v59  ;;  %v10556_v59 = vld [vmem:[#allocation3 + $0x111] sm:$0xff] }
 0x62c   : > { %18183 = vmatmul.mubr.msk.f32.gmra.mrb[54].mxu1 %vm550_vm2, %v24399_v32  ;;  %v10557_v32 = vld [vmem:[#allocation3 + $0x119] sm:$0xff] }
 0x62d   : > { %18185 = vmatprep.mubr.msk.f32.mxu1 %vm550_vm2, %v24400_v35  ;;  %v10558_v35 = vld [vmem:[#allocation3 + $0x121] sm:$0xff] }
 0x630   : > { %18186 = vmatmul.mubr.msk.f32.gmra.mrb[56].mxu1 %vm550_vm2, %v24401_v16  ;;  %v10559_v16 = vld [vmem:[#allocation3 + $0x129] sm:$0xff] }
 0x631   : > { %18188 = vmatprep.mubr.msk.f32.mxu1 %vm550_vm2, %v24402_v40  ;;  %v10560_v40 = vld [vmem:[#allocation3 + $0x131] sm:$0xff] }
 0x634   : > { %18189 = vmatmul.mubr.msk.f32.gmra.mrb[58].mxu1 %vm550_vm2, %v24403_v6  ;;  %v10561_v6 = vld [vmem:[#allocation3 + $0x139] sm:$0xff] }
 0x635   : > { %18191 = vmatprep.mubr.msk.f32.mxu1 %vm550_vm2, %v24404_v14  ;;  %v10562_v14 = vld [vmem:[#allocation3 + $0x141] sm:$0xff] }
 0x638   : > { %18192 = vmatmul.mubr.msk.f32.gmra.mrb[60].mxu1 %vm550_vm2, %v24405_v62  ;;  %v10563_v62 = vld [vmem:[#allocation3 + $0x149] sm:$0xff] }
 0x639   : > { %18194 = vmatprep.mubr.msk.f32.mxu1 %vm550_vm2, %v22685_v51  ;;  %v10022_v51 = vld [vmem:[#allocation3 + $0x178] sm:$0xff] }
 0x63c   : > { %18195 = vmatmul.mubr.msk.f32.gmra.mrb[62].mxu1 %vm550_vm2, %v22689_v29  ;;  %v10029_v29 = vld [vmem:[#allocation3 + $0x1b0] sm:$0xff] }
 0x63d   : > { %18197 = vmatprep.mubr.msk.f32.mxu1 %vm550_vm2, %v22693_v57  ;;  %v10023_v57 = vld [vmem:[#allocation3 + $0x180] sm:$0xff] }
 0x640   : > { %18198 = vmatmul.mubr.msk.f32.gmra.mrb[64].mxu1 %vm550_vm2, %v22697_v52  ;;  %v10027_v52 = vld [vmem:[#allocation3 + $0x1a0] sm:$0xff] }
 0x641   : > { %18200 = vmatprep.mubr.msk.f32.mxu1 %vm550_vm2, %v22701_v41  ;;  %v10028_v41 = vld [vmem:[#allocation3 + $0x1a8] sm:$0xff] }
 0x644   : > { %18201 = vmatmul.mubr.msk.f32.gmra.mrb[66].mxu1 %vm550_vm2, %v10001_v24  ;;  %v10564_v24 = vld [vmem:[#allocation3 + $0x151] sm:$0xff] }
 0x645   : > { %18203 = vmatprep.mubr.msk.f32.mxu1 %vm550_vm2, %v10002_v50  ;;  %v10565_v50 = vld [vmem:[#allocation3 + $0x159] sm:$0xff] }
 0x648   : > { %18204 = vmatmul.mubr.msk.f32.gmra.mrb[68].mxu1 %vm550_vm2, %v10003_v28  ;;  %v10566_v28 = vld [vmem:[#allocation3 + $0x161] sm:$0xff] }
 0x649   : > { %18206 = vmatprep.mubr.msk.f32.mxu1 %vm550_vm2, %v10004_v23  ;;  %v10567_v23 = vld [vmem:[#allocation3 + $0x169] sm:$0xff] }
 0x64c   : > { %18207 = vmatmul.mubr.msk.f32.gmra.mrb[70].mxu1 %vm550_vm2, %v10005_v58  ;;  %v10568_v58 = vld [vmem:[#allocation3 + $0x171] sm:$0xff] }
 0x64d   : > { %18209 = vmatprep.mubr.msk.f32.mxu1 %vm550_vm2, %v10006_v39  ;;  %v10569_v39 = vld [vmem:[#allocation3 + $0x179] sm:$0xff] }
 0x650   : > { %18210 = vmatmul.mubr.msk.f32.gmra.mrb[72].mxu1 %vm550_vm2, %v10007_v53  ;;  %v10570_v53 = vld [vmem:[#allocation3 + $0x181] sm:$0xff] }
 0x651   : > { %18212 = vmatprep.mubr.msk.f32.mxu1 %vm550_vm2, %v10008_v56  ;;  %v10574_v56 = vld [vmem:[#allocation3 + $0x1a1] sm:$0xff] }
 0x654   : > { %18213 = vmatmul.mubr.msk.f32.gmra.mrb[74].mxu1 %vm550_vm2, %v10009_v8  ;;  %v10575_v8 = vld [vmem:[#allocation3 + $0x1a9] sm:$0xff] }
 0x655   : > { %18215 = vmatprep.mubr.msk.f32.mxu1 %vm550_vm2, %v10010_v45  ;;  %v10576_v45 = vld [vmem:[#allocation3 + $0x1b1] sm:$0xff] }
 0x658   : > { %18216 = vmatmul.mubr.msk.f32.gmra.mrb[76].mxu1 %vm550_vm2, %v10011_v0  ;;  %v19649_v0 = vmov 0.0|0.0  }
 0x659   : > { %18218 = vmatprep.mubr.msk.f32.mxu1 %vm550_vm2, %v10012_v9  ;;  %18665 = vmatprep.subr.bf16.mxu0 %v19649_v0 }
 0x65a   : > { %18668 = vmatprep.subr.bf16.mxu1 %v19649_v0 }
 0x65c   : > { %18219 = vmatmul.mubr.msk.f32.gmra.mrb[78].mxu1 %vm550_vm2, %v10013_v48 }
 0x65d   : > { %18221 = vmatprep.mubr.msk.f32.mxu1 %vm550_vm2, %v10014_v12 }
 0x660   : > { %18222 = vmatmul.mubr.msk.f32.gmra.mrb[80].mxu1 %vm550_vm2, %v10015_v37 }
 0x661   : > { %18224 = vmatprep.mubr.msk.f32.mxu1 %vm550_vm2, %v10016_v11 }
 0x664   : > { %18225 = vmatmul.mubr.msk.f32.gmra.mrb[82].mxu1 %vm550_vm2, %v10017_v42 }
 0x665   : > { %18227 = vmatprep.mubr.msk.f32.mxu1 %vm550_vm2, %v10018_v33  ;;  %v24407_v33 = vld [vmem:[#allocation50_spill] sm:$0xff] }
 0x668   : > { %18228 = vmatmul.mubr.msk.f32.gmra.mrb[84].mxu1 %vm550_vm2, %v10019_v1 }
 0x669   : > { %18230 = vmatprep.mubr.msk.f32.mxu1 %vm550_vm2, %v10020_v18 }
 0x66c   : > { %18231 = vmatmul.mubr.msk.f32.gmra.mrb[86].mxu1 %vm550_vm2, %v10021_v2 }
 0x66d   : > { %18233 = vmatprep.mubr.msk.f32.mxu1 %vm550_vm2, %v10022_v51  ;;  %v24408_v51 = vld [vmem:[#allocation48_spill] sm:$0xff] }
 0x670   : > { %18234 = vmatmul.mubr.msk.f32.gmra.mrb[88].mxu1 %vm550_vm2, %v10023_v57 }
 0x671   : > { %18236 = vmatprep.mubr.msk.f32.mxu1 %vm550_vm2, %v22751_v25  ;;  %v10531_v25 = vld [vmem:[#allocation3 + $0x49] sm:$0xff] }
 0x674   : > { %18237 = vmatmul.mubr.msk.f32.gmra.mrb[90].mxu1 %vm550_vm2, %v22755_v63  ;;  %v10532_v63 = vld [vmem:[#allocation3 + $0x51] sm:$0xff] }
 0x675   : > { %18239 = vmatprep.mubr.msk.f32.mxu1 %vm550_vm2, %v22759_v61  ;;  %v10533_v61 = vld [vmem:[#allocation3 + $0x59] sm:$0xff] }
 0x678   : > { %18240 = vmatmul.mubr.msk.f32.gmra.mrb[92].mxu1 %vm550_vm2, %v10027_v52 }
 0x679   : > { %18242 = vmatprep.mubr.msk.f32.mxu1 %vm550_vm2, %v10028_v41 }
 0x67c   : > { %18243 = vmatmul.mubr.msk.f32.gmra.mrb[94].mxu1 %vm550_vm2, %v10029_v29 }
 0x67d   : > { %18247 = vmatprep.mubr.msk.f32.mxu1 %vm550_vm2, %v10529_v22 }
 0x680   : > { %18248 = vmatmul.mubr.msk.f32.vlgmr.msra.gmra.mrb[48].mxu1 %vm550_vm2, %v10530_v54  ;;  %v24409_v54 = vld [vmem:[#allocation49_spill] sm:$0xff] }
 0x681   : > { %18250 = vmatprep.mubr.msk.f32.mxu1 %vm550_vm2, %v10531_v25 }
 0x684   : > { %18251 = vmatmul.mubr.msk.f32.gmra.mrb[50].mxu1 %vm550_vm2, %v10532_v63 }
 0x685   : > { %18253 = vmatprep.mubr.msk.f32.mxu1 %vm550_vm2, %v10533_v61 }
 0x688   : > { %18254 = vmatmul.mubr.msk.f32.gmra.mrb[52].mxu1 %vm550_vm2, %v10534_v47  ;;  %v24410_v47 = vld [vmem:[#allocation47_spill] sm:$0xff] }
 0x689   : > { %18256 = vmatprep.mubr.msk.f32.mxu1 %vm550_vm2, %v10535_v44 }
 0x68c   : > { %18257 = vmatmul.mubr.msk.f32.gmra.mrb[54].mxu1 %vm550_vm2, %v10536_v4 }
 0x68d   : > { %18259 = vmatprep.mubr.msk.f32.mxu1 %vm550_vm2, %v10537_v38 }
 0x690   : > { %18260 = vmatmul.mubr.msk.f32.gmra.mrb[56].mxu1 %vm550_vm2, %v10538_v7 }
 0x691   : > { %18262 = vmatprep.mubr.msk.f32.mxu1 %vm550_vm2, %v10539_v15 }
 0x694   : > { %18263 = vmatmul.mubr.msk.f32.gmra.mrb[58].mxu1 %vm550_vm2, %v10540_v3  ;;  %v24411_v3 = vld [vmem:[#allocation51_spill] sm:$0xff] }
 0x695   : > { %18265 = vmatprep.mubr.msk.f32.mxu1 %vm550_vm2, %v10541_v36 }
 0x698   : > { %18266 = vmatmul.mubr.msk.f32.gmra.mrb[60].mxu1 %vm550_vm2, %v10542_v17 }
 0x699   : > { %18268 = vmatprep.mubr.msk.f32.mxu1 %vm550_vm2, %v10543_v27 }
 0x69c   : > { %18269 = vmatmul.mubr.msk.f32.gmra.mrb[62].mxu1 %vm550_vm2, %v10544_v10  ;;  %v24412_v10 = vld [vmem:[#allocation52_spill] sm:$0xff] }
 0x69d   : > { %18271 = vmatprep.mubr.msk.f32.mxu1 %vm550_vm2, %v10545_v43 }
 0x6a0   : > { %18272 = vmatmul.mubr.msk.f32.gmra.mrb[64].mxu1 %vm550_vm2, %v10546_v21 }
 0x6a1   : > { %18274 = vmatprep.mubr.msk.f32.mxu1 %vm550_vm2, %v10547_v31 }
 0x6a4   : > { %18275 = vmatmul.mubr.msk.f32.gmra.mrb[66].mxu1 %vm550_vm2, %v10548_v5 }
 0x6a5   : > { %18277 = vmatprep.mubr.msk.f32.mxu1 %vm550_vm2, %v10549_v55 }
 0x6a8   : > { %18278 = vmatmul.mubr.msk.f32.gmra.mrb[68].mxu1 %vm550_vm2, %v10550_v20  ;;  %v24413_v20 = vld [vmem:[#allocation6_spill] sm:$0xff] }
 0x6a9   : > { %18280 = vmatprep.mubr.msk.f32.mxu1 %vm550_vm2, %v10551_v19 }
 0x6ac   : > { %18281 = vmatmul.mubr.msk.f32.gmra.mrb[70].mxu1 %vm550_vm2, %v10552_v49 }
 0x6ad   : > { %18283 = vmatprep.mubr.msk.f32.mxu1 %vm550_vm2, %v10553_v30 }
 0x6b0   : > { %18284 = vmatmul.mubr.msk.f32.gmra.mrb[72].mxu1 %vm550_vm2, %v10554_v46  ;;  %v24414_v46 = vld [vmem:[#allocation53_spill] sm:$0xff] }
 0x6b1   : > { %18286 = vmatprep.mubr.msk.f32.mxu1 %vm550_vm2, %v10555_v34 }
 0x6b4   : > { %18287 = vmatmul.mubr.msk.f32.gmra.mrb[74].mxu1 %vm550_vm2, %v10556_v59 }
 0x6b5   : > { %18289 = vmatprep.mubr.msk.f32.mxu1 %vm550_vm2, %v10557_v32 }
 0x6b8   : > { %18290 = vmatmul.mubr.msk.f32.gmra.mrb[76].mxu1 %vm550_vm2, %v10558_v35 }
 0x6b9   : > { %18292 = vmatprep.mubr.msk.f32.mxu1 %vm550_vm2, %v10559_v16 }
 0x6bc   : > { %18293 = vmatmul.mubr.msk.f32.gmra.mrb[78].mxu1 %vm550_vm2, %v10560_v40  ;;  %v24415_v40 = vld [vmem:[#allocation7_spill] sm:$0xff] }
 0x6bd   : > { %18295 = vmatprep.mubr.msk.f32.mxu1 %vm550_vm2, %v10561_v6 }
 0x6c0   : > { %18296 = vmatmul.mubr.msk.f32.gmra.mrb[80].mxu1 %vm550_vm2, %v10562_v14 }
 0x6c1   : > { %18298 = vmatprep.mubr.msk.f32.mxu1 %vm550_vm2, %v10563_v62 }
 0x6c4   : > { %18299 = vmatmul.mubr.msk.f32.gmra.mrb[82].mxu1 %vm550_vm2, %v10564_v24 }
 0x6c5   : > { %18301 = vmatprep.mubr.msk.f32.mxu1 %vm550_vm2, %v10565_v50  ;;  %v24416_v50 = vld [vmem:[#allocation54_spill] sm:$0xff] }
 0x6c8   : > { %18302 = vmatmul.mubr.msk.f32.gmra.mrb[84].mxu1 %vm550_vm2, %v10566_v28 }
 0x6c9   : > { %18304 = vmatprep.mubr.msk.f32.mxu1 %vm550_vm2, %v10567_v23 }
 0x6cc   : > { %18305 = vmatmul.mubr.msk.f32.gmra.mrb[86].mxu1 %vm550_vm2, %v10568_v58 }
 0x6cd   : > { %18307 = vmatprep.mubr.msk.f32.mxu1 %vm550_vm2, %v10569_v39 }
 0x6d0   : > { %18308 = vmatmul.mubr.msk.f32.gmra.mrb[88].mxu1 %vm550_vm2, %v10570_v53 }
 0x6d1   : > { %18310 = vmatprep.mubr.msk.f32.mxu1 %vm550_vm2, %v22856_v13  ;;  %v24406_v13 = vmov 0.0  }
 0x6d2   : > { %18323 = vmatprep.mubr.msk.f32.mxu0 %vm19650_vm3, %v24406_v13 }
 0x6d4   : > { %18311 = vmatmul.mubr.msk.f32.gmra.mrb[90].mxu1 %vm550_vm2, %v22860_v60  ;;  %v23094_v60 = vld [vmem:[%s23866_s6] ss:$0 sm:$0xff] }
 0x6d5   : > { %18313 = vmatprep.mubr.msk.f32.mxu1 %vm550_vm2, %v22864_v26 }
 0x6d8   : > { %18314 = vmatmul.mubr.msk.f32.gmra.mrb[92].mxu1 %vm550_vm2, %v10574_v56 }
 0x6d9   : > { %18316 = vmatprep.mubr.msk.f32.mxu1 %vm550_vm2, %v10575_v8 }
 0x6dc   : > { %18317 = vmatmul.mubr.msk.f32.gmra.mrb[94].mxu1 %vm550_vm2, %v10576_v45 }
 0x6dd   : > { %18330 = vmatprep.mubr.msk.f32.mxu1 %vm19650_vm3, %v24406_v13 }
 0x753   : > { %v18249_v26 = vpop.f32.mrb[48].mxu1 }
 0x754   : > { %v11084_v9 = vadd.f32 %v18249_v26, %v23094_v60  ;;  %v10789_v48 = vpop.f32.mrb[49].mxu1 }
 0x755   : > { %v11083_v12 = vadd.f32 %v23094_v60, %v10789_v48  ;;  %v24417_v48 = vld [vmem:[#allocation8_spill] sm:$0xff] }
 0x756   : > { %v11132_v37 = vmax.f32 %v11084_v9, 0.0 }
 0x757   : > { %v11131_v11 = vmax.f32 %v11083_v12, 0.0  ;;  %v18252_v42 = vpop.f32.mrb[50].mxu1 }
 0x758   : > { %v11180_v1 = vmul.f32 %v11132_v37, %v24407_v33  ;;  %v11086_v18 = vadd.f32 %v18252_v42, %v23094_v60  ;;  %v10799_v2 = vpop.f32.mrb[51].mxu1  ;;  %v24418_v42 = vld [vmem:[#allocation55_spill] sm:$0xff] }
 0x759   : > { %v11179_v57 = vmul.f32 %v11131_v11, %v24408_v51  ;;  %v11085_v52 = vadd.f32 %v23094_v60, %v10799_v2 }
 0x75a   : > { %11228 = vst.msk [vmem:[%s23103_s19 + $0x8] sm:$0xff] %vm550_vm2, %v11180_v1  ;;  %11276 = vst.msk [vmem:[#allocation4 + $0x28] sm:$0xff] %vm550_vm2, %v11180_v1  ;;  %v11134_v41 = vmax.f32 %v11086_v18, 0.0 }
 0x75b   : > { %11227 = vst.msk [vmem:[%s23103_s19] sm:$0xff] %vm550_vm2, %v11179_v57  ;;  %11275 = vst.msk [vmem:[#allocation4 + $0x20] sm:$0xff] %vm550_vm2, %v11179_v57  ;;  %v11133_v29 = vmax.f32 %v11085_v52, 0.0  ;;  %v18255_v22 = vpop.f32.mrb[52].mxu1  ;;  %v23164_v52 = vld [vmem:[%s23871_s11] sm:$0xff] }
 0x75c   : > { %v11182_v25 = vmul.f32 %v11134_v41, %v24409_v54  ;;  %v11088_v63 = vadd.f32 %v18255_v22, %v23094_v60  ;;  %v10809_v61 = vpop.f32.mrb[53].mxu1  ;;  %v23169_v41 = vld [vmem:[%s23871_s11 + $0x8] sm:$0xff] }
 0x75d   : > { %v11181_v44 = vmul.f32 %v11133_v29, %v24410_v47  ;;  %v11087_v4 = vadd.f32 %v23094_v60, %v10809_v61  ;;  %v24419_v29 = vld [vmem:[#allocation12_spill] sm:$0xff] }
 0x75e   : > { %11230 = vst.msk [vmem:[%s23103_s19 + $0x18] sm:$0xff] %vm550_vm2, %v11182_v25  ;;  %11278 = vst.msk [vmem:[#allocation4 + $0x38] sm:$0xff] %vm550_vm2, %v11182_v25  ;;  %v11136_v38 = vmax.f32 %v11088_v63, 0.0  ;;  %v24420_v63 = vld [vmem:[#allocation56_spill] sm:$0xff] }
 0x75f   : > { %11229 = vst.msk [vmem:[%s23103_s19 + $0x10] sm:$0xff] %vm550_vm2, %v11181_v44  ;;  %v11135_v7 = vmax.f32 %v11087_v4, 0.0  ;;  %v18258_v15 = vpop.f32.mrb[54].mxu1 }
 0x760   : > { %v11184_v36 = vmul.f32 %v11136_v38, %v24411_v3  ;;  %v11090_v17 = vadd.f32 %v18258_v15, %v23094_v60  ;;  %v10819_v27 = vpop.f32.mrb[55].mxu1 }
 0x761   : > { %v11183_v43 = vmul.f32 %v11135_v7, %v24412_v10  ;;  %v11089_v21 = vadd.f32 %v23094_v60, %v10819_v27  ;;  %v11324_v53 = vld [vmem:[#allocation4 + $0x28] sm:$0xff] }
 0x762   : > { %11232 = vst.msk [vmem:[%s23103_s19 + $0x28] sm:$0xff] %vm550_vm2, %v11184_v36  ;;  %v11138_v31 = vmax.f32 %v11090_v17, 0.0  ;;  %v11323_v39 = vld [vmem:[#allocation4 + $0x20] sm:$0xff]  ;;  %v24421_v7 = vld [vmem:[#allocation13_spill] sm:$0xff] }
 0x763   : > { %11231 = vst.msk [vmem:[%s23103_s19 + $0x20] sm:$0xff] %vm550_vm2, %v11183_v43  ;;  %11279 = vst.msk [vmem:[#allocation4 + $0x40] sm:$0xff] %vm550_vm2, %v11183_v43  ;;  %v11137_v5 = vmax.f32 %v11089_v21, 0.0  ;;  %v18261_v55 = vpop.f32.mrb[56].mxu1  ;;  %v24422_v27 = vld [vmem:[#allocation57_spill] sm:$0xff] }
 0x764   : > { %v11186_v19 = vmul.f32 %v11138_v31, %v24413_v20  ;;  %v11092_v49 = vadd.f32 %v18261_v55, %v23094_v60  ;;  %v10829_v30 = vpop.f32.mrb[57].mxu1 }
 0x765   : > { %v11185_v34 = vmul.f32 %v11137_v5, %v24414_v46  ;;  %v11091_v59 = vadd.f32 %v23094_v60, %v10829_v30  ;;  %v11325_v24 = vld [vmem:[#allocation4 + $0x38] sm:$0xff]  ;;  %v24423_v46 = vld [vmem:[#allocation14_spill] sm:$0xff] }
 0x766   : > { %11234 = vst.msk [vmem:[%s23103_s19 + $0x38] sm:$0xff] %vm550_vm2, %v11186_v19  ;;  %11282 = vst.msk [vmem:[#allocation4 + $0x58] sm:$0xff] %vm550_vm2, %v11186_v19  ;;  %v11140_v32 = vmax.f32 %v11092_v49, 0.0  ;;  %v11327_v26 = vmax.f32 %v11323_v39, %v11325_v24  ;;  %v24426_v39 = vld [vmem:[#allocation59_spill] sm:$0xff] }
 0x767   : > { %11233 = vst.msk [vmem:[%s23103_s19 + $0x30] sm:$0xff] %vm550_vm2, %v11185_v34  ;;  %11281 = vst.msk [vmem:[#allocation4 + $0x50] sm:$0xff] %vm550_vm2, %v11185_v34  ;;  %v11139_v35 = vmax.f32 %v11091_v59, 0.0  ;;  %v18264_v16 = vpop.f32.mrb[58].mxu1 }
 0x768   : > { %v11188_v6 = vmul.f32 %v11140_v32, %v24415_v40  ;;  %v11094_v14 = vadd.f32 %v18264_v16, %v23094_v60  ;;  %v10839_v62 = vpop.f32.mrb[59].mxu1 }
 0x769   : > { %v11187_v28 = vmul.f32 %v11139_v35, %v24416_v50  ;;  %v11093_v23 = vadd.f32 %v23094_v60, %v10839_v62  ;;  %v24424_v35 = vld [vmem:[#allocation58_spill] sm:$0xff]  ;;  %v24425_v50 = vld [vmem:[#allocation15_spill] sm:$0xff] }
 0x76a   : > { %11236 = vst.msk [vmem:[%s23103_s19 + $0x48] sm:$0xff] %vm550_vm2, %v11188_v6  ;;  %11284 = vst.msk [vmem:[#allocation4 + $0x68] sm:$0xff] %vm550_vm2, %v11188_v6  ;;  %v11142_v58 = vmax.f32 %v11094_v14, 0.0  ;;  %v11326_v56 = vld [vmem:[#allocation4 + $0x40] sm:$0xff] }
 0x76b   : > { %11235 = vst.msk [vmem:[%s23103_s19 + $0x40] sm:$0xff] %vm550_vm2, %v11187_v28  ;;  %v11141_v8 = vmax.f32 %v11093_v23, 0.0  ;;  %v18267_v45 = vpop.f32.mrb[60].mxu1  ;;  %v11328_v9 = vmax.f32 %v11324_v53, %v11326_v56 }
 0x76c   : > { %v11190_v12 = vmul.f32 %v11142_v58, %v24417_v48  ;;  %v11096_v37 = vadd.f32 %v18267_v45, %v23094_v60  ;;  %v10849_v11 = vpop.f32.mrb[61].mxu1 }
 0x76d   : > { %v11189_v33 = vmul.f32 %v11141_v8, %v24418_v42  ;;  %v11095_v1 = vadd.f32 %v23094_v60, %v10849_v11  ;;  %v18666_v18 = vpack.c.bf16 %v11328_v9, %v11327_v26  ;;  %v11479_v5 = vld [vmem:[#allocation4 + $0x58] sm:$0xff]  ;;  %v24427_v9 = vld [vmem:[#allocation16_spill] sm:$0xff] }
 0x76e   : > { %11238 = vst.msk [vmem:[%s23103_s19 + $0x58] sm:$0xff] %vm550_vm2, %v11190_v12  ;;  %v11144_v2 = vmax.f32 %v11096_v37, 0.0  ;;  %v11478_v31 = vld [vmem:[#allocation4 + $0x50] sm:$0xff]  ;;  %v24428_v42 = vld [vmem:[#allocation60_spill] sm:$0xff] }
 0x76f   : > { %11237 = vst.msk [vmem:[%s23103_s19 + $0x50] sm:$0xff] %vm550_vm2, %v11189_v33  ;;  %11285 = vst.msk [vmem:[#allocation4 + $0x70] sm:$0xff] %vm550_vm2, %v11189_v33  ;;  %v11143_v51 = vmax.f32 %v11095_v1, 0.0  ;;  %v18270_v57 = vpop.f32.mrb[62].mxu1  ;;  %18667 = vmatpush3.bf16.msra.mxu0 %v18666_v18  ;;  %18670 = vmatpush3.bf16.msra.mxu1 %v18666_v18 }
 0x770   : > { %v11192_v22 = vmul.f32 %v11144_v2, %v24419_v29  ;;  %v11098_v54 = vadd.f32 %v18270_v57, %v23094_v60  ;;  %v10859_v25 = vpop.f32.mrb[63].mxu1  ;;  %18671 = vmatprep.subr.bf16.mxu0 %v19649_v0  ;;  %18674 = vmatprep.subr.bf16.mxu1 %v19649_v0 }
 0x771   : > { %v11191_v61 = vmul.f32 %v11143_v51, %v24420_v63  ;;  %v11097_v47 = vadd.f32 %v23094_v60, %v10859_v25  ;;  %v11480_v17 = vld [vmem:[#allocation4 + $0x68] sm:$0xff] }
 0x772   : > { %11240 = vst.msk [vmem:[%s23103_s19 + $0x68] sm:$0xff] %vm550_vm2, %v11192_v22  ;;  %11288 = vst.msk [vmem:[#allocation4 + $0x88] sm:$0xff] %vm550_vm2, %v11192_v22  ;;  %v11146_v44 = vmax.f32 %v11098_v54, 0.0  ;;  %18324 = vmatmul.mubr.msk.f32.vlgmr.msra.gmra.mrb[48].mxu0 %vm11329_vm4, %v23164_v52  ;;  %18331 = vmatmul.mubr.msk.f32.vlgmr.msra.gmra.mrb[96].mxu1 %vm11329_vm4, %v23169_v41  ;;  %v11482_v49 = vmax.f32 %v11478_v31, %v11480_v17  ;;  %v24429_v63 = vld [vmem:[#allocation17_spill] sm:$0xff]  ;;  %v24432_v31 = vld [vmem:[#allocation62_spill] sm:$0xff] }
 0x773   : > { %11239 = vst.msk [vmem:[%s23103_s19 + $0x60] sm:$0xff] %vm550_vm2, %v11191_v61  ;;  %11287 = vst.msk [vmem:[#allocation4 + $0x80] sm:$0xff] %vm550_vm2, %v11191_v61  ;;  %v11145_v4 = vmax.f32 %v11097_v47, 0.0  ;;  %v18273_v38 = vpop.f32.mrb[64].mxu1  ;;  %18337 = vmatprep.mubr.msk.f32.mxu0 %vm19650_vm3, %v24406_v13  ;;  %18344 = vmatprep.mubr.msk.f32.mxu1 %vm19650_vm3, %v24406_v13 }
 0x774   : > { %v11194_v15 = vmul.f32 %v11146_v44, %v24421_v7  ;;  %v11100_v3 = vadd.f32 %v18273_v38, %v23094_v60  ;;  %v10869_v36 = vpop.f32.mrb[65].mxu1 }
 0x775   : > { %v11193_v10 = vmul.f32 %v11145_v4, %v24422_v27  ;;  %v11099_v43 = vadd.f32 %v23094_v60, %v10869_v36  ;;  %v24430_v4 = vld [vmem:[#allocation61_spill] sm:$0xff]  ;;  %v24431_v27 = vld [vmem:[#allocation18_spill] sm:$0xff] }
 0x776   : > { %11242 = vst.msk [vmem:[%s23103_s19 + $0x78] sm:$0xff] %vm550_vm2, %v11194_v15  ;;  %11290 = vst.msk [vmem:[#allocation4 + $0x98] sm:$0xff] %vm550_vm2, %v11194_v15  ;;  %v11148_v21 = vmax.f32 %v11100_v3, 0.0  ;;  %v11481_v55 = vld [vmem:[#allocation4 + $0x70] sm:$0xff] }
 0x777   : > { %11241 = vst.msk [vmem:[%s23103_s19 + $0x70] sm:$0xff] %vm550_vm2, %v11193_v10  ;;  %v11147_v20 = vmax.f32 %v11099_v43, 0.0  ;;  %v18276_v19 = vpop.f32.mrb[66].mxu1  ;;  %v11483_v30 = vmax.f32 %v11479_v5, %v11481_v55 }
 0x778   : > { %v11196_v34 = vmul.f32 %v11148_v21, %v24423_v46  ;;  %v11102_v59 = vadd.f32 %v18276_v19, %v23094_v60  ;;  %v10879_v32 = vpop.f32.mrb[67].mxu1 }
 0x779   : > { %v11195_v16 = vmul.f32 %v11147_v20, %v24424_v35  ;;  %v11101_v40 = vadd.f32 %v23094_v60, %v10879_v32  ;;  %v18672_v6 = vpack.c.bf16 %v11483_v30, %v11482_v49  ;;  %v11627_v51 = vld [vmem:[#allocation4 + $0x88] sm:$0xff]  ;;  %v24433_v30 = vld [vmem:[#allocation19_spill] sm:$0xff] }
 0x77a   : > { %11244 = vst.msk [vmem:[%s23103_s19 + $0x88] sm:$0xff] %vm550_vm2, %v11196_v34  ;;  %v11150_v14 = vmax.f32 %v11102_v59, 0.0  ;;  %v11626_v2 = vld [vmem:[#allocation4 + $0x80] sm:$0xff]  ;;  %v24434_v35 = vld [vmem:[#allocation63_spill] sm:$0xff] }
 0x77b   : > { %11243 = vst.msk [vmem:[%s23103_s19 + $0x80] sm:$0xff] %vm550_vm2, %v11195_v16  ;;  %11291 = vst.msk [vmem:[#allocation4 + $0xa0] sm:$0xff] %vm550_vm2, %v11195_v16  ;;  %v11149_v62 = vmax.f32 %v11101_v40, 0.0  ;;  %v18279_v24 = vpop.f32.mrb[68].mxu1  ;;  %18673 = vmatpush3.bf16.msra.mxu0 %v18672_v6  ;;  %18676 = vmatpush3.bf16.msra.mxu1 %v18672_v6 }
 0x77c   : > { %v11198_v28 = vmul.f32 %v11150_v14, %v24425_v50  ;;  %v11104_v23 = vadd.f32 %v18279_v24, %v23094_v60  ;;  %v10889_v58 = vpop.f32.mrb[69].mxu1  ;;  %18677 = vmatprep.subr.bf16.mxu0 %v19649_v0  ;;  %18680 = vmatprep.subr.bf16.mxu1 %v19649_v0 }
 0x77d   : > { %v11197_v53 = vmul.f32 %v11149_v62, %v24426_v39  ;;  %v11103_v56 = vadd.f32 %v23094_v60, %v10889_v58  ;;  %v11628_v11 = vld [vmem:[#allocation4 + $0x98] sm:$0xff]  ;;  %v24435_v39 = vld [vmem:[#allocation20_spill] sm:$0xff] }
 0x77e   : > { %11246 = vst.msk [vmem:[%s23103_s19 + $0x98] sm:$0xff] %vm550_vm2, %v11198_v28  ;;  %11294 = vst.msk [vmem:[#allocation4 + $0xb8] sm:$0xff] %vm550_vm2, %v11198_v28  ;;  %v11152_v8 = vmax.f32 %v11104_v23, 0.0  ;;  %18338 = vmatmul.mubr.msk.f32.vlgmr.msra.gmra.mrb[50].mxu0 %vm11329_vm4, %v23164_v52  ;;  %18345 = vmatmul.mubr.msk.f32.vlgmr.msra.gmra.mrb[98].mxu1 %vm11329_vm4, %v23169_v41  ;;  %v11630_v54 = vmax.f32 %v11626_v2, %v11628_v11  ;;  %v24438_v2 = vld [vmem:[#allocation65_spill] sm:$0xff] }
 0x77f   : > { %11245 = vst.msk [vmem:[%s23103_s19 + $0x90] sm:$0xff] %vm550_vm2, %v11197_v53  ;;  %11293 = vst.msk [vmem:[#allocation4 + $0xb0] sm:$0xff] %vm550_vm2, %v11197_v53  ;;  %v11151_v45 = vmax.f32 %v11103_v56, 0.0  ;;  %v18282_v26 = vpop.f32.mrb[70].mxu1  ;;  %18351 = vmatprep.mubr.msk.f32.mxu0 %vm19650_vm3, %v24406_v13  ;;  %18358 = vmatprep.mubr.msk.f32.mxu1 %vm19650_vm3, %v24406_v13 }
 0x780   : > { %v11200_v48 = vmul.f32 %v11152_v8, %v24427_v9  ;;  %v11106_v12 = vadd.f32 %v18282_v26, %v23094_v60  ;;  %v10899_v37 = vpop.f32.mrb[71].mxu1 }
 0x781   : > { %v11199_v33 = vmul.f32 %v11151_v45, %v24428_v42  ;;  %v11105_v1 = vadd.f32 %v23094_v60, %v10899_v37  ;;  %v24436_v45 = vld [vmem:[#allocation64_spill] sm:$0xff]  ;;  %v24437_v42 = vld [vmem:[#allocation21_spill] sm:$0xff] }
 0x782   : > { %11248 = vst.msk [vmem:[%s23103_s19 + $0xa8] sm:$0xff] %vm550_vm2, %v11200_v48  ;;  %11296 = vst.msk [vmem:[#allocation4 + $0xc8] sm:$0xff] %vm550_vm2, %v11200_v48  ;;  %v11154_v18 = vmax.f32 %v11106_v12, 0.0  ;;  %v11629_v57 = vld [vmem:[#allocation4 + $0xa0] sm:$0xff] }
 0x783   : > { %11247 = vst.msk [vmem:[%s23103_s19 + $0xa0] sm:$0xff] %vm550_vm2, %v11199_v33  ;;  %v11153_v29 = vmax.f32 %v11105_v1, 0.0  ;;  %v18285_v22 = vpop.f32.mrb[72].mxu1  ;;  %v11631_v25 = vmax.f32 %v11627_v51, %v11629_v57 }
 0x784   : > { %v11202_v61 = vmul.f32 %v11154_v18, %v24429_v63  ;;  %v11108_v47 = vadd.f32 %v18285_v22, %v23094_v60  ;;  %v10909_v44 = vpop.f32.mrb[73].mxu1 }
 0x785   : > { %v11201_v38 = vmul.f32 %v11153_v29, %v24430_v4  ;;  %v11107_v7 = vadd.f32 %v23094_v60, %v10909_v44  ;;  %v18678_v15 = vpack.c.bf16 %v11631_v25, %v11630_v54  ;;  %v11775_v62 = vld [vmem:[#allocation4 + $0xb8] sm:$0xff]  ;;  %v24439_v25 = vld [vmem:[#allocation22_spill] sm:$0xff] }
 0x786   : > { %11250 = vst.msk [vmem:[%s23103_s19 + $0xb8] sm:$0xff] %vm550_vm2, %v11202_v61  ;;  %v11156_v3 = vmax.f32 %v11108_v47, 0.0  ;;  %v11774_v14 = vld [vmem:[#allocation4 + $0xb0] sm:$0xff]  ;;  %v24440_v4 = vld [vmem:[#allocation23_spill] sm:$0xff] }
 0x787   : > { %11249 = vst.msk [vmem:[%s23103_s19 + $0xb0] sm:$0xff] %vm550_vm2, %v11201_v38  ;;  %11297 = vst.msk [vmem:[#allocation4 + $0xd0] sm:$0xff] %vm550_vm2, %v11201_v38  ;;  %v11155_v36 = vmax.f32 %v11107_v7, 0.0  ;;  %v18288_v17 = vpop.f32.mrb[74].mxu1  ;;  %18679 = vmatpush3.bf16.msra.mxu0 %v18678_v15  ;;  %18682 = vmatpush3.bf16.msra.mxu1 %v18678_v15 }
 0x788   : > { %v11204_v10 = vmul.f32 %v11156_v3, %v24431_v27  ;;  %v11110_v43 = vadd.f32 %v18288_v17, %v23094_v60  ;;  %v10919_v21 = vpop.f32.mrb[75].mxu1  ;;  %18683 = vmatprep.subr.bf16.mxu0 %v19649_v0  ;;  %18686 = vmatprep.subr.bf16.mxu1 %v19649_v0 }
 0x789   : > { %v11203_v5 = vmul.f32 %v11155_v36, %v24432_v31  ;;  %v11109_v55 = vadd.f32 %v23094_v60, %v10919_v21  ;;  %v11776_v32 = vld [vmem:[#allocation4 + $0xc8] sm:$0xff]  ;;  %v24441_v31 = vld [vmem:[#allocation24_spill] sm:$0xff] }
 0x78a   : > { %11252 = vst.msk [vmem:[%s23103_s19 + $0xc8] sm:$0xff] %vm550_vm2, %v11204_v10  ;;  %11300 = vst.msk [vmem:[#allocation4 + $0xe8] sm:$0xff] %vm550_vm2, %v11204_v10  ;;  %v11158_v20 = vmax.f32 %v11110_v43, 0.0  ;;  %18352 = vmatmul.mubr.msk.f32.vlgmr.msra.gmra.mrb[52].mxu0 %vm11329_vm4, %v23164_v52  ;;  %18359 = vmatmul.mubr.msk.f32.vlgmr.msra.gmra.mrb[100].mxu1 %vm11329_vm4, %v23169_v41  ;;  %v11778_v23 = vmax.f32 %v11774_v14, %v11776_v32  ;;  %v24444_v14 = vld [vmem:[#allocation27_spill] sm:$0xff] }
 0x78b   : > { %11251 = vst.msk [vmem:[%s23103_s19 + $0xc0] sm:$0xff] %vm550_vm2, %v11203_v5  ;;  %11299 = vst.msk [vmem:[#allocation4 + $0xe0] sm:$0xff] %vm550_vm2, %v11203_v5  ;;  %v11157_v19 = vmax.f32 %v11109_v55, 0.0  ;;  %v18291_v49 = vpop.f32.mrb[76].mxu1  ;;  %18365 = vmatprep.mubr.msk.f32.mxu0 %vm19650_vm3, %v24406_v13  ;;  %18372 = vmatprep.mubr.msk.f32.mxu1 %vm19650_vm3, %v24406_v13 }
 0x78c   : > { %v11206_v46 = vmul.f32 %v11158_v20, %v24433_v30  ;;  %v11112_v34 = vadd.f32 %v18291_v49, %v23094_v60  ;;  %v10929_v59 = vpop.f32.mrb[77].mxu1 }
 0x78d   : > { %v11205_v16 = vmul.f32 %v11157_v19, %v24434_v35  ;;  %v11111_v40 = vadd.f32 %v23094_v60, %v10929_v59  ;;  %v24442_v19 = vld [vmem:[#allocation25_spill] sm:$0xff]  ;;  %v24443_v35 = vld [vmem:[#allocation26_spill] sm:$0xff] }
 0x78e   : > { %11254 = vst.msk [vmem:[%s23103_s19 + $0xd8] sm:$0xff] %vm550_vm2, %v11206_v46  ;;  %11302 = vst.msk [vmem:[#allocation4 + $0xf8] sm:$0xff] %vm550_vm2, %v11206_v46  ;;  %v11160_v6 = vmax.f32 %v11112_v34, 0.0  ;;  %v11777_v24 = vld [vmem:[#allocation4 + $0xd0] sm:$0xff] }
 0x78f   : > { %11253 = vst.msk [vmem:[%s23103_s19 + $0xd0] sm:$0xff] %vm550_vm2, %v11205_v16  ;;  %v11159_v50 = vmax.f32 %v11111_v40, 0.0  ;;  %v18294_v28 = vpop.f32.mrb[78].mxu1  ;;  %v11779_v58 = vmax.f32 %v11775_v62, %v11777_v24 }
 0x790   : > { %v11208_v53 = vmul.f32 %v11160_v6, %v24435_v39  ;;  %v11114_v56 = vadd.f32 %v18294_v28, %v23094_v60  ;;  %v10939_v8 = vpop.f32.mrb[79].mxu1 }
 0x791   : > { %v11207_v26 = vmul.f32 %v11159_v50, %v24436_v45  ;;  %v11113_v9 = vadd.f32 %v23094_v60, %v10939_v8  ;;  %v18684_v48 = vpack.c.bf16 %v11779_v58, %v11778_v23  ;;  %v11923_v36 = vld [vmem:[#allocation4 + $0xe8] sm:$0xff]  ;;  %v24445_v58 = vld [vmem:[#allocation28_spill] sm:$0xff] }
 0x792   : > { %11256 = vst.msk [vmem:[%s23103_s19 + $0xe8] sm:$0xff] %vm550_vm2, %v11208_v53  ;;  %v11162_v12 = vmax.f32 %v11114_v56, 0.0  ;;  %v11922_v3 = vld [vmem:[#allocation4 + $0xe0] sm:$0xff]  ;;  %v24446_v45 = vld [vmem:[#allocation29_spill] sm:$0xff] }
 0x793   : > { %11255 = vst.msk [vmem:[%s23103_s19 + $0xe0] sm:$0xff] %vm550_vm2, %v11207_v26  ;;  %11303 = vst.msk [vmem:[#allocation4 + $0x100] sm:$0xff] %vm550_vm2, %v11207_v26  ;;  %v11161_v37 = vmax.f32 %v11113_v9, 0.0  ;;  %v18297_v11 = vpop.f32.mrb[80].mxu1  ;;  %18685 = vmatpush3.bf16.msra.mxu0 %v18684_v48  ;;  %18688 = vmatpush3.bf16.msra.mxu1 %v18684_v48 }
 0x794   : > { %v11210_v33 = vmul.f32 %v11162_v12, %v24437_v42  ;;  %v11116_v1 = vadd.f32 %v18297_v11, %v23094_v60  ;;  %v10949_v18 = vpop.f32.mrb[81].mxu1  ;;  %18689 = vmatprep.subr.bf16.mxu0 %v19649_v0  ;;  %18692 = vmatprep.subr.bf16.mxu1 %v19649_v0 }
 0x795   : > { %v11209_v51 = vmul.f32 %v11161_v37, %v24438_v2  ;;  %v11115_v57 = vadd.f32 %v23094_v60, %v10949_v18  ;;  %v11924_v44 = vld [vmem:[#allocation4 + $0xf8] sm:$0xff]  ;;  %v24447_v2 = vld [vmem:[#allocation30_spill] sm:$0xff] }
 0x796   : > { %11258 = vst.msk [vmem:[%s23103_s19 + $0xf8] sm:$0xff] %vm550_vm2, %v11210_v33  ;;  %11306 = vst.msk [vmem:[#allocation4 + $0x118] sm:$0xff] %vm550_vm2, %v11210_v33  ;;  %v11164_v29 = vmax.f32 %v11116_v1, 0.0  ;;  %18366 = vmatmul.mubr.msk.f32.vlgmr.msra.gmra.mrb[54].mxu0 %vm11329_vm4, %v23164_v52  ;;  %18373 = vmatmul.mubr.msk.f32.vlgmr.msra.gmra.mrb[102].mxu1 %vm11329_vm4, %v23169_v41  ;;  %v11926_v43 = vmax.f32 %v11922_v3, %v11924_v44  ;;  %v24450_v3 = vld [vmem:[#allocation35_spill] sm:$0xff] }
 0x797   : > { %11257 = vst.msk [vmem:[%s23103_s19 + $0xf0] sm:$0xff] %vm550_vm2, %v11209_v51  ;;  %11305 = vst.msk [vmem:[#allocation4 + $0x110] sm:$0xff] %vm550_vm2, %v11209_v51  ;;  %v11163_v22 = vmax.f32 %v11115_v57, 0.0  ;;  %v18300_v54 = vpop.f32.mrb[82].mxu1  ;;  %18379 = vmatprep.mubr.msk.f32.mxu0 %vm19650_vm3, %v24406_v13  ;;  %18386 = vmatprep.mubr.msk.f32.mxu1 %vm19650_vm3, %v24406_v13 }
 0x798   : > { %v11212_v63 = vmul.f32 %v11164_v29, %v24439_v25  ;;  %v11118_v61 = vadd.f32 %v18300_v54, %v23094_v60  ;;  %v10959_v47 = vpop.f32.mrb[83].mxu1 }
 0x799   : > { %v11211_v38 = vmul.f32 %v11163_v22, %v24440_v4  ;;  %v11117_v7 = vadd.f32 %v23094_v60, %v10959_v47  ;;  %v24448_v22 = vld [vmem:[#allocation31_spill] sm:$0xff]  ;;  %v24449_v4 = vld [vmem:[#allocation33_spill] sm:$0xff] }
 0x79a   : > { %11260 = vst.msk [vmem:[%s23103_s19 + $0x108] sm:$0xff] %vm550_vm2, %v11212_v63  ;;  %11308 = vst.msk [vmem:[#allocation4 + $0x128] sm:$0xff] %vm550_vm2, %v11212_v63  ;;  %v11166_v15 = vmax.f32 %v11118_v61, 0.0  ;;  %v11925_v17 = vld [vmem:[#allocation4 + $0x100] sm:$0xff] }
 0x79b   : > { %11259 = vst.msk [vmem:[%s23103_s19 + $0x100] sm:$0xff] %vm550_vm2, %v11211_v38  ;;  %v11165_v27 = vmax.f32 %v11117_v7, 0.0  ;;  %v18303_v10 = vpop.f32.mrb[84].mxu1  ;;  %v11927_v21 = vmax.f32 %v11923_v36, %v11925_v17 }
 0x79c   : > { %v11214_v5 = vmul.f32 %v11166_v15, %v24441_v31  ;;  %v11120_v55 = vadd.f32 %v18303_v10, %v23094_v60  ;;  %v10969_v20 = vpop.f32.mrb[85].mxu1 }
 0x79d   : > { %v11213_v49 = vmul.f32 %v11165_v27, %v24442_v19  ;;  %v11119_v30 = vadd.f32 %v23094_v60, %v10969_v20  ;;  %v18690_v46 = vpack.c.bf16 %v11927_v21, %v11926_v43  ;;  %v12071_v37 = vld [vmem:[#allocation4 + $0x118] sm:$0xff]  ;;  %v24451_v21 = vld [vmem:[#allocation38_spill] sm:$0xff]  ;;  %v24452_v19 = vld [vmem:[#allocation9_spill] sm:$0xff] }
 0x79e   : > { %11262 = vst.msk [vmem:[%s23103_s19 + $0x118] sm:$0xff] %vm550_vm2, %v11214_v5  ;;  %v11168_v34 = vmax.f32 %v11120_v55, 0.0  ;;  %v12070_v12 = vld [vmem:[#allocation4 + $0x110] sm:$0xff] }
 0x79f   : > { %11261 = vst.msk [vmem:[%s23103_s19 + $0x110] sm:$0xff] %vm550_vm2, %v11213_v49  ;;  %11309 = vst.msk [vmem:[#allocation4 + $0x130] sm:$0xff] %vm550_vm2, %v11213_v49  ;;  %v11167_v59 = vmax.f32 %v11119_v30, 0.0  ;;  %v18306_v32 = vpop.f32.mrb[86].mxu1  ;;  %18691 = vmatpush3.bf16.msra.mxu0 %v18690_v46  ;;  %18694 = vmatpush3.bf16.msra.mxu1 %v18690_v46 }
 0x7a0   : > { %v11216_v16 = vmul.f32 %v11168_v34, %v24443_v35  ;;  %v11122_v40 = vadd.f32 %v18306_v32, %v23094_v60  ;;  %v10979_v6 = vpop.f32.mrb[87].mxu1  ;;  %18695 = vmatprep.subr.bf16.mxu0 %v19649_v0  ;;  %18698 = vmatprep.subr.bf16.mxu1 %v19649_v0 }
 0x7a1   : > { %v11215_v62 = vmul.f32 %v11167_v59, %v24444_v14  ;;  %v11121_v24 = vadd.f32 %v23094_v60, %v10979_v6  ;;  %v12072_v8 = vld [vmem:[#allocation4 + $0x128] sm:$0xff]  ;;  %v24453_v6 = vld [vmem:[#allocation40_spill] sm:$0xff] }
 0x7a2   : > { %11264 = vst.msk [vmem:[%s23103_s19 + $0x128] sm:$0xff] %vm550_vm2, %v11216_v16  ;;  %11312 = vst.msk [vmem:[#allocation4 + $0x148] sm:$0xff] %vm550_vm2, %v11216_v16  ;;  %v11170_v50 = vmax.f32 %v11122_v40, 0.0  ;;  %18380 = vmatmul.mubr.msk.f32.vlgmr.msra.gmra.mrb[56].mxu0 %vm11329_vm4, %v23164_v52  ;;  %18387 = vmatmul.mubr.msk.f32.vlgmr.msra.gmra.mrb[104].mxu1 %vm11329_vm4, %v23169_v41  ;;  %v12074_v1 = vmax.f32 %v12070_v12, %v12072_v8  ;;  %v12532_v8 = vld [vmem:[#allocation5 + $0x10] sm:$0xff] }
 0x7a3   : > { %11263 = vst.msk [vmem:[%s23103_s19 + $0x120] sm:$0xff] %vm550_vm2, %v11215_v62  ;;  %11311 = vst.msk [vmem:[#allocation4 + $0x140] sm:$0xff] %vm550_vm2, %v11215_v62  ;;  %v11169_v28 = vmax.f32 %v11121_v24, 0.0  ;;  %v18309_v23 = vpop.f32.mrb[88].mxu1  ;;  %18393 = vmatprep.mubr.msk.f32.mxu0 %vm19650_vm3, %v24406_v13  ;;  %18400 = vmatprep.mubr.msk.f32.mxu1 %vm19650_vm3, %v24406_v13  ;;  %v24454_v62 = vld [vmem:[#allocation42_spill] sm:$0xff] }
 0x7a4   : > { %v11218_v39 = vmul.f32 %v11170_v50, %v24445_v58  ;;  %v11124_v53 = vadd.f32 %v18309_v23, %v23094_v60  ;;  %v10989_v56 = vpop.f32.mrb[89].mxu1 }
 0x7a5   : > { %v11217_v26 = vmul.f32 %v11169_v28, %v24446_v45  ;;  %v11123_v9 = vadd.f32 %v23094_v60, %v10989_v56  ;;  %v12530_v45 = vld [vmem:[%s23867_s7] sm:$0xff] }
 0x7a6   : > { %11266 = vst.msk [vmem:[%s23103_s19 + $0x138] sm:$0xff] %vm550_vm2, %v11218_v39  ;;  %11314 = vst.msk [vmem:[#allocation4 + $0x158] sm:$0xff] %vm550_vm2, %v11218_v39  ;;  %v11172_v48 = vmax.f32 %v11124_v53, 0.0  ;;  %v12073_v11 = vld [vmem:[#allocation4 + $0x130] sm:$0xff] }
 0x7a7   : > { %11265 = vst.msk [vmem:[%s23103_s19 + $0x130] sm:$0xff] %vm550_vm2, %v11217_v26  ;;  %v11171_v42 = vmax.f32 %v11123_v9, 0.0  ;;  %v18312_v33 = vpop.f32.mrb[90].mxu1  ;;  %v12075_v18 = vmax.f32 %v12071_v37, %v12073_v11  ;;  %v23426_v37 = vld [vmem:[#allocation5 + $0x20] sm:$0xff] }
 0x7a8   : > { %v11220_v51 = vmul.f32 %v11172_v48, %v24447_v2  ;;  %v11126_v57 = vadd.f32 %v18312_v33, %v23094_v60  ;;  %v10999_v29 = vpop.f32.mrb[91].mxu1 }
 0x7a9   : > { %v11219_v54 = vmul.f32 %v11171_v42, %v24448_v22  ;;  %v11125_v25 = vadd.f32 %v23094_v60, %v10999_v29  ;;  %v18696_v63 = vpack.c.bf16 %v12075_v18, %v12074_v1  ;;  %v12219_v59 = vld [vmem:[#allocation4 + $0x148] sm:$0xff] }
 0x7aa   : > { %11268 = vst.msk [vmem:[%s23103_s19 + $0x148] sm:$0xff] %vm550_vm2, %v11220_v51  ;;  %v11174_v61 = vmax.f32 %v11126_v57, 0.0  ;;  %v12218_v34 = vld [vmem:[#allocation4 + $0x140] sm:$0xff]  ;;  %v23435_v51 = vld [vmem:[#allocation5 + $0x30] sm:$0xff] }
 0x7ab   : > { %11267 = vst.msk [vmem:[%s23103_s19 + $0x140] sm:$0xff] %vm550_vm2, %v11219_v54  ;;  %11315 = vst.msk [vmem:[#allocation4 + $0x160] sm:$0xff] %vm550_vm2, %v11219_v54  ;;  %v11173_v47 = vmax.f32 %v11125_v25, 0.0  ;;  %v18315_v44 = vpop.f32.mrb[92].mxu1  ;;  %18697 = vmatpush3.bf16.msra.mxu0 %v18696_v63  ;;  %18700 = vmatpush3.bf16.msra.mxu1 %v18696_v63 }
 0x7ac   : > { %v11222_v38 = vmul.f32 %v11174_v61, %v24449_v4  ;;  %v11128_v7 = vadd.f32 %v18315_v44, %v23094_v60  ;;  %v11009_v15 = vpop.f32.mrb[93].mxu1  ;;  %18701 = vmatprep.subr.bf16.mxu0 %v19649_v0  ;;  %18704 = vmatprep.subr.bf16.mxu1 %v19649_v0  ;;  %v23444_v61 = vld [vmem:[#allocation5 + $0x40] sm:$0xff] }
 0x7ad   : > { %v11221_v36 = vmul.f32 %v11173_v47, %v24450_v3  ;;  %v11127_v17 = vadd.f32 %v23094_v60, %v11009_v15  ;;  %v12220_v20 = vld [vmem:[#allocation4 + $0x158] sm:$0xff]  ;;  %v23453_v3 = vld [vmem:[#allocation5 + $0x50] sm:$0xff] }
 0x7ae   : > { %11270 = vst.msk [vmem:[%s23103_s19 + $0x158] sm:$0xff] %vm550_vm2, %v11222_v38  ;;  %11318 = vst.msk [vmem:[#allocation4 + $0x178] sm:$0xff] %vm550_vm2, %v11222_v38  ;;  %v11176_v27 = vmax.f32 %v11128_v7, 0.0  ;;  %18394 = vmatmul.mubr.msk.f32.vlgmr.msra.gmra.mrb[58].mxu0 %vm11329_vm4, %v23164_v52  ;;  %18401 = vmatmul.mubr.msk.f32.vlgmr.msra.gmra.mrb[106].mxu1 %vm11329_vm4, %v23169_v41  ;;  %v12222_v16 = vmax.f32 %v12218_v34, %v12220_v20 }
 0x7af   : > { %11269 = vst.msk [vmem:[%s23103_s19 + $0x150] sm:$0xff] %vm550_vm2, %v11221_v36  ;;  %11317 = vst.msk [vmem:[#allocation4 + $0x170] sm:$0xff] %vm550_vm2, %v11221_v36  ;;  %v11175_v10 = vmax.f32 %v11127_v17, 0.0  ;;  %v18318_v43 = vpop.f32.mrb[94].mxu1  ;;  %18407 = vmatprep.mubr.msk.f32.mxu0 %vm19650_vm3, %v24406_v13  ;;  %18414 = vmatprep.mubr.msk.f32.mxu1 %vm19650_vm3, %v24406_v13 }
 0x7b0   : > { %v11224_v31 = vmul.f32 %v11176_v27, %v24451_v21  ;;  %v11130_v5 = vadd.f32 %v18318_v43, %v23094_v60  ;;  %v11019_v55 = vpop.f32.mrb[95].mxu1 }
 0x7b1   : > { %v11223_v49 = vmul.f32 %v11175_v10, %v24452_v19  ;;  %v11129_v30 = vadd.f32 %v23094_v60, %v11019_v55 }
 0x7b2   : > { %11272 = vst.msk [vmem:[%s23103_s19 + $0x168] sm:$0xff] %vm550_vm2, %v11224_v31  ;;  %11320 = vst.msk [vmem:[#allocation4 + $0x188] sm:$0xff] %vm550_vm2, %v11224_v31  ;;  %v11178_v46 = vmax.f32 %v11130_v5, 0.0  ;;  %v12221_v32 = vld [vmem:[#allocation4 + $0x160] sm:$0xff] }
 0x7b3   : > { %11271 = vst.msk [vmem:[%s23103_s19 + $0x160] sm:$0xff] %vm550_vm2, %v11223_v49  ;;  %v11177_v35 = vmax.f32 %v11129_v30, 0.0  ;;  %v12223_v40 = vmax.f32 %v12219_v59, %v12221_v32  ;;  %v23462_v31 = vld [vmem:[#allocation5 + $0x60] sm:$0xff] }
 0x7b4   : > { %v11226_v14 = vmul.f32 %v11178_v46, %v24453_v6  ;;  %v23471_v46 = vld [vmem:[#allocation5 + $0x70] sm:$0xff]  ;;  %v23480_v6 = vld [vmem:[#allocation5 + $0x80] sm:$0xff] }
 0x7b5   : > { %v11225_v24 = vmul.f32 %v11177_v35, %v24454_v62  ;;  %v18702_v50 = vpack.c.bf16 %v12223_v40, %v12222_v16  ;;  %v12367_v23 = vld [vmem:[#allocation4 + $0x178] sm:$0xff]  ;;  %v12514_v62 = vld [vmem:[#allocation5 + $0x7] sm:$0xff] }
 0x7b6   : > { %11274 = vst.msk [vmem:[%s23103_s19 + $0x178] sm:$0xff] %vm550_vm2, %v11226_v14  ;;  %v12366_v28 = vld [vmem:[#allocation4 + $0x170] sm:$0xff] }
 0x7b7   : > { %11273 = vst.msk [vmem:[%s23103_s19 + $0x170] sm:$0xff] %vm550_vm2, %v11225_v24  ;;  %11321 = vst.msk [vmem:[#allocation4 + $0x190] sm:$0xff] %vm550_vm2, %v11225_v24  ;;  %18703 = vmatpush3.bf16.msra.mxu0 %v18702_v50  ;;  %18706 = vmatpush3.bf16.msra.mxu1 %v18702_v50  ;;  %s23809_s19 = scalar_lea.vmem %s23874_s14, %s15903_s16 }
 0x7b8   : > { %18707 = vmatprep.subr.bf16.mxu0 %v19649_v0  ;;  %18710 = vmatprep.subr.bf16.mxu1 %v19649_v0  ;;  %v15747_v0 = vld [vmem:[%s23867_s7 + $0x8] sm:$0xff] }
 0x7b9   : > { %v12368_v60 = vld [vmem:[#allocation4 + $0x188] sm:$0xff] }
 0x7ba   : > { %18408 = vmatmul.mubr.msk.f32.vlgmr.msra.gmra.mrb[60].mxu0 %vm11329_vm4, %v23164_v52  ;;  %18415 = vmatmul.mubr.msk.f32.vlgmr.msra.gmra.mrb[108].mxu1 %vm11329_vm4, %v23169_v41  ;;  %v12370_v39 = vmax.f32 %v12366_v28, %v12368_v60  ;;  %v12515_v60 = vld [vmem:[#allocation5 + $0xf] sm:$0xff] }
 0x7bb   : > { %18421 = vmatprep.mubr.msk.f32.mxu0 %vm19650_vm3, %v24406_v13  ;;  %18428 = vmatprep.mubr.msk.f32.mxu1 %vm19650_vm3, %v24406_v13  ;;  %v12531_v13 = vld [vmem:[#allocation5 + $0x8] sm:$0xff] }
 0x7be   : > { %v12369_v58 = vld [vmem:[#allocation4 + $0x190] sm:$0xff] }
 0x7bf   : > { %v12371_v53 = vmax.f32 %v12367_v23, %v12369_v58 }
 0x7c1   : > { %v18708_v56 = vpack.c.bf16 %v12371_v53, %v12370_v39  ;;  %v15797_v39 = vld [vmem:[%s23867_s7 + $0x18] sm:$0xff] }
 0x7c3   : > { %18709 = vmatpush3.bf16.msra.mxu0 %v18708_v56  ;;  %18712 = vmatpush3.bf16.msra.mxu1 %v18708_v56 }
 0x7c4   : > { %18431 = vmatprep.subr.mxu0 %v15747_v0 }
 0x7c6   : > { %18422 = vmatmul.mubr.msk.f32.vlgmr.msra.gmra.mrb[62].mxu0 %vm11329_vm4, %v23164_v52  ;;  %18429 = vmatmul.mubr.msk.f32.vlgmr.msra.gmra.mrb[110].mxu1 %vm11329_vm4, %v23169_v41  ;;  %v23422_v52 = vld [vmem:[%s23867_s7 + $0x10] sm:$0xff] }
 0x7c7   : > { %18433 = vmatprep.mubr.msk.f32.mxu0 %vm550_vm2, %v12531_v13  ;;  %18432 = vmatpush3.msra.mxu0 %v15747_v0 }
 0x7c8   : > { %18457 = vmatprep.subr.mxu0 %v12530_v45 }
 0x7ca   : > { %18434 = vmatmul.mubr.msk.f32.vlgmr.msra.gmra.mrb[64].mxu0 %vm550_vm2, %v12532_v8 }
 0x7cb   : > { %18458 = vmatpush3.msra.mxu0 %v12530_v45 }
 0x7cc   : > { %18483 = vmatprep.subr.mxu0 %v23422_v52 }
 0x845   : > { %v11399_v41 = vpop.f32.mrb[48].mxu0  ;;  %v11472_v26 = vpop.f32.mrb[96].mxu1 }
 0x846   : > { %v11476_v9 = vmax.f32 %v11399_v41, %v11472_v26  ;;  %v18325_v48 = vpop.f32.mrb[49].mxu0  ;;  %v18332_v12 = vpop.f32.mrb[97].mxu1 }
 0x848   : > { %11477 = vst.msk [vmem:[#allocation5 + $0x18] sm:$0xff] %vm550_vm2, %v11476_v9 }
 0x84f   : > { %v23428_v11 = vld [vmem:[#allocation5 + $0x18] sm:$0xff] }
 0x850   : > { %18436 = vmatprep.mubr.msk.f32.mxu0 %vm550_vm2, %v23428_v11  ;;  %v23494_v53 = vld [vmem:[#allocation5 + $0x17] sm:$0xff]  ;;  %v23499_v56 = vld [vmem:[#allocation5 + $0x1f] sm:$0xff] }
 0x851   : > { %v11550_v42 = vpop.f32.mrb[50].mxu0  ;;  %v11620_v33 = vpop.f32.mrb[98].mxu1  ;;  %18437 = vmatmul.mubr.msk.f32.gmra.mrb[66].mxu0 %vm550_vm2, %v23426_v37 }
 0x852   : > { %v11624_v1 = vmax.f32 %v11550_v42, %v11620_v33  ;;  %v18339_v18 = vpop.f32.mrb[51].mxu0  ;;  %v18346_v2 = vpop.f32.mrb[99].mxu1  ;;  %v12935_v33 = vld [vmem:[#allocation5 + $0x9] sm:$0xff] }
 0x853   : > { %v12936_v18 = vld [vmem:[#allocation5 + $0x11] sm:$0xff]  ;;  %v15814_v2 = vld [vmem:[%s23867_s7 + $0x20] sm:$0xff] }
 0x854   : > { %11625 = vst.msk [vmem:[#allocation5 + $0x28] sm:$0xff] %vm550_vm2, %v11624_v1 }
 0x85b   : > { %v23437_v57 = vld [vmem:[#allocation5 + $0x28] sm:$0xff] }
 0x85c   : > { %18439 = vmatprep.mubr.msk.f32.mxu0 %vm550_vm2, %v23437_v57  ;;  %v23503_v0 = vld [vmem:[#allocation5 + $0x27] sm:$0xff]  ;;  %v23507_v13 = vld [vmem:[#allocation5 + $0x2f] sm:$0xff] }
 0x85d   : > { %v11698_v29 = vpop.f32.mrb[52].mxu0  ;;  %v11768_v22 = vpop.f32.mrb[100].mxu1  ;;  %18440 = vmatmul.mubr.msk.f32.gmra.mrb[68].mxu0 %vm550_vm2, %v23435_v51 }
 0x85e   : > { %v11772_v54 = vmax.f32 %v11698_v29, %v11768_v22  ;;  %v18353_v25 = vpop.f32.mrb[53].mxu0  ;;  %v18360_v63 = vpop.f32.mrb[101].mxu1  ;;  %v23556_v29 = vld [vmem:[#allocation5 + $0x19] sm:$0xff]  ;;  %v23560_v22 = vld [vmem:[#allocation5 + $0x21] sm:$0xff] }
 0x860   : > { %11773 = vst.msk [vmem:[#allocation5 + $0x38] sm:$0xff] %vm550_vm2, %v11772_v54  ;;  %v23564_v54 = vld [vmem:[#allocation5 + $0x29] sm:$0xff] }
 0x867   : > { %v23446_v47 = vld [vmem:[#allocation5 + $0x38] sm:$0xff] }
 0x868   : > { %18442 = vmatprep.mubr.msk.f32.mxu0 %vm550_vm2, %v23446_v47  ;;  %v23511_v8 = vld [vmem:[#allocation5 + $0x37] sm:$0xff]  ;;  %v23515_v45 = vld [vmem:[#allocation5 + $0x3f] sm:$0xff] }
 0x869   : > { %v11846_v44 = vpop.f32.mrb[54].mxu0  ;;  %v11916_v4 = vpop.f32.mrb[102].mxu1  ;;  %18443 = vmatmul.mubr.msk.f32.gmra.mrb[70].mxu0 %vm550_vm2, %v23444_v61  ;;  %v23568_v25 = vld [vmem:[#allocation5 + $0x31] sm:$0xff]  ;;  %v23572_v63 = vld [vmem:[#allocation5 + $0x39] sm:$0xff] }
 0x86a   : > { %v11920_v38 = vmax.f32 %v11846_v44, %v11916_v4  ;;  %v18367_v7 = vpop.f32.mrb[55].mxu0  ;;  %v18374_v15 = vpop.f32.mrb[103].mxu1 }
 0x86c   : > { %11921 = vst.msk [vmem:[#allocation5 + $0x48] sm:$0xff] %vm550_vm2, %v11920_v38 }
 0x873   : > { %v23455_v36 = vld [vmem:[#allocation5 + $0x48] sm:$0xff] }
 0x874   : > { %18445 = vmatprep.mubr.msk.f32.mxu0 %vm550_vm2, %v23455_v36  ;;  %v23523_v41 = vld [vmem:[#allocation5 + $0x4f] sm:$0xff]  ;;  %v23576_v44 = vld [vmem:[#allocation5 + $0x41] sm:$0xff] }
 0x875   : > { %v11994_v17 = vpop.f32.mrb[56].mxu0  ;;  %v12064_v27 = vpop.f32.mrb[104].mxu1  ;;  %18446 = vmatmul.mubr.msk.f32.gmra.mrb[72].mxu0 %vm550_vm2, %v23453_v3  ;;  %v23580_v4 = vld [vmem:[#allocation5 + $0x49] sm:$0xff] }
 0x876   : > { %v12068_v10 = vmax.f32 %v11994_v17, %v12064_v27  ;;  %v18381_v43 = vpop.f32.mrb[57].mxu0  ;;  %v18388_v21 = vpop.f32.mrb[105].mxu1 }
 0x877   : > { %v15831_v21 = vld [vmem:[%s23867_s7 + $0x28] sm:$0xff] }
 0x878   : > { %12069 = vst.msk [vmem:[#allocation5 + $0x58] sm:$0xff] %vm550_vm2, %v12068_v10 }
 0x87f   : > { %v23464_v5 = vld [vmem:[#allocation5 + $0x58] sm:$0xff] }
 0x880   : > { %18448 = vmatprep.mubr.msk.f32.mxu0 %vm550_vm2, %v23464_v5  ;;  %v23527_v26 = vld [vmem:[#allocation5 + $0x57] sm:$0xff]  ;;  %v23531_v9 = vld [vmem:[#allocation5 + $0x5f] sm:$0xff] }
 0x881   : > { %v12142_v55 = vpop.f32.mrb[58].mxu0  ;;  %v12212_v20 = vpop.f32.mrb[106].mxu1  ;;  %18449 = vmatmul.mubr.msk.f32.gmra.mrb[74].mxu0 %vm550_vm2, %v23462_v31  ;;  %v23584_v38 = vld [vmem:[#allocation5 + $0x51] sm:$0xff]  ;;  %v23588_v7 = vld [vmem:[#allocation5 + $0x59] sm:$0xff] }
 0x882   : > { %v12216_v19 = vmax.f32 %v12142_v55, %v12212_v20  ;;  %v18395_v49 = vpop.f32.mrb[59].mxu0  ;;  %v18402_v30 = vpop.f32.mrb[107].mxu1 }
 0x883   : > { %v15865_v49 = vld [vmem:[%s23867_s7 + $0x38] sm:$0xff] }
 0x884   : > { %12217 = vst.msk [vmem:[#allocation5 + $0x68] sm:$0xff] %vm550_vm2, %v12216_v19  ;;  %v15848_v19 = vld [vmem:[%s23867_s7 + $0x30] sm:$0xff] }
 0x88b   : > { %v23473_v34 = vld [vmem:[#allocation5 + $0x68] sm:$0xff] }
 0x88c   : > { %18451 = vmatprep.mubr.msk.f32.mxu0 %vm550_vm2, %v23473_v34  ;;  %v23535_v48 = vld [vmem:[#allocation5 + $0x67] sm:$0xff]  ;;  %v23539_v12 = vld [vmem:[#allocation5 + $0x6f] sm:$0xff] }
 0x88d   : > { %v12290_v59 = vpop.f32.mrb[60].mxu0  ;;  %v12360_v32 = vpop.f32.mrb[108].mxu1  ;;  %18452 = vmatmul.mubr.msk.f32.gmra.mrb[76].mxu0 %vm550_vm2, %v23471_v46  ;;  %v23592_v15 = vld [vmem:[#allocation5 + $0x61] sm:$0xff]  ;;  %v23596_v17 = vld [vmem:[#allocation5 + $0x69] sm:$0xff] }
 0x88e   : > { %v12364_v35 = vmax.f32 %v12290_v59, %v12360_v32  ;;  %v18409_v16 = vpop.f32.mrb[61].mxu0  ;;  %v18416_v40 = vpop.f32.mrb[109].mxu1  ;;  %v13631_v59 = vld [vmem:[#allocation5 + $0x91] sm:$0xff]  ;;  %v15882_v32 = vld [vmem:[%s23867_s7 + $0x40] sm:$0xff] }
 0x88f   : > { %v13858_v16 = vld [vmem:[#allocation5 + $0x9f] sm:$0xff] }
 0x890   : > { %12365 = vst.msk [vmem:[#allocation5 + $0x78] sm:$0xff] %vm550_vm2, %v12364_v35  ;;  %v13857_v35 = vld [vmem:[#allocation5 + $0x97] sm:$0xff] }
 0x897   : > { %v23482_v14 = vld [vmem:[#allocation5 + $0x78] sm:$0xff] }
 0x898   : > { %18454 = vmatprep.mubr.msk.f32.mxu0 %vm550_vm2, %v23482_v14  ;;  %v23543_v42 = vld [vmem:[#allocation5 + $0x77] sm:$0xff]  ;;  %v23547_v1 = vld [vmem:[#allocation5 + $0x7f] sm:$0xff] }
 0x899   : > { %18455 = vmatmul.mubr.msk.f32.gmra.mrb[78].mxu0 %vm550_vm2, %v23480_v6  ;;  %v12438_v24 = vpop.f32.mrb[62].mxu0  ;;  %v12508_v50 = vpop.f32.mrb[110].mxu1  ;;  %v23600_v27 = vld [vmem:[#allocation5 + $0x71] sm:$0xff]  ;;  %v23604_v10 = vld [vmem:[#allocation5 + $0x79] sm:$0xff] }
 0x89a   : > { %18459 = vmatprep.mubr.msk.f32.mxu0 %vm550_vm2, %v12514_v62  ;;  %v12512_v28 = vmax.f32 %v12438_v24, %v12508_v50  ;;  %v18423_v23 = vpop.f32.mrb[63].mxu0  ;;  %v18430_v58 = vpop.f32.mrb[111].mxu1 }
 0x89c   : > { %12513 = vst.msk [vmem:[#allocation5 + $0x88] sm:$0xff] %vm550_vm2, %v12512_v28 }
 0x89d   : > { %18460 = vmatmul.mubr.msk.f32.vlgmr.msra.gmra.mrb[64].mxu0 %vm550_vm2, %v12515_v60 }
 0x89e   : > { %18462 = vmatprep.mubr.msk.f32.mxu0 %vm550_vm2, %v23494_v53  ;;  %18484 = vmatpush3.msra.mxu0 %v23422_v52  ;;  %v23519_v52 = vld [vmem:[#allocation5 + $0x47] sm:$0xff] }
 0x89f   : > { %18509 = vmatprep.subr.mxu0 %v15797_v39 }
 0x8a1   : > { %18463 = vmatmul.mubr.msk.f32.gmra.mrb[66].mxu0 %vm550_vm2, %v23499_v56 }
 0x8a2   : > { %18465 = vmatprep.mubr.msk.f32.mxu0 %vm550_vm2, %v23503_v0 }
 0x8a3   : > { %v23608_v43 = vld [vmem:[#allocation5 + $0x81] sm:$0xff]  ;;  %v13177_v20 = vld [vmem:[#allocation5 + $0x8f] sm:$0xff] }
 0x8a4   : > { %v13176_v55 = vld [vmem:[#allocation5 + $0x87] sm:$0xff] }
 0x8a5   : > { %18466 = vmatmul.mubr.msk.f32.gmra.mrb[68].mxu0 %vm550_vm2, %v23507_v13  ;;  %v13630_v30 = vld [vmem:[#allocation5 + $0x89] sm:$0xff] }
 0x8a6   : > { %18468 = vmatprep.mubr.msk.f32.mxu0 %vm550_vm2, %v23511_v8 }
 0x8a9   : > { %18469 = vmatmul.mubr.msk.f32.gmra.mrb[70].mxu0 %vm550_vm2, %v23515_v45 }
 0x8aa   : > { %18471 = vmatprep.mubr.msk.f32.mxu0 %vm550_vm2, %v23519_v52 }
 0x8ad   : > { %18472 = vmatmul.mubr.msk.f32.gmra.mrb[72].mxu0 %vm550_vm2, %v23523_v41 }
 0x8ae   : > { %18474 = vmatprep.mubr.msk.f32.mxu0 %vm550_vm2, %v23527_v26 }
 0x8b1   : > { %18475 = vmatmul.mubr.msk.f32.gmra.mrb[74].mxu0 %vm550_vm2, %v23531_v9 }
 0x8b2   : > { %18477 = vmatprep.mubr.msk.f32.mxu0 %vm550_vm2, %v23535_v48 }
 0x8b5   : > { %18478 = vmatmul.mubr.msk.f32.gmra.mrb[76].mxu0 %vm550_vm2, %v23539_v12 }
 0x8b6   : > { %18480 = vmatprep.mubr.msk.f32.mxu0 %vm550_vm2, %v23543_v42 }
 0x8b9   : > { %18481 = vmatmul.mubr.msk.f32.gmra.mrb[78].mxu0 %vm550_vm2, %v23547_v1 }
 0x8ba   : > { %18485 = vmatprep.mubr.msk.f32.mxu0 %vm550_vm2, %v12935_v33 }
 0x8bd   : > { %18486 = vmatmul.mubr.msk.f32.vlgmr.msra.gmra.mrb[64].mxu0 %vm550_vm2, %v12936_v18 }
 0x8be   : > { %18488 = vmatprep.mubr.msk.f32.mxu0 %vm550_vm2, %v23556_v29  ;;  %18510 = vmatpush3.msra.mxu0 %v15797_v39 }
 0x8bf   : > { %18535 = vmatprep.subr.mxu0 %v15814_v2 }
 0x8c1   : > { %18489 = vmatmul.mubr.msk.f32.gmra.mrb[66].mxu0 %vm550_vm2, %v23560_v22 }
 0x8c2   : > { %18491 = vmatprep.mubr.msk.f32.mxu0 %vm550_vm2, %v23564_v54 }
 0x8c5   : > { %18492 = vmatmul.mubr.msk.f32.gmra.mrb[68].mxu0 %vm550_vm2, %v23568_v25 }
 0x8c6   : > { %18494 = vmatprep.mubr.msk.f32.mxu0 %vm550_vm2, %v23572_v63 }
 0x8c9   : > { %18495 = vmatmul.mubr.msk.f32.gmra.mrb[70].mxu0 %vm550_vm2, %v23576_v44 }
 0x8ca   : > { %18497 = vmatprep.mubr.msk.f32.mxu0 %vm550_vm2, %v23580_v4 }
 0x8cd   : > { %18498 = vmatmul.mubr.msk.f32.gmra.mrb[72].mxu0 %vm550_vm2, %v23584_v38 }
 0x8ce   : > { %18500 = vmatprep.mubr.msk.f32.mxu0 %vm550_vm2, %v23588_v7 }
 0x8d1   : > { %18501 = vmatmul.mubr.msk.f32.gmra.mrb[74].mxu0 %vm550_vm2, %v23592_v15 }
 0x8d2   : > { %18503 = vmatprep.mubr.msk.f32.mxu0 %vm550_vm2, %v23596_v17 }
 0x8d5   : > { %18504 = vmatmul.mubr.msk.f32.gmra.mrb[76].mxu0 %vm550_vm2, %v23600_v27 }
 0x8d6   : > { %18506 = vmatprep.mubr.msk.f32.mxu0 %vm550_vm2, %v23604_v10 }
 0x8d9   : > { %18507 = vmatmul.mubr.msk.f32.gmra.mrb[78].mxu0 %vm550_vm2, %v23608_v43 }
 0x8da   : > { %18511 = vmatprep.mubr.msk.f32.mxu0 %vm550_vm2, %v23494_v53 }
 0x8dd   : > { %18512 = vmatmul.mubr.msk.f32.vlgmr.msra.gmra.mrb[64].mxu0 %vm550_vm2, %v23499_v56 }
 0x8de   : > { %18514 = vmatprep.mubr.msk.f32.mxu0 %vm550_vm2, %v23503_v0  ;;  %18536 = vmatpush3.msra.mxu0 %v15814_v2 }
 0x8df   : > { %18561 = vmatprep.subr.mxu0 %v15831_v21 }
 0x8e1   : > { %18515 = vmatmul.mubr.msk.f32.gmra.mrb[66].mxu0 %vm550_vm2, %v23507_v13 }
 0x8e2   : > { %18517 = vmatprep.mubr.msk.f32.mxu0 %vm550_vm2, %v23511_v8 }
 0x8e5   : > { %18518 = vmatmul.mubr.msk.f32.gmra.mrb[68].mxu0 %vm550_vm2, %v23515_v45 }
 0x8e6   : > { %18520 = vmatprep.mubr.msk.f32.mxu0 %vm550_vm2, %v23519_v52 }
 0x8e9   : > { %18521 = vmatmul.mubr.msk.f32.gmra.mrb[70].mxu0 %vm550_vm2, %v23523_v41 }
 0x8ea   : > { %18523 = vmatprep.mubr.msk.f32.mxu0 %vm550_vm2, %v23527_v26 }
 0x8ed   : > { %18524 = vmatmul.mubr.msk.f32.gmra.mrb[72].mxu0 %vm550_vm2, %v23531_v9 }
 0x8ee   : > { %18526 = vmatprep.mubr.msk.f32.mxu0 %vm550_vm2, %v23535_v48 }
 0x8f1   : > { %18527 = vmatmul.mubr.msk.f32.gmra.mrb[74].mxu0 %vm550_vm2, %v23539_v12 }
 0x8f2   : > { %18529 = vmatprep.mubr.msk.f32.mxu0 %vm550_vm2, %v23543_v42 }
 0x8f5   : > { %18530 = vmatmul.mubr.msk.f32.gmra.mrb[76].mxu0 %vm550_vm2, %v23547_v1 }
 0x8f6   : > { %18532 = vmatprep.mubr.msk.f32.mxu0 %vm550_vm2, %v13176_v55 }
 0x8f9   : > { %18533 = vmatmul.mubr.msk.f32.gmra.mrb[78].mxu0 %vm550_vm2, %v13177_v20 }
 0x8fa   : > { %18537 = vmatprep.mubr.msk.f32.mxu0 %vm550_vm2, %v23428_v11  ;;  %v13404_v11 = vld [vmem:[#allocation5 + $0x90] sm:$0xff] }
 0x8fd   : > { %18538 = vmatmul.mubr.msk.f32.vlgmr.msra.gmra.mrb[64].mxu0 %vm550_vm2, %v23426_v37  ;;  %v13403_v37 = vld [vmem:[#allocation5 + $0x88] sm:$0xff] }
 0x8fe   : > { %18540 = vmatprep.mubr.msk.f32.mxu0 %vm550_vm2, %v23437_v57  ;;  %18562 = vmatpush3.msra.mxu0 %v15831_v21 }
 0x8ff   : > { %18587 = vmatprep.subr.mxu0 %v15848_v19 }
 0x901   : > { %18541 = vmatmul.mubr.msk.f32.gmra.mrb[66].mxu0 %vm550_vm2, %v23435_v51 }
 0x902   : > { %18543 = vmatprep.mubr.msk.f32.mxu0 %vm550_vm2, %v23446_v47 }
 0x905   : > { %18544 = vmatmul.mubr.msk.f32.gmra.mrb[68].mxu0 %vm550_vm2, %v23444_v61 }
 0x906   : > { %18546 = vmatprep.mubr.msk.f32.mxu0 %vm550_vm2, %v23455_v36 }
 0x909   : > { %18547 = vmatmul.mubr.msk.f32.gmra.mrb[70].mxu0 %vm550_vm2, %v23453_v3 }
 0x90a   : > { %18549 = vmatprep.mubr.msk.f32.mxu0 %vm550_vm2, %v23464_v5 }
 0x90d   : > { %18550 = vmatmul.mubr.msk.f32.gmra.mrb[72].mxu0 %vm550_vm2, %v23462_v31 }
 0x90e   : > { %18552 = vmatprep.mubr.msk.f32.mxu0 %vm550_vm2, %v23473_v34 }
 0x911   : > { %18553 = vmatmul.mubr.msk.f32.gmra.mrb[74].mxu0 %vm550_vm2, %v23471_v46 }
 0x912   : > { %18555 = vmatprep.mubr.msk.f32.mxu0 %vm550_vm2, %v23482_v14 }
 0x915   : > { %18556 = vmatmul.mubr.msk.f32.gmra.mrb[76].mxu0 %vm550_vm2, %v23480_v6 }
 0x916   : > { %18558 = vmatprep.mubr.msk.f32.mxu0 %vm550_vm2, %v13403_v37 }
 0x919   : > { %18559 = vmatmul.mubr.msk.f32.gmra.mrb[78].mxu0 %vm550_vm2, %v13404_v11 }
 0x91a   : > { %18563 = vmatprep.mubr.msk.f32.mxu0 %vm550_vm2, %v23556_v29 }
 0x91d   : > { %18564 = vmatmul.mubr.msk.f32.vlgmr.msra.gmra.mrb[64].mxu0 %vm550_vm2, %v23560_v22 }
 0x91e   : > { %18566 = vmatprep.mubr.msk.f32.mxu0 %vm550_vm2, %v23564_v54  ;;  %18588 = vmatpush3.msra.mxu0 %v15848_v19 }
 0x91f   : > { %18613 = vmatprep.subr.mxu0 %v15865_v49 }
 0x921   : > { %18567 = vmatmul.mubr.msk.f32.gmra.mrb[66].mxu0 %vm550_vm2, %v23568_v25 }
 0x922   : > { %18569 = vmatprep.mubr.msk.f32.mxu0 %vm550_vm2, %v23572_v63 }
 0x925   : > { %18570 = vmatmul.mubr.msk.f32.gmra.mrb[68].mxu0 %vm550_vm2, %v23576_v44 }
 0x926   : > { %18572 = vmatprep.mubr.msk.f32.mxu0 %vm550_vm2, %v23580_v4 }
 0x929   : > { %18573 = vmatmul.mubr.msk.f32.gmra.mrb[70].mxu0 %vm550_vm2, %v23584_v38 }
 0x92a   : > { %18575 = vmatprep.mubr.msk.f32.mxu0 %vm550_vm2, %v23588_v7 }
 0x92d   : > { %18576 = vmatmul.mubr.msk.f32.gmra.mrb[72].mxu0 %vm550_vm2, %v23592_v15 }
 0x92e   : > { %18578 = vmatprep.mubr.msk.f32.mxu0 %vm550_vm2, %v23596_v17 }
 0x931   : > { %18579 = vmatmul.mubr.msk.f32.gmra.mrb[74].mxu0 %vm550_vm2, %v23600_v27 }
 0x932   : > { %18581 = vmatprep.mubr.msk.f32.mxu0 %vm550_vm2, %v23604_v10 }
 0x935   : > { %18582 = vmatmul.mubr.msk.f32.gmra.mrb[76].mxu0 %vm550_vm2, %v23608_v43 }
 0x936   : > { %18584 = vmatprep.mubr.msk.f32.mxu0 %vm550_vm2, %v13630_v30 }
 0x939   : > { %18585 = vmatmul.mubr.msk.f32.gmra.mrb[78].mxu0 %vm550_vm2, %v13631_v59 }
 0x93a   : > { %18589 = vmatprep.mubr.msk.f32.mxu0 %vm550_vm2, %v23503_v0 }
 0x93d   : > { %18590 = vmatmul.mubr.msk.f32.vlgmr.msra.gmra.mrb[64].mxu0 %vm550_vm2, %v23507_v13 }
 0x93e   : > { %18592 = vmatprep.mubr.msk.f32.mxu0 %vm550_vm2, %v23511_v8  ;;  %18614 = vmatpush3.msra.mxu0 %v15865_v49 }
 0x93f   : > { %18639 = vmatprep.subr.mxu0 %v15882_v32 }
 0x941   : > { %18593 = vmatmul.mubr.msk.f32.gmra.mrb[66].mxu0 %vm550_vm2, %v23515_v45 }
 0x942   : > { %18595 = vmatprep.mubr.msk.f32.mxu0 %vm550_vm2, %v23519_v52 }
 0x945   : > { %18596 = vmatmul.mubr.msk.f32.gmra.mrb[68].mxu0 %vm550_vm2, %v23523_v41 }
 0x946   : > { %18598 = vmatprep.mubr.msk.f32.mxu0 %vm550_vm2, %v23527_v26 }
 0x949   : > { %18599 = vmatmul.mubr.msk.f32.gmra.mrb[70].mxu0 %vm550_vm2, %v23531_v9 }
 0x94a   : > { %18601 = vmatprep.mubr.msk.f32.mxu0 %vm550_vm2, %v23535_v48 }
 0x94d   : > { %18602 = vmatmul.mubr.msk.f32.gmra.mrb[72].mxu0 %vm550_vm2, %v23539_v12 }
 0x94e   : > { %18604 = vmatprep.mubr.msk.f32.mxu0 %vm550_vm2, %v23543_v42 }
 0x951   : > { %18605 = vmatmul.mubr.msk.f32.gmra.mrb[74].mxu0 %vm550_vm2, %v23547_v1 }
 0x952   : > { %18607 = vmatprep.mubr.msk.f32.mxu0 %vm550_vm2, %v13176_v55 }
 0x955   : > { %18608 = vmatmul.mubr.msk.f32.gmra.mrb[76].mxu0 %vm550_vm2, %v13177_v20 }
 0x956   : > { %18610 = vmatprep.mubr.msk.f32.mxu0 %vm550_vm2, %v13857_v35 }
 0x959   : > { %18611 = vmatmul.mubr.msk.f32.gmra.mrb[78].mxu0 %vm550_vm2, %v13858_v16 }
 0x95a   : > { %18615 = vmatprep.mubr.msk.f32.mxu0 %vm550_vm2, %v23437_v57  ;;  %v14085_v57 = vld [vmem:[#allocation5 + $0xa0] sm:$0xff] }
 0x95d   : > { %18616 = vmatmul.mubr.msk.f32.vlgmr.msra.gmra.mrb[64].mxu0 %vm550_vm2, %v23435_v51  ;;  %v14084_v51 = vld [vmem:[#allocation5 + $0x98] sm:$0xff] }
 0x95e   : > { %18618 = vmatprep.mubr.msk.f32.mxu0 %vm550_vm2, %v23446_v47  ;;  %18640 = vmatpush3.msra.mxu0 %v15882_v32  ;;  %v14312_v47 = vld [vmem:[#allocation5 + $0xa1] sm:$0xff] }
 0x961   : > { %18619 = vmatmul.mubr.msk.f32.gmra.mrb[66].mxu0 %vm550_vm2, %v23444_v61  ;;  %v14311_v61 = vld [vmem:[#allocation5 + $0x99] sm:$0xff] }
 0x962   : > { %18621 = vmatprep.mubr.msk.f32.mxu0 %vm550_vm2, %v23455_v36  ;;  %v14566_v36 = vpop.permute.xlu0 %14565 }
 0x965   : > { %18622 = vmatmul.mubr.msk.f32.gmra.mrb[68].mxu0 %vm550_vm2, %v23453_v3  ;;  %v14571_v3 = vpop.permute.xlu1 %14570 }
 0x966   : > { %18624 = vmatprep.mubr.msk.f32.mxu0 %vm550_vm2, %v23464_v5  ;;  %v14576_v5 = vpop.permute.xlu0 %14575 }
 0x969   : > { %18625 = vmatmul.mubr.msk.f32.gmra.mrb[70].mxu0 %vm550_vm2, %v23462_v31  ;;  %v14581_v31 = vpop.permute.xlu1 %14580 }
 0x96a   : > { %18627 = vmatprep.mubr.msk.f32.mxu0 %vm550_vm2, %v23473_v34  ;;  %v14586_v24 = vpop.permute.xlu0 %14585 }
 0x96d   : > { %18628 = vmatmul.mubr.msk.f32.gmra.mrb[72].mxu0 %vm550_vm2, %v23471_v46  ;;  %v23801_v46 = vld [vmem:[%s23868_s8] ss:$0 sm:$0xff] }
 0x96e   : > { %18630 = vmatprep.mubr.msk.f32.mxu0 %vm550_vm2, %v23482_v14  ;;  %v14591_v14 = vpop.permute.xlu1 %14590  ;;  %v14596_v52 = vpop.permute.xlu0 %14595 }
 0x971   : > { %18631 = vmatmul.mubr.msk.f32.gmra.mrb[74].mxu0 %vm550_vm2, %v23480_v6 }
 0x972   : > { %18633 = vmatprep.mubr.msk.f32.mxu0 %vm550_vm2, %v13403_v37  ;;  %v14601_v13 = vpop.permute.xlu1 %14600 }
 0x975   : > { %18634 = vmatmul.mubr.msk.f32.gmra.mrb[76].mxu0 %vm550_vm2, %v13404_v11 }
 0x976   : > { %18636 = vmatprep.mubr.msk.f32.mxu0 %vm550_vm2, %v14084_v51  ;;  %v14611_v22 = vpop.permute.xlu1 %14610 }
 0x979   : > { %18637 = vmatmul.mubr.msk.f32.gmra.mrb[78].mxu0 %vm550_vm2, %v14085_v57 }
 0x97a   : > { %18641 = vmatprep.mubr.msk.f32.mxu0 %vm550_vm2, %v23564_v54  ;;  %v14621_v21 = vpop.permute.xlu1 %14620 }
 0x97d   : > { %18642 = vmatmul.mubr.msk.f32.vlgmr.msra.gmra.mrb[64].mxu0 %vm550_vm2, %v23568_v25 }
 0x97e   : > { %18644 = vmatprep.mubr.msk.f32.mxu0 %vm550_vm2, %v23572_v63  ;;  %v14606_v63 = vpop.permute.xlu0 %14605 }
 0x981   : > { %18645 = vmatmul.mubr.msk.f32.gmra.mrb[66].mxu0 %vm550_vm2, %v23576_v44 }
 0x982   : > { %18647 = vmatprep.mubr.msk.f32.mxu0 %vm550_vm2, %v23580_v4  ;;  %v14616_v19 = vpop.permute.xlu0 %14615 }
 0x985   : > { %18648 = vmatmul.mubr.msk.f32.gmra.mrb[68].mxu0 %vm550_vm2, %v23584_v38 }
 0x986   : > { %18650 = vmatprep.mubr.msk.f32.mxu0 %vm550_vm2, %v23588_v7 }
 0x989   : > { %18651 = vmatmul.mubr.msk.f32.gmra.mrb[70].mxu0 %vm550_vm2, %v23592_v15 }
 0x98a   : > { %18653 = vmatprep.mubr.msk.f32.mxu0 %vm550_vm2, %v23596_v17 }
 0x98d   : > { %18654 = vmatmul.mubr.msk.f32.gmra.mrb[72].mxu0 %vm550_vm2, %v23600_v27 }
 0x98e   : > { %18656 = vmatprep.mubr.msk.f32.mxu0 %vm550_vm2, %v23604_v10 }
 0x991   : > { %18657 = vmatmul.mubr.msk.f32.gmra.mrb[74].mxu0 %vm550_vm2, %v23608_v43 }
 0x992   : > { %18659 = vmatprep.mubr.msk.f32.mxu0 %vm550_vm2, %v13630_v30 }
 0x995   : > { %18660 = vmatmul.mubr.msk.f32.gmra.mrb[76].mxu0 %vm550_vm2, %v13631_v59 }
 0x996   : > { %18662 = vmatprep.mubr.msk.f32.mxu0 %vm550_vm2, %v14311_v61 }
 0x999   : > { %18663 = vmatmul.mubr.msk.f32.gmra.mrb[78].mxu0 %vm550_vm2, %v14312_v47  ;;  %v14631_v47 = vpop.permute.xlu1 %14630 }
 0xa50   : > { %v18643_v34 = vpop.f32.mrb[64].mxu0 }
 0xa51   : > { %v14532_v40 = vadd.f32 %v18643_v34, %v23801_v46  ;;  %v14429_v6 = vpop.f32.mrb[65].mxu0 }
 0xa52   : > { %v14531_v62 = vadd.f32 %v23801_v46, %v14429_v6 }
 0xa53   : > { %v14548_v50 = vmax.f32 %v14532_v40, 0.0 }
 0xa54   : > { %v14547_v60 = vmax.f32 %v14531_v62, 0.0  ;;  %v18646_v28 = vpop.f32.mrb[66].mxu0 }
 0xa55   : > { %v14644_v23 = vmul.f32 %v14571_v3, %v14548_v50  ;;  %v14534_v58 = vadd.f32 %v18646_v28, %v23801_v46  ;;  %v14439_v39 = vpop.f32.mrb[67].mxu0  ;;  %v14641_v28 = vpop.permute.xlu1 %14640 }
 0xa56   : > { %v14643_v53 = vmul.f32 %v14566_v36, %v14547_v60  ;;  %v14533_v56 = vadd.f32 %v23801_v46, %v14439_v39 }
 0xa57   : > { %14660 = vst.msk [vmem:[%s23809_s19 + $0x8] sm:$0xff] %vm11329_vm4, %v14644_v23  ;;  %v14550_v0 = vmax.f32 %v14534_v58, 0.0 }
 0xa58   : > { %14659 = vst.msk [vmem:[%s23809_s19] sm:$0xff] %vm11329_vm4, %v14643_v53  ;;  %v14549_v8 = vmax.f32 %v14533_v56, 0.0  ;;  %v18649_v45 = vpop.f32.mrb[68].mxu0 }
 0xa59   : > { %v14646_v41 = vmul.f32 %v14581_v31, %v14550_v0  ;;  %v14536_v26 = vadd.f32 %v18649_v45, %v23801_v46  ;;  %v14449_v9 = vpop.f32.mrb[69].mxu0  ;;  %v14626_v31 = vpop.permute.xlu0 %14625 }
 0xa5a   : > { %v14645_v48 = vmul.f32 %v14576_v5, %v14549_v8  ;;  %v14535_v12 = vadd.f32 %v23801_v46, %v14449_v9 }
 0xa5b   : > { %14662 = vst.msk [vmem:[%s23809_s19 + $0x18] sm:$0xff] %vm11329_vm4, %v14646_v41  ;;  %v14552_v42 = vmax.f32 %v14536_v26, 0.0 }
 0xa5c   : > { %14661 = vst.msk [vmem:[%s23809_s19 + $0x10] sm:$0xff] %vm11329_vm4, %v14645_v48  ;;  %v14551_v33 = vmax.f32 %v14535_v12, 0.0  ;;  %v18652_v1 = vpop.f32.mrb[70].mxu0 }
 0xa5d   : > { %v14648_v18 = vmul.f32 %v14591_v14, %v14552_v42  ;;  %v14538_v2 = vadd.f32 %v18652_v1, %v23801_v46  ;;  %v14459_v29 = vpop.f32.mrb[71].mxu0  ;;  %v14636_v58 = vpop.permute.xlu0 %14635 }
 0xa5e   : > { %v14647_v54 = vmul.f32 %v14586_v24, %v14551_v33  ;;  %v14537_v25 = vadd.f32 %v23801_v46, %v14459_v29 }
 0xa5f   : > { %14664 = vst.msk [vmem:[%s23809_s19 + $0x28] sm:$0xff] %vm11329_vm4, %v14648_v18  ;;  %v14554_v44 = vmax.f32 %v14538_v2, 0.0 }
 0xa60   : > { %14663 = vst.msk [vmem:[%s23809_s19 + $0x20] sm:$0xff] %vm11329_vm4, %v14647_v54  ;;  %v14553_v4 = vmax.f32 %v14537_v25, 0.0  ;;  %v18655_v38 = vpop.f32.mrb[72].mxu0 }
 0xa61   : > { %v14650_v7 = vmul.f32 %v14601_v13, %v14554_v44  ;;  %v14540_v15 = vadd.f32 %v18655_v38, %v23801_v46  ;;  %v14469_v17 = vpop.f32.mrb[73].mxu0 }
 0xa62   : > { %v14649_v27 = vmul.f32 %v14596_v52, %v14553_v4  ;;  %v14539_v10 = vadd.f32 %v23801_v46, %v14469_v17 }
 0xa63   : > { %14666 = vst.msk [vmem:[%s23809_s19 + $0x38] sm:$0xff] %vm11329_vm4, %v14650_v7  ;;  %v14556_v43 = vmax.f32 %v14540_v15, 0.0 }
 0xa64   : > { %14665 = vst.msk [vmem:[%s23809_s19 + $0x30] sm:$0xff] %vm11329_vm4, %v14649_v27  ;;  %v14555_v55 = vmax.f32 %v14539_v10, 0.0  ;;  %v18658_v20 = vpop.f32.mrb[74].mxu0 }
 0xa65   : > { %v14652_v37 = vmul.f32 %v14611_v22, %v14556_v43  ;;  %v14542_v11 = vadd.f32 %v18658_v20, %v23801_v46  ;;  %v14479_v49 = vpop.f32.mrb[75].mxu0 }
 0xa66   : > { %v14651_v30 = vmul.f32 %v14606_v63, %v14555_v55  ;;  %v14541_v59 = vadd.f32 %v23801_v46, %v14479_v49 }
 0xa67   : > { %14668 = vst.msk [vmem:[%s23809_s19 + $0x48] sm:$0xff] %vm11329_vm4, %v14652_v37  ;;  %v14558_v32 = vmax.f32 %v14542_v11, 0.0 }
 0xa68   : > { %14667 = vst.msk [vmem:[%s23809_s19 + $0x40] sm:$0xff] %vm11329_vm4, %v14651_v30  ;;  %v14557_v35 = vmax.f32 %v14541_v59, 0.0  ;;  %v18661_v16 = vpop.f32.mrb[76].mxu0 }
 0xa69   : > { %v14654_v51 = vmul.f32 %v14621_v21, %v14558_v32  ;;  %v14544_v57 = vadd.f32 %v18661_v16, %v23801_v46  ;;  %v14489_v61 = vpop.f32.mrb[77].mxu0 }
 0xa6a   : > { %v14653_v3 = vmul.f32 %v14616_v19, %v14557_v35  ;;  %v14543_v36 = vadd.f32 %v23801_v46, %v14489_v61 }
 0xa6b   : > { %14670 = vst.msk [vmem:[%s23809_s19 + $0x58] sm:$0xff] %vm11329_vm4, %v14654_v51  ;;  %v14560_v5 = vmax.f32 %v14544_v57, 0.0 }
 0xa6c   : > { %14669 = vst.msk [vmem:[%s23809_s19 + $0x50] sm:$0xff] %vm11329_vm4, %v14653_v3  ;;  %v14559_v34 = vmax.f32 %v14543_v36, 0.0  ;;  %v18664_v40 = vpop.f32.mrb[78].mxu0 }
 0xa6d   : > { %v14656_v6 = vmul.f32 %v14631_v47, %v14560_v5  ;;  %v14546_v14 = vadd.f32 %v18664_v40, %v23801_v46  ;;  %v14499_v62 = vpop.f32.mrb[79].mxu0 }
 0xa6e   : > { %v14655_v24 = vmul.f32 %v14626_v31, %v14559_v34  ;;  %v14545_v50 = vadd.f32 %v23801_v46, %v14499_v62 }
 0xa6f   : > { %14672 = vst.msk [vmem:[%s23809_s19 + $0x68] sm:$0xff] %vm11329_vm4, %v14656_v6  ;;  %v14562_v60 = vmax.f32 %v14546_v14, 0.0 }
 0xa70   : > { %14671 = vst.msk [vmem:[%s23809_s19 + $0x60] sm:$0xff] %vm11329_vm4, %v14655_v24  ;;  %v14561_v23 = vmax.f32 %v14545_v50, 0.0 }
 0xa71   : > { %v14658_v39 = vmul.f32 %v14641_v28, %v14562_v60 }
 0xa72   : > { %v14657_v53 = vmul.f32 %v14636_v58, %v14561_v23 }
 0xa73   : > { %14674 = vst.msk [vmem:[%s23809_s19 + $0x78] sm:$0xff] %vm11329_vm4, %v14658_v39 }
 0xa74   : > { %14673 = vst.msk [vmem:[%s23809_s19 + $0x70] sm:$0xff] %vm11329_vm4, %v14657_v53 }
 0xa75 PF: > { %s25_s29 = sadd.s32 1, %s19645_s29  }
 0xa76   : > { %p22_p4 = scmp.ge.s32.totalorder %s25_s29, 4  }
 0xa78   :  { %24 = sbr.rel (!%p22_p4) target bundleno = 1 (0x1), region = 162 }

</bundles_post_ra>
